<compile_context>
chip_gen: v7x
topology: tpu7x:2x2x1
jax: 0.10.0
libtpu: 0.0.40
codegen_flags: <defaults>
</compile_context>

<pallas_src>
import numpy as np
import jax
import jax.numpy as jnp
from jax import lax
from jax.experimental import pallas as pl
from jax.experimental.pallas import tpu as pltpu

_W = 32           # native image width of the flat spatial layout
_L = _W * _W      # flattened spatial length per image (1024 lanes)


# ------------------------------ fused kernel --------------------------------

def _fused_kernel(x_ref, w1t_ref, b1_ref, w2t_ref, b2_ref, g_ref,
                  f1t_ref, f1b_ref, f2w_ref, f2b_ref, f3w_ref, f3b_ref,
                  o_ref):
    def shift(v, off):
        # Circular left shift along lanes: out[:, p] = v[:, p + off].
        # Valid output positions never read wrapped data (static guarantee).
        if off == 0:
            return v
        return jnp.concatenate([v[:, off:], v[:, :off]], axis=1)

    def conv5x5_relu(v, taps_ref, b_ref, cout, rstride, cstride):
        # out[co, p] = sum_{kh,kw,ci} w[co,ci,kh,kw] * v[ci, p + kh*rstride + kw*cstride]
        acc = jnp.zeros((cout, v.shape[1]), jnp.float32)
        for kh in range(5):
            for kw in range(5):
                t = taps_ref[kh * 5 + kw]                      # (cout, cin_pad)
                acc = acc + jnp.dot(t, shift(v, kh * rstride + kw * cstride),
                                    preferred_element_type=jnp.float32)
        return jnp.maximum(acc + b_ref[...], 0.0)

    def maxpool2x2(v, rstride, cstride):
        a = jnp.maximum(v, shift(v, cstride))
        return jnp.maximum(a, shift(a, rstride))

    x = x_ref[0]                                               # (8, 1024)
    a1 = conv5x5_relu(x, w1t_ref, b1_ref, 8, _W, 1)            # (8, 1024)
    p1 = maxpool2x2(a1, _W, 1)                                 # residency stride 2
    a2 = conv5x5_relu(p1, w2t_ref, b2_ref, 16, 2 * _W, 2)      # (16, 1024)
    p2 = maxpool2x2(a2, 2 * _W, 2)                             # residency stride 4

    # Gather the 16 x 5 x 5 valid pooled features into lanes 0..24 of a
    # compact (16, 128) block via a one-hot selection matmul.
    r = jnp.dot(p2, g_ref[...], preferred_element_type=jnp.float32)

    # fc1: contraction over (c2, h3, w3) as 25 accumulated matmuls; result is
    # valid at lane 0 of a (120, 128) block.
    h = jnp.zeros((120, 128), jnp.float32)
    for j in range(25):
        h = h + jnp.dot(f1t_ref[j], shift(r, j),
                        preferred_element_type=jnp.float32)
    h = jnp.maximum(h + f1b_ref[...], 0.0)
    h = jnp.maximum(jnp.dot(f2w_ref[...], h,
                            preferred_element_type=jnp.float32) + f2b_ref[...],
                    0.0)
    o_ref[0] = jnp.dot(f3w_ref[...], h,
                       preferred_element_type=jnp.float32) + f3b_ref[...]


def _gather_matrix():
    # (1024, 128) one-hot: lane 4*h3*32 + 4*w3 (pool2 residency) -> column h3*5+w3.
    g = np.zeros((_L, 128), np.float32)
    for h3 in range(5):
        for w3 in range(5):
            g[(4 * h3) * _W + 4 * w3, h3 * 5 + w3] = 1.0
    return g


# ------------------------------- wrapper -------------------------------------

def tutorial_net_forward(x, params):
    """x: (N, 3, 32, 32) float32 NCHW -> logits (N, 10). Fully fused Pallas forward."""
    N = x.shape[0]
    f32 = jnp.float32

    # Tiny trace-time weight repacking / zero padding (PyTorch layouts in,
    # MXU-friendly multiples-of-8 layouts out).
    x8 = jnp.pad(x.reshape(N, 3, _L).astype(f32), ((0, 0), (0, 5), (0, 0)))   # (N, 8, 1024)
    w1t = jnp.pad(params["conv1_w"].transpose(2, 3, 0, 1).reshape(25, 6, 3),
                  ((0, 0), (0, 2), (0, 5)))                                    # (25, 8, 8)
    b1 = jnp.pad(params["conv1_b"], (0, 2)).reshape(8, 1)
    w2t = jnp.pad(params["conv2_w"].transpose(2, 3, 0, 1).reshape(25, 16, 6),
                  ((0, 0), (0, 0), (0, 2)))                                    # (25, 16, 8)
    b2 = params["conv2_b"].reshape(16, 1)
    f1t = params["fc1_w"].reshape(120, 16, 25).transpose(2, 0, 1)              # (25, 120, 16)
    f1b = params["fc1_b"].reshape(120, 1)
    f2w = jnp.pad(params["fc2_w"], ((0, 4), (0, 0)))                           # (88, 120)
    f2b = jnp.pad(params["fc2_b"], (0, 4)).reshape(88, 1)
    f3w = jnp.pad(params["fc3_w"], ((0, 6), (0, 4)))                           # (16, 88)
    f3b = jnp.pad(params["fc3_b"], (0, 6)).reshape(16, 1)
    g = jnp.asarray(_gather_matrix())                                          # (1024, 128)

    out = pl.pallas_call(
        _fused_kernel,
        out_shape=jax.ShapeDtypeStruct((N, 16, 128), f32),
        grid=(N,),
        in_specs=[
            pl.BlockSpec((1, 8, _L), lambda n: (n, 0, 0)),       # per-image input
            pl.BlockSpec((25, 8, 8), lambda n: (0, 0, 0)),       # conv1 taps
            pl.BlockSpec((8, 1), lambda n: (0, 0)),              # conv1 bias
            pl.BlockSpec((25, 16, 8), lambda n: (0, 0, 0)),      # conv2 taps
            pl.BlockSpec((16, 1), lambda n: (0, 0)),             # conv2 bias
            pl.BlockSpec((_L, 128), lambda n: (0, 0)),           # gather matrix
            pl.BlockSpec((25, 120, 16), lambda n: (0, 0, 0)),    # fc1 taps
            pl.BlockSpec((120, 1), lambda n: (0, 0)),            # fc1 bias
            pl.BlockSpec((88, 120), lambda n: (0, 0)),           # fc2 weight
            pl.BlockSpec((88, 1), lambda n: (0, 0)),             # fc2 bias
            pl.BlockSpec((16, 88), lambda n: (0, 0)),            # fc3 weight
            pl.BlockSpec((16, 1), lambda n: (0, 0)),             # fc3 bias
        ],
        out_specs=pl.BlockSpec((1, 16, 128), lambda n: (n, 0, 0)),
        compiler_params=pltpu.CompilerParams(
            dimension_semantics=("parallel",)),
    )(x8, w1t, b1, w2t, b2, g, f1t, f1b, f2w, f2b, f3w, f3b)

    return out[:, :10, 0]                                        # (N, 10)


# --------------------------- pure-JAX reference ------------------------------

def reference_forward(x, params):
    dn = ("NCHW", "OIHW", "NCHW")
    hp = lax.Precision.HIGHEST

    def conv_relu_pool(h, w, b):
        h = lax.conv_general_dilated(h, w, (1, 1), "VALID",
                                     dimension_numbers=dn, precision=hp)
        h = jnp.maximum(h + b[None, :, None, None], 0.0)
        return lax.reduce_window(h, -jnp.inf, lax.max,
                                 (1, 1, 2, 2), (1, 1, 2, 2), "VALID")

    h = conv_relu_pool(x, params["conv1_w"], params["conv1_b"])
    h = conv_relu_pool(h, params["conv2_w"], params["conv2_b"])
    z = h.reshape(h.shape[0], -1)
    z = jnp.maximum(jnp.dot(z, params["fc1_w"].T, precision=hp) + params["fc1_b"], 0.0)
    z = jnp.maximum(jnp.dot(z, params["fc2_w"].T, precision=hp) + params["fc2_b"], 0.0)
    return jnp.dot(z, params["fc3_w"].T, precision=hp) + params["fc3_b"]


# ---------------------------------- main --------------------------------------

if __name__ == "__main__":
    M1, M2, k1, k2 = 6, 16, 120, 84
    N = 2  # spatial must be 32x32 (the flatten assumes M2*5*5 features)

    key = jax.random.PRNGKey(0)
    ks = jax.random.split(key, 11)
    f32 = jnp.float32
    params = {
        "conv1_w": 0.1 * jax.random.normal(ks[0], (M1, 3, 5, 5), f32),
        "conv1_b": 0.1 * jax.random.normal(ks[1], (M1,), f32),
        "conv2_w": 0.1 * jax.random.normal(ks[2], (M2, M1, 5, 5), f32),
        "conv2_b": 0.1 * jax.random.normal(ks[3], (M2,), f32),
        "fc1_w": 0.1 * jax.random.normal(ks[4], (k1, M2 * 5 * 5), f32),
        "fc1_b": 0.1 * jax.random.normal(ks[5], (k1,), f32),
        "fc2_w": 0.1 * jax.random.normal(ks[6], (k2, k1), f32),
        "fc2_b": 0.1 * jax.random.normal(ks[7], (k2,), f32),
        "fc3_w": 0.1 * jax.random.normal(ks[8], (10, k2), f32),
        "fc3_b": 0.1 * jax.random.normal(ks[9], (10,), f32),
    }
    x = jax.random.normal(ks[10], (N, 3, 32, 32), f32)

    out = jax.jit(tutorial_net_forward)(x, params)
    out = jax.block_until_ready(out)
    assert out.shape == (N, 10) and out.dtype == jnp.float32

    ref = reference_forward(x, params)
    err = float(jnp.max(jnp.abs(out - ref)))
    assert jnp.allclose(out, ref, atol=2e-2, rtol=2e-2), (
        f"mismatch, max abs diff = {err}")

    print("KERNEL_OK")
</pallas_src>

<mosaic_0001>
module attributes {stable_mosaic.version = 11 : i64} {
  func.func @_fused_kernel(%arg0: i32, %arg1: memref<1x8x1024xf32, #tpu.memory_space<vmem>>, %arg2: memref<25x8x8xf32, #tpu.memory_space<vmem>>, %arg3: memref<8x1xf32, #tpu.memory_space<vmem>>, %arg4: memref<25x16x8xf32, #tpu.memory_space<vmem>>, %arg5: memref<16x1xf32, #tpu.memory_space<vmem>>, %arg6: memref<1024x128xf32, #tpu.memory_space<vmem>>, %arg7: memref<25x120x16xf32, #tpu.memory_space<vmem>>, %arg8: memref<120x1xf32, #tpu.memory_space<vmem>>, %arg9: memref<88x120xf32, #tpu.memory_space<vmem>>, %arg10: memref<88x1xf32, #tpu.memory_space<vmem>>, %arg11: memref<16x88xf32, #tpu.memory_space<vmem>>, %arg12: memref<16x1xf32, #tpu.memory_space<vmem>>, %arg13: memref<1x16x128xf32, #tpu.memory_space<vmem>>) attributes {dimension_semantics = [#tpu.dimension_semantics<parallel>], iteration_bounds = array<i64: 2>, scalar_prefetch = 0 : i64, scratch_operands = 0 : i64, tpu.core_type = #tpu.core_type<tc>, window_params = [{transform_indices = @transform_0, window_bounds = array<i64: 1, 8, 1024>}, {pipeline_mode = #tpu.pipeline_mode<synchronous>, transform_indices = @transform_1, window_bounds = array<i64: 25, 8, 8>}, {pipeline_mode = #tpu.pipeline_mode<synchronous>, transform_indices = @transform_2, window_bounds = array<i64: 8, 1>}, {pipeline_mode = #tpu.pipeline_mode<synchronous>, transform_indices = @transform_3, window_bounds = array<i64: 25, 16, 8>}, {pipeline_mode = #tpu.pipeline_mode<synchronous>, transform_indices = @transform_4, window_bounds = array<i64: 16, 1>}, {pipeline_mode = #tpu.pipeline_mode<synchronous>, transform_indices = @transform_5, window_bounds = array<i64: 1024, 128>}, {pipeline_mode = #tpu.pipeline_mode<synchronous>, transform_indices = @transform_6, window_bounds = array<i64: 25, 120, 16>}, {pipeline_mode = #tpu.pipeline_mode<synchronous>, transform_indices = @transform_7, window_bounds = array<i64: 120, 1>}, {pipeline_mode = #tpu.pipeline_mode<synchronous>, transform_indices = @transform_8, window_bounds = array<i64: 88, 120>}, {pipeline_mode = #tpu.pipeline_mode<synchronous>, transform_indices = @transform_9, window_bounds = array<i64: 88, 1>}, {pipeline_mode = #tpu.pipeline_mode<synchronous>, transform_indices = @transform_10, window_bounds = array<i64: 16, 88>}, {pipeline_mode = #tpu.pipeline_mode<synchronous>, transform_indices = @transform_11, window_bounds = array<i64: 16, 1>}, {transform_indices = @transform_12, window_bounds = array<i64: 1, 16, 128>}]} {
    %c0 = arith.constant 0 : index
    %c0_0 = arith.constant 0 : index
    %c0_1 = arith.constant 0 : index
    %0 = vector.load %arg1[%c0, %c0_0, %c0_1] : memref<1x8x1024xf32, #tpu.memory_space<vmem>>, vector<1x8x1024xf32>
    %1 = vector.shape_cast %0 : vector<1x8x1024xf32> to vector<8x1024xf32>
    %cst = arith.constant 0.000000e+00 : f32
    %2 = vector.broadcast %cst : f32 to vector<8x1024xf32>
    %c0_2 = arith.constant 0 : index
    %c0_3 = arith.constant 0 : index
    %c0_4 = arith.constant 0 : index
    %3 = vector.load %arg2[%c0_2, %c0_3, %c0_4] : memref<25x8x8xf32, #tpu.memory_space<vmem>>, vector<1x8x8xf32>
    %4 = vector.shape_cast %3 : vector<1x8x8xf32> to vector<8x8xf32>
    %cst_5 = arith.constant dense<0.000000e+00> : vector<8x1024xf32>
    %5 = tpu.matmul %4, %1, %cst_5 {dimension_numbers = #tpu.dot_dimension_numbers<[1], [0], [0], [1], [0, 0, 1, 1], [], []>} : vector<8x8xf32>, vector<8x1024xf32>, vector<8x1024xf32> -> vector<8x1024xf32>
    %6 = arith.addf %2, %5 : vector<8x1024xf32>
    %c1 = arith.constant 1 : index
    %c0_6 = arith.constant 0 : index
    %c0_7 = arith.constant 0 : index
    %7 = vector.load %arg2[%c1, %c0_6, %c0_7] : memref<25x8x8xf32, #tpu.memory_space<vmem>>, vector<1x8x8xf32>
    %8 = vector.shape_cast %7 : vector<1x8x8xf32> to vector<8x8xf32>
    %9 = vector.extract_strided_slice %1 {offsets = [0, 1], sizes = [8, 1023], strides = [1, 1]} : vector<8x1024xf32> to vector<8x1023xf32>
    %10 = vector.extract_strided_slice %1 {offsets = [0, 0], sizes = [8, 1], strides = [1, 1]} : vector<8x1024xf32> to vector<8x1xf32>
    %11 = tpu.concatenate %9, %10 in 1 : vector<8x1023xf32>, vector<8x1xf32> -> vector<8x1024xf32>
    %cst_8 = arith.constant dense<0.000000e+00> : vector<8x1024xf32>
    %12 = tpu.matmul %8, %11, %cst_8 {dimension_numbers = #tpu.dot_dimension_numbers<[1], [0], [0], [1], [0, 0, 1, 1], [], []>} : vector<8x8xf32>, vector<8x1024xf32>, vector<8x1024xf32> -> vector<8x1024xf32>
    %13 = arith.addf %6, %12 : vector<8x1024xf32>
    %c2 = arith.constant 2 : index
    %c0_9 = arith.constant 0 : index
    %c0_10 = arith.constant 0 : index
    %14 = vector.load %arg2[%c2, %c0_9, %c0_10] : memref<25x8x8xf32, #tpu.memory_space<vmem>>, vector<1x8x8xf32>
    %15 = vector.shape_cast %14 : vector<1x8x8xf32> to vector<8x8xf32>
    %16 = vector.extract_strided_slice %1 {offsets = [0, 2], sizes = [8, 1022], strides = [1, 1]} : vector<8x1024xf32> to vector<8x1022xf32>
    %17 = vector.extract_strided_slice %1 {offsets = [0, 0], sizes = [8, 2], strides = [1, 1]} : vector<8x1024xf32> to vector<8x2xf32>
    %18 = tpu.concatenate %16, %17 in 1 : vector<8x1022xf32>, vector<8x2xf32> -> vector<8x1024xf32>
    %cst_11 = arith.constant dense<0.000000e+00> : vector<8x1024xf32>
    %19 = tpu.matmul %15, %18, %cst_11 {dimension_numbers = #tpu.dot_dimension_numbers<[1], [0], [0], [1], [0, 0, 1, 1], [], []>} : vector<8x8xf32>, vector<8x1024xf32>, vector<8x1024xf32> -> vector<8x1024xf32>
    %20 = arith.addf %13, %19 : vector<8x1024xf32>
    %c3 = arith.constant 3 : index
    %c0_12 = arith.constant 0 : index
    %c0_13 = arith.constant 0 : index
    %21 = vector.load %arg2[%c3, %c0_12, %c0_13] : memref<25x8x8xf32, #tpu.memory_space<vmem>>, vector<1x8x8xf32>
    %22 = vector.shape_cast %21 : vector<1x8x8xf32> to vector<8x8xf32>
    %23 = vector.extract_strided_slice %1 {offsets = [0, 3], sizes = [8, 1021], strides = [1, 1]} : vector<8x1024xf32> to vector<8x1021xf32>
    %24 = vector.extract_strided_slice %1 {offsets = [0, 0], sizes = [8, 3], strides = [1, 1]} : vector<8x1024xf32> to vector<8x3xf32>
    %25 = tpu.concatenate %23, %24 in 1 : vector<8x1021xf32>, vector<8x3xf32> -> vector<8x1024xf32>
    %cst_14 = arith.constant dense<0.000000e+00> : vector<8x1024xf32>
    %26 = tpu.matmul %22, %25, %cst_14 {dimension_numbers = #tpu.dot_dimension_numbers<[1], [0], [0], [1], [0, 0, 1, 1], [], []>} : vector<8x8xf32>, vector<8x1024xf32>, vector<8x1024xf32> -> vector<8x1024xf32>
    %27 = arith.addf %20, %26 : vector<8x1024xf32>
    %c4 = arith.constant 4 : index
    %c0_15 = arith.constant 0 : index
    %c0_16 = arith.constant 0 : index
    %28 = vector.load %arg2[%c4, %c0_15, %c0_16] : memref<25x8x8xf32, #tpu.memory_space<vmem>>, vector<1x8x8xf32>
    %29 = vector.shape_cast %28 : vector<1x8x8xf32> to vector<8x8xf32>
    %30 = vector.extract_strided_slice %1 {offsets = [0, 4], sizes = [8, 1020], strides = [1, 1]} : vector<8x1024xf32> to vector<8x1020xf32>
    %31 = vector.extract_strided_slice %1 {offsets = [0, 0], sizes = [8, 4], strides = [1, 1]} : vector<8x1024xf32> to vector<8x4xf32>
    %32 = tpu.concatenate %30, %31 in 1 : vector<8x1020xf32>, vector<8x4xf32> -> vector<8x1024xf32>
    %cst_17 = arith.constant dense<0.000000e+00> : vector<8x1024xf32>
    %33 = tpu.matmul %29, %32, %cst_17 {dimension_numbers = #tpu.dot_dimension_numbers<[1], [0], [0], [1], [0, 0, 1, 1], [], []>} : vector<8x8xf32>, vector<8x1024xf32>, vector<8x1024xf32> -> vector<8x1024xf32>
    %34 = arith.addf %27, %33 : vector<8x1024xf32>
    %c5 = arith.constant 5 : index
    %c0_18 = arith.constant 0 : index
    %c0_19 = arith.constant 0 : index
    %35 = vector.load %arg2[%c5, %c0_18, %c0_19] : memref<25x8x8xf32, #tpu.memory_space<vmem>>, vector<1x8x8xf32>
    %36 = vector.shape_cast %35 : vector<1x8x8xf32> to vector<8x8xf32>
    %37 = vector.extract_strided_slice %1 {offsets = [0, 32], sizes = [8, 992], strides = [1, 1]} : vector<8x1024xf32> to vector<8x992xf32>
    %38 = vector.extract_strided_slice %1 {offsets = [0, 0], sizes = [8, 32], strides = [1, 1]} : vector<8x1024xf32> to vector<8x32xf32>
    %39 = tpu.concatenate %37, %38 in 1 : vector<8x992xf32>, vector<8x32xf32> -> vector<8x1024xf32>
    %cst_20 = arith.constant dense<0.000000e+00> : vector<8x1024xf32>
    %40 = tpu.matmul %36, %39, %cst_20 {dimension_numbers = #tpu.dot_dimension_numbers<[1], [0], [0], [1], [0, 0, 1, 1], [], []>} : vector<8x8xf32>, vector<8x1024xf32>, vector<8x1024xf32> -> vector<8x1024xf32>
    %41 = arith.addf %34, %40 : vector<8x1024xf32>
    %c6 = arith.constant 6 : index
    %c0_21 = arith.constant 0 : index
    %c0_22 = arith.constant 0 : index
    %42 = vector.load %arg2[%c6, %c0_21, %c0_22] : memref<25x8x8xf32, #tpu.memory_space<vmem>>, vector<1x8x8xf32>
    %43 = vector.shape_cast %42 : vector<1x8x8xf32> to vector<8x8xf32>
    %44 = vector.extract_strided_slice %1 {offsets = [0, 33], sizes = [8, 991], strides = [1, 1]} : vector<8x1024xf32> to vector<8x991xf32>
    %45 = vector.extract_strided_slice %1 {offsets = [0, 0], sizes = [8, 33], strides = [1, 1]} : vector<8x1024xf32> to vector<8x33xf32>
    %46 = tpu.concatenate %44, %45 in 1 : vector<8x991xf32>, vector<8x33xf32> -> vector<8x1024xf32>
    %cst_23 = arith.constant dense<0.000000e+00> : vector<8x1024xf32>
    %47 = tpu.matmul %43, %46, %cst_23 {dimension_numbers = #tpu.dot_dimension_numbers<[1], [0], [0], [1], [0, 0, 1, 1], [], []>} : vector<8x8xf32>, vector<8x1024xf32>, vector<8x1024xf32> -> vector<8x1024xf32>
    %48 = arith.addf %41, %47 : vector<8x1024xf32>
    %c7 = arith.constant 7 : index
    %c0_24 = arith.constant 0 : index
    %c0_25 = arith.constant 0 : index
    %49 = vector.load %arg2[%c7, %c0_24, %c0_25] : memref<25x8x8xf32, #tpu.memory_space<vmem>>, vector<1x8x8xf32>
    %50 = vector.shape_cast %49 : vector<1x8x8xf32> to vector<8x8xf32>
    %51 = vector.extract_strided_slice %1 {offsets = [0, 34], sizes = [8, 990], strides = [1, 1]} : vector<8x1024xf32> to vector<8x990xf32>
    %52 = vector.extract_strided_slice %1 {offsets = [0, 0], sizes = [8, 34], strides = [1, 1]} : vector<8x1024xf32> to vector<8x34xf32>
    %53 = tpu.concatenate %51, %52 in 1 : vector<8x990xf32>, vector<8x34xf32> -> vector<8x1024xf32>
    %cst_26 = arith.constant dense<0.000000e+00> : vector<8x1024xf32>
    %54 = tpu.matmul %50, %53, %cst_26 {dimension_numbers = #tpu.dot_dimension_numbers<[1], [0], [0], [1], [0, 0, 1, 1], [], []>} : vector<8x8xf32>, vector<8x1024xf32>, vector<8x1024xf32> -> vector<8x1024xf32>
    %55 = arith.addf %48, %54 : vector<8x1024xf32>
    %c8 = arith.constant 8 : index
    %c0_27 = arith.constant 0 : index
    %c0_28 = arith.constant 0 : index
    %56 = vector.load %arg2[%c8, %c0_27, %c0_28] : memref<25x8x8xf32, #tpu.memory_space<vmem>>, vector<1x8x8xf32>
    %57 = vector.shape_cast %56 : vector<1x8x8xf32> to vector<8x8xf32>
    %58 = vector.extract_strided_slice %1 {offsets = [0, 35], sizes = [8, 989], strides = [1, 1]} : vector<8x1024xf32> to vector<8x989xf32>
    %59 = vector.extract_strided_slice %1 {offsets = [0, 0], sizes = [8, 35], strides = [1, 1]} : vector<8x1024xf32> to vector<8x35xf32>
    %60 = tpu.concatenate %58, %59 in 1 : vector<8x989xf32>, vector<8x35xf32> -> vector<8x1024xf32>
    %cst_29 = arith.constant dense<0.000000e+00> : vector<8x1024xf32>
    %61 = tpu.matmul %57, %60, %cst_29 {dimension_numbers = #tpu.dot_dimension_numbers<[1], [0], [0], [1], [0, 0, 1, 1], [], []>} : vector<8x8xf32>, vector<8x1024xf32>, vector<8x1024xf32> -> vector<8x1024xf32>
    %62 = arith.addf %55, %61 : vector<8x1024xf32>
    %c9 = arith.constant 9 : index
    %c0_30 = arith.constant 0 : index
    %c0_31 = arith.constant 0 : index
    %63 = vector.load %arg2[%c9, %c0_30, %c0_31] : memref<25x8x8xf32, #tpu.memory_space<vmem>>, vector<1x8x8xf32>
    %64 = vector.shape_cast %63 : vector<1x8x8xf32> to vector<8x8xf32>
    %65 = vector.extract_strided_slice %1 {offsets = [0, 36], sizes = [8, 988], strides = [1, 1]} : vector<8x1024xf32> to vector<8x988xf32>
    %66 = vector.extract_strided_slice %1 {offsets = [0, 0], sizes = [8, 36], strides = [1, 1]} : vector<8x1024xf32> to vector<8x36xf32>
    %67 = tpu.concatenate %65, %66 in 1 : vector<8x988xf32>, vector<8x36xf32> -> vector<8x1024xf32>
    %cst_32 = arith.constant dense<0.000000e+00> : vector<8x1024xf32>
    %68 = tpu.matmul %64, %67, %cst_32 {dimension_numbers = #tpu.dot_dimension_numbers<[1], [0], [0], [1], [0, 0, 1, 1], [], []>} : vector<8x8xf32>, vector<8x1024xf32>, vector<8x1024xf32> -> vector<8x1024xf32>
    %69 = arith.addf %62, %68 : vector<8x1024xf32>
    %c10 = arith.constant 10 : index
    %c0_33 = arith.constant 0 : index
    %c0_34 = arith.constant 0 : index
    %70 = vector.load %arg2[%c10, %c0_33, %c0_34] : memref<25x8x8xf32, #tpu.memory_space<vmem>>, vector<1x8x8xf32>
    %71 = vector.shape_cast %70 : vector<1x8x8xf32> to vector<8x8xf32>
    %72 = vector.extract_strided_slice %1 {offsets = [0, 64], sizes = [8, 960], strides = [1, 1]} : vector<8x1024xf32> to vector<8x960xf32>
    %73 = vector.extract_strided_slice %1 {offsets = [0, 0], sizes = [8, 64], strides = [1, 1]} : vector<8x1024xf32> to vector<8x64xf32>
    %74 = tpu.concatenate %72, %73 in 1 : vector<8x960xf32>, vector<8x64xf32> -> vector<8x1024xf32>
    %cst_35 = arith.constant dense<0.000000e+00> : vector<8x1024xf32>
    %75 = tpu.matmul %71, %74, %cst_35 {dimension_numbers = #tpu.dot_dimension_numbers<[1], [0], [0], [1], [0, 0, 1, 1], [], []>} : vector<8x8xf32>, vector<8x1024xf32>, vector<8x1024xf32> -> vector<8x1024xf32>
    %76 = arith.addf %69, %75 : vector<8x1024xf32>
    %c11 = arith.constant 11 : index
    %c0_36 = arith.constant 0 : index
    %c0_37 = arith.constant 0 : index
    %77 = vector.load %arg2[%c11, %c0_36, %c0_37] : memref<25x8x8xf32, #tpu.memory_space<vmem>>, vector<1x8x8xf32>
    %78 = vector.shape_cast %77 : vector<1x8x8xf32> to vector<8x8xf32>
    %79 = vector.extract_strided_slice %1 {offsets = [0, 65], sizes = [8, 959], strides = [1, 1]} : vector<8x1024xf32> to vector<8x959xf32>
    %80 = vector.extract_strided_slice %1 {offsets = [0, 0], sizes = [8, 65], strides = [1, 1]} : vector<8x1024xf32> to vector<8x65xf32>
    %81 = tpu.concatenate %79, %80 in 1 : vector<8x959xf32>, vector<8x65xf32> -> vector<8x1024xf32>
    %cst_38 = arith.constant dense<0.000000e+00> : vector<8x1024xf32>
    %82 = tpu.matmul %78, %81, %cst_38 {dimension_numbers = #tpu.dot_dimension_numbers<[1], [0], [0], [1], [0, 0, 1, 1], [], []>} : vector<8x8xf32>, vector<8x1024xf32>, vector<8x1024xf32> -> vector<8x1024xf32>
    %83 = arith.addf %76, %82 : vector<8x1024xf32>
    %c12 = arith.constant 12 : index
    %c0_39 = arith.constant 0 : index
    %c0_40 = arith.constant 0 : index
    %84 = vector.load %arg2[%c12, %c0_39, %c0_40] : memref<25x8x8xf32, #tpu.memory_space<vmem>>, vector<1x8x8xf32>
    %85 = vector.shape_cast %84 : vector<1x8x8xf32> to vector<8x8xf32>
    %86 = vector.extract_strided_slice %1 {offsets = [0, 66], sizes = [8, 958], strides = [1, 1]} : vector<8x1024xf32> to vector<8x958xf32>
    %87 = vector.extract_strided_slice %1 {offsets = [0, 0], sizes = [8, 66], strides = [1, 1]} : vector<8x1024xf32> to vector<8x66xf32>
    %88 = tpu.concatenate %86, %87 in 1 : vector<8x958xf32>, vector<8x66xf32> -> vector<8x1024xf32>
    %cst_41 = arith.constant dense<0.000000e+00> : vector<8x1024xf32>
    %89 = tpu.matmul %85, %88, %cst_41 {dimension_numbers = #tpu.dot_dimension_numbers<[1], [0], [0], [1], [0, 0, 1, 1], [], []>} : vector<8x8xf32>, vector<8x1024xf32>, vector<8x1024xf32> -> vector<8x1024xf32>
    %90 = arith.addf %83, %89 : vector<8x1024xf32>
    %c13 = arith.constant 13 : index
    %c0_42 = arith.constant 0 : index
    %c0_43 = arith.constant 0 : index
    %91 = vector.load %arg2[%c13, %c0_42, %c0_43] : memref<25x8x8xf32, #tpu.memory_space<vmem>>, vector<1x8x8xf32>
    %92 = vector.shape_cast %91 : vector<1x8x8xf32> to vector<8x8xf32>
    %93 = vector.extract_strided_slice %1 {offsets = [0, 67], sizes = [8, 957], strides = [1, 1]} : vector<8x1024xf32> to vector<8x957xf32>
    %94 = vector.extract_strided_slice %1 {offsets = [0, 0], sizes = [8, 67], strides = [1, 1]} : vector<8x1024xf32> to vector<8x67xf32>
    %95 = tpu.concatenate %93, %94 in 1 : vector<8x957xf32>, vector<8x67xf32> -> vector<8x1024xf32>
    %cst_44 = arith.constant dense<0.000000e+00> : vector<8x1024xf32>
    %96 = tpu.matmul %92, %95, %cst_44 {dimension_numbers = #tpu.dot_dimension_numbers<[1], [0], [0], [1], [0, 0, 1, 1], [], []>} : vector<8x8xf32>, vector<8x1024xf32>, vector<8x1024xf32> -> vector<8x1024xf32>
    %97 = arith.addf %90, %96 : vector<8x1024xf32>
    %c14 = arith.constant 14 : index
    %c0_45 = arith.constant 0 : index
    %c0_46 = arith.constant 0 : index
    %98 = vector.load %arg2[%c14, %c0_45, %c0_46] : memref<25x8x8xf32, #tpu.memory_space<vmem>>, vector<1x8x8xf32>
    %99 = vector.shape_cast %98 : vector<1x8x8xf32> to vector<8x8xf32>
    %100 = vector.extract_strided_slice %1 {offsets = [0, 68], sizes = [8, 956], strides = [1, 1]} : vector<8x1024xf32> to vector<8x956xf32>
    %101 = vector.extract_strided_slice %1 {offsets = [0, 0], sizes = [8, 68], strides = [1, 1]} : vector<8x1024xf32> to vector<8x68xf32>
    %102 = tpu.concatenate %100, %101 in 1 : vector<8x956xf32>, vector<8x68xf32> -> vector<8x1024xf32>
    %cst_47 = arith.constant dense<0.000000e+00> : vector<8x1024xf32>
    %103 = tpu.matmul %99, %102, %cst_47 {dimension_numbers = #tpu.dot_dimension_numbers<[1], [0], [0], [1], [0, 0, 1, 1], [], []>} : vector<8x8xf32>, vector<8x1024xf32>, vector<8x1024xf32> -> vector<8x1024xf32>
    %104 = arith.addf %97, %103 : vector<8x1024xf32>
    %c15 = arith.constant 15 : index
    %c0_48 = arith.constant 0 : index
    %c0_49 = arith.constant 0 : index
    %105 = vector.load %arg2[%c15, %c0_48, %c0_49] : memref<25x8x8xf32, #tpu.memory_space<vmem>>, vector<1x8x8xf32>
    %106 = vector.shape_cast %105 : vector<1x8x8xf32> to vector<8x8xf32>
    %107 = vector.extract_strided_slice %1 {offsets = [0, 96], sizes = [8, 928], strides = [1, 1]} : vector<8x1024xf32> to vector<8x928xf32>
    %108 = vector.extract_strided_slice %1 {offsets = [0, 0], sizes = [8, 96], strides = [1, 1]} : vector<8x1024xf32> to vector<8x96xf32>
    %109 = tpu.concatenate %107, %108 in 1 : vector<8x928xf32>, vector<8x96xf32> -> vector<8x1024xf32>
    %cst_50 = arith.constant dense<0.000000e+00> : vector<8x1024xf32>
    %110 = tpu.matmul %106, %109, %cst_50 {dimension_numbers = #tpu.dot_dimension_numbers<[1], [0], [0], [1], [0, 0, 1, 1], [], []>} : vector<8x8xf32>, vector<8x1024xf32>, vector<8x1024xf32> -> vector<8x1024xf32>
    %111 = arith.addf %104, %110 : vector<8x1024xf32>
    %c16 = arith.constant 16 : index
    %c0_51 = arith.constant 0 : index
    %c0_52 = arith.constant 0 : index
    %112 = vector.load %arg2[%c16, %c0_51, %c0_52] : memref<25x8x8xf32, #tpu.memory_space<vmem>>, vector<1x8x8xf32>
    %113 = vector.shape_cast %112 : vector<1x8x8xf32> to vector<8x8xf32>
    %114 = vector.extract_strided_slice %1 {offsets = [0, 97], sizes = [8, 927], strides = [1, 1]} : vector<8x1024xf32> to vector<8x927xf32>
    %115 = vector.extract_strided_slice %1 {offsets = [0, 0], sizes = [8, 97], strides = [1, 1]} : vector<8x1024xf32> to vector<8x97xf32>
    %116 = tpu.concatenate %114, %115 in 1 : vector<8x927xf32>, vector<8x97xf32> -> vector<8x1024xf32>
    %cst_53 = arith.constant dense<0.000000e+00> : vector<8x1024xf32>
    %117 = tpu.matmul %113, %116, %cst_53 {dimension_numbers = #tpu.dot_dimension_numbers<[1], [0], [0], [1], [0, 0, 1, 1], [], []>} : vector<8x8xf32>, vector<8x1024xf32>, vector<8x1024xf32> -> vector<8x1024xf32>
    %118 = arith.addf %111, %117 : vector<8x1024xf32>
    %c17 = arith.constant 17 : index
    %c0_54 = arith.constant 0 : index
    %c0_55 = arith.constant 0 : index
    %119 = vector.load %arg2[%c17, %c0_54, %c0_55] : memref<25x8x8xf32, #tpu.memory_space<vmem>>, vector<1x8x8xf32>
    %120 = vector.shape_cast %119 : vector<1x8x8xf32> to vector<8x8xf32>
    %121 = vector.extract_strided_slice %1 {offsets = [0, 98], sizes = [8, 926], strides = [1, 1]} : vector<8x1024xf32> to vector<8x926xf32>
    %122 = vector.extract_strided_slice %1 {offsets = [0, 0], sizes = [8, 98], strides = [1, 1]} : vector<8x1024xf32> to vector<8x98xf32>
    %123 = tpu.concatenate %121, %122 in 1 : vector<8x926xf32>, vector<8x98xf32> -> vector<8x1024xf32>
    %cst_56 = arith.constant dense<0.000000e+00> : vector<8x1024xf32>
    %124 = tpu.matmul %120, %123, %cst_56 {dimension_numbers = #tpu.dot_dimension_numbers<[1], [0], [0], [1], [0, 0, 1, 1], [], []>} : vector<8x8xf32>, vector<8x1024xf32>, vector<8x1024xf32> -> vector<8x1024xf32>
    %125 = arith.addf %118, %124 : vector<8x1024xf32>
    %c18 = arith.constant 18 : index
    %c0_57 = arith.constant 0 : index
    %c0_58 = arith.constant 0 : index
    %126 = vector.load %arg2[%c18, %c0_57, %c0_58] : memref<25x8x8xf32, #tpu.memory_space<vmem>>, vector<1x8x8xf32>
    %127 = vector.shape_cast %126 : vector<1x8x8xf32> to vector<8x8xf32>
    %128 = vector.extract_strided_slice %1 {offsets = [0, 99], sizes = [8, 925], strides = [1, 1]} : vector<8x1024xf32> to vector<8x925xf32>
    %129 = vector.extract_strided_slice %1 {offsets = [0, 0], sizes = [8, 99], strides = [1, 1]} : vector<8x1024xf32> to vector<8x99xf32>
    %130 = tpu.concatenate %128, %129 in 1 : vector<8x925xf32>, vector<8x99xf32> -> vector<8x1024xf32>
    %cst_59 = arith.constant dense<0.000000e+00> : vector<8x1024xf32>
    %131 = tpu.matmul %127, %130, %cst_59 {dimension_numbers = #tpu.dot_dimension_numbers<[1], [0], [0], [1], [0, 0, 1, 1], [], []>} : vector<8x8xf32>, vector<8x1024xf32>, vector<8x1024xf32> -> vector<8x1024xf32>
    %132 = arith.addf %125, %131 : vector<8x1024xf32>
    %c19 = arith.constant 19 : index
    %c0_60 = arith.constant 0 : index
    %c0_61 = arith.constant 0 : index
    %133 = vector.load %arg2[%c19, %c0_60, %c0_61] : memref<25x8x8xf32, #tpu.memory_space<vmem>>, vector<1x8x8xf32>
    %134 = vector.shape_cast %133 : vector<1x8x8xf32> to vector<8x8xf32>
    %135 = vector.extract_strided_slice %1 {offsets = [0, 100], sizes = [8, 924], strides = [1, 1]} : vector<8x1024xf32> to vector<8x924xf32>
    %136 = vector.extract_strided_slice %1 {offsets = [0, 0], sizes = [8, 100], strides = [1, 1]} : vector<8x1024xf32> to vector<8x100xf32>
    %137 = tpu.concatenate %135, %136 in 1 : vector<8x924xf32>, vector<8x100xf32> -> vector<8x1024xf32>
    %cst_62 = arith.constant dense<0.000000e+00> : vector<8x1024xf32>
    %138 = tpu.matmul %134, %137, %cst_62 {dimension_numbers = #tpu.dot_dimension_numbers<[1], [0], [0], [1], [0, 0, 1, 1], [], []>} : vector<8x8xf32>, vector<8x1024xf32>, vector<8x1024xf32> -> vector<8x1024xf32>
    %139 = arith.addf %132, %138 : vector<8x1024xf32>
    %c20 = arith.constant 20 : index
    %c0_63 = arith.constant 0 : index
    %c0_64 = arith.constant 0 : index
    %140 = vector.load %arg2[%c20, %c0_63, %c0_64] : memref<25x8x8xf32, #tpu.memory_space<vmem>>, vector<1x8x8xf32>
    %141 = vector.shape_cast %140 : vector<1x8x8xf32> to vector<8x8xf32>
    %142 = vector.extract_strided_slice %1 {offsets = [0, 128], sizes = [8, 896], strides = [1, 1]} : vector<8x1024xf32> to vector<8x896xf32>
    %143 = vector.extract_strided_slice %1 {offsets = [0, 0], sizes = [8, 128], strides = [1, 1]} : vector<8x1024xf32> to vector<8x128xf32>
    %144 = tpu.concatenate %142, %143 in 1 : vector<8x896xf32>, vector<8x128xf32> -> vector<8x1024xf32>
    %cst_65 = arith.constant dense<0.000000e+00> : vector<8x1024xf32>
    %145 = tpu.matmul %141, %144, %cst_65 {dimension_numbers = #tpu.dot_dimension_numbers<[1], [0], [0], [1], [0, 0, 1, 1], [], []>} : vector<8x8xf32>, vector<8x1024xf32>, vector<8x1024xf32> -> vector<8x1024xf32>
    %146 = arith.addf %139, %145 : vector<8x1024xf32>
    %c21 = arith.constant 21 : index
    %c0_66 = arith.constant 0 : index
    %c0_67 = arith.constant 0 : index
    %147 = vector.load %arg2[%c21, %c0_66, %c0_67] : memref<25x8x8xf32, #tpu.memory_space<vmem>>, vector<1x8x8xf32>
    %148 = vector.shape_cast %147 : vector<1x8x8xf32> to vector<8x8xf32>
    %149 = vector.extract_strided_slice %1 {offsets = [0, 129], sizes = [8, 895], strides = [1, 1]} : vector<8x1024xf32> to vector<8x895xf32>
    %150 = vector.extract_strided_slice %1 {offsets = [0, 0], sizes = [8, 129], strides = [1, 1]} : vector<8x1024xf32> to vector<8x129xf32>
    %151 = tpu.concatenate %149, %150 in 1 : vector<8x895xf32>, vector<8x129xf32> -> vector<8x1024xf32>
    %cst_68 = arith.constant dense<0.000000e+00> : vector<8x1024xf32>
    %152 = tpu.matmul %148, %151, %cst_68 {dimension_numbers = #tpu.dot_dimension_numbers<[1], [0], [0], [1], [0, 0, 1, 1], [], []>} : vector<8x8xf32>, vector<8x1024xf32>, vector<8x1024xf32> -> vector<8x1024xf32>
    %153 = arith.addf %146, %152 : vector<8x1024xf32>
    %c22 = arith.constant 22 : index
    %c0_69 = arith.constant 0 : index
    %c0_70 = arith.constant 0 : index
    %154 = vector.load %arg2[%c22, %c0_69, %c0_70] : memref<25x8x8xf32, #tpu.memory_space<vmem>>, vector<1x8x8xf32>
    %155 = vector.shape_cast %154 : vector<1x8x8xf32> to vector<8x8xf32>
    %156 = vector.extract_strided_slice %1 {offsets = [0, 130], sizes = [8, 894], strides = [1, 1]} : vector<8x1024xf32> to vector<8x894xf32>
    %157 = vector.extract_strided_slice %1 {offsets = [0, 0], sizes = [8, 130], strides = [1, 1]} : vector<8x1024xf32> to vector<8x130xf32>
    %158 = tpu.concatenate %156, %157 in 1 : vector<8x894xf32>, vector<8x130xf32> -> vector<8x1024xf32>
    %cst_71 = arith.constant dense<0.000000e+00> : vector<8x1024xf32>
    %159 = tpu.matmul %155, %158, %cst_71 {dimension_numbers = #tpu.dot_dimension_numbers<[1], [0], [0], [1], [0, 0, 1, 1], [], []>} : vector<8x8xf32>, vector<8x1024xf32>, vector<8x1024xf32> -> vector<8x1024xf32>
    %160 = arith.addf %153, %159 : vector<8x1024xf32>
    %c23 = arith.constant 23 : index
    %c0_72 = arith.constant 0 : index
    %c0_73 = arith.constant 0 : index
    %161 = vector.load %arg2[%c23, %c0_72, %c0_73] : memref<25x8x8xf32, #tpu.memory_space<vmem>>, vector<1x8x8xf32>
    %162 = vector.shape_cast %161 : vector<1x8x8xf32> to vector<8x8xf32>
    %163 = vector.extract_strided_slice %1 {offsets = [0, 131], sizes = [8, 893], strides = [1, 1]} : vector<8x1024xf32> to vector<8x893xf32>
    %164 = vector.extract_strided_slice %1 {offsets = [0, 0], sizes = [8, 131], strides = [1, 1]} : vector<8x1024xf32> to vector<8x131xf32>
    %165 = tpu.concatenate %163, %164 in 1 : vector<8x893xf32>, vector<8x131xf32> -> vector<8x1024xf32>
    %cst_74 = arith.constant dense<0.000000e+00> : vector<8x1024xf32>
    %166 = tpu.matmul %162, %165, %cst_74 {dimension_numbers = #tpu.dot_dimension_numbers<[1], [0], [0], [1], [0, 0, 1, 1], [], []>} : vector<8x8xf32>, vector<8x1024xf32>, vector<8x1024xf32> -> vector<8x1024xf32>
    %167 = arith.addf %160, %166 : vector<8x1024xf32>
    %c24 = arith.constant 24 : index
    %c0_75 = arith.constant 0 : index
    %c0_76 = arith.constant 0 : index
    %168 = vector.load %arg2[%c24, %c0_75, %c0_76] : memref<25x8x8xf32, #tpu.memory_space<vmem>>, vector<1x8x8xf32>
    %169 = vector.shape_cast %168 : vector<1x8x8xf32> to vector<8x8xf32>
    %170 = vector.extract_strided_slice %1 {offsets = [0, 132], sizes = [8, 892], strides = [1, 1]} : vector<8x1024xf32> to vector<8x892xf32>
    %171 = vector.extract_strided_slice %1 {offsets = [0, 0], sizes = [8, 132], strides = [1, 1]} : vector<8x1024xf32> to vector<8x132xf32>
    %172 = tpu.concatenate %170, %171 in 1 : vector<8x892xf32>, vector<8x132xf32> -> vector<8x1024xf32>
    %cst_77 = arith.constant dense<0.000000e+00> : vector<8x1024xf32>
    %173 = tpu.matmul %169, %172, %cst_77 {dimension_numbers = #tpu.dot_dimension_numbers<[1], [0], [0], [1], [0, 0, 1, 1], [], []>} : vector<8x8xf32>, vector<8x1024xf32>, vector<8x1024xf32> -> vector<8x1024xf32>
    %174 = arith.addf %167, %173 : vector<8x1024xf32>
    %c0_78 = arith.constant 0 : index
    %c0_79 = arith.constant 0 : index
    %175 = vector.load %arg3[%c0_78, %c0_79] : memref<8x1xf32, #tpu.memory_space<vmem>>, vector<8x1xf32>
    %176 = vector.broadcast %175 : vector<8x1xf32> to vector<8x1024xf32>
    %177 = arith.addf %174, %176 : vector<8x1024xf32>
    %cst_80 = arith.constant 0.000000e+00 : f32
    %178 = vector.broadcast %cst_80 : f32 to vector<8x1024xf32>
    %179 = arith.maximumf %177, %178 : vector<8x1024xf32>
    %180 = vector.extract_strided_slice %179 {offsets = [0, 1], sizes = [8, 1023], strides = [1, 1]} : vector<8x1024xf32> to vector<8x1023xf32>
    %181 = vector.extract_strided_slice %179 {offsets = [0, 0], sizes = [8, 1], strides = [1, 1]} : vector<8x1024xf32> to vector<8x1xf32>
    %182 = tpu.concatenate %180, %181 in 1 : vector<8x1023xf32>, vector<8x1xf32> -> vector<8x1024xf32>
    %183 = arith.maximumf %179, %182 : vector<8x1024xf32>
    %184 = vector.extract_strided_slice %183 {offsets = [0, 32], sizes = [8, 992], strides = [1, 1]} : vector<8x1024xf32> to vector<8x992xf32>
    %185 = vector.extract_strided_slice %183 {offsets = [0, 0], sizes = [8, 32], strides = [1, 1]} : vector<8x1024xf32> to vector<8x32xf32>
    %186 = tpu.concatenate %184, %185 in 1 : vector<8x992xf32>, vector<8x32xf32> -> vector<8x1024xf32>
    %187 = arith.maximumf %183, %186 : vector<8x1024xf32>
    %cst_81 = arith.constant 0.000000e+00 : f32
    %188 = vector.broadcast %cst_81 : f32 to vector<16x1024xf32>
    %c0_82 = arith.constant 0 : index
    %c0_83 = arith.constant 0 : index
    %c0_84 = arith.constant 0 : index
    %189 = vector.load %arg4[%c0_82, %c0_83, %c0_84] : memref<25x16x8xf32, #tpu.memory_space<vmem>>, vector<1x16x8xf32>
    %190 = vector.shape_cast %189 : vector<1x16x8xf32> to vector<16x8xf32>
    %cst_85 = arith.constant dense<0.000000e+00> : vector<16x1024xf32>
    %191 = tpu.matmul %190, %187, %cst_85 {dimension_numbers = #tpu.dot_dimension_numbers<[1], [0], [0], [1], [0, 0, 1, 1], [], []>} : vector<16x8xf32>, vector<8x1024xf32>, vector<16x1024xf32> -> vector<16x1024xf32>
    %192 = arith.addf %188, %191 : vector<16x1024xf32>
    %c1_86 = arith.constant 1 : index
    %c0_87 = arith.constant 0 : index
    %c0_88 = arith.constant 0 : index
    %193 = vector.load %arg4[%c1_86, %c0_87, %c0_88] : memref<25x16x8xf32, #tpu.memory_space<vmem>>, vector<1x16x8xf32>
    %194 = vector.shape_cast %193 : vector<1x16x8xf32> to vector<16x8xf32>
    %195 = vector.extract_strided_slice %187 {offsets = [0, 2], sizes = [8, 1022], strides = [1, 1]} : vector<8x1024xf32> to vector<8x1022xf32>
    %196 = vector.extract_strided_slice %187 {offsets = [0, 0], sizes = [8, 2], strides = [1, 1]} : vector<8x1024xf32> to vector<8x2xf32>
    %197 = tpu.concatenate %195, %196 in 1 : vector<8x1022xf32>, vector<8x2xf32> -> vector<8x1024xf32>
    %cst_89 = arith.constant dense<0.000000e+00> : vector<16x1024xf32>
    %198 = tpu.matmul %194, %197, %cst_89 {dimension_numbers = #tpu.dot_dimension_numbers<[1], [0], [0], [1], [0, 0, 1, 1], [], []>} : vector<16x8xf32>, vector<8x1024xf32>, vector<16x1024xf32> -> vector<16x1024xf32>
    %199 = arith.addf %192, %198 : vector<16x1024xf32>
    %c2_90 = arith.constant 2 : index
    %c0_91 = arith.constant 0 : index
    %c0_92 = arith.constant 0 : index
    %200 = vector.load %arg4[%c2_90, %c0_91, %c0_92] : memref<25x16x8xf32, #tpu.memory_space<vmem>>, vector<1x16x8xf32>
    %201 = vector.shape_cast %200 : vector<1x16x8xf32> to vector<16x8xf32>
    %202 = vector.extract_strided_slice %187 {offsets = [0, 4], sizes = [8, 1020], strides = [1, 1]} : vector<8x1024xf32> to vector<8x1020xf32>
    %203 = vector.extract_strided_slice %187 {offsets = [0, 0], sizes = [8, 4], strides = [1, 1]} : vector<8x1024xf32> to vector<8x4xf32>
    %204 = tpu.concatenate %202, %203 in 1 : vector<8x1020xf32>, vector<8x4xf32> -> vector<8x1024xf32>
    %cst_93 = arith.constant dense<0.000000e+00> : vector<16x1024xf32>
    %205 = tpu.matmul %201, %204, %cst_93 {dimension_numbers = #tpu.dot_dimension_numbers<[1], [0], [0], [1], [0, 0, 1, 1], [], []>} : vector<16x8xf32>, vector<8x1024xf32>, vector<16x1024xf32> -> vector<16x1024xf32>
    %206 = arith.addf %199, %205 : vector<16x1024xf32>
    %c3_94 = arith.constant 3 : index
    %c0_95 = arith.constant 0 : index
    %c0_96 = arith.constant 0 : index
    %207 = vector.load %arg4[%c3_94, %c0_95, %c0_96] : memref<25x16x8xf32, #tpu.memory_space<vmem>>, vector<1x16x8xf32>
    %208 = vector.shape_cast %207 : vector<1x16x8xf32> to vector<16x8xf32>
    %209 = vector.extract_strided_slice %187 {offsets = [0, 6], sizes = [8, 1018], strides = [1, 1]} : vector<8x1024xf32> to vector<8x1018xf32>
    %210 = vector.extract_strided_slice %187 {offsets = [0, 0], sizes = [8, 6], strides = [1, 1]} : vector<8x1024xf32> to vector<8x6xf32>
    %211 = tpu.concatenate %209, %210 in 1 : vector<8x1018xf32>, vector<8x6xf32> -> vector<8x1024xf32>
    %cst_97 = arith.constant dense<0.000000e+00> : vector<16x1024xf32>
    %212 = tpu.matmul %208, %211, %cst_97 {dimension_numbers = #tpu.dot_dimension_numbers<[1], [0], [0], [1], [0, 0, 1, 1], [], []>} : vector<16x8xf32>, vector<8x1024xf32>, vector<16x1024xf32> -> vector<16x1024xf32>
    %213 = arith.addf %206, %212 : vector<16x1024xf32>
    %c4_98 = arith.constant 4 : index
    %c0_99 = arith.constant 0 : index
    %c0_100 = arith.constant 0 : index
    %214 = vector.load %arg4[%c4_98, %c0_99, %c0_100] : memref<25x16x8xf32, #tpu.memory_space<vmem>>, vector<1x16x8xf32>
    %215 = vector.shape_cast %214 : vector<1x16x8xf32> to vector<16x8xf32>
    %216 = vector.extract_strided_slice %187 {offsets = [0, 8], sizes = [8, 1016], strides = [1, 1]} : vector<8x1024xf32> to vector<8x1016xf32>
    %217 = vector.extract_strided_slice %187 {offsets = [0, 0], sizes = [8, 8], strides = [1, 1]} : vector<8x1024xf32> to vector<8x8xf32>
    %218 = tpu.concatenate %216, %217 in 1 : vector<8x1016xf32>, vector<8x8xf32> -> vector<8x1024xf32>
    %cst_101 = arith.constant dense<0.000000e+00> : vector<16x1024xf32>
    %219 = tpu.matmul %215, %218, %cst_101 {dimension_numbers = #tpu.dot_dimension_numbers<[1], [0], [0], [1], [0, 0, 1, 1], [], []>} : vector<16x8xf32>, vector<8x1024xf32>, vector<16x1024xf32> -> vector<16x1024xf32>
    %220 = arith.addf %213, %219 : vector<16x1024xf32>
    %c5_102 = arith.constant 5 : index
    %c0_103 = arith.constant 0 : index
    %c0_104 = arith.constant 0 : index
    %221 = vector.load %arg4[%c5_102, %c0_103, %c0_104] : memref<25x16x8xf32, #tpu.memory_space<vmem>>, vector<1x16x8xf32>
    %222 = vector.shape_cast %221 : vector<1x16x8xf32> to vector<16x8xf32>
    %223 = vector.extract_strided_slice %187 {offsets = [0, 64], sizes = [8, 960], strides = [1, 1]} : vector<8x1024xf32> to vector<8x960xf32>
    %224 = vector.extract_strided_slice %187 {offsets = [0, 0], sizes = [8, 64], strides = [1, 1]} : vector<8x1024xf32> to vector<8x64xf32>
    %225 = tpu.concatenate %223, %224 in 1 : vector<8x960xf32>, vector<8x64xf32> -> vector<8x1024xf32>
    %cst_105 = arith.constant dense<0.000000e+00> : vector<16x1024xf32>
    %226 = tpu.matmul %222, %225, %cst_105 {dimension_numbers = #tpu.dot_dimension_numbers<[1], [0], [0], [1], [0, 0, 1, 1], [], []>} : vector<16x8xf32>, vector<8x1024xf32>, vector<16x1024xf32> -> vector<16x1024xf32>
    %227 = arith.addf %220, %226 : vector<16x1024xf32>
    %c6_106 = arith.constant 6 : index
    %c0_107 = arith.constant 0 : index
    %c0_108 = arith.constant 0 : index
    %228 = vector.load %arg4[%c6_106, %c0_107, %c0_108] : memref<25x16x8xf32, #tpu.memory_space<vmem>>, vector<1x16x8xf32>
    %229 = vector.shape_cast %228 : vector<1x16x8xf32> to vector<16x8xf32>
    %230 = vector.extract_strided_slice %187 {offsets = [0, 66], sizes = [8, 958], strides = [1, 1]} : vector<8x1024xf32> to vector<8x958xf32>
    %231 = vector.extract_strided_slice %187 {offsets = [0, 0], sizes = [8, 66], strides = [1, 1]} : vector<8x1024xf32> to vector<8x66xf32>
    %232 = tpu.concatenate %230, %231 in 1 : vector<8x958xf32>, vector<8x66xf32> -> vector<8x1024xf32>
    %cst_109 = arith.constant dense<0.000000e+00> : vector<16x1024xf32>
    %233 = tpu.matmul %229, %232, %cst_109 {dimension_numbers = #tpu.dot_dimension_numbers<[1], [0], [0], [1], [0, 0, 1, 1], [], []>} : vector<16x8xf32>, vector<8x1024xf32>, vector<16x1024xf32> -> vector<16x1024xf32>
    %234 = arith.addf %227, %233 : vector<16x1024xf32>
    %c7_110 = arith.constant 7 : index
    %c0_111 = arith.constant 0 : index
    %c0_112 = arith.constant 0 : index
    %235 = vector.load %arg4[%c7_110, %c0_111, %c0_112] : memref<25x16x8xf32, #tpu.memory_space<vmem>>, vector<1x16x8xf32>
    %236 = vector.shape_cast %235 : vector<1x16x8xf32> to vector<16x8xf32>
    %237 = vector.extract_strided_slice %187 {offsets = [0, 68], sizes = [8, 956], strides = [1, 1]} : vector<8x1024xf32> to vector<8x956xf32>
    %238 = vector.extract_strided_slice %187 {offsets = [0, 0], sizes = [8, 68], strides = [1, 1]} : vector<8x1024xf32> to vector<8x68xf32>
    %239 = tpu.concatenate %237, %238 in 1 : vector<8x956xf32>, vector<8x68xf32> -> vector<8x1024xf32>
    %cst_113 = arith.constant dense<0.000000e+00> : vector<16x1024xf32>
    %240 = tpu.matmul %236, %239, %cst_113 {dimension_numbers = #tpu.dot_dimension_numbers<[1], [0], [0], [1], [0, 0, 1, 1], [], []>} : vector<16x8xf32>, vector<8x1024xf32>, vector<16x1024xf32> -> vector<16x1024xf32>
    %241 = arith.addf %234, %240 : vector<16x1024xf32>
    %c8_114 = arith.constant 8 : index
    %c0_115 = arith.constant 0 : index
    %c0_116 = arith.constant 0 : index
    %242 = vector.load %arg4[%c8_114, %c0_115, %c0_116] : memref<25x16x8xf32, #tpu.memory_space<vmem>>, vector<1x16x8xf32>
    %243 = vector.shape_cast %242 : vector<1x16x8xf32> to vector<16x8xf32>
    %244 = vector.extract_strided_slice %187 {offsets = [0, 70], sizes = [8, 954], strides = [1, 1]} : vector<8x1024xf32> to vector<8x954xf32>
    %245 = vector.extract_strided_slice %187 {offsets = [0, 0], sizes = [8, 70], strides = [1, 1]} : vector<8x1024xf32> to vector<8x70xf32>
    %246 = tpu.concatenate %244, %245 in 1 : vector<8x954xf32>, vector<8x70xf32> -> vector<8x1024xf32>
    %cst_117 = arith.constant dense<0.000000e+00> : vector<16x1024xf32>
    %247 = tpu.matmul %243, %246, %cst_117 {dimension_numbers = #tpu.dot_dimension_numbers<[1], [0], [0], [1], [0, 0, 1, 1], [], []>} : vector<16x8xf32>, vector<8x1024xf32>, vector<16x1024xf32> -> vector<16x1024xf32>
    %248 = arith.addf %241, %247 : vector<16x1024xf32>
    %c9_118 = arith.constant 9 : index
    %c0_119 = arith.constant 0 : index
    %c0_120 = arith.constant 0 : index
    %249 = vector.load %arg4[%c9_118, %c0_119, %c0_120] : memref<25x16x8xf32, #tpu.memory_space<vmem>>, vector<1x16x8xf32>
    %250 = vector.shape_cast %249 : vector<1x16x8xf32> to vector<16x8xf32>
    %251 = vector.extract_strided_slice %187 {offsets = [0, 72], sizes = [8, 952], strides = [1, 1]} : vector<8x1024xf32> to vector<8x952xf32>
    %252 = vector.extract_strided_slice %187 {offsets = [0, 0], sizes = [8, 72], strides = [1, 1]} : vector<8x1024xf32> to vector<8x72xf32>
    %253 = tpu.concatenate %251, %252 in 1 : vector<8x952xf32>, vector<8x72xf32> -> vector<8x1024xf32>
    %cst_121 = arith.constant dense<0.000000e+00> : vector<16x1024xf32>
    %254 = tpu.matmul %250, %253, %cst_121 {dimension_numbers = #tpu.dot_dimension_numbers<[1], [0], [0], [1], [0, 0, 1, 1], [], []>} : vector<16x8xf32>, vector<8x1024xf32>, vector<16x1024xf32> -> vector<16x1024xf32>
    %255 = arith.addf %248, %254 : vector<16x1024xf32>
    %c10_122 = arith.constant 10 : index
    %c0_123 = arith.constant 0 : index
    %c0_124 = arith.constant 0 : index
    %256 = vector.load %arg4[%c10_122, %c0_123, %c0_124] : memref<25x16x8xf32, #tpu.memory_space<vmem>>, vector<1x16x8xf32>
    %257 = vector.shape_cast %256 : vector<1x16x8xf32> to vector<16x8xf32>
    %258 = vector.extract_strided_slice %187 {offsets = [0, 128], sizes = [8, 896], strides = [1, 1]} : vector<8x1024xf32> to vector<8x896xf32>
    %259 = vector.extract_strided_slice %187 {offsets = [0, 0], sizes = [8, 128], strides = [1, 1]} : vector<8x1024xf32> to vector<8x128xf32>
    %260 = tpu.concatenate %258, %259 in 1 : vector<8x896xf32>, vector<8x128xf32> -> vector<8x1024xf32>
    %cst_125 = arith.constant dense<0.000000e+00> : vector<16x1024xf32>
    %261 = tpu.matmul %257, %260, %cst_125 {dimension_numbers = #tpu.dot_dimension_numbers<[1], [0], [0], [1], [0, 0, 1, 1], [], []>} : vector<16x8xf32>, vector<8x1024xf32>, vector<16x1024xf32> -> vector<16x1024xf32>
    %262 = arith.addf %255, %261 : vector<16x1024xf32>
    %c11_126 = arith.constant 11 : index
    %c0_127 = arith.constant 0 : index
    %c0_128 = arith.constant 0 : index
    %263 = vector.load %arg4[%c11_126, %c0_127, %c0_128] : memref<25x16x8xf32, #tpu.memory_space<vmem>>, vector<1x16x8xf32>
    %264 = vector.shape_cast %263 : vector<1x16x8xf32> to vector<16x8xf32>
    %265 = vector.extract_strided_slice %187 {offsets = [0, 130], sizes = [8, 894], strides = [1, 1]} : vector<8x1024xf32> to vector<8x894xf32>
    %266 = vector.extract_strided_slice %187 {offsets = [0, 0], sizes = [8, 130], strides = [1, 1]} : vector<8x1024xf32> to vector<8x130xf32>
    %267 = tpu.concatenate %265, %266 in 1 : vector<8x894xf32>, vector<8x130xf32> -> vector<8x1024xf32>
    %cst_129 = arith.constant dense<0.000000e+00> : vector<16x1024xf32>
    %268 = tpu.matmul %264, %267, %cst_129 {dimension_numbers = #tpu.dot_dimension_numbers<[1], [0], [0], [1], [0, 0, 1, 1], [], []>} : vector<16x8xf32>, vector<8x1024xf32>, vector<16x1024xf32> -> vector<16x1024xf32>
    %269 = arith.addf %262, %268 : vector<16x1024xf32>
    %c12_130 = arith.constant 12 : index
    %c0_131 = arith.constant 0 : index
    %c0_132 = arith.constant 0 : index
    %270 = vector.load %arg4[%c12_130, %c0_131, %c0_132] : memref<25x16x8xf32, #tpu.memory_space<vmem>>, vector<1x16x8xf32>
    %271 = vector.shape_cast %270 : vector<1x16x8xf32> to vector<16x8xf32>
    %272 = vector.extract_strided_slice %187 {offsets = [0, 132], sizes = [8, 892], strides = [1, 1]} : vector<8x1024xf32> to vector<8x892xf32>
    %273 = vector.extract_strided_slice %187 {offsets = [0, 0], sizes = [8, 132], strides = [1, 1]} : vector<8x1024xf32> to vector<8x132xf32>
    %274 = tpu.concatenate %272, %273 in 1 : vector<8x892xf32>, vector<8x132xf32> -> vector<8x1024xf32>
    %cst_133 = arith.constant dense<0.000000e+00> : vector<16x1024xf32>
    %275 = tpu.matmul %271, %274, %cst_133 {dimension_numbers = #tpu.dot_dimension_numbers<[1], [0], [0], [1], [0, 0, 1, 1], [], []>} : vector<16x8xf32>, vector<8x1024xf32>, vector<16x1024xf32> -> vector<16x1024xf32>
    %276 = arith.addf %269, %275 : vector<16x1024xf32>
    %c13_134 = arith.constant 13 : index
    %c0_135 = arith.constant 0 : index
    %c0_136 = arith.constant 0 : index
    %277 = vector.load %arg4[%c13_134, %c0_135, %c0_136] : memref<25x16x8xf32, #tpu.memory_space<vmem>>, vector<1x16x8xf32>
    %278 = vector.shape_cast %277 : vector<1x16x8xf32> to vector<16x8xf32>
    %279 = vector.extract_strided_slice %187 {offsets = [0, 134], sizes = [8, 890], strides = [1, 1]} : vector<8x1024xf32> to vector<8x890xf32>
    %280 = vector.extract_strided_slice %187 {offsets = [0, 0], sizes = [8, 134], strides = [1, 1]} : vector<8x1024xf32> to vector<8x134xf32>
    %281 = tpu.concatenate %279, %280 in 1 : vector<8x890xf32>, vector<8x134xf32> -> vector<8x1024xf32>
    %cst_137 = arith.constant dense<0.000000e+00> : vector<16x1024xf32>
    %282 = tpu.matmul %278, %281, %cst_137 {dimension_numbers = #tpu.dot_dimension_numbers<[1], [0], [0], [1], [0, 0, 1, 1], [], []>} : vector<16x8xf32>, vector<8x1024xf32>, vector<16x1024xf32> -> vector<16x1024xf32>
    %283 = arith.addf %276, %282 : vector<16x1024xf32>
    %c14_138 = arith.constant 14 : index
    %c0_139 = arith.constant 0 : index
    %c0_140 = arith.constant 0 : index
    %284 = vector.load %arg4[%c14_138, %c0_139, %c0_140] : memref<25x16x8xf32, #tpu.memory_space<vmem>>, vector<1x16x8xf32>
    %285 = vector.shape_cast %284 : vector<1x16x8xf32> to vector<16x8xf32>
    %286 = vector.extract_strided_slice %187 {offsets = [0, 136], sizes = [8, 888], strides = [1, 1]} : vector<8x1024xf32> to vector<8x888xf32>
    %287 = vector.extract_strided_slice %187 {offsets = [0, 0], sizes = [8, 136], strides = [1, 1]} : vector<8x1024xf32> to vector<8x136xf32>
    %288 = tpu.concatenate %286, %287 in 1 : vector<8x888xf32>, vector<8x136xf32> -> vector<8x1024xf32>
    %cst_141 = arith.constant dense<0.000000e+00> : vector<16x1024xf32>
    %289 = tpu.matmul %285, %288, %cst_141 {dimension_numbers = #tpu.dot_dimension_numbers<[1], [0], [0], [1], [0, 0, 1, 1], [], []>} : vector<16x8xf32>, vector<8x1024xf32>, vector<16x1024xf32> -> vector<16x1024xf32>
    %290 = arith.addf %283, %289 : vector<16x1024xf32>
    %c15_142 = arith.constant 15 : index
    %c0_143 = arith.constant 0 : index
    %c0_144 = arith.constant 0 : index
    %291 = vector.load %arg4[%c15_142, %c0_143, %c0_144] : memref<25x16x8xf32, #tpu.memory_space<vmem>>, vector<1x16x8xf32>
    %292 = vector.shape_cast %291 : vector<1x16x8xf32> to vector<16x8xf32>
    %293 = vector.extract_strided_slice %187 {offsets = [0, 192], sizes = [8, 832], strides = [1, 1]} : vector<8x1024xf32> to vector<8x832xf32>
    %294 = vector.extract_strided_slice %187 {offsets = [0, 0], sizes = [8, 192], strides = [1, 1]} : vector<8x1024xf32> to vector<8x192xf32>
    %295 = tpu.concatenate %293, %294 in 1 : vector<8x832xf32>, vector<8x192xf32> -> vector<8x1024xf32>
    %cst_145 = arith.constant dense<0.000000e+00> : vector<16x1024xf32>
    %296 = tpu.matmul %292, %295, %cst_145 {dimension_numbers = #tpu.dot_dimension_numbers<[1], [0], [0], [1], [0, 0, 1, 1], [], []>} : vector<16x8xf32>, vector<8x1024xf32>, vector<16x1024xf32> -> vector<16x1024xf32>
    %297 = arith.addf %290, %296 : vector<16x1024xf32>
    %c16_146 = arith.constant 16 : index
    %c0_147 = arith.constant 0 : index
    %c0_148 = arith.constant 0 : index
    %298 = vector.load %arg4[%c16_146, %c0_147, %c0_148] : memref<25x16x8xf32, #tpu.memory_space<vmem>>, vector<1x16x8xf32>
    %299 = vector.shape_cast %298 : vector<1x16x8xf32> to vector<16x8xf32>
    %300 = vector.extract_strided_slice %187 {offsets = [0, 194], sizes = [8, 830], strides = [1, 1]} : vector<8x1024xf32> to vector<8x830xf32>
    %301 = vector.extract_strided_slice %187 {offsets = [0, 0], sizes = [8, 194], strides = [1, 1]} : vector<8x1024xf32> to vector<8x194xf32>
    %302 = tpu.concatenate %300, %301 in 1 : vector<8x830xf32>, vector<8x194xf32> -> vector<8x1024xf32>
    %cst_149 = arith.constant dense<0.000000e+00> : vector<16x1024xf32>
    %303 = tpu.matmul %299, %302, %cst_149 {dimension_numbers = #tpu.dot_dimension_numbers<[1], [0], [0], [1], [0, 0, 1, 1], [], []>} : vector<16x8xf32>, vector<8x1024xf32>, vector<16x1024xf32> -> vector<16x1024xf32>
    %304 = arith.addf %297, %303 : vector<16x1024xf32>
    %c17_150 = arith.constant 17 : index
    %c0_151 = arith.constant 0 : index
    %c0_152 = arith.constant 0 : index
    %305 = vector.load %arg4[%c17_150, %c0_151, %c0_152] : memref<25x16x8xf32, #tpu.memory_space<vmem>>, vector<1x16x8xf32>
    %306 = vector.shape_cast %305 : vector<1x16x8xf32> to vector<16x8xf32>
    %307 = vector.extract_strided_slice %187 {offsets = [0, 196], sizes = [8, 828], strides = [1, 1]} : vector<8x1024xf32> to vector<8x828xf32>
    %308 = vector.extract_strided_slice %187 {offsets = [0, 0], sizes = [8, 196], strides = [1, 1]} : vector<8x1024xf32> to vector<8x196xf32>
    %309 = tpu.concatenate %307, %308 in 1 : vector<8x828xf32>, vector<8x196xf32> -> vector<8x1024xf32>
    %cst_153 = arith.constant dense<0.000000e+00> : vector<16x1024xf32>
    %310 = tpu.matmul %306, %309, %cst_153 {dimension_numbers = #tpu.dot_dimension_numbers<[1], [0], [0], [1], [0, 0, 1, 1], [], []>} : vector<16x8xf32>, vector<8x1024xf32>, vector<16x1024xf32> -> vector<16x1024xf32>
    %311 = arith.addf %304, %310 : vector<16x1024xf32>
    %c18_154 = arith.constant 18 : index
    %c0_155 = arith.constant 0 : index
    %c0_156 = arith.constant 0 : index
    %312 = vector.load %arg4[%c18_154, %c0_155, %c0_156] : memref<25x16x8xf32, #tpu.memory_space<vmem>>, vector<1x16x8xf32>
    %313 = vector.shape_cast %312 : vector<1x16x8xf32> to vector<16x8xf32>
    %314 = vector.extract_strided_slice %187 {offsets = [0, 198], sizes = [8, 826], strides = [1, 1]} : vector<8x1024xf32> to vector<8x826xf32>
    %315 = vector.extract_strided_slice %187 {offsets = [0, 0], sizes = [8, 198], strides = [1, 1]} : vector<8x1024xf32> to vector<8x198xf32>
    %316 = tpu.concatenate %314, %315 in 1 : vector<8x826xf32>, vector<8x198xf32> -> vector<8x1024xf32>
    %cst_157 = arith.constant dense<0.000000e+00> : vector<16x1024xf32>
    %317 = tpu.matmul %313, %316, %cst_157 {dimension_numbers = #tpu.dot_dimension_numbers<[1], [0], [0], [1], [0, 0, 1, 1], [], []>} : vector<16x8xf32>, vector<8x1024xf32>, vector<16x1024xf32> -> vector<16x1024xf32>
    %318 = arith.addf %311, %317 : vector<16x1024xf32>
    %c19_158 = arith.constant 19 : index
    %c0_159 = arith.constant 0 : index
    %c0_160 = arith.constant 0 : index
    %319 = vector.load %arg4[%c19_158, %c0_159, %c0_160] : memref<25x16x8xf32, #tpu.memory_space<vmem>>, vector<1x16x8xf32>
    %320 = vector.shape_cast %319 : vector<1x16x8xf32> to vector<16x8xf32>
    %321 = vector.extract_strided_slice %187 {offsets = [0, 200], sizes = [8, 824], strides = [1, 1]} : vector<8x1024xf32> to vector<8x824xf32>
    %322 = vector.extract_strided_slice %187 {offsets = [0, 0], sizes = [8, 200], strides = [1, 1]} : vector<8x1024xf32> to vector<8x200xf32>
    %323 = tpu.concatenate %321, %322 in 1 : vector<8x824xf32>, vector<8x200xf32> -> vector<8x1024xf32>
    %cst_161 = arith.constant dense<0.000000e+00> : vector<16x1024xf32>
    %324 = tpu.matmul %320, %323, %cst_161 {dimension_numbers = #tpu.dot_dimension_numbers<[1], [0], [0], [1], [0, 0, 1, 1], [], []>} : vector<16x8xf32>, vector<8x1024xf32>, vector<16x1024xf32> -> vector<16x1024xf32>
    %325 = arith.addf %318, %324 : vector<16x1024xf32>
    %c20_162 = arith.constant 20 : index
    %c0_163 = arith.constant 0 : index
    %c0_164 = arith.constant 0 : index
    %326 = vector.load %arg4[%c20_162, %c0_163, %c0_164] : memref<25x16x8xf32, #tpu.memory_space<vmem>>, vector<1x16x8xf32>
    %327 = vector.shape_cast %326 : vector<1x16x8xf32> to vector<16x8xf32>
    %328 = vector.extract_strided_slice %187 {offsets = [0, 256], sizes = [8, 768], strides = [1, 1]} : vector<8x1024xf32> to vector<8x768xf32>
    %329 = vector.extract_strided_slice %187 {offsets = [0, 0], sizes = [8, 256], strides = [1, 1]} : vector<8x1024xf32> to vector<8x256xf32>
    %330 = tpu.concatenate %328, %329 in 1 : vector<8x768xf32>, vector<8x256xf32> -> vector<8x1024xf32>
    %cst_165 = arith.constant dense<0.000000e+00> : vector<16x1024xf32>
    %331 = tpu.matmul %327, %330, %cst_165 {dimension_numbers = #tpu.dot_dimension_numbers<[1], [0], [0], [1], [0, 0, 1, 1], [], []>} : vector<16x8xf32>, vector<8x1024xf32>, vector<16x1024xf32> -> vector<16x1024xf32>
    %332 = arith.addf %325, %331 : vector<16x1024xf32>
    %c21_166 = arith.constant 21 : index
    %c0_167 = arith.constant 0 : index
    %c0_168 = arith.constant 0 : index
    %333 = vector.load %arg4[%c21_166, %c0_167, %c0_168] : memref<25x16x8xf32, #tpu.memory_space<vmem>>, vector<1x16x8xf32>
    %334 = vector.shape_cast %333 : vector<1x16x8xf32> to vector<16x8xf32>
    %335 = vector.extract_strided_slice %187 {offsets = [0, 258], sizes = [8, 766], strides = [1, 1]} : vector<8x1024xf32> to vector<8x766xf32>
    %336 = vector.extract_strided_slice %187 {offsets = [0, 0], sizes = [8, 258], strides = [1, 1]} : vector<8x1024xf32> to vector<8x258xf32>
    %337 = tpu.concatenate %335, %336 in 1 : vector<8x766xf32>, vector<8x258xf32> -> vector<8x1024xf32>
    %cst_169 = arith.constant dense<0.000000e+00> : vector<16x1024xf32>
    %338 = tpu.matmul %334, %337, %cst_169 {dimension_numbers = #tpu.dot_dimension_numbers<[1], [0], [0], [1], [0, 0, 1, 1], [], []>} : vector<16x8xf32>, vector<8x1024xf32>, vector<16x1024xf32> -> vector<16x1024xf32>
    %339 = arith.addf %332, %338 : vector<16x1024xf32>
    %c22_170 = arith.constant 22 : index
    %c0_171 = arith.constant 0 : index
    %c0_172 = arith.constant 0 : index
    %340 = vector.load %arg4[%c22_170, %c0_171, %c0_172] : memref<25x16x8xf32, #tpu.memory_space<vmem>>, vector<1x16x8xf32>
    %341 = vector.shape_cast %340 : vector<1x16x8xf32> to vector<16x8xf32>
    %342 = vector.extract_strided_slice %187 {offsets = [0, 260], sizes = [8, 764], strides = [1, 1]} : vector<8x1024xf32> to vector<8x764xf32>
    %343 = vector.extract_strided_slice %187 {offsets = [0, 0], sizes = [8, 260], strides = [1, 1]} : vector<8x1024xf32> to vector<8x260xf32>
    %344 = tpu.concatenate %342, %343 in 1 : vector<8x764xf32>, vector<8x260xf32> -> vector<8x1024xf32>
    %cst_173 = arith.constant dense<0.000000e+00> : vector<16x1024xf32>
    %345 = tpu.matmul %341, %344, %cst_173 {dimension_numbers = #tpu.dot_dimension_numbers<[1], [0], [0], [1], [0, 0, 1, 1], [], []>} : vector<16x8xf32>, vector<8x1024xf32>, vector<16x1024xf32> -> vector<16x1024xf32>
    %346 = arith.addf %339, %345 : vector<16x1024xf32>
    %c23_174 = arith.constant 23 : index
    %c0_175 = arith.constant 0 : index
    %c0_176 = arith.constant 0 : index
    %347 = vector.load %arg4[%c23_174, %c0_175, %c0_176] : memref<25x16x8xf32, #tpu.memory_space<vmem>>, vector<1x16x8xf32>
    %348 = vector.shape_cast %347 : vector<1x16x8xf32> to vector<16x8xf32>
    %349 = vector.extract_strided_slice %187 {offsets = [0, 262], sizes = [8, 762], strides = [1, 1]} : vector<8x1024xf32> to vector<8x762xf32>
    %350 = vector.extract_strided_slice %187 {offsets = [0, 0], sizes = [8, 262], strides = [1, 1]} : vector<8x1024xf32> to vector<8x262xf32>
    %351 = tpu.concatenate %349, %350 in 1 : vector<8x762xf32>, vector<8x262xf32> -> vector<8x1024xf32>
    %cst_177 = arith.constant dense<0.000000e+00> : vector<16x1024xf32>
    %352 = tpu.matmul %348, %351, %cst_177 {dimension_numbers = #tpu.dot_dimension_numbers<[1], [0], [0], [1], [0, 0, 1, 1], [], []>} : vector<16x8xf32>, vector<8x1024xf32>, vector<16x1024xf32> -> vector<16x1024xf32>
    %353 = arith.addf %346, %352 : vector<16x1024xf32>
    %c24_178 = arith.constant 24 : index
    %c0_179 = arith.constant 0 : index
    %c0_180 = arith.constant 0 : index
    %354 = vector.load %arg4[%c24_178, %c0_179, %c0_180] : memref<25x16x8xf32, #tpu.memory_space<vmem>>, vector<1x16x8xf32>
    %355 = vector.shape_cast %354 : vector<1x16x8xf32> to vector<16x8xf32>
    %356 = vector.extract_strided_slice %187 {offsets = [0, 264], sizes = [8, 760], strides = [1, 1]} : vector<8x1024xf32> to vector<8x760xf32>
    %357 = vector.extract_strided_slice %187 {offsets = [0, 0], sizes = [8, 264], strides = [1, 1]} : vector<8x1024xf32> to vector<8x264xf32>
    %358 = tpu.concatenate %356, %357 in 1 : vector<8x760xf32>, vector<8x264xf32> -> vector<8x1024xf32>
    %cst_181 = arith.constant dense<0.000000e+00> : vector<16x1024xf32>
    %359 = tpu.matmul %355, %358, %cst_181 {dimension_numbers = #tpu.dot_dimension_numbers<[1], [0], [0], [1], [0, 0, 1, 1], [], []>} : vector<16x8xf32>, vector<8x1024xf32>, vector<16x1024xf32> -> vector<16x1024xf32>
    %360 = arith.addf %353, %359 : vector<16x1024xf32>
    %c0_182 = arith.constant 0 : index
    %c0_183 = arith.constant 0 : index
    %361 = vector.load %arg5[%c0_182, %c0_183] : memref<16x1xf32, #tpu.memory_space<vmem>>, vector<16x1xf32>
    %362 = vector.broadcast %361 : vector<16x1xf32> to vector<16x1024xf32>
    %363 = arith.addf %360, %362 : vector<16x1024xf32>
    %cst_184 = arith.constant 0.000000e+00 : f32
    %364 = vector.broadcast %cst_184 : f32 to vector<16x1024xf32>
    %365 = arith.maximumf %363, %364 : vector<16x1024xf32>
    %366 = vector.extract_strided_slice %365 {offsets = [0, 2], sizes = [16, 1022], strides = [1, 1]} : vector<16x1024xf32> to vector<16x1022xf32>
    %367 = vector.extract_strided_slice %365 {offsets = [0, 0], sizes = [16, 2], strides = [1, 1]} : vector<16x1024xf32> to vector<16x2xf32>
    %368 = tpu.concatenate %366, %367 in 1 : vector<16x1022xf32>, vector<16x2xf32> -> vector<16x1024xf32>
    %369 = arith.maximumf %365, %368 : vector<16x1024xf32>
    %370 = vector.extract_strided_slice %369 {offsets = [0, 64], sizes = [16, 960], strides = [1, 1]} : vector<16x1024xf32> to vector<16x960xf32>
    %371 = vector.extract_strided_slice %369 {offsets = [0, 0], sizes = [16, 64], strides = [1, 1]} : vector<16x1024xf32> to vector<16x64xf32>
    %372 = tpu.concatenate %370, %371 in 1 : vector<16x960xf32>, vector<16x64xf32> -> vector<16x1024xf32>
    %373 = arith.maximumf %369, %372 : vector<16x1024xf32>
    %c0_185 = arith.constant 0 : index
    %c0_186 = arith.constant 0 : index
    %374 = vector.load %arg6[%c0_185, %c0_186] : memref<1024x128xf32, #tpu.memory_space<vmem>>, vector<1024x128xf32>
    %cst_187 = arith.constant dense<0.000000e+00> : vector<16x128xf32>
    %375 = tpu.matmul %373, %374, %cst_187 {dimension_numbers = #tpu.dot_dimension_numbers<[1], [0], [0], [1], [0, 0, 1, 1], [], []>} : vector<16x1024xf32>, vector<1024x128xf32>, vector<16x128xf32> -> vector<16x128xf32>
    %cst_188 = arith.constant 0.000000e+00 : f32
    %376 = vector.broadcast %cst_188 : f32 to vector<120x128xf32>
    %c0_189 = arith.constant 0 : index
    %c0_190 = arith.constant 0 : index
    %c0_191 = arith.constant 0 : index
    %377 = vector.load %arg7[%c0_189, %c0_190, %c0_191] : memref<25x120x16xf32, #tpu.memory_space<vmem>>, vector<1x120x16xf32>
    %378 = vector.shape_cast %377 : vector<1x120x16xf32> to vector<120x16xf32>
    %cst_192 = arith.constant dense<0.000000e+00> : vector<120x128xf32>
    %379 = tpu.matmul %378, %375, %cst_192 {dimension_numbers = #tpu.dot_dimension_numbers<[1], [0], [0], [1], [0, 0, 1, 1], [], []>} : vector<120x16xf32>, vector<16x128xf32>, vector<120x128xf32> -> vector<120x128xf32>
    %380 = arith.addf %376, %379 : vector<120x128xf32>
    %c1_193 = arith.constant 1 : index
    %c0_194 = arith.constant 0 : index
    %c0_195 = arith.constant 0 : index
    %381 = vector.load %arg7[%c1_193, %c0_194, %c0_195] : memref<25x120x16xf32, #tpu.memory_space<vmem>>, vector<1x120x16xf32>
    %382 = vector.shape_cast %381 : vector<1x120x16xf32> to vector<120x16xf32>
    %383 = vector.extract_strided_slice %375 {offsets = [0, 1], sizes = [16, 127], strides = [1, 1]} : vector<16x128xf32> to vector<16x127xf32>
    %384 = vector.extract_strided_slice %375 {offsets = [0, 0], sizes = [16, 1], strides = [1, 1]} : vector<16x128xf32> to vector<16x1xf32>
    %385 = tpu.concatenate %383, %384 in 1 : vector<16x127xf32>, vector<16x1xf32> -> vector<16x128xf32>
    %cst_196 = arith.constant dense<0.000000e+00> : vector<120x128xf32>
    %386 = tpu.matmul %382, %385, %cst_196 {dimension_numbers = #tpu.dot_dimension_numbers<[1], [0], [0], [1], [0, 0, 1, 1], [], []>} : vector<120x16xf32>, vector<16x128xf32>, vector<120x128xf32> -> vector<120x128xf32>
    %387 = arith.addf %380, %386 : vector<120x128xf32>
    %c2_197 = arith.constant 2 : index
    %c0_198 = arith.constant 0 : index
    %c0_199 = arith.constant 0 : index
    %388 = vector.load %arg7[%c2_197, %c0_198, %c0_199] : memref<25x120x16xf32, #tpu.memory_space<vmem>>, vector<1x120x16xf32>
    %389 = vector.shape_cast %388 : vector<1x120x16xf32> to vector<120x16xf32>
    %390 = vector.extract_strided_slice %375 {offsets = [0, 2], sizes = [16, 126], strides = [1, 1]} : vector<16x128xf32> to vector<16x126xf32>
    %391 = vector.extract_strided_slice %375 {offsets = [0, 0], sizes = [16, 2], strides = [1, 1]} : vector<16x128xf32> to vector<16x2xf32>
    %392 = tpu.concatenate %390, %391 in 1 : vector<16x126xf32>, vector<16x2xf32> -> vector<16x128xf32>
    %cst_200 = arith.constant dense<0.000000e+00> : vector<120x128xf32>
    %393 = tpu.matmul %389, %392, %cst_200 {dimension_numbers = #tpu.dot_dimension_numbers<[1], [0], [0], [1], [0, 0, 1, 1], [], []>} : vector<120x16xf32>, vector<16x128xf32>, vector<120x128xf32> -> vector<120x128xf32>
    %394 = arith.addf %387, %393 : vector<120x128xf32>
    %c3_201 = arith.constant 3 : index
    %c0_202 = arith.constant 0 : index
    %c0_203 = arith.constant 0 : index
    %395 = vector.load %arg7[%c3_201, %c0_202, %c0_203] : memref<25x120x16xf32, #tpu.memory_space<vmem>>, vector<1x120x16xf32>
    %396 = vector.shape_cast %395 : vector<1x120x16xf32> to vector<120x16xf32>
    %397 = vector.extract_strided_slice %375 {offsets = [0, 3], sizes = [16, 125], strides = [1, 1]} : vector<16x128xf32> to vector<16x125xf32>
    %398 = vector.extract_strided_slice %375 {offsets = [0, 0], sizes = [16, 3], strides = [1, 1]} : vector<16x128xf32> to vector<16x3xf32>
    %399 = tpu.concatenate %397, %398 in 1 : vector<16x125xf32>, vector<16x3xf32> -> vector<16x128xf32>
    %cst_204 = arith.constant dense<0.000000e+00> : vector<120x128xf32>
    %400 = tpu.matmul %396, %399, %cst_204 {dimension_numbers = #tpu.dot_dimension_numbers<[1], [0], [0], [1], [0, 0, 1, 1], [], []>} : vector<120x16xf32>, vector<16x128xf32>, vector<120x128xf32> -> vector<120x128xf32>
    %401 = arith.addf %394, %400 : vector<120x128xf32>
    %c4_205 = arith.constant 4 : index
    %c0_206 = arith.constant 0 : index
    %c0_207 = arith.constant 0 : index
    %402 = vector.load %arg7[%c4_205, %c0_206, %c0_207] : memref<25x120x16xf32, #tpu.memory_space<vmem>>, vector<1x120x16xf32>
    %403 = vector.shape_cast %402 : vector<1x120x16xf32> to vector<120x16xf32>
    %404 = vector.extract_strided_slice %375 {offsets = [0, 4], sizes = [16, 124], strides = [1, 1]} : vector<16x128xf32> to vector<16x124xf32>
    %405 = vector.extract_strided_slice %375 {offsets = [0, 0], sizes = [16, 4], strides = [1, 1]} : vector<16x128xf32> to vector<16x4xf32>
    %406 = tpu.concatenate %404, %405 in 1 : vector<16x124xf32>, vector<16x4xf32> -> vector<16x128xf32>
    %cst_208 = arith.constant dense<0.000000e+00> : vector<120x128xf32>
    %407 = tpu.matmul %403, %406, %cst_208 {dimension_numbers = #tpu.dot_dimension_numbers<[1], [0], [0], [1], [0, 0, 1, 1], [], []>} : vector<120x16xf32>, vector<16x128xf32>, vector<120x128xf32> -> vector<120x128xf32>
    %408 = arith.addf %401, %407 : vector<120x128xf32>
    %c5_209 = arith.constant 5 : index
    %c0_210 = arith.constant 0 : index
    %c0_211 = arith.constant 0 : index
    %409 = vector.load %arg7[%c5_209, %c0_210, %c0_211] : memref<25x120x16xf32, #tpu.memory_space<vmem>>, vector<1x120x16xf32>
    %410 = vector.shape_cast %409 : vector<1x120x16xf32> to vector<120x16xf32>
    %411 = vector.extract_strided_slice %375 {offsets = [0, 5], sizes = [16, 123], strides = [1, 1]} : vector<16x128xf32> to vector<16x123xf32>
    %412 = vector.extract_strided_slice %375 {offsets = [0, 0], sizes = [16, 5], strides = [1, 1]} : vector<16x128xf32> to vector<16x5xf32>
    %413 = tpu.concatenate %411, %412 in 1 : vector<16x123xf32>, vector<16x5xf32> -> vector<16x128xf32>
    %cst_212 = arith.constant dense<0.000000e+00> : vector<120x128xf32>
    %414 = tpu.matmul %410, %413, %cst_212 {dimension_numbers = #tpu.dot_dimension_numbers<[1], [0], [0], [1], [0, 0, 1, 1], [], []>} : vector<120x16xf32>, vector<16x128xf32>, vector<120x128xf32> -> vector<120x128xf32>
    %415 = arith.addf %408, %414 : vector<120x128xf32>
    %c6_213 = arith.constant 6 : index
    %c0_214 = arith.constant 0 : index
    %c0_215 = arith.constant 0 : index
    %416 = vector.load %arg7[%c6_213, %c0_214, %c0_215] : memref<25x120x16xf32, #tpu.memory_space<vmem>>, vector<1x120x16xf32>
    %417 = vector.shape_cast %416 : vector<1x120x16xf32> to vector<120x16xf32>
    %418 = vector.extract_strided_slice %375 {offsets = [0, 6], sizes = [16, 122], strides = [1, 1]} : vector<16x128xf32> to vector<16x122xf32>
    %419 = vector.extract_strided_slice %375 {offsets = [0, 0], sizes = [16, 6], strides = [1, 1]} : vector<16x128xf32> to vector<16x6xf32>
    %420 = tpu.concatenate %418, %419 in 1 : vector<16x122xf32>, vector<16x6xf32> -> vector<16x128xf32>
    %cst_216 = arith.constant dense<0.000000e+00> : vector<120x128xf32>
    %421 = tpu.matmul %417, %420, %cst_216 {dimension_numbers = #tpu.dot_dimension_numbers<[1], [0], [0], [1], [0, 0, 1, 1], [], []>} : vector<120x16xf32>, vector<16x128xf32>, vector<120x128xf32> -> vector<120x128xf32>
    %422 = arith.addf %415, %421 : vector<120x128xf32>
    %c7_217 = arith.constant 7 : index
    %c0_218 = arith.constant 0 : index
    %c0_219 = arith.constant 0 : index
    %423 = vector.load %arg7[%c7_217, %c0_218, %c0_219] : memref<25x120x16xf32, #tpu.memory_space<vmem>>, vector<1x120x16xf32>
    %424 = vector.shape_cast %423 : vector<1x120x16xf32> to vector<120x16xf32>
    %425 = vector.extract_strided_slice %375 {offsets = [0, 7], sizes = [16, 121], strides = [1, 1]} : vector<16x128xf32> to vector<16x121xf32>
    %426 = vector.extract_strided_slice %375 {offsets = [0, 0], sizes = [16, 7], strides = [1, 1]} : vector<16x128xf32> to vector<16x7xf32>
    %427 = tpu.concatenate %425, %426 in 1 : vector<16x121xf32>, vector<16x7xf32> -> vector<16x128xf32>
    %cst_220 = arith.constant dense<0.000000e+00> : vector<120x128xf32>
    %428 = tpu.matmul %424, %427, %cst_220 {dimension_numbers = #tpu.dot_dimension_numbers<[1], [0], [0], [1], [0, 0, 1, 1], [], []>} : vector<120x16xf32>, vector<16x128xf32>, vector<120x128xf32> -> vector<120x128xf32>
    %429 = arith.addf %422, %428 : vector<120x128xf32>
    %c8_221 = arith.constant 8 : index
    %c0_222 = arith.constant 0 : index
    %c0_223 = arith.constant 0 : index
    %430 = vector.load %arg7[%c8_221, %c0_222, %c0_223] : memref<25x120x16xf32, #tpu.memory_space<vmem>>, vector<1x120x16xf32>
    %431 = vector.shape_cast %430 : vector<1x120x16xf32> to vector<120x16xf32>
    %432 = vector.extract_strided_slice %375 {offsets = [0, 8], sizes = [16, 120], strides = [1, 1]} : vector<16x128xf32> to vector<16x120xf32>
    %433 = vector.extract_strided_slice %375 {offsets = [0, 0], sizes = [16, 8], strides = [1, 1]} : vector<16x128xf32> to vector<16x8xf32>
    %434 = tpu.concatenate %432, %433 in 1 : vector<16x120xf32>, vector<16x8xf32> -> vector<16x128xf32>
    %cst_224 = arith.constant dense<0.000000e+00> : vector<120x128xf32>
    %435 = tpu.matmul %431, %434, %cst_224 {dimension_numbers = #tpu.dot_dimension_numbers<[1], [0], [0], [1], [0, 0, 1, 1], [], []>} : vector<120x16xf32>, vector<16x128xf32>, vector<120x128xf32> -> vector<120x128xf32>
    %436 = arith.addf %429, %435 : vector<120x128xf32>
    %c9_225 = arith.constant 9 : index
    %c0_226 = arith.constant 0 : index
    %c0_227 = arith.constant 0 : index
    %437 = vector.load %arg7[%c9_225, %c0_226, %c0_227] : memref<25x120x16xf32, #tpu.memory_space<vmem>>, vector<1x120x16xf32>
    %438 = vector.shape_cast %437 : vector<1x120x16xf32> to vector<120x16xf32>
    %439 = vector.extract_strided_slice %375 {offsets = [0, 9], sizes = [16, 119], strides = [1, 1]} : vector<16x128xf32> to vector<16x119xf32>
    %440 = vector.extract_strided_slice %375 {offsets = [0, 0], sizes = [16, 9], strides = [1, 1]} : vector<16x128xf32> to vector<16x9xf32>
    %441 = tpu.concatenate %439, %440 in 1 : vector<16x119xf32>, vector<16x9xf32> -> vector<16x128xf32>
    %cst_228 = arith.constant dense<0.000000e+00> : vector<120x128xf32>
    %442 = tpu.matmul %438, %441, %cst_228 {dimension_numbers = #tpu.dot_dimension_numbers<[1], [0], [0], [1], [0, 0, 1, 1], [], []>} : vector<120x16xf32>, vector<16x128xf32>, vector<120x128xf32> -> vector<120x128xf32>
    %443 = arith.addf %436, %442 : vector<120x128xf32>
    %c10_229 = arith.constant 10 : index
    %c0_230 = arith.constant 0 : index
    %c0_231 = arith.constant 0 : index
    %444 = vector.load %arg7[%c10_229, %c0_230, %c0_231] : memref<25x120x16xf32, #tpu.memory_space<vmem>>, vector<1x120x16xf32>
    %445 = vector.shape_cast %444 : vector<1x120x16xf32> to vector<120x16xf32>
    %446 = vector.extract_strided_slice %375 {offsets = [0, 10], sizes = [16, 118], strides = [1, 1]} : vector<16x128xf32> to vector<16x118xf32>
    %447 = vector.extract_strided_slice %375 {offsets = [0, 0], sizes = [16, 10], strides = [1, 1]} : vector<16x128xf32> to vector<16x10xf32>
    %448 = tpu.concatenate %446, %447 in 1 : vector<16x118xf32>, vector<16x10xf32> -> vector<16x128xf32>
    %cst_232 = arith.constant dense<0.000000e+00> : vector<120x128xf32>
    %449 = tpu.matmul %445, %448, %cst_232 {dimension_numbers = #tpu.dot_dimension_numbers<[1], [0], [0], [1], [0, 0, 1, 1], [], []>} : vector<120x16xf32>, vector<16x128xf32>, vector<120x128xf32> -> vector<120x128xf32>
    %450 = arith.addf %443, %449 : vector<120x128xf32>
    %c11_233 = arith.constant 11 : index
    %c0_234 = arith.constant 0 : index
    %c0_235 = arith.constant 0 : index
    %451 = vector.load %arg7[%c11_233, %c0_234, %c0_235] : memref<25x120x16xf32, #tpu.memory_space<vmem>>, vector<1x120x16xf32>
    %452 = vector.shape_cast %451 : vector<1x120x16xf32> to vector<120x16xf32>
    %453 = vector.extract_strided_slice %375 {offsets = [0, 11], sizes = [16, 117], strides = [1, 1]} : vector<16x128xf32> to vector<16x117xf32>
    %454 = vector.extract_strided_slice %375 {offsets = [0, 0], sizes = [16, 11], strides = [1, 1]} : vector<16x128xf32> to vector<16x11xf32>
    %455 = tpu.concatenate %453, %454 in 1 : vector<16x117xf32>, vector<16x11xf32> -> vector<16x128xf32>
    %cst_236 = arith.constant dense<0.000000e+00> : vector<120x128xf32>
    %456 = tpu.matmul %452, %455, %cst_236 {dimension_numbers = #tpu.dot_dimension_numbers<[1], [0], [0], [1], [0, 0, 1, 1], [], []>} : vector<120x16xf32>, vector<16x128xf32>, vector<120x128xf32> -> vector<120x128xf32>
    %457 = arith.addf %450, %456 : vector<120x128xf32>
    %c12_237 = arith.constant 12 : index
    %c0_238 = arith.constant 0 : index
    %c0_239 = arith.constant 0 : index
    %458 = vector.load %arg7[%c12_237, %c0_238, %c0_239] : memref<25x120x16xf32, #tpu.memory_space<vmem>>, vector<1x120x16xf32>
    %459 = vector.shape_cast %458 : vector<1x120x16xf32> to vector<120x16xf32>
    %460 = vector.extract_strided_slice %375 {offsets = [0, 12], sizes = [16, 116], strides = [1, 1]} : vector<16x128xf32> to vector<16x116xf32>
    %461 = vector.extract_strided_slice %375 {offsets = [0, 0], sizes = [16, 12], strides = [1, 1]} : vector<16x128xf32> to vector<16x12xf32>
    %462 = tpu.concatenate %460, %461 in 1 : vector<16x116xf32>, vector<16x12xf32> -> vector<16x128xf32>
    %cst_240 = arith.constant dense<0.000000e+00> : vector<120x128xf32>
    %463 = tpu.matmul %459, %462, %cst_240 {dimension_numbers = #tpu.dot_dimension_numbers<[1], [0], [0], [1], [0, 0, 1, 1], [], []>} : vector<120x16xf32>, vector<16x128xf32>, vector<120x128xf32> -> vector<120x128xf32>
    %464 = arith.addf %457, %463 : vector<120x128xf32>
    %c13_241 = arith.constant 13 : index
    %c0_242 = arith.constant 0 : index
    %c0_243 = arith.constant 0 : index
    %465 = vector.load %arg7[%c13_241, %c0_242, %c0_243] : memref<25x120x16xf32, #tpu.memory_space<vmem>>, vector<1x120x16xf32>
    %466 = vector.shape_cast %465 : vector<1x120x16xf32> to vector<120x16xf32>
    %467 = vector.extract_strided_slice %375 {offsets = [0, 13], sizes = [16, 115], strides = [1, 1]} : vector<16x128xf32> to vector<16x115xf32>
    %468 = vector.extract_strided_slice %375 {offsets = [0, 0], sizes = [16, 13], strides = [1, 1]} : vector<16x128xf32> to vector<16x13xf32>
    %469 = tpu.concatenate %467, %468 in 1 : vector<16x115xf32>, vector<16x13xf32> -> vector<16x128xf32>
    %cst_244 = arith.constant dense<0.000000e+00> : vector<120x128xf32>
    %470 = tpu.matmul %466, %469, %cst_244 {dimension_numbers = #tpu.dot_dimension_numbers<[1], [0], [0], [1], [0, 0, 1, 1], [], []>} : vector<120x16xf32>, vector<16x128xf32>, vector<120x128xf32> -> vector<120x128xf32>
    %471 = arith.addf %464, %470 : vector<120x128xf32>
    %c14_245 = arith.constant 14 : index
    %c0_246 = arith.constant 0 : index
    %c0_247 = arith.constant 0 : index
    %472 = vector.load %arg7[%c14_245, %c0_246, %c0_247] : memref<25x120x16xf32, #tpu.memory_space<vmem>>, vector<1x120x16xf32>
    %473 = vector.shape_cast %472 : vector<1x120x16xf32> to vector<120x16xf32>
    %474 = vector.extract_strided_slice %375 {offsets = [0, 14], sizes = [16, 114], strides = [1, 1]} : vector<16x128xf32> to vector<16x114xf32>
    %475 = vector.extract_strided_slice %375 {offsets = [0, 0], sizes = [16, 14], strides = [1, 1]} : vector<16x128xf32> to vector<16x14xf32>
    %476 = tpu.concatenate %474, %475 in 1 : vector<16x114xf32>, vector<16x14xf32> -> vector<16x128xf32>
    %cst_248 = arith.constant dense<0.000000e+00> : vector<120x128xf32>
    %477 = tpu.matmul %473, %476, %cst_248 {dimension_numbers = #tpu.dot_dimension_numbers<[1], [0], [0], [1], [0, 0, 1, 1], [], []>} : vector<120x16xf32>, vector<16x128xf32>, vector<120x128xf32> -> vector<120x128xf32>
    %478 = arith.addf %471, %477 : vector<120x128xf32>
    %c15_249 = arith.constant 15 : index
    %c0_250 = arith.constant 0 : index
    %c0_251 = arith.constant 0 : index
    %479 = vector.load %arg7[%c15_249, %c0_250, %c0_251] : memref<25x120x16xf32, #tpu.memory_space<vmem>>, vector<1x120x16xf32>
    %480 = vector.shape_cast %479 : vector<1x120x16xf32> to vector<120x16xf32>
    %481 = vector.extract_strided_slice %375 {offsets = [0, 15], sizes = [16, 113], strides = [1, 1]} : vector<16x128xf32> to vector<16x113xf32>
    %482 = vector.extract_strided_slice %375 {offsets = [0, 0], sizes = [16, 15], strides = [1, 1]} : vector<16x128xf32> to vector<16x15xf32>
    %483 = tpu.concatenate %481, %482 in 1 : vector<16x113xf32>, vector<16x15xf32> -> vector<16x128xf32>
    %cst_252 = arith.constant dense<0.000000e+00> : vector<120x128xf32>
    %484 = tpu.matmul %480, %483, %cst_252 {dimension_numbers = #tpu.dot_dimension_numbers<[1], [0], [0], [1], [0, 0, 1, 1], [], []>} : vector<120x16xf32>, vector<16x128xf32>, vector<120x128xf32> -> vector<120x128xf32>
    %485 = arith.addf %478, %484 : vector<120x128xf32>
    %c16_253 = arith.constant 16 : index
    %c0_254 = arith.constant 0 : index
    %c0_255 = arith.constant 0 : index
    %486 = vector.load %arg7[%c16_253, %c0_254, %c0_255] : memref<25x120x16xf32, #tpu.memory_space<vmem>>, vector<1x120x16xf32>
    %487 = vector.shape_cast %486 : vector<1x120x16xf32> to vector<120x16xf32>
    %488 = vector.extract_strided_slice %375 {offsets = [0, 16], sizes = [16, 112], strides = [1, 1]} : vector<16x128xf32> to vector<16x112xf32>
    %489 = vector.extract_strided_slice %375 {offsets = [0, 0], sizes = [16, 16], strides = [1, 1]} : vector<16x128xf32> to vector<16x16xf32>
    %490 = tpu.concatenate %488, %489 in 1 : vector<16x112xf32>, vector<16x16xf32> -> vector<16x128xf32>
    %cst_256 = arith.constant dense<0.000000e+00> : vector<120x128xf32>
    %491 = tpu.matmul %487, %490, %cst_256 {dimension_numbers = #tpu.dot_dimension_numbers<[1], [0], [0], [1], [0, 0, 1, 1], [], []>} : vector<120x16xf32>, vector<16x128xf32>, vector<120x128xf32> -> vector<120x128xf32>
    %492 = arith.addf %485, %491 : vector<120x128xf32>
    %c17_257 = arith.constant 17 : index
    %c0_258 = arith.constant 0 : index
    %c0_259 = arith.constant 0 : index
    %493 = vector.load %arg7[%c17_257, %c0_258, %c0_259] : memref<25x120x16xf32, #tpu.memory_space<vmem>>, vector<1x120x16xf32>
    %494 = vector.shape_cast %493 : vector<1x120x16xf32> to vector<120x16xf32>
    %495 = vector.extract_strided_slice %375 {offsets = [0, 17], sizes = [16, 111], strides = [1, 1]} : vector<16x128xf32> to vector<16x111xf32>
    %496 = vector.extract_strided_slice %375 {offsets = [0, 0], sizes = [16, 17], strides = [1, 1]} : vector<16x128xf32> to vector<16x17xf32>
    %497 = tpu.concatenate %495, %496 in 1 : vector<16x111xf32>, vector<16x17xf32> -> vector<16x128xf32>
    %cst_260 = arith.constant dense<0.000000e+00> : vector<120x128xf32>
    %498 = tpu.matmul %494, %497, %cst_260 {dimension_numbers = #tpu.dot_dimension_numbers<[1], [0], [0], [1], [0, 0, 1, 1], [], []>} : vector<120x16xf32>, vector<16x128xf32>, vector<120x128xf32> -> vector<120x128xf32>
    %499 = arith.addf %492, %498 : vector<120x128xf32>
    %c18_261 = arith.constant 18 : index
    %c0_262 = arith.constant 0 : index
    %c0_263 = arith.constant 0 : index
    %500 = vector.load %arg7[%c18_261, %c0_262, %c0_263] : memref<25x120x16xf32, #tpu.memory_space<vmem>>, vector<1x120x16xf32>
    %501 = vector.shape_cast %500 : vector<1x120x16xf32> to vector<120x16xf32>
    %502 = vector.extract_strided_slice %375 {offsets = [0, 18], sizes = [16, 110], strides = [1, 1]} : vector<16x128xf32> to vector<16x110xf32>
    %503 = vector.extract_strided_slice %375 {offsets = [0, 0], sizes = [16, 18], strides = [1, 1]} : vector<16x128xf32> to vector<16x18xf32>
    %504 = tpu.concatenate %502, %503 in 1 : vector<16x110xf32>, vector<16x18xf32> -> vector<16x128xf32>
    %cst_264 = arith.constant dense<0.000000e+00> : vector<120x128xf32>
    %505 = tpu.matmul %501, %504, %cst_264 {dimension_numbers = #tpu.dot_dimension_numbers<[1], [0], [0], [1], [0, 0, 1, 1], [], []>} : vector<120x16xf32>, vector<16x128xf32>, vector<120x128xf32> -> vector<120x128xf32>
    %506 = arith.addf %499, %505 : vector<120x128xf32>
    %c19_265 = arith.constant 19 : index
    %c0_266 = arith.constant 0 : index
    %c0_267 = arith.constant 0 : index
    %507 = vector.load %arg7[%c19_265, %c0_266, %c0_267] : memref<25x120x16xf32, #tpu.memory_space<vmem>>, vector<1x120x16xf32>
    %508 = vector.shape_cast %507 : vector<1x120x16xf32> to vector<120x16xf32>
    %509 = vector.extract_strided_slice %375 {offsets = [0, 19], sizes = [16, 109], strides = [1, 1]} : vector<16x128xf32> to vector<16x109xf32>
    %510 = vector.extract_strided_slice %375 {offsets = [0, 0], sizes = [16, 19], strides = [1, 1]} : vector<16x128xf32> to vector<16x19xf32>
    %511 = tpu.concatenate %509, %510 in 1 : vector<16x109xf32>, vector<16x19xf32> -> vector<16x128xf32>
    %cst_268 = arith.constant dense<0.000000e+00> : vector<120x128xf32>
    %512 = tpu.matmul %508, %511, %cst_268 {dimension_numbers = #tpu.dot_dimension_numbers<[1], [0], [0], [1], [0, 0, 1, 1], [], []>} : vector<120x16xf32>, vector<16x128xf32>, vector<120x128xf32> -> vector<120x128xf32>
    %513 = arith.addf %506, %512 : vector<120x128xf32>
    %c20_269 = arith.constant 20 : index
    %c0_270 = arith.constant 0 : index
    %c0_271 = arith.constant 0 : index
    %514 = vector.load %arg7[%c20_269, %c0_270, %c0_271] : memref<25x120x16xf32, #tpu.memory_space<vmem>>, vector<1x120x16xf32>
    %515 = vector.shape_cast %514 : vector<1x120x16xf32> to vector<120x16xf32>
    %516 = vector.extract_strided_slice %375 {offsets = [0, 20], sizes = [16, 108], strides = [1, 1]} : vector<16x128xf32> to vector<16x108xf32>
    %517 = vector.extract_strided_slice %375 {offsets = [0, 0], sizes = [16, 20], strides = [1, 1]} : vector<16x128xf32> to vector<16x20xf32>
    %518 = tpu.concatenate %516, %517 in 1 : vector<16x108xf32>, vector<16x20xf32> -> vector<16x128xf32>
    %cst_272 = arith.constant dense<0.000000e+00> : vector<120x128xf32>
    %519 = tpu.matmul %515, %518, %cst_272 {dimension_numbers = #tpu.dot_dimension_numbers<[1], [0], [0], [1], [0, 0, 1, 1], [], []>} : vector<120x16xf32>, vector<16x128xf32>, vector<120x128xf32> -> vector<120x128xf32>
    %520 = arith.addf %513, %519 : vector<120x128xf32>
    %c21_273 = arith.constant 21 : index
    %c0_274 = arith.constant 0 : index
    %c0_275 = arith.constant 0 : index
    %521 = vector.load %arg7[%c21_273, %c0_274, %c0_275] : memref<25x120x16xf32, #tpu.memory_space<vmem>>, vector<1x120x16xf32>
    %522 = vector.shape_cast %521 : vector<1x120x16xf32> to vector<120x16xf32>
    %523 = vector.extract_strided_slice %375 {offsets = [0, 21], sizes = [16, 107], strides = [1, 1]} : vector<16x128xf32> to vector<16x107xf32>
    %524 = vector.extract_strided_slice %375 {offsets = [0, 0], sizes = [16, 21], strides = [1, 1]} : vector<16x128xf32> to vector<16x21xf32>
    %525 = tpu.concatenate %523, %524 in 1 : vector<16x107xf32>, vector<16x21xf32> -> vector<16x128xf32>
    %cst_276 = arith.constant dense<0.000000e+00> : vector<120x128xf32>
    %526 = tpu.matmul %522, %525, %cst_276 {dimension_numbers = #tpu.dot_dimension_numbers<[1], [0], [0], [1], [0, 0, 1, 1], [], []>} : vector<120x16xf32>, vector<16x128xf32>, vector<120x128xf32> -> vector<120x128xf32>
    %527 = arith.addf %520, %526 : vector<120x128xf32>
    %c22_277 = arith.constant 22 : index
    %c0_278 = arith.constant 0 : index
    %c0_279 = arith.constant 0 : index
    %528 = vector.load %arg7[%c22_277, %c0_278, %c0_279] : memref<25x120x16xf32, #tpu.memory_space<vmem>>, vector<1x120x16xf32>
    %529 = vector.shape_cast %528 : vector<1x120x16xf32> to vector<120x16xf32>
    %530 = vector.extract_strided_slice %375 {offsets = [0, 22], sizes = [16, 106], strides = [1, 1]} : vector<16x128xf32> to vector<16x106xf32>
    %531 = vector.extract_strided_slice %375 {offsets = [0, 0], sizes = [16, 22], strides = [1, 1]} : vector<16x128xf32> to vector<16x22xf32>
    %532 = tpu.concatenate %530, %531 in 1 : vector<16x106xf32>, vector<16x22xf32> -> vector<16x128xf32>
    %cst_280 = arith.constant dense<0.000000e+00> : vector<120x128xf32>
    %533 = tpu.matmul %529, %532, %cst_280 {dimension_numbers = #tpu.dot_dimension_numbers<[1], [0], [0], [1], [0, 0, 1, 1], [], []>} : vector<120x16xf32>, vector<16x128xf32>, vector<120x128xf32> -> vector<120x128xf32>
    %534 = arith.addf %527, %533 : vector<120x128xf32>
    %c23_281 = arith.constant 23 : index
    %c0_282 = arith.constant 0 : index
    %c0_283 = arith.constant 0 : index
    %535 = vector.load %arg7[%c23_281, %c0_282, %c0_283] : memref<25x120x16xf32, #tpu.memory_space<vmem>>, vector<1x120x16xf32>
    %536 = vector.shape_cast %535 : vector<1x120x16xf32> to vector<120x16xf32>
    %537 = vector.extract_strided_slice %375 {offsets = [0, 23], sizes = [16, 105], strides = [1, 1]} : vector<16x128xf32> to vector<16x105xf32>
    %538 = vector.extract_strided_slice %375 {offsets = [0, 0], sizes = [16, 23], strides = [1, 1]} : vector<16x128xf32> to vector<16x23xf32>
    %539 = tpu.concatenate %537, %538 in 1 : vector<16x105xf32>, vector<16x23xf32> -> vector<16x128xf32>
    %cst_284 = arith.constant dense<0.000000e+00> : vector<120x128xf32>
    %540 = tpu.matmul %536, %539, %cst_284 {dimension_numbers = #tpu.dot_dimension_numbers<[1], [0], [0], [1], [0, 0, 1, 1], [], []>} : vector<120x16xf32>, vector<16x128xf32>, vector<120x128xf32> -> vector<120x128xf32>
    %541 = arith.addf %534, %540 : vector<120x128xf32>
    %c24_285 = arith.constant 24 : index
    %c0_286 = arith.constant 0 : index
    %c0_287 = arith.constant 0 : index
    %542 = vector.load %arg7[%c24_285, %c0_286, %c0_287] : memref<25x120x16xf32, #tpu.memory_space<vmem>>, vector<1x120x16xf32>
    %543 = vector.shape_cast %542 : vector<1x120x16xf32> to vector<120x16xf32>
    %544 = vector.extract_strided_slice %375 {offsets = [0, 24], sizes = [16, 104], strides = [1, 1]} : vector<16x128xf32> to vector<16x104xf32>
    %545 = vector.extract_strided_slice %375 {offsets = [0, 0], sizes = [16, 24], strides = [1, 1]} : vector<16x128xf32> to vector<16x24xf32>
    %546 = tpu.concatenate %544, %545 in 1 : vector<16x104xf32>, vector<16x24xf32> -> vector<16x128xf32>
    %cst_288 = arith.constant dense<0.000000e+00> : vector<120x128xf32>
    %547 = tpu.matmul %543, %546, %cst_288 {dimension_numbers = #tpu.dot_dimension_numbers<[1], [0], [0], [1], [0, 0, 1, 1], [], []>} : vector<120x16xf32>, vector<16x128xf32>, vector<120x128xf32> -> vector<120x128xf32>
    %548 = arith.addf %541, %547 : vector<120x128xf32>
    %c0_289 = arith.constant 0 : index
    %c0_290 = arith.constant 0 : index
    %549 = vector.load %arg8[%c0_289, %c0_290] : memref<120x1xf32, #tpu.memory_space<vmem>>, vector<120x1xf32>
    %550 = vector.broadcast %549 : vector<120x1xf32> to vector<120x128xf32>
    %551 = arith.addf %548, %550 : vector<120x128xf32>
    %cst_291 = arith.constant 0.000000e+00 : f32
    %552 = vector.broadcast %cst_291 : f32 to vector<120x128xf32>
    %553 = arith.maximumf %551, %552 : vector<120x128xf32>
    %c0_292 = arith.constant 0 : index
    %c0_293 = arith.constant 0 : index
    %554 = vector.load %arg9[%c0_292, %c0_293] : memref<88x120xf32, #tpu.memory_space<vmem>>, vector<88x120xf32>
    %cst_294 = arith.constant dense<0.000000e+00> : vector<88x128xf32>
    %555 = tpu.matmul %554, %553, %cst_294 {dimension_numbers = #tpu.dot_dimension_numbers<[1], [0], [0], [1], [0, 0, 1, 1], [], []>} : vector<88x120xf32>, vector<120x128xf32>, vector<88x128xf32> -> vector<88x128xf32>
    %c0_295 = arith.constant 0 : index
    %c0_296 = arith.constant 0 : index
    %556 = vector.load %arg10[%c0_295, %c0_296] : memref<88x1xf32, #tpu.memory_space<vmem>>, vector<88x1xf32>
    %557 = vector.broadcast %556 : vector<88x1xf32> to vector<88x128xf32>
    %558 = arith.addf %555, %557 : vector<88x128xf32>
    %cst_297 = arith.constant 0.000000e+00 : f32
    %559 = vector.broadcast %cst_297 : f32 to vector<88x128xf32>
    %560 = arith.maximumf %558, %559 : vector<88x128xf32>
    %c0_298 = arith.constant 0 : index
    %c0_299 = arith.constant 0 : index
    %561 = vector.load %arg11[%c0_298, %c0_299] : memref<16x88xf32, #tpu.memory_space<vmem>>, vector<16x88xf32>
    %cst_300 = arith.constant dense<0.000000e+00> : vector<16x128xf32>
    %562 = tpu.matmul %561, %560, %cst_300 {dimension_numbers = #tpu.dot_dimension_numbers<[1], [0], [0], [1], [0, 0, 1, 1], [], []>} : vector<16x88xf32>, vector<88x128xf32>, vector<16x128xf32> -> vector<16x128xf32>
    %c0_301 = arith.constant 0 : index
    %c0_302 = arith.constant 0 : index
    %563 = vector.load %arg12[%c0_301, %c0_302] : memref<16x1xf32, #tpu.memory_space<vmem>>, vector<16x1xf32>
    %564 = vector.broadcast %563 : vector<16x1xf32> to vector<16x128xf32>
    %565 = arith.addf %562, %564 : vector<16x128xf32>
    %c0_303 = arith.constant 0 : index
    %c0_304 = arith.constant 0 : index
    %c0_305 = arith.constant 0 : index
    %566 = vector.load %arg13[%c0_303, %c0_304, %c0_305] : memref<1x16x128xf32, #tpu.memory_space<vmem>>, vector<1x16x128xf32>
    %567 = vector.shape_cast %566 : vector<1x16x128xf32> to vector<16x128xf32>
    %568 = vector.shape_cast %565 : vector<16x128xf32> to vector<1x16x128xf32>
    tpu.vector_store %arg13[%c0_303, %c0_304, %c0_305], %568 {strides = array<i32>} : memref<1x16x128xf32, #tpu.memory_space<vmem>>, vector<1x16x128xf32>,
    return
  }
  func.func @transform_0(%arg0: i32) -> (i32, i32, i32) {
    %c0_i32 = arith.constant 0 : i32
    %c0_i32_0 = arith.constant 0 : i32
    %c0_i32_1 = arith.constant 0 : i32
    return %arg0, %c0_i32, %c0_i32_0 : i32, i32, i32
  }
  func.func @transform_1(%arg0: i32) -> (i32, i32, i32) {
    %c0_i32 = arith.constant 0 : i32
    %c0_i32_0 = arith.constant 0 : i32
    %c0_i32_1 = arith.constant 0 : i32
    %c0_i32_2 = arith.constant 0 : i32
    return %c0_i32, %c0_i32_0, %c0_i32_1 : i32, i32, i32
  }
  func.func @transform_2(%arg0: i32) -> (i32, i32) {
    %c0_i32 = arith.constant 0 : i32
    %c0_i32_0 = arith.constant 0 : i32
    %c0_i32_1 = arith.constant 0 : i32
    return %c0_i32, %c0_i32_0 : i32, i32
  }
  func.func @transform_3(%arg0: i32) -> (i32, i32, i32) {
    %c0_i32 = arith.constant 0 : i32
    %c0_i32_0 = arith.constant 0 : i32
    %c0_i32_1 = arith.constant 0 : i32
    %c0_i32_2 = arith.constant 0 : i32
    return %c0_i32, %c0_i32_0, %c0_i32_1 : i32, i32, i32
  }
  func.func @transform_4(%arg0: i32) -> (i32, i32) {
    %c0_i32 = arith.constant 0 : i32
    %c0_i32_0 = arith.constant 0 : i32
    %c0_i32_1 = arith.constant 0 : i32
    return %c0_i32, %c0_i32_0 : i32, i32
  }
  func.func @transform_5(%arg0: i32) -> (i32, i32) {
    %c0_i32 = arith.constant 0 : i32
    %c0_i32_0 = arith.constant 0 : i32
    %c0_i32_1 = arith.constant 0 : i32
    return %c0_i32, %c0_i32_0 : i32, i32
  }
  func.func @transform_6(%arg0: i32) -> (i32, i32, i32) {
    %c0_i32 = arith.constant 0 : i32
    %c0_i32_0 = arith.constant 0 : i32
    %c0_i32_1 = arith.constant 0 : i32
    %c0_i32_2 = arith.constant 0 : i32
    return %c0_i32, %c0_i32_0, %c0_i32_1 : i32, i32, i32
  }
  func.func @transform_7(%arg0: i32) -> (i32, i32) {
    %c0_i32 = arith.constant 0 : i32
    %c0_i32_0 = arith.constant 0 : i32
    %c0_i32_1 = arith.constant 0 : i32
    return %c0_i32, %c0_i32_0 : i32, i32
  }
  func.func @transform_8(%arg0: i32) -> (i32, i32) {
    %c0_i32 = arith.constant 0 : i32
    %c0_i32_0 = arith.constant 0 : i32
    %c0_i32_1 = arith.constant 0 : i32
    return %c0_i32, %c0_i32_0 : i32, i32
  }
  func.func @transform_9(%arg0: i32) -> (i32, i32) {
    %c0_i32 = arith.constant 0 : i32
    %c0_i32_0 = arith.constant 0 : i32
    %c0_i32_1 = arith.constant 0 : i32
    return %c0_i32, %c0_i32_0 : i32, i32
  }
  func.func @transform_10(%arg0: i32) -> (i32, i32) {
    %c0_i32 = arith.constant 0 : i32
    %c0_i32_0 = arith.constant 0 : i32
    %c0_i32_1 = arith.constant 0 : i32
    return %c0_i32, %c0_i32_0 : i32, i32
  }
  func.func @transform_11(%arg0: i32) -> (i32, i32) {
    %c0_i32 = arith.constant 0 : i32
    %c0_i32_0 = arith.constant 0 : i32
    %c0_i32_1 = arith.constant 0 : i32
    return %c0_i32, %c0_i32_0 : i32, i32
  }
  func.func @transform_12(%arg0: i32) -> (i32, i32, i32) {
    %c0_i32 = arith.constant 0 : i32
    %c0_i32_0 = arith.constant 0 : i32
    %c0_i32_1 = arith.constant 0 : i32
    return %arg0, %c0_i32, %c0_i32_0 : i32, i32, i32
  }
}

</mosaic_0001>

<bundles_post_ra>
// kernel: tutorial_net_forward.1
= control target key start
LH: loop header
LB: loop body
LE: loop exit
PB: predicated region body
PF: predicated region fallthrough
CT: control target
= control target key end

     0   :  { %s28162_s21 = smov 0   ;;  %s34418_s0 = inlined_call_operand.vmem [shape: f32[2,8,1024], index: 0, kind: input, shape index: {}]   ;;  %s34419_s1 = inlined_call_operand.vmem [shape: f32[25,8,8], index: 1, kind: input, shape index: {}]   ;;  %s34420_s2 = inlined_call_operand.vmem [shape: f32[8,1], index: 2, kind: input, shape index: {}]   ;;  %s34421_s3 = inlined_call_operand.vmem [shape: f32[25,16,8], index: 3, kind: input, shape index: {}]   ;;  %s34422_s4 = inlined_call_operand.vmem [shape: f32[16,1], index: 4, kind: input, shape index: {}]   ;;  %s34423_s5 = inlined_call_operand.vmem [shape: f32[1024,128], index: 5, kind: input, shape index: {}]   ;;  %s34424_s6 = inlined_call_operand.vmem [shape: f32[25,120,16], index: 6, kind: input, shape index: {}]   ;;  %s34425_s7 = inlined_call_operand.vmem [shape: f32[120,1], index: 7, kind: input, shape index: {}]   ;;  %s34426_s8 = inlined_call_operand.vmem [shape: f32[88,120], index: 8, kind: input, shape index: {}]   ;;  %s34427_s9 = inlined_call_operand.vmem [shape: f32[88,1], index: 9, kind: input, shape index: {}]   ;;  %s34428_s10 = inlined_call_operand.vmem [shape: f32[16,88], index: 10, kind: input, shape index: {}]   ;;  %s34429_s11 = inlined_call_operand.vmem [shape: f32[16,1], index: 11, kind: input, shape index: {}]   ;;  %s34430_s12 = inlined_call_operand.vmem [shape: f32[2,16,128], index: 12, kind: output, shape index: {}]  }
   0x1 LB: > { %s23904_s22 = sadd.s32 4294967295, %s28050_s21   ;;  %p23908_p0 = scmp.ge.s32.totalorder %s28050_s21, 1  ;;  %s28050_s21 = sphi %s28162_s21, %s22_s21  }
   0x2   : > { %p362_p1 = scmp.lt.s32.totalorder %s28050_s21, 3 }
   0x4   : > { %p363_p2 = pnand %p23908_p0, %p362_p1 }
   0x6   : > { %366 = sbr.rel (%p363_p2) target bundleno = 3769 (0xeb9), region = 68 }
   0xd   : > { %p404_p3 = scmp.lt.s32.totalorder %s23904_s22, 1  ;;  %v28052_v0 = vmov 0.0   ;;  %s28053_s27 = smov 127   ;;  %vm449_vm0 = vcmask 1039360   ;;  %v23913_v14 = vld [vmem:[%s34419_s1 + $0x8] sm:$0xff]  ;;  %vm467_vm1 = vcmask 64512  }
   0xe   : > { %535 = vmatprep.mubr.f32.mxu1 %v28052_v0  ;;  %677 = vmatprep.mubr.f32.mxu0 %v28052_v0  ;;  %s28054_s28 = smov 126   ;;  %s28055_s29 = smov 125   ;;  %v422_v28 = vld [vmem:[%s34419_s1] sm:$0xff]  ;;  %vm1060_vm2 = vcmask 1031168   ;;  %v23922_v41 = vld [vmem:[%s34419_s1 + $0x10] sm:$0xff]  ;;  %vm1391_vm3 = vcmask 1022976  }
   0xf   : > { %s34511_s22 = smov (!%p404_p3, %s23904_s22), 1  ;;  %s28056_s30 = smov 124   ;;  %v23927_v50 = vld [vmem:[%s34419_s1 + $0x18] sm:$0xff]  ;;  %vm1722_vm4 = vcmask 1014784   ;;  %vm2053_vm5 = vcmask 785408   ;;  %vm2384_vm6 = vcmask 777216  }
  0x10   : > { %s25035_s23 = sshll.u32 %s34511_s22, 6  ;;  %s28057_s13 = smov 96   ;;  %vm2715_vm7 = vcmask 769024   ;;  %vm3046_vm8 = vcmask 760832   ;;  %vm3377_vm9 = vcmask 752640   ;;  %vm3708_vm10 = vcmask 523264  }
  0x11   : > { %s28178_s26 = scalar_lea.vmem %s34418_s0, %s25035_s23  ;;  %s28058_s14 = smov 95   ;;  %vm4039_vm11 = vcmask 515072   ;;  %vm4370_vm12 = vcmask 506880   ;;  %vm4701_vm13 = vcmask 498688   ;;  %vm5032_vm14 = vcmask 490496  }
  0x12   : > { %v28181_v1 = vld [vmem:[%s28178_s26 + $0x8] sm:$0xff]  ;;  %v28184_v2 = vld [vmem:[%s28178_s26] sm:$0xff]  ;;  %v28191_v3 = vld [vmem:[%s28178_s26 + $0x10] sm:$0xff]  ;;  %s28059_s15 = smov 94   ;;  %s28060_s16 = smov 93   ;;  %vm5363_vm15 = vcmask 261120  }
  0x13   : > { %435 = vrot.lane.b32.xlu0 %v28181_v1, %s28053_s27  ;;  %433 = vrot.lane.b32.xlu1 %v28184_v2, %s28053_s27  ;;  %v28194_v4 = vld [vmem:[%s28178_s26 + $0x18] sm:$0xff]  ;;  %v28201_v5 = vld [vmem:[%s28178_s26 + $0x20] sm:$0xff]  ;;  %s28061_s19 = smov 92   ;;  %s28063_s17 = smov 63  }
  0x14   : > { %v28204_v6 = vld [vmem:[%s28178_s26 + $0x28] sm:$0xff]  ;;  %v28211_v7 = vld [vmem:[%s28178_s26 + $0x30] sm:$0xff]  ;;  %v28214_v8 = vld [vmem:[%s28178_s26 + $0x38] sm:$0xff]  ;;  %s28064_s20 = smov 62   ;;  %s28065_s25 = smov 61  }
  0x15   : > { %s28067_s23 = smov 32   ;;  %s28071_s18 = smov 28  }
  0x16   : > { %s28082_s24 = smov 119  }
  0x17   : > { %437 = vrot.lane.b32.xlu0 %v28191_v3, %s28053_s27  ;;  %439 = vrot.lane.b32.xlu1 %v28194_v4, %s28053_s27 }
  0x1b   : > { %441 = vrot.lane.b32.xlu0 %v28201_v5, %s28053_s27  ;;  %443 = vrot.lane.b32.xlu1 %v28204_v6, %s28053_s27 }
  0x1f   : > { %445 = vrot.lane.b32.xlu0 %v28211_v7, %s28053_s27  ;;  %447 = vrot.lane.b32.xlu1 %v28214_v8, %s28053_s27 }
  0x23   : > { %1046 = vrot.lane.b32.xlu0 %v28181_v1, %s28054_s28  ;;  %1048 = vrot.lane.b32.xlu1 %v28191_v3, %s28054_s28 }
  0x27   : > { %1044 = vrot.lane.b32.xlu0 %v28184_v2, %s28054_s28  ;;  %1050 = vrot.lane.b32.xlu1 %v28194_v4, %s28054_s28 }
  0x2b   : > { %1052 = vrot.lane.b32.xlu0 %v28201_v5, %s28054_s28  ;;  %1054 = vrot.lane.b32.xlu1 %v28204_v6, %s28054_s28 }
  0x2f   : > { %1056 = vrot.lane.b32.xlu0 %v28211_v7, %s28054_s28  ;;  %1058 = vrot.lane.b32.xlu1 %v28214_v8, %s28054_s28 }
  0x33   : > { %1377 = vrot.lane.b32.xlu0 %v28181_v1, %s28055_s29  ;;  %1379 = vrot.lane.b32.xlu1 %v28191_v3, %s28055_s29 }
  0x37   : > { %1375 = vrot.lane.b32.xlu0 %v28184_v2, %s28055_s29  ;;  %1381 = vrot.lane.b32.xlu1 %v28194_v4, %s28055_s29 }
  0x3b   : > { %1383 = vrot.lane.b32.xlu0 %v28201_v5, %s28055_s29  ;;  %1385 = vrot.lane.b32.xlu1 %v28204_v6, %s28055_s29 }
  0x3f   : > { %1387 = vrot.lane.b32.xlu0 %v28211_v7, %s28055_s29  ;;  %1389 = vrot.lane.b32.xlu1 %v28214_v8, %s28055_s29 }
  0x43   : > { %1708 = vrot.lane.b32.xlu0 %v28181_v1, %s28056_s30  ;;  %1710 = vrot.lane.b32.xlu1 %v28191_v3, %s28056_s30 }
  0x47   : > { %1706 = vrot.lane.b32.xlu0 %v28184_v2, %s28056_s30  ;;  %1712 = vrot.lane.b32.xlu1 %v28194_v4, %s28056_s30 }
  0x4b   : > { %1714 = vrot.lane.b32.xlu0 %v28201_v5, %s28056_s30  ;;  %1716 = vrot.lane.b32.xlu1 %v28204_v6, %s28056_s30 }
  0x4f   : > { %1718 = vrot.lane.b32.xlu0 %v28211_v7, %s28056_s30  ;;  %1720 = vrot.lane.b32.xlu1 %v28214_v8, %s28056_s30 }
  0x53   : > { %2039 = vrot.lane.b32.xlu0 %v28181_v1, %s28057_s13  ;;  %2041 = vrot.lane.b32.xlu1 %v28191_v3, %s28057_s13 }
  0x57   : > { %2037 = vrot.lane.b32.xlu0 %v28184_v2, %s28057_s13  ;;  %2043 = vrot.lane.b32.xlu1 %v28194_v4, %s28057_s13 }
  0x5b   : > { %2045 = vrot.lane.b32.xlu0 %v28201_v5, %s28057_s13  ;;  %2047 = vrot.lane.b32.xlu1 %v28204_v6, %s28057_s13 }
  0x5f   : > { %2049 = vrot.lane.b32.xlu0 %v28211_v7, %s28057_s13  ;;  %2051 = vrot.lane.b32.xlu1 %v28214_v8, %s28057_s13 }
  0x63   : > { %2370 = vrot.lane.b32.xlu0 %v28181_v1, %s28058_s14  ;;  %2372 = vrot.lane.b32.xlu1 %v28191_v3, %s28058_s14 }
  0x67   : > { %2368 = vrot.lane.b32.xlu0 %v28184_v2, %s28058_s14  ;;  %2374 = vrot.lane.b32.xlu1 %v28194_v4, %s28058_s14 }
  0x6b   : > { %2376 = vrot.lane.b32.xlu0 %v28201_v5, %s28058_s14  ;;  %2378 = vrot.lane.b32.xlu1 %v28204_v6, %s28058_s14 }
  0x6f   : > { %2380 = vrot.lane.b32.xlu0 %v28211_v7, %s28058_s14  ;;  %2382 = vrot.lane.b32.xlu1 %v28214_v8, %s28058_s14  ;;  %s28062_s14 = smov 64  }
  0x73   : > { %2701 = vrot.lane.b32.xlu0 %v28181_v1, %s28059_s15  ;;  %2703 = vrot.lane.b32.xlu1 %v28191_v3, %s28059_s15 }
  0x77   : > { %2699 = vrot.lane.b32.xlu0 %v28184_v2, %s28059_s15  ;;  %2705 = vrot.lane.b32.xlu1 %v28194_v4, %s28059_s15 }
  0x7b   : > { %2707 = vrot.lane.b32.xlu0 %v28201_v5, %s28059_s15  ;;  %2709 = vrot.lane.b32.xlu1 %v28204_v6, %s28059_s15 }
  0x7f   : > { %2711 = vrot.lane.b32.xlu0 %v28211_v7, %s28059_s15  ;;  %2713 = vrot.lane.b32.xlu1 %v28214_v8, %s28059_s15  ;;  %s28068_s15 = smov 31  }
  0x83   : > { %3032 = vrot.lane.b32.xlu0 %v28181_v1, %s28060_s16  ;;  %3034 = vrot.lane.b32.xlu1 %v28191_v3, %s28060_s16 }
  0x85   : > { %v436_v9 = vpop.permute.xlu0 %435  ;;  %v434_v10 = vpop.permute.xlu1 %433 }
  0x86   : > { %v28313_v15 = vsel %vm449_vm0, %v434_v10, %v436_v9 }
  0x87   : > { %3030 = vrot.lane.b32.xlu0 %v28184_v2, %s28060_s16  ;;  %3036 = vrot.lane.b32.xlu1 %v28194_v4, %s28060_s16 }
  0x89   : > { %v438_v11 = vpop.permute.xlu0 %437  ;;  %v440_v12 = vpop.permute.xlu1 %439 }
  0x8a   : > { %v28305_v13 = vsel %vm449_vm0, %v436_v9, %v438_v11  ;;  %v28325_v19 = vsel %vm449_vm0, %v438_v11, %v440_v12  ;;  %v23932_v11 = vld [vmem:[%s34419_s1 + $0x20] sm:$0xff] }
  0x8b   : > { %471 = vmatprep.subr.mxu1 %v28305_v13  ;;  %3038 = vrot.lane.b32.xlu0 %v28201_v5, %s28060_s16 }
  0x8c   : > { %3040 = vrot.lane.b32.xlu1 %v28204_v6, %s28060_s16  ;;  %472 = vmatpush1.msra.mxu1 %v28313_v15 }
  0x8d   : > { %v442_v16 = vpop.permute.xlu0 %441  ;;  %v444_v17 = vpop.permute.xlu1 %443  ;;  %23914 = vmatmul.mubr.msk.f32.vlgmr.msra.gmra.mrb[0].mxu1 %vm467_vm1, %v23913_v14 }
  0x8e   : > { %v28319_v18 = vsel %vm449_vm0, %v440_v12, %v442_v16  ;;  %606 = vmatprep.mubr.f32.mxu1 %v28052_v0  ;;  %v28347_v25 = vsel %vm449_vm0, %v442_v16, %v444_v17 }
  0x8f   : > { %3042 = vrot.lane.b32.xlu0 %v28211_v7, %s28060_s16  ;;  %542 = vmatprep.subr.mxu1 %v28319_v18 }
  0x90   : > { %3044 = vrot.lane.b32.xlu1 %v28214_v8, %s28060_s16  ;;  %543 = vmatpush1.msra.mxu1 %v28325_v19  ;;  %s34508_s16 = smov 122  }
  0x91   : > { %v446_v20 = vpop.permute.xlu0 %445  ;;  %v448_v21 = vpop.permute.xlu1 %447  ;;  %23915 = vmatmul.mubr.msk.f32.vlgmr.msra.gmra.mrb[2].mxu1 %vm467_vm1, %v23913_v14 }
  0x92   : > { %v28331_v22 = vsel %vm449_vm0, %v444_v17, %v446_v20  ;;  %v28334_v23 = vsel %vm449_vm0, %v448_v21, %v434_v10  ;;  %v28337_v24 = vsel %vm449_vm0, %v446_v20, %v448_v21  ;;  %748 = vmatprep.mubr.f32.mxu1 %v28052_v0 }
  0x93   : > { %3363 = vrot.lane.b32.xlu0 %v28181_v1, %s28061_s19  ;;  %613 = vmatprep.subr.mxu0 %v28331_v22 }
  0x94   : > { %3365 = vrot.lane.b32.xlu1 %v28191_v3, %s28061_s19  ;;  %684 = vmatprep.subr.mxu1 %v28334_v23 }
  0x95   : > { %614 = vmatpush1.msra.mxu0 %v28347_v25  ;;  %685 = vmatpush1.msra.mxu1 %v28337_v24  ;;  %v1047_v26 = vpop.permute.xlu0 %1046  ;;  %v1049_v27 = vpop.permute.xlu1 %1048 }
  0x96   : > { %23916 = vmatmul.mubr.msk.f32.vlgmr.msra.gmra.mrb[0].mxu0 %vm467_vm1, %v23913_v14  ;;  %758 = vmatprep.subr.mxu0 %v28181_v1  ;;  %v28368_v31 = vsel %vm1060_vm2, %v1047_v26, %v1049_v27 }
  0x97   : > { %3361 = vrot.lane.b32.xlu0 %v28184_v2, %s28061_s19  ;;  %759 = vmatpush1.msra.mxu0 %v28184_v2 }
  0x98   : > { %3367 = vrot.lane.b32.xlu1 %v28194_v4, %s28061_s19  ;;  %23917 = vmatmul.mubr.msk.f32.vlgmr.msra.gmra.mrb[4].mxu1 %vm467_vm1, %v23913_v14 }
  0x99   : > { %822 = vmatprep.mubr.f32.mxu0 %v28052_v0  ;;  %900 = vmatprep.subr.mxu0 %v28204_v6  ;;  %v1045_v29 = vpop.permute.xlu0 %1044  ;;  %v1051_v30 = vpop.permute.xlu1 %1050 }
  0x9a   : > { %23918 = vmatmul.mubr.msk.f32.vlgmr.msra.gmra.mrb[2].mxu0 %vm467_vm1, %v422_v28  ;;  %829 = vmatprep.subr.mxu1 %v28194_v4  ;;  %v28382_v34 = vsel %vm1060_vm2, %v1045_v29, %v1047_v26  ;;  %v28397_v38 = vsel %vm1060_vm2, %v1049_v27, %v1051_v30 }
  0x9b   : > { %901 = vmatpush1.msra.mxu0 %v28201_v5  ;;  %3369 = vrot.lane.b32.xlu0 %v28201_v5, %s28061_s19 }
  0x9c   : > { %1081 = vmatprep.subr.mxu0 %v28368_v31  ;;  %3371 = vrot.lane.b32.xlu1 %v28204_v6, %s28061_s19 }
  0x9d   : > { %830 = vmatpush1.msra.mxu1 %v28191_v3  ;;  %893 = vmatprep.mubr.f32.mxu1 %v28052_v0  ;;  %v1053_v32 = vpop.permute.xlu0 %1052  ;;  %v1055_v33 = vpop.permute.xlu1 %1054 }
  0x9e   : > { %23919 = vmatmul.mubr.msk.f32.vlgmr.msra.gmra.mrb[2].mxu1 %vm467_vm1, %v422_v28  ;;  %964 = vmatprep.mubr.f32.mxu0 %v28052_v0  ;;  %v28385_v35 = vsel %vm1060_vm2, %v1051_v30, %v1053_v32  ;;  %v28423_v45 = vsel %vm1060_vm2, %v1053_v32, %v1055_v33 }
  0x9f   : > { %23920 = vmatmul.mubr.msk.f32.vlgmr.msra.gmra.mrb[0].mxu0 %vm467_vm1, %v422_v28  ;;  %971 = vmatprep.subr.mxu1 %v28214_v8 }
  0xa0   : > { %1082 = vmatpush1.msra.mxu0 %v28382_v34  ;;  %972 = vmatpush1.msra.mxu1 %v28211_v7 }
  0xa1   : > { %3373 = vrot.lane.b32.xlu0 %v28211_v7, %s28061_s19  ;;  %3375 = vrot.lane.b32.xlu1 %v28214_v8, %s28061_s19  ;;  %v1057_v36 = vpop.permute.xlu0 %1056  ;;  %v1059_v37 = vpop.permute.xlu1 %1058  ;;  %s28069_s19 = smov 30  }
  0xa2   : > { %1035 = vmatprep.mubr.f32.mxu1 %v28052_v0  ;;  %1152 = vmatprep.subr.mxu1 %v28385_v35  ;;  %v28401_v39 = vsel %vm1060_vm2, %v1055_v33, %v1057_v36  ;;  %v28404_v40 = vsel %vm1060_vm2, %v1059_v37, %v1045_v29  ;;  %v28416_v42 = vsel %vm1060_vm2, %v1057_v36, %v1059_v37 }
  0xa3   : > { %23921 = vmatmul.mubr.msk.f32.vlgmr.msra.gmra.mrb[4].mxu1 %vm467_vm1, %v422_v28  ;;  %1145 = vmatprep.mubr.f32.mxu0 %v28052_v0 }
  0xa4   : > { %1153 = vmatpush1.msra.mxu1 %v28397_v38  ;;  %1216 = vmatprep.mubr.f32.mxu1 %v28052_v0 }
  0xa5   : > { %3694 = vrot.lane.b32.xlu0 %v28181_v1, %s28062_s14  ;;  %3696 = vrot.lane.b32.xlu1 %v28191_v3, %s28062_s14  ;;  %v1378_v43 = vpop.permute.xlu0 %1377  ;;  %v1380_v44 = vpop.permute.xlu1 %1379 }
  0xa6   : > { %1223 = vmatprep.subr.mxu0 %v28401_v39  ;;  %1294 = vmatprep.subr.mxu1 %v28404_v40  ;;  %v28426_v46 = vsel %vm1391_vm3, %v1378_v43, %v1380_v44 }
  0xa7   : > { %23923 = vmatmul.mubr.msk.f32.vlgmr.msra.gmra.mrb[2].mxu0 %vm467_vm1, %v23922_v41  ;;  %23924 = vmatmul.mubr.msk.f32.vlgmr.msra.gmra.mrb[2].mxu1 %vm467_vm1, %v23922_v41 }
  0xa8   : > { %1224 = vmatpush1.msra.mxu0 %v28423_v45  ;;  %1295 = vmatpush1.msra.mxu1 %v28416_v42 }
  0xa9   : > { %3692 = vrot.lane.b32.xlu0 %v28184_v2, %s28062_s14  ;;  %3698 = vrot.lane.b32.xlu1 %v28194_v4, %s28062_s14  ;;  %v1376_v47 = vpop.permute.xlu0 %1375  ;;  %v1382_v48 = vpop.permute.xlu1 %1381 }
  0xaa   : > { %1412 = vmatprep.subr.mxu0 %v28426_v46  ;;  %1287 = vmatprep.mubr.f32.mxu0 %v28052_v0  ;;  %v28437_v49 = vsel %vm1391_vm3, %v1376_v47, %v1378_v43  ;;  %v28457_v54 = vsel %vm1391_vm3, %v1380_v44, %v1382_v48  ;;  %v23937_v43 = vld [vmem:[%s34419_s1 + $0x28] sm:$0xff] }
  0xab   : > { %23925 = vmatmul.mubr.msk.f32.vlgmr.msra.gmra.mrb[0].mxu0 %vm467_vm1, %v23922_v41  ;;  %1358 = vmatprep.mubr.f32.mxu1 %v28052_v0 }
  0xac   : > { %1413 = vmatpush1.msra.mxu0 %v28437_v49  ;;  %23926 = vmatmul.mubr.msk.f32.vlgmr.msra.gmra.mrb[4].mxu1 %vm467_vm1, %v23922_v41 }
  0xad   : > { %3700 = vrot.lane.b32.xlu0 %v28201_v5, %s28062_s14  ;;  %3702 = vrot.lane.b32.xlu1 %v28204_v6, %s28062_s14  ;;  %v1384_v51 = vpop.permute.xlu0 %1383  ;;  %v1386_v52 = vpop.permute.xlu1 %1385 }
  0xae   : > { %v28451_v53 = vsel %vm1391_vm3, %v1382_v48, %v1384_v51  ;;  %1476 = vmatprep.mubr.f32.mxu0 %v28052_v0  ;;  %1547 = vmatprep.mubr.f32.mxu1 %v28052_v0  ;;  %v28479_v60 = vsel %vm1391_vm3, %v1384_v51, %v1386_v52 }
  0xaf   : > { %1483 = vmatprep.subr.mxu1 %v28451_v53  ;;  %23928 = vmatmul.mubr.msk.f32.vlgmr.msra.gmra.mrb[2].mxu0 %vm467_vm1, %v23927_v50 }
  0xb0   : > { %1484 = vmatpush1.msra.mxu1 %v28457_v54  ;;  %1618 = vmatprep.mubr.f32.mxu0 %v28052_v0 }
  0xb1   : > { %3704 = vrot.lane.b32.xlu0 %v28211_v7, %s28062_s14  ;;  %3706 = vrot.lane.b32.xlu1 %v28214_v8, %s28062_s14  ;;  %v1388_v55 = vpop.permute.xlu0 %1387  ;;  %v1390_v56 = vpop.permute.xlu1 %1389 }
  0xb2   : > { %v28467_v57 = vsel %vm1391_vm3, %v1386_v52, %v1388_v55  ;;  %v28470_v58 = vsel %vm1391_vm3, %v1390_v56, %v1376_v47  ;;  %23929 = vmatmul.mubr.msk.f32.vlgmr.msra.gmra.mrb[2].mxu1 %vm467_vm1, %v23927_v50  ;;  %v28474_v59 = vsel %vm1391_vm3, %v1388_v55, %v1390_v56  ;;  %vm5694_vm3 = vcmask 252928  }
  0xb3   : > { %1554 = vmatprep.subr.mxu0 %v28467_v57  ;;  %1625 = vmatprep.subr.mxu1 %v28470_v58 }
  0xb4   : > { %1555 = vmatpush1.msra.mxu0 %v28479_v60  ;;  %1626 = vmatpush1.msra.mxu1 %v28474_v59 }
  0xb5   : > { %4025 = vrot.lane.b32.xlu0 %v28181_v1, %s28063_s17  ;;  %4027 = vrot.lane.b32.xlu1 %v28191_v3, %s28063_s17  ;;  %v1709_v61 = vpop.permute.xlu0 %1708  ;;  %v1711_v62 = vpop.permute.xlu1 %1710 }
  0xb6   : > { %v28486_v63 = vsel %vm1722_vm4, %v1709_v61, %v1711_v62  ;;  %23930 = vmatmul.mubr.msk.f32.vlgmr.msra.gmra.mrb[0].mxu0 %vm467_vm1, %v23927_v50  ;;  %1689 = vmatprep.mubr.f32.mxu1 %v28052_v0 }
  0xb7   : > { %1743 = vmatprep.subr.mxu0 %v28486_v63  ;;  %23931 = vmatmul.mubr.msk.f32.vlgmr.msra.gmra.mrb[4].mxu1 %vm467_vm1, %v23927_v50 }
  0xb8   : > { %1807 = vmatprep.mubr.f32.mxu0 %v28052_v0  ;;  %1878 = vmatprep.mubr.f32.mxu1 %v28052_v0 }
  0xb9   : > { %4023 = vrot.lane.b32.xlu0 %v28184_v2, %s28063_s17  ;;  %4029 = vrot.lane.b32.xlu1 %v28194_v4, %s28063_s17  ;;  %v1707_v9 = vpop.permute.xlu0 %1706  ;;  %v1713_v10 = vpop.permute.xlu1 %1712 }
  0xba   : > { %v28500_v12 = vsel %vm1722_vm4, %v1707_v9, %v1709_v61  ;;  %v28512_v20 = vsel %vm1722_vm4, %v1711_v62, %v1713_v10 }
  0xbb   : > { %1744 = vmatpush1.msra.mxu0 %v28500_v12 }
  0xbc   : > { %23933 = vmatmul.mubr.msk.f32.vlgmr.msra.gmra.mrb[2].mxu0 %vm467_vm1, %v23932_v11 }
  0xbd   : > { %4031 = vrot.lane.b32.xlu0 %v28201_v5, %s28063_s17  ;;  %4033 = vrot.lane.b32.xlu1 %v28204_v6, %s28063_s17  ;;  %v1715_v14 = vpop.permute.xlu0 %1714  ;;  %v1717_v16 = vpop.permute.xlu1 %1716 }
  0xbe   : > { %v28507_v17 = vsel %vm1722_vm4, %v1713_v10, %v1715_v14  ;;  %1949 = vmatprep.mubr.f32.mxu0 %v28052_v0  ;;  %v28530_v30 = vsel %vm1722_vm4, %v1715_v14, %v1717_v16 }
  0xbf   : > { %1814 = vmatprep.subr.mxu1 %v28507_v17 }
  0xc0   : > { %1815 = vmatpush1.msra.mxu1 %v28512_v20 }
  0xc1   : > { %4035 = vrot.lane.b32.xlu0 %v28211_v7, %s28063_s17  ;;  %4037 = vrot.lane.b32.xlu1 %v28214_v8, %s28063_s17  ;;  %v1719_v21 = vpop.permute.xlu0 %1718  ;;  %v1721_v26 = vpop.permute.xlu1 %1720  ;;  %s28066_s17 = smov 60  }
  0xc2   : > { %v28518_v27 = vsel %vm1722_vm4, %v1717_v16, %v1719_v21  ;;  %v28521_v28 = vsel %vm1722_vm4, %v1721_v26, %v1707_v9  ;;  %23934 = vmatmul.mubr.msk.f32.vlgmr.msra.gmra.mrb[2].mxu1 %vm467_vm1, %v23932_v11  ;;  %v28525_v29 = vsel %vm1722_vm4, %v1719_v21, %v1721_v26  ;;  %v23942_v26 = vld [vmem:[%s34419_s1 + $0x30] sm:$0xff] }
  0xc3   : > { %1885 = vmatprep.subr.mxu0 %v28518_v27  ;;  %1956 = vmatprep.subr.mxu1 %v28521_v28 }
  0xc4   : > { %1886 = vmatpush1.msra.mxu0 %v28530_v30  ;;  %1957 = vmatpush1.msra.mxu1 %v28525_v29 }
  0xc5   : > { %4356 = vrot.lane.b32.xlu0 %v28181_v1, %s28064_s20  ;;  %4358 = vrot.lane.b32.xlu1 %v28191_v3, %s28064_s20  ;;  %v2040_v32 = vpop.permute.xlu0 %2039  ;;  %v2042_v33 = vpop.permute.xlu1 %2041 }
  0xc6   : > { %v2055_v36 = vsel %vm2053_vm5, %v2040_v32, %v2042_v33  ;;  %23935 = vmatmul.mubr.msk.f32.vlgmr.msra.gmra.mrb[0].mxu0 %vm467_vm1, %v23932_v11  ;;  %2020 = vmatprep.mubr.f32.mxu1 %v28052_v0 }
  0xc7   : > { %2074 = vmatprep.subr.mxu0 %v2055_v36  ;;  %23936 = vmatmul.mubr.msk.f32.vlgmr.msra.gmra.mrb[4].mxu1 %vm467_vm1, %v23932_v11 }
  0xc8   : > { %2138 = vmatprep.mubr.f32.mxu0 %v28052_v0  ;;  %2209 = vmatprep.mubr.f32.mxu1 %v28052_v0 }
  0xc9   : > { %4354 = vrot.lane.b32.xlu0 %v28184_v2, %s28064_s20  ;;  %4360 = vrot.lane.b32.xlu1 %v28194_v4, %s28064_s20  ;;  %v2038_v37 = vpop.permute.xlu0 %2037  ;;  %v2044_v41 = vpop.permute.xlu1 %2043 }
  0xca   : > { %v2054_v44 = vsel %vm2053_vm5, %v2038_v37, %v2040_v32  ;;  %v2056_v51 = vsel %vm2053_vm5, %v2042_v33, %v2044_v41 }
  0xcb   : > { %2075 = vmatpush1.msra.mxu0 %v2054_v44 }
  0xcc   : > { %23938 = vmatmul.mubr.msk.f32.vlgmr.msra.gmra.mrb[2].mxu0 %vm467_vm1, %v23937_v43 }
  0xcd   : > { %4362 = vrot.lane.b32.xlu0 %v28201_v5, %s28064_s20  ;;  %4364 = vrot.lane.b32.xlu1 %v28204_v6, %s28064_s20  ;;  %v2046_v47 = vpop.permute.xlu0 %2045  ;;  %v2048_v48 = vpop.permute.xlu1 %2047 }
  0xce   : > { %v2057_v50 = vsel %vm2053_vm5, %v2044_v41, %v2046_v47  ;;  %2280 = vmatprep.mubr.f32.mxu0 %v28052_v0  ;;  %v2058_v9 = vsel %vm2053_vm5, %v2046_v47, %v2048_v48 }
  0xcf   : > { %2145 = vmatprep.subr.mxu1 %v2057_v50 }
  0xd0   : > { %2146 = vmatpush1.msra.mxu1 %v2056_v51 }
  0xd1   : > { %4366 = vrot.lane.b32.xlu0 %v28211_v7, %s28064_s20  ;;  %4368 = vrot.lane.b32.xlu1 %v28214_v8, %s28064_s20  ;;  %v2050_v52 = vpop.permute.xlu0 %2049  ;;  %v2052_v55 = vpop.permute.xlu1 %2051 }
  0xd2   : > { %v2059_v56 = vsel %vm2053_vm5, %v2048_v48, %v2050_v52  ;;  %v2070_v61 = vsel %vm2053_vm5, %v2052_v55, %v2038_v37  ;;  %23939 = vmatmul.mubr.msk.f32.vlgmr.msra.gmra.mrb[2].mxu1 %vm467_vm1, %v23937_v43  ;;  %v2060_v62 = vsel %vm2053_vm5, %v2050_v52, %v2052_v55 }
  0xd3   : > { %2216 = vmatprep.subr.mxu0 %v2059_v56  ;;  %2287 = vmatprep.subr.mxu1 %v2070_v61 }
  0xd4   : > { %2217 = vmatpush1.msra.mxu0 %v2058_v9  ;;  %2288 = vmatpush1.msra.mxu1 %v2060_v62  ;;  %v23947_v9 = vld [vmem:[%s34419_s1 + $0x38] sm:$0xff] }
  0xd5   : > { %4687 = vrot.lane.b32.xlu0 %v28181_v1, %s28065_s25  ;;  %4689 = vrot.lane.b32.xlu1 %v28191_v3, %s28065_s25  ;;  %v2371_v10 = vpop.permute.xlu0 %2370  ;;  %v2373_v11 = vpop.permute.xlu1 %2372 }
  0xd6   : > { %v2386_v14 = vsel %vm2384_vm6, %v2371_v10, %v2373_v11  ;;  %23940 = vmatmul.mubr.msk.f32.vlgmr.msra.gmra.mrb[0].mxu0 %vm467_vm1, %v23937_v43  ;;  %2351 = vmatprep.mubr.f32.mxu1 %v28052_v0 }
  0xd7   : > { %2405 = vmatprep.subr.mxu0 %v2386_v14  ;;  %23941 = vmatmul.mubr.msk.f32.vlgmr.msra.gmra.mrb[4].mxu1 %vm467_vm1, %v23937_v43 }
  0xd8   : > { %2469 = vmatprep.mubr.f32.mxu0 %v28052_v0  ;;  %2540 = vmatprep.mubr.f32.mxu1 %v28052_v0 }
  0xd9   : > { %4685 = vrot.lane.b32.xlu0 %v28184_v2, %s28065_s25  ;;  %4691 = vrot.lane.b32.xlu1 %v28194_v4, %s28065_s25  ;;  %v2369_v16 = vpop.permute.xlu0 %2368  ;;  %v2375_v21 = vpop.permute.xlu1 %2374 }
  0xda   : > { %v2385_v32 = vsel %vm2384_vm6, %v2369_v16, %v2371_v10  ;;  %v2387_v41 = vsel %vm2384_vm6, %v2373_v11, %v2375_v21 }
  0xdb   : > { %2406 = vmatpush1.msra.mxu0 %v2385_v32 }
  0xdc   : > { %23943 = vmatmul.mubr.msk.f32.vlgmr.msra.gmra.mrb[2].mxu0 %vm467_vm1, %v23942_v26 }
  0xdd   : > { %4693 = vrot.lane.b32.xlu0 %v28201_v5, %s28065_s25  ;;  %4695 = vrot.lane.b32.xlu1 %v28204_v6, %s28065_s25  ;;  %v2377_v33 = vpop.permute.xlu0 %2376  ;;  %v2379_v36 = vpop.permute.xlu1 %2378 }
  0xde   : > { %v2388_v37 = vsel %vm2384_vm6, %v2375_v21, %v2377_v33  ;;  %2611 = vmatprep.mubr.f32.mxu0 %v28052_v0  ;;  %v2389_v51 = vsel %vm2384_vm6, %v2377_v33, %v2379_v36 }
  0xdf   : > { %2476 = vmatprep.subr.mxu1 %v2388_v37 }
  0xe0   : > { %2477 = vmatpush1.msra.mxu1 %v2387_v41 }
  0xe1   : > { %4697 = vrot.lane.b32.xlu0 %v28211_v7, %s28065_s25  ;;  %4699 = vrot.lane.b32.xlu1 %v28214_v8, %s28065_s25  ;;  %v2381_v43 = vpop.permute.xlu0 %2380  ;;  %v2383_v44 = vpop.permute.xlu1 %2382  ;;  %s28070_s25 = smov 29  }
  0xe2   : > { %v2390_v47 = vsel %vm2384_vm6, %v2379_v36, %v2381_v43  ;;  %v2401_v48 = vsel %vm2384_vm6, %v2383_v44, %v2369_v16  ;;  %23944 = vmatmul.mubr.msk.f32.vlgmr.msra.gmra.mrb[2].mxu1 %vm467_vm1, %v23942_v26  ;;  %v2391_v50 = vsel %vm2384_vm6, %v2381_v43, %v2383_v44  ;;  %vm6025_vm6 = vcmask 244736  }
  0xe3   : > { %2547 = vmatprep.subr.mxu0 %v2390_v47  ;;  %2618 = vmatprep.subr.mxu1 %v2401_v48 }
  0xe4   : > { %2548 = vmatpush1.msra.mxu0 %v2389_v51  ;;  %2619 = vmatpush1.msra.mxu1 %v2391_v50  ;;  %v23952_v51 = vld [vmem:[%s34419_s1 + $0x40] sm:$0xff] }
  0xe5   : > { %5018 = vrot.lane.b32.xlu0 %v28181_v1, %s28066_s17  ;;  %5020 = vrot.lane.b32.xlu1 %v28191_v3, %s28066_s17  ;;  %v2702_v52 = vpop.permute.xlu0 %2701  ;;  %v2704_v55 = vpop.permute.xlu1 %2703 }
  0xe6   : > { %v2717_v56 = vsel %vm2715_vm7, %v2702_v52, %v2704_v55  ;;  %23945 = vmatmul.mubr.msk.f32.vlgmr.msra.gmra.mrb[0].mxu0 %vm467_vm1, %v23942_v26  ;;  %2682 = vmatprep.mubr.f32.mxu1 %v28052_v0 }
  0xe7   : > { %2736 = vmatprep.subr.mxu0 %v2717_v56  ;;  %23946 = vmatmul.mubr.msk.f32.vlgmr.msra.gmra.mrb[4].mxu1 %vm467_vm1, %v23942_v26 }
  0xe8   : > { %2800 = vmatprep.mubr.f32.mxu0 %v28052_v0  ;;  %2871 = vmatprep.mubr.f32.mxu1 %v28052_v0 }
  0xe9   : > { %5016 = vrot.lane.b32.xlu0 %v28184_v2, %s28066_s17  ;;  %5022 = vrot.lane.b32.xlu1 %v28194_v4, %s28066_s17  ;;  %v2700_v61 = vpop.permute.xlu0 %2699  ;;  %v2706_v62 = vpop.permute.xlu1 %2705 }
  0xea   : > { %v2716_v10 = vsel %vm2715_vm7, %v2700_v61, %v2702_v52  ;;  %v2718_v21 = vsel %vm2715_vm7, %v2704_v55, %v2706_v62 }
  0xeb   : > { %2737 = vmatpush1.msra.mxu0 %v2716_v10 }
  0xec   : > { %23948 = vmatmul.mubr.msk.f32.vlgmr.msra.gmra.mrb[2].mxu0 %vm467_vm1, %v23947_v9 }
  0xed   : > { %5024 = vrot.lane.b32.xlu0 %v28201_v5, %s28066_s17  ;;  %5026 = vrot.lane.b32.xlu1 %v28204_v6, %s28066_s17  ;;  %v2708_v11 = vpop.permute.xlu0 %2707  ;;  %v2710_v14 = vpop.permute.xlu1 %2709 }
  0xee   : > { %v2719_v16 = vsel %vm2715_vm7, %v2706_v62, %v2708_v11  ;;  %2942 = vmatprep.mubr.f32.mxu0 %v28052_v0  ;;  %v2720_v41 = vsel %vm2715_vm7, %v2708_v11, %v2710_v14 }
  0xef   : > { %2807 = vmatprep.subr.mxu1 %v2719_v16 }
  0xf0   : > { %2808 = vmatpush1.msra.mxu1 %v2718_v21 }
  0xf1   : > { %5028 = vrot.lane.b32.xlu0 %v28211_v7, %s28066_s17  ;;  %5030 = vrot.lane.b32.xlu1 %v28214_v8, %s28066_s17  ;;  %v2712_v26 = vpop.permute.xlu0 %2711  ;;  %v2714_v32 = vpop.permute.xlu1 %2713 }
  0xf2   : > { %v2721_v33 = vsel %vm2715_vm7, %v2710_v14, %v2712_v26  ;;  %v2732_v36 = vsel %vm2715_vm7, %v2714_v32, %v2700_v61  ;;  %23949 = vmatmul.mubr.msk.f32.vlgmr.msra.gmra.mrb[2].mxu1 %vm467_vm1, %v23947_v9  ;;  %v2722_v37 = vsel %vm2715_vm7, %v2712_v26, %v2714_v32  ;;  %vm6356_vm7 = vcmask 236544  }
  0xf3   : > { %2878 = vmatprep.subr.mxu0 %v2721_v33  ;;  %2949 = vmatprep.subr.mxu1 %v2732_v36 }
  0xf4   : > { %2879 = vmatpush1.msra.mxu0 %v2720_v41  ;;  %2950 = vmatpush1.msra.mxu1 %v2722_v37  ;;  %v23957_v37 = vld [vmem:[%s34419_s1 + $0x48] sm:$0xff] }
  0xf5   : > { %5349 = vrot.lane.b32.xlu0 %v28181_v1, %s28067_s23  ;;  %5351 = vrot.lane.b32.xlu1 %v28191_v3, %s28067_s23  ;;  %v3033_v43 = vpop.permute.xlu0 %3032  ;;  %v3035_v44 = vpop.permute.xlu1 %3034 }
  0xf6   : > { %v3048_v47 = vsel %vm3046_vm8, %v3033_v43, %v3035_v44  ;;  %23950 = vmatmul.mubr.msk.f32.vlgmr.msra.gmra.mrb[0].mxu0 %vm467_vm1, %v23947_v9  ;;  %3013 = vmatprep.mubr.f32.mxu1 %v28052_v0 }
  0xf7   : > { %3067 = vmatprep.subr.mxu0 %v3048_v47  ;;  %23951 = vmatmul.mubr.msk.f32.vlgmr.msra.gmra.mrb[4].mxu1 %vm467_vm1, %v23947_v9 }
  0xf8   : > { %3131 = vmatprep.mubr.f32.mxu0 %v28052_v0  ;;  %3202 = vmatprep.mubr.f32.mxu1 %v28052_v0 }
  0xf9   : > { %5347 = vrot.lane.b32.xlu0 %v28184_v2, %s28067_s23  ;;  %5353 = vrot.lane.b32.xlu1 %v28194_v4, %s28067_s23  ;;  %v3031_v48 = vpop.permute.xlu0 %3030  ;;  %v3037_v50 = vpop.permute.xlu1 %3036 }
  0xfa   : > { %v3047_v52 = vsel %vm3046_vm8, %v3031_v48, %v3033_v43  ;;  %v3049_v62 = vsel %vm3046_vm8, %v3035_v44, %v3037_v50 }
  0xfb   : > { %3068 = vmatpush1.msra.mxu0 %v3047_v52 }
  0xfc   : > { %23953 = vmatmul.mubr.msk.f32.vlgmr.msra.gmra.mrb[2].mxu0 %vm467_vm1, %v23952_v51 }
  0xfd   : > { %5355 = vrot.lane.b32.xlu0 %v28201_v5, %s28067_s23  ;;  %5357 = vrot.lane.b32.xlu1 %v28204_v6, %s28067_s23  ;;  %v3039_v55 = vpop.permute.xlu0 %3038 }
  0xfe   : > { %v3041_v56 = vpop.permute.xlu1 %3040  ;;  %v3050_v61 = vsel %vm3046_vm8, %v3037_v50, %v3039_v55  ;;  %3273 = vmatprep.mubr.f32.mxu0 %v28052_v0 }
  0xff   : > { %3138 = vmatprep.subr.mxu1 %v3050_v61  ;;  %v3051_v16 = vsel %vm3046_vm8, %v3039_v55, %v3041_v56 }
 0x100   : > { %3139 = vmatpush1.msra.mxu1 %v3049_v62 }
 0x101   : > { %5359 = vrot.lane.b32.xlu0 %v28211_v7, %s28067_s23  ;;  %5361 = vrot.lane.b32.xlu1 %v28214_v8, %s28067_s23  ;;  %v3043_v9 = vpop.permute.xlu0 %3042  ;;  %s28081_s23 = smov 118  }
 0x102   : > { %v3045_v10 = vpop.permute.xlu1 %3044  ;;  %v3052_v11 = vsel %vm3046_vm8, %v3041_v56, %v3043_v9  ;;  %23954 = vmatmul.mubr.msk.f32.vlgmr.msra.gmra.mrb[2].mxu1 %vm467_vm1, %v23952_v51 }
 0x103   : > { %3209 = vmatprep.subr.mxu0 %v3052_v11  ;;  %v3063_v14 = vsel %vm3046_vm8, %v3045_v10, %v3031_v48  ;;  %v3053_v21 = vsel %vm3046_vm8, %v3043_v9, %v3045_v10  ;;  %3344 = vmatprep.mubr.f32.mxu1 %v28052_v0  ;;  %vm6687_vm8 = vcmask 228352  }
 0x104   : > { %3280 = vmatprep.subr.mxu1 %v3063_v14  ;;  %3210 = vmatpush1.msra.mxu0 %v3051_v16 }
 0x105   : > { %5680 = vrot.lane.b32.xlu0 %v28181_v1, %s28068_s15  ;;  %5682 = vrot.lane.b32.xlu1 %v28191_v3, %s28068_s15  ;;  %v3364_v26 = vpop.permute.xlu0 %3363 }
 0x106   : > { %3281 = vmatpush1.msra.mxu1 %v3053_v21  ;;  %v3366_v32 = vpop.permute.xlu1 %3365  ;;  %23955 = vmatmul.mubr.msk.f32.vlgmr.msra.gmra.mrb[0].mxu0 %vm467_vm1, %v23952_v51 }
 0x107   : > { %v3379_v33 = vsel %vm3377_vm9, %v3364_v26, %v3366_v32  ;;  %23956 = vmatmul.mubr.msk.f32.vlgmr.msra.gmra.mrb[4].mxu1 %vm467_vm1, %v23952_v51  ;;  %3462 = vmatprep.mubr.f32.mxu0 %v28052_v0 }
 0x108   : > { %3398 = vmatprep.subr.mxu0 %v3379_v33  ;;  %3533 = vmatprep.mubr.f32.mxu1 %v28052_v0 }
 0x109   : > { %5678 = vrot.lane.b32.xlu0 %v28184_v2, %s28068_s15  ;;  %5684 = vrot.lane.b32.xlu1 %v28194_v4, %s28068_s15  ;;  %v3362_v36 = vpop.permute.xlu0 %3361 }
 0x10a   : > { %v3368_v41 = vpop.permute.xlu1 %3367  ;;  %v3378_v43 = vsel %vm3377_vm9, %v3362_v36, %v3364_v26  ;;  %v23962_v26 = vld [vmem:[%s34419_s1 + $0x50] sm:$0xff] }
 0x10b   : > { %3399 = vmatpush1.msra.mxu0 %v3378_v43  ;;  %v3380_v50 = vsel %vm3377_vm9, %v3366_v32, %v3368_v41 }
 0x10c   : > { %23958 = vmatmul.mubr.msk.f32.vlgmr.msra.gmra.mrb[2].mxu0 %vm467_vm1, %v23957_v37 }
 0x10d   : > { %5686 = vrot.lane.b32.xlu0 %v28201_v5, %s28068_s15  ;;  %5688 = vrot.lane.b32.xlu1 %v28204_v6, %s28068_s15  ;;  %v3370_v44 = vpop.permute.xlu0 %3369 }
 0x10e   : > { %v3372_v47 = vpop.permute.xlu1 %3371  ;;  %v3381_v48 = vsel %vm3377_vm9, %v3368_v41, %v3370_v44  ;;  %3604 = vmatprep.mubr.f32.mxu0 %v28052_v0 }
 0x10f   : > { %3469 = vmatprep.subr.mxu1 %v3381_v48  ;;  %v3382_v62 = vsel %vm3377_vm9, %v3370_v44, %v3372_v47 }
 0x110   : > { %3470 = vmatpush1.msra.mxu1 %v3380_v50 }
 0x111   : > { %5690 = vrot.lane.b32.xlu0 %v28211_v7, %s28068_s15  ;;  %5692 = vrot.lane.b32.xlu1 %v28214_v8, %s28068_s15  ;;  %s28084_s15 = smov 117  }
 0x112   : > { %23959 = vmatmul.mubr.msk.f32.vlgmr.msra.gmra.mrb[2].mxu1 %vm467_vm1, %v23957_v37 }
 0x113   : > { %v3374_v51 = vpop.permute.xlu0 %3373  ;;  %v3376_v52 = vpop.permute.xlu1 %3375  ;;  %3675 = vmatprep.mubr.f32.mxu1 %v28052_v0 }
 0x114   : > { %v3383_v55 = vsel %vm3377_vm9, %v3372_v47, %v3374_v51  ;;  %v3394_v56 = vsel %vm3377_vm9, %v3376_v52, %v3362_v36  ;;  %v3384_v61 = vsel %vm3377_vm9, %v3374_v51, %v3376_v52  ;;  %v23967_v51 = vld [vmem:[%s34419_s1 + $0x58] sm:$0xff]  ;;  %v28745_v52 = vld [vmem:[%s28178_s26 + $0x20] sm:$0xff]  ;;  %vm11863_vm9 = vcmask 457728  }
 0x115   : > { %6011 = vrot.lane.b32.xlu0 %v28181_v1, %s28069_s19  ;;  %6013 = vrot.lane.b32.xlu1 %v28191_v3, %s28069_s19 }
 0x116   : > { %3540 = vmatprep.subr.mxu0 %v3383_v55  ;;  %3611 = vmatprep.subr.mxu1 %v3394_v56  ;;  %v28750_v55 = vld [vmem:[%s28178_s26 + $0x28] sm:$0xff] }
 0x117   : > { %3541 = vmatpush1.msra.mxu0 %v3382_v62  ;;  %3612 = vmatpush1.msra.mxu1 %v3384_v61  ;;  %v3695_v9 = vpop.permute.xlu0 %3694  ;;  %v3697_v10 = vpop.permute.xlu1 %3696 }
 0x118   : > { %v3710_v11 = vsel %vm3708_vm10, %v3695_v9, %v3697_v10  ;;  %23960 = vmatmul.mubr.msk.f32.vlgmr.msra.gmra.mrb[0].mxu0 %vm467_vm1, %v23957_v37  ;;  %23961 = vmatmul.mubr.msk.f32.vlgmr.msra.gmra.mrb[4].mxu1 %vm467_vm1, %v23957_v37 }
 0x119   : > { %6009 = vrot.lane.b32.xlu0 %v28184_v2, %s28069_s19  ;;  %6015 = vrot.lane.b32.xlu1 %v28194_v4, %s28069_s19 }
 0x11a   : > { %3729 = vmatprep.subr.mxu0 %v3710_v11  ;;  %3793 = vmatprep.mubr.f32.mxu0 %v28052_v0 }
 0x11b   : > { %v3693_v14 = vpop.permute.xlu0 %3692  ;;  %v3699_v16 = vpop.permute.xlu1 %3698  ;;  %3864 = vmatprep.mubr.f32.mxu1 %v28052_v0 }
 0x11c   : > { %v3709_v21 = vsel %vm3708_vm10, %v3693_v14, %v3695_v9  ;;  %v28758_v9 = vld [vmem:[%s28178_s26 + $0x30] sm:$0xff] }
 0x11d   : > { %6017 = vrot.lane.b32.xlu0 %v28201_v5, %s28069_s19  ;;  %6019 = vrot.lane.b32.xlu1 %v28204_v6, %s28069_s19  ;;  %v3711_v5 = vsel %vm3708_vm10, %v3697_v10, %v3699_v16  ;;  %v28763_v10 = vld [vmem:[%s28178_s26 + $0x38] sm:$0xff] }
 0x11e   : > { %3730 = vmatpush1.msra.mxu0 %v3709_v21 }
 0x11f   : > { %v3701_v2 = vpop.permute.xlu0 %3700  ;;  %v3703_v4 = vpop.permute.xlu1 %3702  ;;  %23963 = vmatmul.mubr.msk.f32.vlgmr.msra.gmra.mrb[2].mxu0 %vm467_vm1, %v23962_v26 }
 0x120   : > { %v3712_v32 = vsel %vm3708_vm10, %v3699_v16, %v3701_v2  ;;  %3935 = vmatprep.mubr.f32.mxu0 %v28052_v0 }
 0x121   : > { %6021 = vrot.lane.b32.xlu0 %v28211_v7, %s28069_s19  ;;  %6023 = vrot.lane.b32.xlu1 %v28214_v8, %s28069_s19  ;;  %v3713_v7 = vsel %vm3708_vm10, %v3701_v2, %v3703_v4 }
 0x122   : > { %3800 = vmatprep.subr.mxu1 %v3712_v32  ;;  %v28778_v32 = vld [vmem:[%s28178_s26 + $0x10] sm:$0xff] }
 0x123   : > { %3801 = vmatpush1.msra.mxu1 %v3711_v5  ;;  %v3705_v6 = vpop.permute.xlu0 %3704  ;;  %v3707_v33 = vpop.permute.xlu1 %3706 }
 0x124   : > { %v3714_v36 = vsel %vm3708_vm10, %v3703_v4, %v3705_v6  ;;  %v3725_v37 = vsel %vm3708_vm10, %v3707_v33, %v3693_v14  ;;  %23964 = vmatmul.mubr.msk.f32.vlgmr.msra.gmra.mrb[2].mxu1 %vm467_vm1, %v23962_v26  ;;  %v3715_v41 = vsel %vm3708_vm10, %v3705_v6, %v3707_v33  ;;  %v28773_v4 = vld [vmem:[%s28178_s26 + $0x8] sm:$0xff] }
 0x125   : > { %6342 = vrot.lane.b32.xlu0 %v28181_v1, %s28070_s25  ;;  %6344 = vrot.lane.b32.xlu1 %v28191_v3, %s28070_s25  ;;  %v28728_v1 = vld [vmem:[%s28178_s26] sm:$0xff]  ;;  %v28733_v3 = vld [vmem:[%s28178_s26 + $0x18] sm:$0xff]  ;;  %s28076_s26 = smov 56  }
 0x126   : > { %3871 = vmatprep.subr.mxu0 %v3714_v36  ;;  %3942 = vmatprep.subr.mxu1 %v3725_v37 }
 0x127   : > { %3872 = vmatpush1.msra.mxu0 %v3713_v7  ;;  %3943 = vmatpush1.msra.mxu1 %v3715_v41  ;;  %v4026_v8 = vpop.permute.xlu0 %4025  ;;  %v4028_v43 = vpop.permute.xlu1 %4027 }
 0x128   : > { %v4041_v44 = vsel %vm4039_vm11, %v4026_v8, %v4028_v43  ;;  %23965 = vmatmul.mubr.msk.f32.vlgmr.msra.gmra.mrb[0].mxu0 %vm467_vm1, %v23962_v26  ;;  %4006 = vmatprep.mubr.f32.mxu1 %v28052_v0 }
 0x129   : > { %6340 = vrot.lane.b32.xlu0 %v28728_v1, %s28070_s25  ;;  %6346 = vrot.lane.b32.xlu1 %v28733_v3, %s28070_s25 }
 0x12a   : > { %4060 = vmatprep.subr.mxu0 %v4041_v44  ;;  %23966 = vmatmul.mubr.msk.f32.vlgmr.msra.gmra.mrb[4].mxu1 %vm467_vm1, %v23962_v26 }
 0x12b   : > { %v4024_v47 = vpop.permute.xlu0 %4023  ;;  %v4030_v48 = vpop.permute.xlu1 %4029  ;;  %4124 = vmatprep.mubr.f32.mxu0 %v28052_v0  ;;  %4195 = vmatprep.mubr.f32.mxu1 %v28052_v0 }
 0x12c   : > { %v4040_v50 = vsel %vm4039_vm11, %v4024_v47, %v4026_v8  ;;  %v4042_v11 = vsel %vm4039_vm11, %v4028_v43, %v4030_v48  ;;  %v23972_v8 = vld [vmem:[%s34419_s1 + $0x60] sm:$0xff] }
 0x12d   : > { %6348 = vrot.lane.b32.xlu0 %v28745_v52, %s28070_s25  ;;  %6350 = vrot.lane.b32.xlu1 %v28750_v55, %s28070_s25 }
 0x12e   : > { %4061 = vmatpush1.msra.mxu0 %v4040_v50 }
 0x12f   : > { %v4032_v56 = vpop.permute.xlu0 %4031  ;;  %v4034_v61 = vpop.permute.xlu1 %4033  ;;  %23968 = vmatmul.mubr.msk.f32.vlgmr.msra.gmra.mrb[2].mxu0 %vm467_vm1, %v23967_v51 }
 0x130   : > { %v4043_v62 = vsel %vm4039_vm11, %v4030_v48, %v4032_v56  ;;  %4266 = vmatprep.mubr.f32.mxu0 %v28052_v0  ;;  %v4044_v5 = vsel %vm4039_vm11, %v4032_v56, %v4034_v61 }
 0x131   : > { %6352 = vrot.lane.b32.xlu0 %v28758_v9, %s28070_s25  ;;  %6354 = vrot.lane.b32.xlu1 %v28763_v10, %s28070_s25  ;;  %s34456_s25 = smov 120  }
 0x132   : > { %4131 = vmatprep.subr.mxu1 %v4043_v62 }
 0x133   : > { %4132 = vmatpush1.msra.mxu1 %v4042_v11  ;;  %v4036_v14 = vpop.permute.xlu0 %4035  ;;  %v4038_v16 = vpop.permute.xlu1 %4037 }
 0x134   : > { %v4045_v21 = vsel %vm4039_vm11, %v4034_v61, %v4036_v14  ;;  %v4056_v26 = vsel %vm4039_vm11, %v4038_v16, %v4024_v47  ;;  %23969 = vmatmul.mubr.msk.f32.vlgmr.msra.gmra.mrb[2].mxu1 %vm467_vm1, %v23967_v51  ;;  %v4046_v2 = vsel %vm4039_vm11, %v4036_v14, %v4038_v16 }
 0x135   : > { %6673 = vrot.lane.b32.xlu0 %v28773_v4, %s28071_s18  ;;  %6675 = vrot.lane.b32.xlu1 %v28778_v32, %s28071_s18 }
 0x136   : > { %4202 = vmatprep.subr.mxu0 %v4045_v21  ;;  %4273 = vmatprep.subr.mxu1 %v4056_v26 }
 0x137   : > { %4203 = vmatpush1.msra.mxu0 %v4044_v5  ;;  %4274 = vmatpush1.msra.mxu1 %v4046_v2  ;;  %v4357_v6 = vpop.permute.xlu0 %4356  ;;  %v4359_v33 = vpop.permute.xlu1 %4358  ;;  %v23977_v5 = vld [vmem:[%s34419_s1 + $0x68] sm:$0xff] }
 0x138   : > { %v4372_v36 = vsel %vm4370_vm12, %v4357_v6, %v4359_v33  ;;  %23970 = vmatmul.mubr.msk.f32.vlgmr.msra.gmra.mrb[0].mxu0 %vm467_vm1, %v23967_v51  ;;  %4337 = vmatprep.mubr.f32.mxu1 %v28052_v0 }
 0x139   : > { %6671 = vrot.lane.b32.xlu0 %v28728_v1, %s28071_s18  ;;  %6677 = vrot.lane.b32.xlu1 %v28733_v3, %s28071_s18 }
 0x13a   : > { %4391 = vmatprep.subr.mxu0 %v4372_v36  ;;  %23971 = vmatmul.mubr.msk.f32.vlgmr.msra.gmra.mrb[4].mxu1 %vm467_vm1, %v23967_v51 }
 0x13b   : > { %v4355_v37 = vpop.permute.xlu0 %4354  ;;  %v4361_v41 = vpop.permute.xlu1 %4360  ;;  %4455 = vmatprep.mubr.f32.mxu0 %v28052_v0  ;;  %4526 = vmatprep.mubr.f32.mxu1 %v28052_v0 }
 0x13c   : > { %v4371_v7 = vsel %vm4370_vm12, %v4355_v37, %v4357_v6  ;;  %v4373_v48 = vsel %vm4370_vm12, %v4359_v33, %v4361_v41 }
 0x13d   : > { %6679 = vrot.lane.b32.xlu0 %v28745_v52, %s28071_s18  ;;  %6681 = vrot.lane.b32.xlu1 %v28750_v55, %s28071_s18 }
 0x13e   : > { %4392 = vmatpush1.msra.mxu0 %v4371_v7 }
 0x13f   : > { %v4363_v43 = vpop.permute.xlu0 %4362  ;;  %v4365_v44 = vpop.permute.xlu1 %4364  ;;  %23973 = vmatmul.mubr.msk.f32.vlgmr.msra.gmra.mrb[2].mxu0 %vm467_vm1, %v23972_v8 }
 0x140   : > { %v4374_v47 = vsel %vm4370_vm12, %v4361_v41, %v4363_v43  ;;  %4597 = vmatprep.mubr.f32.mxu0 %v28052_v0  ;;  %v4375_v11 = vsel %vm4370_vm12, %v4363_v43, %v4365_v44 }
 0x141   : > { %6683 = vrot.lane.b32.xlu0 %v28758_v9, %s28071_s18  ;;  %6685 = vrot.lane.b32.xlu1 %v28763_v10, %s28071_s18  ;;  %s28079_s18 = smov 123  }
 0x142   : > { %4462 = vmatprep.subr.mxu1 %v4374_v47 }
 0x143   : > { %4463 = vmatpush1.msra.mxu1 %v4373_v48  ;;  %v4367_v50 = vpop.permute.xlu0 %4366  ;;  %v4369_v51 = vpop.permute.xlu1 %4368 }
 0x144   : > { %v4376_v56 = vsel %vm4370_vm12, %v4365_v44, %v4367_v50  ;;  %v4387_v61 = vsel %vm4370_vm12, %v4369_v51, %v4355_v37  ;;  %23974 = vmatmul.mubr.msk.f32.vlgmr.msra.gmra.mrb[2].mxu1 %vm467_vm1, %v23972_v8  ;;  %v4377_v62 = vsel %vm4370_vm12, %v4367_v50, %v4369_v51 }
 0x145   : > { %4533 = vmatprep.subr.mxu0 %v4376_v56  ;;  %4604 = vmatprep.subr.mxu1 %v4387_v61 }
 0x146   : > { %4534 = vmatpush1.msra.mxu0 %v4375_v11  ;;  %4605 = vmatpush1.msra.mxu1 %v4377_v62  ;;  %v23982_v11 = vld [vmem:[%s34419_s1 + $0x70] sm:$0xff] }
 0x147   : > { %v4688_v14 = vpop.permute.xlu0 %4687  ;;  %v4690_v16 = vpop.permute.xlu1 %4689  ;;  %23975 = vmatmul.mubr.msk.f32.vlgmr.msra.gmra.mrb[0].mxu0 %vm467_vm1, %v23972_v8  ;;  %4668 = vmatprep.mubr.f32.mxu1 %v28052_v0 }
 0x148   : > { %v4703_v21 = vsel %vm4701_vm13, %v4688_v14, %v4690_v16  ;;  %23976 = vmatmul.mubr.msk.f32.vlgmr.msra.gmra.mrb[4].mxu1 %vm467_vm1, %v23972_v8  ;;  %4786 = vmatprep.mubr.f32.mxu0 %v28052_v0 }
 0x149   : > { %4722 = vmatprep.subr.mxu0 %v4703_v21  ;;  %4857 = vmatprep.mubr.f32.mxu1 %v28052_v0 }
 0x14b   : > { %v4686_v26 = vpop.permute.xlu0 %4685  ;;  %v4692_v2 = vpop.permute.xlu1 %4691 }
 0x14c   : > { %v4702_v6 = vsel %vm4701_vm13, %v4686_v26, %v4688_v14  ;;  %v4704_v41 = vsel %vm4701_vm13, %v4690_v16, %v4692_v2 }
 0x14d   : > { %4723 = vmatpush1.msra.mxu0 %v4702_v6 }
 0x14e   : > { %23978 = vmatmul.mubr.msk.f32.vlgmr.msra.gmra.mrb[2].mxu0 %vm467_vm1, %v23977_v5 }
 0x14f   : > { %v4694_v33 = vpop.permute.xlu0 %4693  ;;  %v4696_v36 = vpop.permute.xlu1 %4695  ;;  %4928 = vmatprep.mubr.f32.mxu0 %v28052_v0 }
 0x150   : > { %v4705_v37 = vsel %vm4701_vm13, %v4692_v2, %v4694_v33  ;;  %v4706_v48 = vsel %vm4701_vm13, %v4694_v33, %v4696_v36 }
 0x151   : > { %4793 = vmatprep.subr.mxu1 %v4705_v37 }
 0x152   : > { %4794 = vmatpush1.msra.mxu1 %v4704_v41 }
 0x153   : > { %v4698_v7 = vpop.permute.xlu0 %4697  ;;  %v4700_v8 = vpop.permute.xlu1 %4699  ;;  %23979 = vmatmul.mubr.msk.f32.vlgmr.msra.gmra.mrb[2].mxu1 %vm467_vm1, %v23977_v5 }
 0x154   : > { %v4707_v43 = vsel %vm4701_vm13, %v4696_v36, %v4698_v7  ;;  %v4718_v44 = vsel %vm4701_vm13, %v4700_v8, %v4686_v26  ;;  %v4708_v47 = vsel %vm4701_vm13, %v4698_v7, %v4700_v8  ;;  %4999 = vmatprep.mubr.f32.mxu1 %v28052_v0  ;;  %v28072_v36 = vmov 0  }
 0x155   : > { %4864 = vmatprep.subr.mxu0 %v4707_v43  ;;  %4935 = vmatprep.subr.mxu1 %v4718_v44 }
 0x156   : > { %4865 = vmatpush1.msra.mxu0 %v4706_v48  ;;  %4936 = vmatpush1.msra.mxu1 %v4708_v47 }
 0x157   : > { %v5019_v50 = vpop.permute.xlu0 %5018  ;;  %v5021_v51 = vpop.permute.xlu1 %5020  ;;  %23980 = vmatmul.mubr.msk.f32.vlgmr.msra.gmra.mrb[0].mxu0 %vm467_vm1, %v23977_v5  ;;  %23981 = vmatmul.mubr.msk.f32.vlgmr.msra.gmra.mrb[4].mxu1 %vm467_vm1, %v23977_v5  ;;  %v8485_v5 = vld [vmem:[%s34420_s2] sm:$0xff] }
 0x158   : > { %v5034_v56 = vsel %vm5032_vm14, %v5019_v50, %v5021_v51  ;;  %5117 = vmatprep.mubr.f32.mxu0 %v28052_v0  ;;  %5188 = vmatprep.mubr.f32.mxu1 %v28052_v0 }
 0x159   : > { %5053 = vmatprep.subr.mxu0 %v5034_v56  ;;  %27839 = vset.pattern.permute.xlu0 %v28072_v36 }
 0x15a   : > { %8488 = vperm.xlu0 %27839, %v8485_v5   ;;  %27840 = vset.pattern.permute.xlu1 %v28072_v36 }
 0x15b   : > { %v5017_v61 = vpop.permute.xlu0 %5016  ;;  %v5023_v62 = vpop.permute.xlu1 %5022 }
 0x15c   : > { %v5033_v14 = vsel %vm5032_vm14, %v5017_v61, %v5019_v50  ;;  %v5035_v6 = vsel %vm5032_vm14, %v5021_v51, %v5023_v62 }
 0x15d   : > { %5054 = vmatpush1.msra.mxu0 %v5033_v14 }
 0x15e   : > { %23983 = vmatmul.mubr.msk.f32.vlgmr.msra.gmra.mrb[2].mxu0 %vm467_vm1, %v23982_v11 }
 0x15f   : > { %v5025_v16 = vpop.permute.xlu0 %5024  ;;  %v5027_v21 = vpop.permute.xlu1 %5026  ;;  %5259 = vmatprep.mubr.f32.mxu0 %v28052_v0 }
 0x160   : > { %v5036_v26 = vsel %vm5032_vm14, %v5023_v62, %v5025_v16  ;;  %v28846_v2 = vpop.f32.mrb[0].mxu1  ;;  %v5037_v44 = vsel %vm5032_vm14, %v5025_v16, %v5027_v21 }
 0x161   : > { %5124 = vmatprep.subr.mxu1 %v5036_v26  ;;  %v28852_v33 = vpop.f32.mrb[1].mxu1 }
 0x162   : > { %5125 = vmatpush1.msra.mxu1 %v5035_v6 }
 0x163   : > { %v5029_v37 = vpop.permute.xlu0 %5028  ;;  %v5031_v41 = vpop.permute.xlu1 %5030  ;;  %23984 = vmatmul.mubr.msk.f32.vlgmr.msra.gmra.mrb[2].mxu1 %vm467_vm1, %v23982_v11 }
 0x164   : > { %v5038_v7 = vsel %vm5032_vm14, %v5027_v21, %v5029_v37  ;;  %v5049_v8 = vsel %vm5032_vm14, %v5031_v41, %v5017_v61  ;;  %v5039_v43 = vsel %vm5032_vm14, %v5029_v37, %v5031_v41  ;;  %5330 = vmatprep.mubr.f32.mxu1 %v28052_v0  ;;  %v23987_v61 = vld [vmem:[%s34419_s1 + $0x78] sm:$0xff] }
 0x165   : > { %5195 = vmatprep.subr.mxu0 %v5038_v7  ;;  %5266 = vmatprep.subr.mxu1 %v5049_v8 }
 0x166   : > { %5196 = vmatpush1.msra.mxu0 %v5037_v44  ;;  %5267 = vmatpush1.msra.mxu1 %v5039_v43 }
 0x167   : > { %v5350_v47 = vpop.permute.xlu0 %5349  ;;  %v5352_v48 = vpop.permute.xlu1 %5351  ;;  %23985 = vmatmul.mubr.msk.f32.vlgmr.msra.gmra.mrb[0].mxu0 %vm467_vm1, %v23982_v11  ;;  %23986 = vmatmul.mubr.msk.f32.vlgmr.msra.gmra.mrb[4].mxu1 %vm467_vm1, %v23982_v11 }
 0x168   : > { %v5365_v50 = vsel %vm5363_vm15, %v5350_v47, %v5352_v48  ;;  %5448 = vmatprep.mubr.f32.mxu0 %v28052_v0  ;;  %5519 = vmatprep.mubr.f32.mxu1 %v28052_v0 }
 0x169   : > { %5384 = vmatprep.subr.mxu0 %v5365_v50 }
 0x16b   : > { %v5348_v51 = vpop.permute.xlu0 %5347  ;;  %v5354_v56 = vpop.permute.xlu1 %5353 }
 0x16c   : > { %v5364_v62 = vsel %vm5363_vm15, %v5348_v51, %v5350_v47  ;;  %v5366_v21 = vsel %vm5363_vm15, %v5352_v48, %v5354_v56  ;;  %v23992_v48 = vld [vmem:[%s34419_s1 + $0x80] sm:$0xff] }
 0x16d   : > { %5385 = vmatpush1.msra.mxu0 %v5364_v62 }
 0x16e   : > { %23988 = vmatmul.mubr.msk.f32.vlgmr.msra.gmra.mrb[2].mxu0 %vm467_vm1, %v23987_v61 }
 0x16f   : > { %v5356_v14 = vpop.permute.xlu0 %5355  ;;  %v5358_v11 = vpop.permute.xlu1 %5357  ;;  %5590 = vmatprep.mubr.f32.mxu0 %v28052_v0 }
 0x170   : > { %v5367_v16 = vsel %vm5363_vm15, %v5354_v56, %v5356_v14  ;;  %v5368_v41 = vsel %vm5363_vm15, %v5356_v14, %v5358_v11 }
 0x171   : > { %5455 = vmatprep.subr.mxu1 %v5367_v16 }
 0x172   : > { %5456 = vmatpush1.msra.mxu1 %v5366_v21 }
 0x173   : > { %v5360_v26 = vpop.permute.xlu0 %5359  ;;  %v5362_v5 = vpop.permute.xlu1 %5361  ;;  %23989 = vmatmul.mubr.msk.f32.vlgmr.msra.gmra.mrb[2].mxu1 %vm467_vm1, %v23987_v61 }
 0x174   : > { %v5369_v6 = vsel %vm5363_vm15, %v5358_v11, %v5360_v26  ;;  %v5380_v36 = vsel %vm5363_vm15, %v5362_v5, %v5348_v51  ;;  %v5370_v37 = vsel %vm5363_vm15, %v5360_v26, %v5362_v5  ;;  %5661 = vmatprep.mubr.f32.mxu1 %v28052_v0 }
 0x175   : > { %5526 = vmatprep.subr.mxu0 %v5369_v6  ;;  %5597 = vmatprep.subr.mxu1 %v5380_v36 }
 0x176   : > { %5527 = vmatpush1.msra.mxu0 %v5368_v41  ;;  %5598 = vmatpush1.msra.mxu1 %v5370_v37 }
 0x177   : > { %v5681_v7 = vpop.permute.xlu0 %5680  ;;  %v5683_v8 = vpop.permute.xlu1 %5682  ;;  %23990 = vmatmul.mubr.msk.f32.vlgmr.msra.gmra.mrb[0].mxu0 %vm467_vm1, %v23987_v61  ;;  %23991 = vmatmul.mubr.msk.f32.vlgmr.msra.gmra.mrb[4].mxu1 %vm467_vm1, %v23987_v61 }
 0x178   : > { %v5696_v43 = vsel %vm5694_vm3, %v5681_v7, %v5683_v8  ;;  %5779 = vmatprep.mubr.f32.mxu0 %v28052_v0  ;;  %5850 = vmatprep.mubr.f32.mxu1 %v28052_v0 }
 0x179   : > { %5715 = vmatprep.subr.mxu0 %v5696_v43 }
 0x17b   : > { %v5679_v44 = vpop.permute.xlu0 %5678  ;;  %v5685_v47 = vpop.permute.xlu1 %5684 }
 0x17c   : > { %v5695_v50 = vsel %vm5694_vm3, %v5679_v44, %v5681_v7  ;;  %v5697_v62 = vsel %vm5694_vm3, %v5683_v8, %v5685_v47  ;;  %v23997_v8 = vld [vmem:[%s34419_s1 + $0x88] sm:$0xff] }
 0x17d   : > { %5716 = vmatpush1.msra.mxu0 %v5695_v50 }
 0x17e   : > { %23993 = vmatmul.mubr.msk.f32.vlgmr.msra.gmra.mrb[2].mxu0 %vm467_vm1, %v23992_v48 }
 0x17f   : > { %v5687_v51 = vpop.permute.xlu0 %5686  ;;  %v5689_v56 = vpop.permute.xlu1 %5688  ;;  %5921 = vmatprep.mubr.f32.mxu0 %v28052_v0 }
 0x180   : > { %v5698_v61 = vsel %vm5694_vm3, %v5685_v47, %v5687_v51  ;;  %v5699_v5 = vsel %vm5694_vm3, %v5687_v51, %v5689_v56 }
 0x181   : > { %5786 = vmatprep.subr.mxu1 %v5698_v61 }
 0x182   : > { %5787 = vmatpush1.msra.mxu1 %v5697_v62 }
 0x183   : > { %v5691_v14 = vpop.permute.xlu0 %5690  ;;  %v5693_v11 = vpop.permute.xlu1 %5692  ;;  %23994 = vmatmul.mubr.msk.f32.vlgmr.msra.gmra.mrb[2].mxu1 %vm467_vm1, %v23992_v48 }
 0x184   : > { %v5700_v16 = vsel %vm5694_vm3, %v5689_v56, %v5691_v14  ;;  %v5711_v21 = vsel %vm5694_vm3, %v5693_v11, %v5679_v44  ;;  %v5701_v26 = vsel %vm5694_vm3, %v5691_v14, %v5693_v11  ;;  %5992 = vmatprep.mubr.f32.mxu1 %v28052_v0 }
 0x185   : > { %5857 = vmatprep.subr.mxu0 %v5700_v16  ;;  %5928 = vmatprep.subr.mxu1 %v5711_v21 }
 0x186   : > { %5858 = vmatpush1.msra.mxu0 %v5699_v5  ;;  %5929 = vmatpush1.msra.mxu1 %v5701_v26 }
 0x187   : > { %v6012_v6 = vpop.permute.xlu0 %6011  ;;  %v6014_v36 = vpop.permute.xlu1 %6013  ;;  %23995 = vmatmul.mubr.msk.f32.vlgmr.msra.gmra.mrb[0].mxu0 %vm467_vm1, %v23992_v48  ;;  %23996 = vmatmul.mubr.msk.f32.vlgmr.msra.gmra.mrb[4].mxu1 %vm467_vm1, %v23992_v48 }
 0x188   : > { %v6027_v37 = vsel %vm6025_vm6, %v6012_v6, %v6014_v36  ;;  %6110 = vmatprep.mubr.f32.mxu0 %v28052_v0  ;;  %6181 = vmatprep.mubr.f32.mxu1 %v28052_v0 }
 0x189   : > { %6046 = vmatprep.subr.mxu0 %v6027_v37 }
 0x18b   : > { %v6010_v41 = vpop.permute.xlu0 %6009  ;;  %v6016_v7 = vpop.permute.xlu1 %6015 }
 0x18c   : > { %v6026_v43 = vsel %vm6025_vm6, %v6010_v41, %v6012_v6  ;;  %v6028_v50 = vsel %vm6025_vm6, %v6014_v36, %v6016_v7  ;;  %v24002_v36 = vld [vmem:[%s34419_s1 + $0x90] sm:$0xff] }
 0x18d   : > { %6047 = vmatpush1.msra.mxu0 %v6026_v43 }
 0x18e   : > { %23998 = vmatmul.mubr.msk.f32.vlgmr.msra.gmra.mrb[2].mxu0 %vm467_vm1, %v23997_v8 }
 0x18f   : > { %v6018_v44 = vpop.permute.xlu0 %6017  ;;  %v6020_v47 = vpop.permute.xlu1 %6019  ;;  %6252 = vmatprep.mubr.f32.mxu0 %v28052_v0 }
 0x190   : > { %v6029_v48 = vsel %vm6025_vm6, %v6016_v7, %v6018_v44  ;;  %v6030_v11 = vsel %vm6025_vm6, %v6018_v44, %v6020_v47 }
 0x191   : > { %6117 = vmatprep.subr.mxu1 %v6029_v48 }
 0x192   : > { %6118 = vmatpush1.msra.mxu1 %v6028_v50 }
 0x193   : > { %v6022_v51 = vpop.permute.xlu0 %6021  ;;  %v6024_v56 = vpop.permute.xlu1 %6023  ;;  %23999 = vmatmul.mubr.msk.f32.vlgmr.msra.gmra.mrb[2].mxu1 %vm467_vm1, %v23997_v8 }
 0x194   : > { %v6031_v61 = vsel %vm6025_vm6, %v6020_v47, %v6022_v51  ;;  %v6042_v62 = vsel %vm6025_vm6, %v6024_v56, %v6010_v41  ;;  %v6032_v14 = vsel %vm6025_vm6, %v6022_v51, %v6024_v56  ;;  %6323 = vmatprep.mubr.f32.mxu1 %v28052_v0 }
 0x195   : > { %6188 = vmatprep.subr.mxu0 %v6031_v61  ;;  %6259 = vmatprep.subr.mxu1 %v6042_v62 }
 0x196   : > { %6189 = vmatpush1.msra.mxu0 %v6030_v11  ;;  %6260 = vmatpush1.msra.mxu1 %v6032_v14 }
 0x197   : > { %v6343_v16 = vpop.permute.xlu0 %6342  ;;  %v6345_v21 = vpop.permute.xlu1 %6344  ;;  %24000 = vmatmul.mubr.msk.f32.vlgmr.msra.gmra.mrb[0].mxu0 %vm467_vm1, %v23997_v8  ;;  %24001 = vmatmul.mubr.msk.f32.vlgmr.msra.gmra.mrb[4].mxu1 %vm467_vm1, %v23997_v8 }
 0x198   : > { %v6358_v26 = vsel %vm6356_vm7, %v6343_v16, %v6345_v21  ;;  %6441 = vmatprep.mubr.f32.mxu0 %v28052_v0  ;;  %6512 = vmatprep.mubr.f32.mxu1 %v28052_v0 }
 0x199   : > { %6377 = vmatprep.subr.mxu0 %v6358_v26 }
 0x19b   : > { %v6341_v5 = vpop.permute.xlu0 %6340  ;;  %v6347_v6 = vpop.permute.xlu1 %6346 }
 0x19c   : > { %v6357_v37 = vsel %vm6356_vm7, %v6341_v5, %v6343_v16  ;;  %v6359_v43 = vsel %vm6356_vm7, %v6345_v21, %v6347_v6  ;;  %v24007_v21 = vld [vmem:[%s34419_s1 + $0x98] sm:$0xff] }
 0x19d   : > { %6378 = vmatpush1.msra.mxu0 %v6357_v37 }
 0x19e   : > { %24003 = vmatmul.mubr.msk.f32.vlgmr.msra.gmra.mrb[2].mxu0 %vm467_vm1, %v24002_v36 }
 0x19f   : > { %v6349_v41 = vpop.permute.xlu0 %6348  ;;  %v6351_v7 = vpop.permute.xlu1 %6350  ;;  %6583 = vmatprep.mubr.f32.mxu0 %v28052_v0 }
 0x1a0   : > { %v6360_v8 = vsel %vm6356_vm7, %v6347_v6, %v6349_v41  ;;  %v6361_v56 = vsel %vm6356_vm7, %v6349_v41, %v6351_v7 }
 0x1a1   : > { %6448 = vmatprep.subr.mxu1 %v6360_v8 }
 0x1a2   : > { %6449 = vmatpush1.msra.mxu1 %v6359_v43 }
 0x1a3   : > { %v6353_v44 = vpop.permute.xlu0 %6352  ;;  %v6355_v47 = vpop.permute.xlu1 %6354  ;;  %24004 = vmatmul.mubr.msk.f32.vlgmr.msra.gmra.mrb[2].mxu1 %vm467_vm1, %v24002_v36 }
 0x1a4   : > { %v6362_v48 = vsel %vm6356_vm7, %v6351_v7, %v6353_v44  ;;  %v6373_v50 = vsel %vm6356_vm7, %v6355_v47, %v6341_v5  ;;  %v6363_v51 = vsel %vm6356_vm7, %v6353_v44, %v6355_v47  ;;  %6654 = vmatprep.mubr.f32.mxu1 %v28052_v0 }
 0x1a5   : > { %6519 = vmatprep.subr.mxu0 %v6362_v48  ;;  %6590 = vmatprep.subr.mxu1 %v6373_v50  ;;  %v24012_v48 = vld [vmem:[%s34419_s1 + $0xa0] sm:$0xff] }
 0x1a6   : > { %6520 = vmatpush1.msra.mxu0 %v6361_v56  ;;  %6591 = vmatpush1.msra.mxu1 %v6363_v51 }
 0x1a7   : > { %v6674_v61 = vpop.permute.xlu0 %6673  ;;  %v6676_v62 = vpop.permute.xlu1 %6675  ;;  %24005 = vmatmul.mubr.msk.f32.vlgmr.msra.gmra.mrb[0].mxu0 %vm467_vm1, %v24002_v36  ;;  %24006 = vmatmul.mubr.msk.f32.vlgmr.msra.gmra.mrb[4].mxu1 %vm467_vm1, %v24002_v36 }
 0x1a8   : > { %v6689_v14 = vsel %vm6687_vm8, %v6674_v61, %v6676_v62  ;;  %6772 = vmatprep.mubr.f32.mxu0 %v28052_v0  ;;  %6843 = vmatprep.mubr.f32.mxu1 %v28052_v0 }
 0x1a9   : > { %6708 = vmatprep.subr.mxu0 %v6689_v14 }
 0x1ab   : > { %v6672_v11 = vpop.permute.xlu0 %6671  ;;  %v6678_v16 = vpop.permute.xlu1 %6677 }
 0x1ac   : > { %v6688_v26 = vsel %vm6687_vm8, %v6672_v11, %v6674_v61  ;;  %v6690_v37 = vsel %vm6687_vm8, %v6676_v62, %v6678_v16 }
 0x1ad   : > { %6709 = vmatpush1.msra.mxu0 %v6688_v26 }
 0x1ae   : > { %24008 = vmatmul.mubr.msk.f32.vlgmr.msra.gmra.mrb[2].mxu0 %vm467_vm1, %v24007_v21 }
 0x1af   : > { %v6680_v5 = vpop.permute.xlu0 %6679  ;;  %v6682_v6 = vpop.permute.xlu1 %6681  ;;  %6914 = vmatprep.mubr.f32.mxu0 %v28052_v0 }
 0x1b0   : > { %v6691_v36 = vsel %vm6687_vm8, %v6678_v16, %v6680_v5  ;;  %v6692_v47 = vsel %vm6687_vm8, %v6680_v5, %v6682_v6 }
 0x1b1   : > { %6779 = vmatprep.subr.mxu1 %v6691_v36 }
 0x1b2   : > { %6780 = vmatpush1.msra.mxu1 %v6690_v37 }
 0x1b3   : > { %v6684_v41 = vpop.permute.xlu0 %6683  ;;  %24009 = vmatmul.mubr.msk.f32.vlgmr.msra.gmra.mrb[2].mxu1 %vm467_vm1, %v24007_v21  ;;  %v6686_v7 = vpop.permute.xlu1 %6685 }
 0x1b4   : > { %v6693_v8 = vsel %vm6687_vm8, %v6682_v6, %v6684_v41  ;;  %v6704_v43 = vsel %vm6687_vm8, %v6686_v7, %v6672_v11  ;;  %v6694_v44 = vsel %vm6687_vm8, %v6684_v41, %v6686_v7  ;;  %6985 = vmatprep.mubr.f32.mxu1 %v28052_v0 }
 0x1b5   : > { %6850 = vmatprep.subr.mxu0 %v6693_v8  ;;  %6921 = vmatprep.subr.mxu1 %v6704_v43 }
 0x1b6   : > { %6851 = vmatpush1.msra.mxu0 %v6692_v47  ;;  %6922 = vmatpush1.msra.mxu1 %v6694_v44 }
 0x1b7   : > { %24010 = vmatmul.mubr.msk.f32.vlgmr.msra.gmra.mrb[0].mxu0 %vm467_vm1, %v24007_v21  ;;  %24011 = vmatmul.mubr.msk.f32.vlgmr.msra.gmra.mrb[4].mxu1 %vm467_vm1, %v24007_v21 }
 0x1b8   : > { %7005 = vmatprep.subr.mxu0 %v28778_v32  ;;  %7076 = vmatprep.subr.mxu1 %v28745_v52 }
 0x1b9   : > { %7006 = vmatpush1.msra.mxu0 %v28773_v4  ;;  %7077 = vmatpush1.msra.mxu1 %v28733_v3 }
 0x1ba   : > { %7069 = vmatprep.mubr.f32.mxu0 %v28052_v0  ;;  %7140 = vmatprep.mubr.f32.mxu1 %v28052_v0 }
 0x1bb   : > { %7147 = vmatprep.subr.mxu0 %v28758_v9  ;;  %7218 = vmatprep.subr.mxu1 %v28728_v1  ;;  %v24017_v1 = vld [vmem:[%s34419_s1 + $0xa8] sm:$0xff] }
 0x1bc   : > { %24013 = vmatmul.mubr.msk.f32.vlgmr.msra.gmra.mrb[2].mxu0 %vm467_vm1, %v24012_v48  ;;  %24014 = vmatmul.mubr.msk.f32.vlgmr.msra.gmra.mrb[2].mxu1 %vm467_vm1, %v24012_v48 }
 0x1bd   : > { %7148 = vmatpush1.msra.mxu0 %v28750_v55  ;;  %7219 = vmatpush1.msra.mxu1 %v28763_v10 }
 0x1be   : > { %7302 = vmatprep.subr.mxu0 %v28325_v19  ;;  %7373 = vmatprep.subr.mxu1 %v28347_v25 }
 0x1bf   : > { %7211 = vmatprep.mubr.f32.mxu0 %v28052_v0  ;;  %7282 = vmatprep.mubr.f32.mxu1 %v28052_v0 }
 0x1c0   : > { %24015 = vmatmul.mubr.msk.f32.vlgmr.msra.gmra.mrb[0].mxu0 %vm467_vm1, %v24012_v48  ;;  %24016 = vmatmul.mubr.msk.f32.vlgmr.msra.gmra.mrb[4].mxu1 %vm467_vm1, %v24012_v48 }
 0x1c1   : > { %7303 = vmatpush1.msra.mxu0 %v28305_v13  ;;  %7374 = vmatpush1.msra.mxu1 %v28319_v18  ;;  %v24022_v13 = vld [vmem:[%s34419_s1 + $0xb0] sm:$0xff]  ;;  %v24032_v18 = vld [vmem:[%s34419_s1 + $0xc0] sm:$0xff] }
 0x1c2   : > { %7444 = vmatprep.subr.mxu0 %v28337_v24  ;;  %7515 = vmatprep.subr.mxu1 %v28313_v15  ;;  %v24027_v15 = vld [vmem:[%s34419_s1 + $0xb8] sm:$0xff] }
 0x1c3   : > { %7366 = vmatprep.mubr.f32.mxu0 %v28052_v0  ;;  %7437 = vmatprep.mubr.f32.mxu1 %v28052_v0 }
 0x1c4   : > { %24018 = vmatmul.mubr.msk.f32.vlgmr.msra.gmra.mrb[2].mxu0 %vm467_vm1, %v24017_v1  ;;  %24019 = vmatmul.mubr.msk.f32.vlgmr.msra.gmra.mrb[2].mxu1 %vm467_vm1, %v24017_v1 }
 0x1c5   : > { %7445 = vmatpush1.msra.mxu0 %v28331_v22  ;;  %7516 = vmatpush1.msra.mxu1 %v28334_v23 }
 0x1c6   : > { %7599 = vmatprep.subr.mxu0 %v28397_v38  ;;  %7670 = vmatprep.subr.mxu1 %v28423_v45 }
 0x1c7   : > { %7508 = vmatprep.mubr.f32.mxu0 %v28052_v0  ;;  %7579 = vmatprep.mubr.f32.mxu1 %v28052_v0 }
 0x1c8   : > { %24020 = vmatmul.mubr.msk.f32.vlgmr.msra.gmra.mrb[0].mxu0 %vm467_vm1, %v24017_v1  ;;  %24021 = vmatmul.mubr.msk.f32.vlgmr.msra.gmra.mrb[4].mxu1 %vm467_vm1, %v24017_v1 }
 0x1c9   : > { %7600 = vmatpush1.msra.mxu0 %v28368_v31  ;;  %7671 = vmatpush1.msra.mxu1 %v28385_v35 }
 0x1ca   : > { %7741 = vmatprep.subr.mxu0 %v28416_v42  ;;  %7812 = vmatprep.subr.mxu1 %v28382_v34 }
 0x1cb   : > { %7663 = vmatprep.mubr.f32.mxu0 %v28052_v0  ;;  %7734 = vmatprep.mubr.f32.mxu1 %v28052_v0 }
 0x1cc   : > { %24023 = vmatmul.mubr.msk.f32.vlgmr.msra.gmra.mrb[2].mxu0 %vm467_vm1, %v24022_v13  ;;  %24024 = vmatmul.mubr.msk.f32.vlgmr.msra.gmra.mrb[2].mxu1 %vm467_vm1, %v24022_v13 }
 0x1cd   : > { %7742 = vmatpush1.msra.mxu0 %v28401_v39  ;;  %7813 = vmatpush1.msra.mxu1 %v28404_v40 }
 0x1ce   : > { %7896 = vmatprep.subr.mxu0 %v28457_v54  ;;  %7967 = vmatprep.subr.mxu1 %v28479_v60 }
 0x1cf   : > { %7805 = vmatprep.mubr.f32.mxu0 %v28052_v0  ;;  %7876 = vmatprep.mubr.f32.mxu1 %v28052_v0 }
 0x1d0   : > { %24025 = vmatmul.mubr.msk.f32.vlgmr.msra.gmra.mrb[0].mxu0 %vm467_vm1, %v24022_v13  ;;  %24026 = vmatmul.mubr.msk.f32.vlgmr.msra.gmra.mrb[4].mxu1 %vm467_vm1, %v24022_v13 }
 0x1d1   : > { %7897 = vmatpush1.msra.mxu0 %v28426_v46  ;;  %7968 = vmatpush1.msra.mxu1 %v28451_v53 }
 0x1d2   : > { %8038 = vmatprep.subr.mxu0 %v28474_v59  ;;  %8109 = vmatprep.subr.mxu1 %v28437_v49 }
 0x1d3   : > { %7960 = vmatprep.mubr.f32.mxu0 %v28052_v0  ;;  %8031 = vmatprep.mubr.f32.mxu1 %v28052_v0 }
 0x1d4   : > { %24028 = vmatmul.mubr.msk.f32.vlgmr.msra.gmra.mrb[2].mxu0 %vm467_vm1, %v24027_v15  ;;  %24029 = vmatmul.mubr.msk.f32.vlgmr.msra.gmra.mrb[2].mxu1 %vm467_vm1, %v24027_v15 }
 0x1d5   : > { %8039 = vmatpush1.msra.mxu0 %v28467_v57  ;;  %8110 = vmatpush1.msra.mxu1 %v28470_v58 }
 0x1d6   : > { %8193 = vmatprep.subr.mxu0 %v28512_v20  ;;  %8264 = vmatprep.subr.mxu1 %v28530_v30 }
 0x1d7   : > { %8102 = vmatprep.mubr.f32.mxu0 %v28052_v0  ;;  %8173 = vmatprep.mubr.f32.mxu1 %v28052_v0 }
 0x1d8   : > { %24030 = vmatmul.mubr.msk.f32.vlgmr.msra.gmra.mrb[0].mxu0 %vm467_vm1, %v24027_v15  ;;  %24031 = vmatmul.mubr.msk.f32.vlgmr.msra.gmra.mrb[4].mxu1 %vm467_vm1, %v24027_v15 }
 0x1d9   : > { %8194 = vmatpush1.msra.mxu0 %v28486_v63  ;;  %8265 = vmatpush1.msra.mxu1 %v28507_v17  ;;  %v8489_v19 = vpop.permute.xlu0 %8488 }
 0x1da   : > { %8335 = vmatprep.subr.mxu0 %v28525_v29  ;;  %8406 = vmatprep.subr.mxu1 %v28500_v12 }
 0x1db   : > { %8257 = vmatprep.mubr.f32.mxu0 %v28052_v0  ;;  %8328 = vmatprep.mubr.f32.mxu1 %v28052_v0 }
 0x1dc   : > { %24033 = vmatmul.mubr.msk.f32.vlgmr.msra.gmra.mrb[2].mxu0 %vm467_vm1, %v24032_v18  ;;  %24034 = vmatmul.mubr.msk.f32.vlgmr.msra.gmra.mrb[2].mxu1 %vm467_vm1, %v24032_v18 }
 0x1dd   : > { %8336 = vmatpush1.msra.mxu0 %v28518_v27  ;;  %8407 = vmatpush1.msra.mxu1 %v28521_v28 }
 0x1de   : > { %8399 = vmatprep.mubr.f32.mxu0 %v28052_v0  ;;  %8470 = vmatprep.mubr.f32.mxu1 %v28052_v0 }
 0x1e0   : > { %24035 = vmatmul.mubr.msk.f32.vlgmr.msra.gmra.mrb[0].mxu0 %vm467_vm1, %v24032_v18  ;;  %24036 = vmatmul.mubr.msk.f32.vlgmr.msra.gmra.mrb[4].mxu1 %vm467_vm1, %v24032_v18 }
 0x1e1   : > { %8721 = vmatprep.mubr.f32.mxu0 %v28052_v0  ;;  %8798 = vmatprep.mubr.f32.mxu1 %v28052_v0 }
 0x2af   : > { %v8259_v22 = vpop.f32.mrb[2].mxu0  ;;  %v8330_v23 = vpop.f32.mrb[2].mxu1 }
 0x2b0   : > { %v27210_v24 = vadd.f32 %v8259_v22, %v28846_v2  ;;  %v8261_v25 = vpop.f32.mrb[3].mxu0  ;;  %v8332_v31 = vpop.f32.mrb[3].mxu1  ;;  %v8493_v59 = vadd.f32 %v8489_v19, %v8330_v23 }
 0x2b1   : > { %v27211_v34 = vadd.f32 %v8261_v25, %v28852_v33  ;;  %v8494_v35 = vadd.f32 %v8489_v19, %v8332_v31 }
 0x2b2   : > { %v8491_v38 = vadd.f32 %v27210_v24, %v8489_v19  ;;  %v8501_v12 = vmax.f32 %v8493_v59, 0.0 }
 0x2b3   : > { %v8492_v39 = vadd.f32 %v27211_v34, %v8489_v19  ;;  %v8502_v40 = vmax.f32 %v8494_v35, 0.0  ;;  %v8401_v42 = vpop.f32.mrb[0].mxu0  ;;  %v8472_v45 = vpop.f32.mrb[4].mxu1 }
 0x2b4   : > { %v8403_v46 = vpop.f32.mrb[1].mxu0  ;;  %v8474_v49 = vpop.f32.mrb[5].mxu1  ;;  %v8495_v54 = vadd.f32 %v8489_v19, %v8401_v42  ;;  %v8499_v57 = vmax.f32 %v8491_v38, 0.0  ;;  %v8497_v58 = vadd.f32 %v8489_v19, %v8472_v45 }
 0x2b5   : > { %v8500_v53 = vmax.f32 %v8492_v39, 0.0  ;;  %8521 = vrot.lane.b32.xlu0 %v8502_v40, %s28053_s27  ;;  %v8496_v17 = vadd.f32 %v8489_v19, %v8403_v46  ;;  %v8498_v27 = vadd.f32 %v8489_v19, %v8474_v49 }
 0x2b6   : > { %v8503_v60 = vmax.f32 %v8495_v54, 0.0  ;;  %v8505_v63 = vmax.f32 %v8497_v58, 0.0 }
 0x2b7   : > { %8517 = vrot.lane.b32.xlu1 %v8500_v53, %s28053_s27  ;;  %v8504_v20 = vmax.f32 %v8496_v17, 0.0  ;;  %v8506_v28 = vmax.f32 %v8498_v27, 0.0 }
 0x2b9   : > { %8515 = vrot.lane.b32.xlu0 %v8499_v57, %s28053_s27 }
 0x2bb   : > { %8523 = vrot.lane.b32.xlu1 %v8503_v60, %s28053_s27 }
 0x2bd   : > { %8527 = vrot.lane.b32.xlu0 %v8505_v63, %s28053_s27 }
 0x2bf   : > { %8519 = vrot.lane.b32.xlu1 %v8501_v12, %s28053_s27 }
 0x2c3   : > { %8525 = vrot.lane.b32.xlu1 %v8504_v20, %s28053_s27 }
 0x2c7   : > { %8529 = vrot.lane.b32.xlu1 %v8506_v28, %s28053_s27 }
 0x327   : > { %v8522_v29 = vpop.permute.xlu0 %8521 }
 0x329   : > { %v8518_v30 = vpop.permute.xlu1 %8517 }
 0x32b   : > { %v8516_v3 = vpop.permute.xlu0 %8515 }
 0x32c   : > { %v8531_v52 = vsel %vm449_vm0, %v8516_v3, %v8518_v30 }
 0x32d   : > { %v8548_v55 = vmax.f32 %v8499_v57, %v8531_v52  ;;  %v8524_v9 = vpop.permute.xlu1 %8523  ;;  %v24037_v57 = vld [vmem:[%s34421_s3 + $0x10] sm:$0xff] }
 0x32e   : > { %v8534_v50 = vsel %vm449_vm0, %v8522_v29, %v8524_v9 }
 0x32f   : > { %8564 = vrot.lane.b32.xlu1 %v8548_v55, %s28057_s13  ;;  %v8528_v51 = vpop.permute.xlu0 %8527  ;;  %v8551_v62 = vmax.f32 %v8502_v40, %v8534_v50  ;;  %v8606_v50 = vld [vmem:[%s34421_s3 + $0x8] sm:$0xff] }
 0x331   : > { %v8520_v10 = vpop.permute.xlu1 %8519 }
 0x332   : > { %v8532_v4 = vsel %vm449_vm0, %v8518_v30, %v8520_v10  ;;  %v8533_v32 = vsel %vm449_vm0, %v8520_v10, %v8522_v29 }
 0x333   : > { %v8549_v2 = vmax.f32 %v8500_v53, %v8532_v4  ;;  %v8550_v33 = vmax.f32 %v8501_v12, %v8533_v32  ;;  %v24038_v12 = vld [vmem:[%s34421_s3 + $0x18] sm:$0xff]  ;;  %v8605_v4 = vld [vmem:[%s34421_s3] sm:$0xff] }
 0x335   : > { %8568 = vrot.lane.b32.xlu1 %v8550_v33, %s28057_s13  ;;  %8566 = vrot.lane.b32.xlu0 %v8549_v2, %s28057_s13  ;;  %v8526_v56 = vpop.permute.xlu1 %8525 }
 0x336   : > { %v8536_v61 = vsel %vm449_vm0, %v8526_v56, %v8528_v51  ;;  %v8535_v11 = vsel %vm449_vm0, %v8524_v9, %v8526_v56  ;;  %v17206_v56 = vld [vmem:[%s34422_s4] sm:$0xff] }
 0x337   : > { %v8553_v14 = vmax.f32 %v8504_v20, %v8536_v61  ;;  %v8552_v26 = vmax.f32 %v8503_v60, %v8535_v11 }
 0x339   : > { %8570 = vrot.lane.b32.xlu0 %v8551_v62, %s28057_s13  ;;  %8574 = vrot.lane.b32.xlu1 %v8553_v14, %s28057_s13  ;;  %v8530_v16 = vpop.permute.xlu1 %8529 }
 0x33a   : > { %v8547_v21 = vsel %vm449_vm0, %v8530_v16, %v8516_v3  ;;  %v8537_v6 = vsel %vm449_vm0, %v8528_v51, %v8530_v16  ;;  %vm9664_vm0 = vcmask 998400  }
 0x33b   : > { %v8555_v5 = vmax.f32 %v8506_v28, %v8547_v21  ;;  %v8554_v36 = vmax.f32 %v8505_v63, %v8537_v6 }
 0x33d   : > { %8572 = vrot.lane.b32.xlu0 %v8552_v26, %s28057_s13  ;;  %8578 = vrot.lane.b32.xlu1 %v8555_v5, %s28057_s13 }
 0x341   : > { %8576 = vrot.lane.b32.xlu0 %v8554_v36, %s28057_s13  ;;  %s34457_s13 = smov 122  }
 0x3a1   : > { %v8565_v37 = vpop.permute.xlu1 %8564 }
 0x3a7   : > { %v8567_v41 = vpop.permute.xlu0 %8566  ;;  %v8569_v7 = vpop.permute.xlu1 %8568 }
 0x3a8   : > { %v8580_v8 = vsel %vm2053_vm5, %v8565_v37, %v8567_v41  ;;  %v8581_v44 = vsel %vm2053_vm5, %v8567_v41, %v8569_v7 }
 0x3a9   : > { %v29081_v43 = vmax.f32 %v8548_v55, %v8580_v8  ;;  %v29087_v1 = vmax.f32 %v8549_v2, %v8581_v44 }
 0x3ab   : > { %v8571_v47 = vpop.permute.xlu0 %8570  ;;  %8618 = vrot.lane.b32.xlu0 %v29081_v43, %s28054_s28  ;;  %v8575_v15 = vpop.permute.xlu1 %8574 }
 0x3ac   : > { %v8582_v48 = vsel %vm2053_vm5, %v8569_v7, %v8571_v47 }
 0x3ad   : > { %v29089_v13 = vmax.f32 %v8550_v33, %v8582_v48 }
 0x3af   : > { %v8573_v18 = vpop.permute.xlu0 %8572  ;;  %8622 = vrot.lane.b32.xlu1 %v29089_v13, %s28054_s28  ;;  %8620 = vrot.lane.b32.xlu0 %v29087_v1, %s28054_s28  ;;  %v8579_v25 = vpop.permute.xlu1 %8578 }
 0x3b0   : > { %v8583_v19 = vsel %vm2053_vm5, %v8571_v47, %v8573_v18  ;;  %v8584_v22 = vsel %vm2053_vm5, %v8573_v18, %v8575_v15  ;;  %v8596_v40 = vsel %vm2053_vm5, %v8579_v25, %v8565_v37  ;;  %v24055_v37 = vld [vmem:[%s34421_s3 + $0x20] sm:$0xff]  ;;  %v24056_v47 = vld [vmem:[%s34421_s3 + $0x28] sm:$0xff] }
 0x3b1   : > { %v29097_v23 = vmax.f32 %v8551_v62, %v8583_v19  ;;  %v29099_v24 = vmax.f32 %v8552_v26, %v8584_v22  ;;  %v29116_v42 = vmax.f32 %v8555_v5, %v8596_v40 }
 0x3b3   : > { %v8577_v31 = vpop.permute.xlu0 %8576  ;;  %8624 = vrot.lane.b32.xlu1 %v29097_v23, %s28054_s28  ;;  %8626 = vrot.lane.b32.xlu0 %v29099_v24, %s28054_s28 }
 0x3b4   : > { %v8585_v34 = vsel %vm2053_vm5, %v8575_v15, %v8577_v31  ;;  %v8586_v35 = vsel %vm2053_vm5, %v8577_v31, %v8579_v25  ;;  %vm11496_vm5 = vcmask 474112  }
 0x3b5   : > { %v29107_v38 = vmax.f32 %v8553_v14, %v8585_v34  ;;  %v29109_v39 = vmax.f32 %v8554_v36, %v8586_v35 }
 0x3b7   : > { %8628 = vrot.lane.b32.xlu1 %v29107_v38, %s28054_s28  ;;  %8630 = vrot.lane.b32.xlu0 %v29109_v39, %s28054_s28 }
 0x3bb   : > { %8632 = vrot.lane.b32.xlu1 %v29116_v42, %s28054_s28  ;;  %9284 = vrot.lane.b32.xlu0 %v29087_v1, %s28056_s30 }
 0x3bf   : > { %9286 = vrot.lane.b32.xlu1 %v29089_v13, %s28056_s30  ;;  %9282 = vrot.lane.b32.xlu0 %v29081_v43, %s28056_s30 }
 0x3c3   : > { %9288 = vrot.lane.b32.xlu1 %v29097_v23, %s28056_s30  ;;  %9290 = vrot.lane.b32.xlu0 %v29099_v24, %s28056_s30 }
 0x3c7   : > { %9292 = vrot.lane.b32.xlu1 %v29107_v38, %s28056_s30  ;;  %9294 = vrot.lane.b32.xlu0 %v29109_v39, %s28056_s30 }
 0x3cb   : > { %9296 = vrot.lane.b32.xlu1 %v29116_v42, %s28056_s30  ;;  %9650 = vrot.lane.b32.xlu0 %v29087_v1, %s34457_s13 }
 0x3cf   : > { %9652 = vrot.lane.b32.xlu1 %v29089_v13, %s34457_s13  ;;  %9648 = vrot.lane.b32.xlu0 %v29081_v43, %s34457_s13 }
 0x3d3   : > { %9654 = vrot.lane.b32.xlu1 %v29097_v23, %s34457_s13  ;;  %9656 = vrot.lane.b32.xlu0 %v29099_v24, %s34457_s13 }
 0x3d7   : > { %9658 = vrot.lane.b32.xlu1 %v29107_v38, %s34457_s13  ;;  %9660 = vrot.lane.b32.xlu0 %v29109_v39, %s34457_s13 }
 0x3db   : > { %9662 = vrot.lane.b32.xlu1 %v29116_v42, %s34457_s13  ;;  %10017 = vrot.lane.b32.xlu0 %v29087_v1, %s34456_s25  ;;  %s34509_s13 = smov 120  }
 0x3df   : > { %10019 = vrot.lane.b32.xlu1 %v29089_v13, %s34456_s25  ;;  %10015 = vrot.lane.b32.xlu0 %v29081_v43, %s34456_s25 }
 0x3e3   : > { %10021 = vrot.lane.b32.xlu1 %v29097_v23, %s34456_s25  ;;  %10023 = vrot.lane.b32.xlu0 %v29099_v24, %s34456_s25 }
 0x3e7   : > { %10025 = vrot.lane.b32.xlu1 %v29107_v38, %s34456_s25  ;;  %10027 = vrot.lane.b32.xlu0 %v29109_v39, %s34456_s25 }
 0x3eb   : > { %10029 = vrot.lane.b32.xlu1 %v29116_v42, %s34456_s25  ;;  %10384 = vrot.lane.b32.xlu0 %v29087_v1, %s28062_s14  ;;  %s28083_s25 = smov 116  }
 0x3ef   : > { %10386 = vrot.lane.b32.xlu1 %v29089_v13, %s28062_s14  ;;  %10382 = vrot.lane.b32.xlu0 %v29081_v43, %s28062_s14 }
 0x3f3   : > { %10388 = vrot.lane.b32.xlu1 %v29097_v23, %s28062_s14  ;;  %10390 = vrot.lane.b32.xlu0 %v29099_v24, %s28062_s14 }
 0x3f7   : > { %10392 = vrot.lane.b32.xlu1 %v29107_v38, %s28062_s14  ;;  %10394 = vrot.lane.b32.xlu0 %v29109_v39, %s28062_s14 }
 0x3fb   : > { %10396 = vrot.lane.b32.xlu1 %v29116_v42, %s28062_s14  ;;  %10750 = vrot.lane.b32.xlu0 %v29087_v1, %s28064_s20 }
 0x3ff   : > { %10752 = vrot.lane.b32.xlu1 %v29089_v13, %s28064_s20  ;;  %10748 = vrot.lane.b32.xlu0 %v29081_v43, %s28064_s20 }
 0x403   : > { %10754 = vrot.lane.b32.xlu1 %v29097_v23, %s28064_s20  ;;  %10756 = vrot.lane.b32.xlu0 %v29099_v24, %s28064_s20 }
 0x407   : > { %10758 = vrot.lane.b32.xlu1 %v29107_v38, %s28064_s20  ;;  %10760 = vrot.lane.b32.xlu0 %v29109_v39, %s28064_s20 }
 0x40b   : > { %10762 = vrot.lane.b32.xlu1 %v29116_v42, %s28064_s20  ;;  %11116 = vrot.lane.b32.xlu0 %v29087_v1, %s28066_s17  ;;  %s28075_s20 = smov 58  }
 0x40f   : > { %11118 = vrot.lane.b32.xlu1 %v29089_v13, %s28066_s17  ;;  %11114 = vrot.lane.b32.xlu0 %v29081_v43, %s28066_s17 }
 0x413   : > { %11120 = vrot.lane.b32.xlu1 %v29097_v23, %s28066_s17  ;;  %11122 = vrot.lane.b32.xlu0 %v29099_v24, %s28066_s17 }
 0x417   : > { %11124 = vrot.lane.b32.xlu1 %v29107_v38, %s28066_s17  ;;  %11126 = vrot.lane.b32.xlu0 %v29109_v39, %s28066_s17 }
 0x41b   : > { %11128 = vrot.lane.b32.xlu1 %v29116_v42, %s28066_s17  ;;  %11482 = vrot.lane.b32.xlu0 %v29087_v1, %s28075_s20 }
 0x41d   : > { %v8619_v45 = vpop.permute.xlu0 %8618 }
 0x41f   : > { %11484 = vrot.lane.b32.xlu1 %v29089_v13, %s28075_s20  ;;  %11480 = vrot.lane.b32.xlu0 %v29081_v43, %s28075_s20 }
 0x421   : > { %v8621_v46 = vpop.permute.xlu0 %8620  ;;  %v8623_v49 = vpop.permute.xlu1 %8622 }
 0x422   : > { %v29223_v53 = vsel %vm1060_vm2, %v8621_v46, %v8623_v49  ;;  %v29226_v54 = vsel %vm1060_vm2, %v8619_v45, %v8621_v46 }
 0x423   : > { %11486 = vrot.lane.b32.xlu1 %v29097_v23, %s28075_s20  ;;  %11488 = vrot.lane.b32.xlu0 %v29099_v24, %s28075_s20 }
 0x424   : > { %8657 = vmatprep.subr.mxu0 %v29223_v53 }
 0x425   : > { %8658 = vmatpush1.msra.mxu0 %v29226_v54  ;;  %v8627_v58 = vpop.permute.xlu0 %8626  ;;  %v8625_v59 = vpop.permute.xlu1 %8624 }
 0x426   : > { %24039 = vmatmul.mubr.msk.f32.vlgmr.msra.gmra.mrb[4].mxu0 %vm467_vm1, %v24037_v57  ;;  %v29239_v60 = vsel %vm1060_vm2, %v8625_v59, %v8627_v58  ;;  %v29242_v63 = vsel %vm1060_vm2, %v8623_v49, %v8625_v59  ;;  %v24065_v49 = vld [vmem:[%s34421_s3 + $0x30] sm:$0xff] }
 0x427   : > { %11490 = vrot.lane.b32.xlu1 %v29107_v38, %s28075_s20  ;;  %11492 = vrot.lane.b32.xlu0 %v29109_v39, %s28075_s20 }
 0x428   : > { %8734 = vmatprep.subr.mxu1 %v29239_v60  ;;  %8727 = vmatprep.mubr.f32.mxu0 %v28052_v0 }
 0x429   : > { %8735 = vmatpush1.msra.mxu1 %v29242_v63  ;;  %v8631_v17 = vpop.permute.xlu0 %8630  ;;  %v8629_v20 = vpop.permute.xlu1 %8628 }
 0x42a   : > { %24040 = vmatmul.mubr.msk.f32.gmra.mrb[6].mxu0 %vm467_vm1, %v24038_v12  ;;  %24041 = vmatmul.mubr.msk.f32.vlgmr.msra.gmra.mrb[6].mxu1 %vm467_vm1, %v24037_v57  ;;  %v29257_v27 = vsel %vm1060_vm2, %v8629_v20, %v8631_v17  ;;  %v29260_v28 = vsel %vm1060_vm2, %v8627_v58, %v8629_v20 }
 0x42b   : > { %11494 = vrot.lane.b32.xlu1 %v29116_v42, %s28075_s20  ;;  %11849 = vrot.lane.b32.xlu0 %v29087_v1, %s28076_s26 }
 0x42c   : > { %8811 = vmatprep.subr.mxu0 %v29257_v27  ;;  %8804 = vmatprep.mubr.f32.mxu1 %v28052_v0 }
 0x42d   : > { %8812 = vmatpush1.msra.mxu0 %v29260_v28  ;;  %8875 = vmatprep.mubr.f32.mxu0 %v28052_v0  ;;  %v9285_v29 = vpop.permute.xlu0 %9284  ;;  %v8633_v30 = vpop.permute.xlu1 %8632 }
 0x42e   : > { %24042 = vmatmul.mubr.msk.f32.gmra.mrb[8].mxu1 %vm467_vm1, %v24038_v12  ;;  %24043 = vmatmul.mubr.msk.f32.vlgmr.msra.gmra.mrb[8].mxu0 %vm467_vm1, %v24037_v57  ;;  %v29273_v3 = vsel %vm1060_vm2, %v8633_v30, %v8619_v45  ;;  %v29279_v52 = vsel %vm1060_vm2, %v8631_v17, %v8633_v30  ;;  %v24066_v17 = vld [vmem:[%s34421_s3 + $0x38] sm:$0xff] }
 0x42f   : > { %8971 = vmatprep.subr.mxu0 %v29087_v1  ;;  %11851 = vrot.lane.b32.xlu1 %v29089_v13, %s28076_s26 }
 0x430   : > { %8972 = vmatpush1.msra.mxu0 %v29081_v43  ;;  %11847 = vrot.lane.b32.xlu0 %v29081_v43, %s28076_s26 }
 0x431   : > { %8888 = vmatprep.subr.mxu1 %v29273_v3  ;;  %9125 = vmatprep.subr.mxu0 %v29107_v38  ;;  %v9283_v55 = vpop.permute.xlu0 %9282  ;;  %v9287_v9 = vpop.permute.xlu1 %9286 }
 0x432   : > { %8881 = vmatprep.mubr.f32.mxu0 %v28052_v0  ;;  %8889 = vmatpush1.msra.mxu1 %v29279_v52  ;;  %v29307_v2 = vsel %vm1722_vm4, %v9285_v29, %v9287_v9  ;;  %v29336_v11 = vsel %vm1722_vm4, %v9283_v55, %v9285_v29 }
 0x433   : > { %8952 = vmatprep.mubr.f32.mxu1 %v28052_v0  ;;  %24044 = vmatmul.mubr.msk.f32.gmra.mrb[10].mxu0 %vm467_vm1, %v24038_v12 }
 0x434   : > { %24045 = vmatmul.mubr.msk.f32.vlgmr.msra.gmra.mrb[10].mxu1 %vm467_vm1, %v24037_v57  ;;  %9048 = vmatprep.subr.mxu1 %v29097_v23 }
 0x435   : > { %9049 = vmatpush1.msra.mxu1 %v29089_v13  ;;  %11853 = vrot.lane.b32.xlu1 %v29097_v23, %s28076_s26  ;;  %v9291_v10 = vpop.permute.xlu0 %9290  ;;  %v9289_v32 = vpop.permute.xlu1 %9288 }
 0x436   : > { %11855 = vrot.lane.b32.xlu0 %v29099_v24, %s28076_s26  ;;  %9202 = vmatprep.subr.mxu1 %v29116_v42  ;;  %v29326_v61 = vsel %vm1722_vm4, %v9289_v32, %v9291_v10  ;;  %v29348_v5 = vsel %vm1722_vm4, %v9287_v9, %v9289_v32 }
 0x437   : > { %8958 = vmatprep.mubr.f32.mxu1 %v28052_v0  ;;  %9035 = vmatprep.mubr.f32.mxu0 %v28052_v0 }
 0x438   : > { %24046 = vmatmul.mubr.msk.f32.gmra.mrb[12].mxu1 %vm467_vm1, %v24038_v12  ;;  %24047 = vmatmul.mubr.msk.f32.vlgmr.msra.gmra.mrb[4].mxu0 %vm467_vm1, %v8605_v4 }
 0x439   : > { %9126 = vmatpush1.msra.mxu0 %v29099_v24  ;;  %11857 = vrot.lane.b32.xlu1 %v29107_v38, %s28076_s26  ;;  %v9295_v33 = vpop.permute.xlu0 %9294  ;;  %v9293_v51 = vpop.permute.xlu1 %9292 }
 0x43a   : > { %9321 = vmatprep.subr.mxu0 %v29307_v2  ;;  %11859 = vrot.lane.b32.xlu0 %v29109_v39, %s28076_s26  ;;  %v29340_v16 = vsel %vm1722_vm4, %v9293_v51, %v9295_v33  ;;  %v29363_v7 = vsel %vm1722_vm4, %v9291_v10, %v9293_v51 }
 0x43b   : > { %9041 = vmatprep.mubr.f32.mxu0 %v28052_v0  ;;  %9112 = vmatprep.mubr.f32.mxu1 %v28052_v0 }
 0x43c   : > { %24048 = vmatmul.mubr.msk.f32.gmra.mrb[6].mxu0 %vm467_vm1, %v8606_v50  ;;  %24049 = vmatmul.mubr.msk.f32.vlgmr.msra.gmra.mrb[6].mxu1 %vm467_vm1, %v8605_v4 }
 0x43d   : > { %9203 = vmatpush1.msra.mxu1 %v29109_v39  ;;  %11861 = vrot.lane.b32.xlu1 %v29116_v42, %s28076_s26  ;;  %v9651_v62 = vpop.permute.xlu0 %9650  ;;  %v9297_v14 = vpop.permute.xlu1 %9296  ;;  %s28080_s26 = smov 121  }
 0x43e   : > { %9398 = vmatprep.subr.mxu1 %v29326_v61  ;;  %17210 = vperm.xlu0 %27839, %v17206_v56   ;;  %v29352_v6 = vsel %vm1722_vm4, %v9297_v14, %v9283_v55  ;;  %v29378_v15 = vsel %vm1722_vm4, %v9295_v33, %v9297_v14  ;;  %vm10031_vm4 = vcmask 982016  }
 0x43f   : > { %9118 = vmatprep.mubr.f32.mxu1 %v28052_v0  ;;  %9189 = vmatprep.mubr.f32.mxu0 %v28052_v0 }
 0x440   : > { %24050 = vmatmul.mubr.msk.f32.gmra.mrb[8].mxu1 %vm467_vm1, %v8606_v50  ;;  %24051 = vmatmul.mubr.msk.f32.vlgmr.msra.gmra.mrb[8].mxu0 %vm467_vm1, %v8605_v4 }
 0x441   : > { %9322 = vmatpush1.msra.mxu0 %v29336_v11  ;;  %9195 = vmatprep.mubr.f32.mxu0 %v28052_v0  ;;  %v9649_v21 = vpop.permute.xlu0 %9648  ;;  %v9653_v26 = vpop.permute.xlu1 %9652 }
 0x442   : > { %9475 = vmatprep.subr.mxu0 %v29340_v16  ;;  %9266 = vmatprep.mubr.f32.mxu1 %v28052_v0  ;;  %v29367_v8 = vsel %vm9664_vm0, %v9651_v62, %v9653_v26  ;;  %v29390_v25 = vsel %vm9664_vm0, %v9649_v21, %v9651_v62  ;;  %v24075_v62 = vld [vmem:[%s34421_s3 + $0x40] sm:$0xff] }
 0x444   : > { %24052 = vmatmul.mubr.msk.f32.gmra.mrb[10].mxu0 %vm467_vm1, %v8606_v50  ;;  %24053 = vmatmul.mubr.msk.f32.vlgmr.msra.gmra.mrb[10].mxu1 %vm467_vm1, %v8605_v4 }
 0x445   : > { %9399 = vmatpush1.msra.mxu1 %v29348_v5  ;;  %9272 = vmatprep.mubr.f32.mxu1 %v28052_v0  ;;  %v9657_v36 = vpop.permute.xlu0 %9656  ;;  %v9655_v41 = vpop.permute.xlu1 %9654 }
 0x446   : > { %9552 = vmatprep.subr.mxu1 %v29352_v6  ;;  %9385 = vmatprep.mubr.f32.mxu0 %v28052_v0  ;;  %v29382_v18 = vsel %vm9664_vm0, %v9655_v41, %v9657_v36  ;;  %v29402_v40 = vsel %vm9664_vm0, %v9653_v26, %v9655_v41 }
 0x448   : > { %24054 = vmatmul.mubr.msk.f32.gmra.mrb[12].mxu1 %vm467_vm1, %v8606_v50  ;;  %24057 = vmatmul.mubr.msk.f32.vlgmr.msra.gmra.mrb[4].mxu0 %vm467_vm1, %v24055_v37 }
 0x449   : > { %9476 = vmatpush1.msra.mxu0 %v29363_v7  ;;  %9391 = vmatprep.mubr.f32.mxu0 %v28052_v0  ;;  %v9661_v44 = vpop.permute.xlu0 %9660  ;;  %v9659_v48 = vpop.permute.xlu1 %9658 }
 0x44a   : > { %9688 = vmatprep.subr.mxu0 %v29367_v8  ;;  %9462 = vmatprep.mubr.f32.mxu1 %v28052_v0  ;;  %v29394_v31 = vsel %vm9664_vm0, %v9659_v48, %v9661_v44  ;;  %v29417_v58 = vsel %vm9664_vm0, %v9657_v36, %v9659_v48 }
 0x44c   : > { %24058 = vmatmul.mubr.msk.f32.gmra.mrb[6].mxu0 %vm467_vm1, %v24056_v47  ;;  %24059 = vmatmul.mubr.msk.f32.vlgmr.msra.gmra.mrb[6].mxu1 %vm467_vm1, %v24055_v37 }
 0x44d   : > { %9553 = vmatpush1.msra.mxu1 %v29378_v15  ;;  %9468 = vmatprep.mubr.f32.mxu1 %v28052_v0  ;;  %v10018_v19 = vpop.permute.xlu0 %10017  ;;  %v9663_v22 = vpop.permute.xlu1 %9662 }
 0x44e   : > { %9765 = vmatprep.subr.mxu1 %v29382_v18  ;;  %9539 = vmatprep.mubr.f32.mxu0 %v28052_v0  ;;  %v29406_v45 = vsel %vm9664_vm0, %v9663_v22, %v9649_v21  ;;  %v29432_v29 = vsel %vm9664_vm0, %v9661_v44, %v9663_v22 }
 0x450   : > { %24060 = vmatmul.mubr.msk.f32.gmra.mrb[8].mxu1 %vm467_vm1, %v24056_v47  ;;  %24061 = vmatmul.mubr.msk.f32.vlgmr.msra.gmra.mrb[8].mxu0 %vm467_vm1, %v24055_v37 }
 0x451   : > { %9689 = vmatpush1.msra.mxu0 %v29390_v25  ;;  %9545 = vmatprep.mubr.f32.mxu0 %v28052_v0  ;;  %v10016_v34 = vpop.permute.xlu0 %10015  ;;  %v10020_v35 = vpop.permute.xlu1 %10019 }
 0x452   : > { %9842 = vmatprep.subr.mxu0 %v29394_v31  ;;  %9616 = vmatprep.mubr.f32.mxu1 %v28052_v0  ;;  %v29421_v59 = vsel %vm10031_vm4, %v10018_v19, %v10020_v35  ;;  %v29444_v10 = vsel %vm10031_vm4, %v10016_v34, %v10018_v19 }
 0x454   : > { %24062 = vmatmul.mubr.msk.f32.gmra.mrb[10].mxu0 %vm467_vm1, %v24056_v47  ;;  %24063 = vmatmul.mubr.msk.f32.vlgmr.msra.gmra.mrb[10].mxu1 %vm467_vm1, %v24055_v37  ;;  %v24076_v37 = vld [vmem:[%s34421_s3 + $0x48] sm:$0xff] }
 0x455   : > { %9766 = vmatpush1.msra.mxu1 %v29402_v40  ;;  %9622 = vmatprep.mubr.f32.mxu1 %v28052_v0  ;;  %v10024_v46 = vpop.permute.xlu0 %10023  ;;  %v10022_v57 = vpop.permute.xlu1 %10021 }
 0x456   : > { %9919 = vmatprep.subr.mxu1 %v29406_v45  ;;  %9752 = vmatprep.mubr.f32.mxu0 %v28052_v0  ;;  %v29436_v30 = vsel %vm10031_vm4, %v10022_v57, %v10024_v46  ;;  %v29456_v50 = vsel %vm10031_vm4, %v10020_v35, %v10022_v57 }
 0x458   : > { %24064 = vmatmul.mubr.msk.f32.gmra.mrb[12].mxu1 %vm467_vm1, %v24056_v47  ;;  %24067 = vmatmul.mubr.msk.f32.vlgmr.msra.gmra.mrb[4].mxu0 %vm467_vm1, %v24065_v49 }
 0x459   : > { %9843 = vmatpush1.msra.mxu0 %v29417_v58  ;;  %9758 = vmatprep.mubr.f32.mxu0 %v28052_v0  ;;  %v10028_v12 = vpop.permute.xlu0 %10027  ;;  %v10026_v20 = vpop.permute.xlu1 %10025 }
 0x45a   : > { %10055 = vmatprep.subr.mxu0 %v29421_v59  ;;  %9829 = vmatprep.mubr.f32.mxu1 %v28052_v0  ;;  %v29448_v4 = vsel %vm10031_vm4, %v10026_v20, %v10028_v12  ;;  %v29471_v21 = vsel %vm10031_vm4, %v10024_v46, %v10026_v20 }
 0x45c   : > { %24068 = vmatmul.mubr.msk.f32.gmra.mrb[6].mxu0 %vm467_vm1, %v24066_v17  ;;  %24069 = vmatmul.mubr.msk.f32.vlgmr.msra.gmra.mrb[6].mxu1 %vm467_vm1, %v24065_v49 }
 0x45d   : > { %9920 = vmatpush1.msra.mxu1 %v29432_v29  ;;  %9835 = vmatprep.mubr.f32.mxu1 %v28052_v0  ;;  %v10385_v55 = vpop.permute.xlu0 %10384  ;;  %v10030_v9 = vpop.permute.xlu1 %10029 }
 0x45e   : > { %10132 = vmatprep.subr.mxu1 %v29436_v30  ;;  %9906 = vmatprep.mubr.f32.mxu0 %v28052_v0  ;;  %v29460_v51 = vsel %vm10031_vm4, %v10030_v9, %v10016_v34  ;;  %v29486_v44 = vsel %vm10031_vm4, %v10028_v12, %v10030_v9 }
 0x460   : > { %24070 = vmatmul.mubr.msk.f32.gmra.mrb[8].mxu1 %vm467_vm1, %v24066_v17  ;;  %24071 = vmatmul.mubr.msk.f32.vlgmr.msra.gmra.mrb[8].mxu0 %vm467_vm1, %v24065_v49 }
 0x461   : > { %10056 = vmatpush1.msra.mxu0 %v29444_v10  ;;  %9912 = vmatprep.mubr.f32.mxu0 %v28052_v0  ;;  %v10383_v32 = vpop.permute.xlu0 %10382  ;;  %v10387_v33 = vpop.permute.xlu1 %10386 }
 0x462   : > { %10209 = vmatprep.subr.mxu0 %v29448_v4  ;;  %9983 = vmatprep.mubr.f32.mxu1 %v28052_v0  ;;  %v29475_v26 = vsel %vm3708_vm10, %v10385_v55, %v10387_v33  ;;  %v29498_v22 = vsel %vm3708_vm10, %v10383_v32, %v10385_v55 }
 0x464   : > { %24072 = vmatmul.mubr.msk.f32.gmra.mrb[10].mxu0 %vm467_vm1, %v24066_v17  ;;  %24073 = vmatmul.mubr.msk.f32.vlgmr.msra.gmra.mrb[10].mxu1 %vm467_vm1, %v24065_v49 }
 0x465   : > { %10133 = vmatpush1.msra.mxu1 %v29456_v50  ;;  %9989 = vmatprep.mubr.f32.mxu1 %v28052_v0  ;;  %v10391_v56 = vpop.permute.xlu0 %10390  ;;  %v10389_v14 = vpop.permute.xlu1 %10388 }
 0x466   : > { %10286 = vmatprep.subr.mxu1 %v29460_v51  ;;  %10119 = vmatprep.mubr.f32.mxu0 %v28052_v0  ;;  %v29490_v47 = vsel %vm3708_vm10, %v10389_v14, %v10391_v56  ;;  %v29510_v49 = vsel %vm3708_vm10, %v10387_v33, %v10389_v14  ;;  %v24086_v33 = vld [vmem:[%s34421_s3 + $0x58] sm:$0xff] }
 0x468   : > { %24074 = vmatmul.mubr.msk.f32.gmra.mrb[12].mxu1 %vm467_vm1, %v24066_v17  ;;  %24077 = vmatmul.mubr.msk.f32.vlgmr.msra.gmra.mrb[4].mxu0 %vm467_vm1, %v24075_v62  ;;  %v24085_v17 = vld [vmem:[%s34421_s3 + $0x50] sm:$0xff] }
 0x469   : > { %10210 = vmatpush1.msra.mxu0 %v29471_v21  ;;  %10125 = vmatprep.mubr.f32.mxu0 %v28052_v0  ;;  %v10395_v36 = vpop.permute.xlu0 %10394  ;;  %v10393_v41 = vpop.permute.xlu1 %10392 }
 0x46a   : > { %10421 = vmatprep.subr.mxu0 %v29475_v26  ;;  %10196 = vmatprep.mubr.f32.mxu1 %v28052_v0  ;;  %v29502_v34 = vsel %vm3708_vm10, %v10393_v41, %v10395_v36  ;;  %v29525_v55 = vsel %vm3708_vm10, %v10391_v56, %v10393_v41 }
 0x46b   : > { %34458 = vst [vmem:[#allocation2_spill] sm:$0xff] %v29502_v34 }
 0x46c   : > { %24078 = vmatmul.mubr.msk.f32.gmra.mrb[6].mxu0 %vm467_vm1, %v24076_v37  ;;  %24079 = vmatmul.mubr.msk.f32.vlgmr.msra.gmra.mrb[6].mxu1 %vm467_vm1, %v24075_v62 }
 0x46d   : > { %10287 = vmatpush1.msra.mxu1 %v29486_v44  ;;  %10202 = vmatprep.mubr.f32.mxu1 %v28052_v0  ;;  %v10751_v48 = vpop.permute.xlu0 %10750  ;;  %v10397_v19 = vpop.permute.xlu1 %10396 }
 0x46e   : > { %10498 = vmatprep.subr.mxu1 %v29490_v47  ;;  %10273 = vmatprep.mubr.f32.mxu0 %v28052_v0  ;;  %v29514_v57 = vsel %vm3708_vm10, %v10397_v19, %v10383_v32  ;;  %v29540_v56 = vsel %vm3708_vm10, %v10395_v36, %v10397_v19 }
 0x46f   : > { %34459 = vst [vmem:[#allocation3_spill] sm:$0xff] %v29514_v57 }
 0x470   : > { %24080 = vmatmul.mubr.msk.f32.gmra.mrb[8].mxu1 %vm467_vm1, %v24076_v37  ;;  %24081 = vmatmul.mubr.msk.f32.vlgmr.msra.gmra.mrb[8].mxu0 %vm467_vm1, %v24075_v62 }
 0x471   : > { %10422 = vmatpush1.msra.mxu0 %v29498_v22  ;;  %10279 = vmatprep.mubr.f32.mxu0 %v28052_v0  ;;  %v10749_v35 = vpop.permute.xlu0 %10748  ;;  %v10753_v46 = vpop.permute.xlu1 %10752 }
 0x472   : > { %10575 = vmatprep.subr.mxu0 %v29502_v34  ;;  %10350 = vmatprep.mubr.f32.mxu1 %v28052_v0  ;;  %v29529_v9 = vsel %vm4370_vm12, %v10751_v48, %v10753_v46  ;;  %v29552_v36 = vsel %vm4370_vm12, %v10749_v35, %v10751_v48 }
 0x473   : > { %34460 = vst [vmem:[#allocation4_spill] sm:$0xff] %v29529_v9  ;;  %34462 = vst [vmem:[#allocation6_spill] sm:$0xff] %v29552_v36 }
 0x474   : > { %24082 = vmatmul.mubr.msk.f32.gmra.mrb[10].mxu0 %vm467_vm1, %v24076_v37  ;;  %24083 = vmatmul.mubr.msk.f32.vlgmr.msra.gmra.mrb[10].mxu1 %vm467_vm1, %v24075_v62 }
 0x475   : > { %10499 = vmatpush1.msra.mxu1 %v29510_v49  ;;  %10356 = vmatprep.mubr.f32.mxu1 %v28052_v0  ;;  %v10757_v12 = vpop.permute.xlu0 %10756  ;;  %v10755_v20 = vpop.permute.xlu1 %10754 }
 0x476   : > { %10652 = vmatprep.subr.mxu1 %v29514_v57  ;;  %10485 = vmatprep.mubr.f32.mxu0 %v28052_v0  ;;  %v29544_v14 = vsel %vm4370_vm12, %v10755_v20, %v10757_v12  ;;  %v29564_v48 = vsel %vm4370_vm12, %v10753_v46, %v10755_v20  ;;  %v24096_v20 = vld [vmem:[%s34421_s3 + $0x68] sm:$0xff] }
 0x477   : > { %34461 = vst [vmem:[#allocation5_spill] sm:$0xff] %v29544_v14  ;;  %34464 = vst [vmem:[#allocation8_spill] sm:$0xff] %v29564_v48 }
 0x478   : > { %24084 = vmatmul.mubr.msk.f32.gmra.mrb[12].mxu1 %vm467_vm1, %v24076_v37  ;;  %24087 = vmatmul.mubr.msk.f32.vlgmr.msra.gmra.mrb[4].mxu0 %vm467_vm1, %v24085_v17 }
 0x479   : > { %10576 = vmatpush1.msra.mxu0 %v29525_v55  ;;  %10491 = vmatprep.mubr.f32.mxu0 %v28052_v0  ;;  %v10761_v32 = vpop.permute.xlu0 %10760  ;;  %v10759_v62 = vpop.permute.xlu1 %10758 }
 0x47a   : > { %10787 = vmatprep.subr.mxu0 %v29529_v9  ;;  %10562 = vmatprep.mubr.f32.mxu1 %v28052_v0  ;;  %v29556_v19 = vsel %vm4370_vm12, %v10759_v62, %v10761_v32  ;;  %v29577_v46 = vsel %vm4370_vm12, %v10757_v12, %v10759_v62 }
 0x47b   : > { %34463 = vst [vmem:[#allocation7_spill] sm:$0xff] %v29556_v19  ;;  %34466 = vst [vmem:[#allocation10_spill] sm:$0xff] %v29577_v46 }
 0x47c   : > { %24088 = vmatmul.mubr.msk.f32.gmra.mrb[6].mxu0 %vm467_vm1, %v24086_v33  ;;  %24089 = vmatmul.mubr.msk.f32.vlgmr.msra.gmra.mrb[6].mxu1 %vm467_vm1, %v24085_v17 }
 0x47d   : > { %10653 = vmatpush1.msra.mxu1 %v29540_v56  ;;  %10568 = vmatprep.mubr.f32.mxu1 %v28052_v0  ;;  %v11117_v37 = vpop.permute.xlu0 %11116  ;;  %v10763_v41 = vpop.permute.xlu1 %10762 }
 0x47e   : > { %10864 = vmatprep.subr.mxu1 %v29544_v14  ;;  %10639 = vmatprep.mubr.f32.mxu0 %v28052_v0  ;;  %v29592_v12 = vsel %vm4370_vm12, %v10761_v32, %v10763_v41 }
 0x47f   : > { %34468 = vst [vmem:[#allocation12_spill] sm:$0xff] %v29592_v12 }
 0x480   : > { %24090 = vmatmul.mubr.msk.f32.gmra.mrb[8].mxu1 %vm467_vm1, %v24086_v33  ;;  %24091 = vmatmul.mubr.msk.f32.vlgmr.msra.gmra.mrb[8].mxu0 %vm467_vm1, %v24085_v17 }
 0x481   : > { %10788 = vmatpush1.msra.mxu0 %v29552_v36  ;;  %10645 = vmatprep.mubr.f32.mxu0 %v28052_v0  ;;  %v11115_v9 = vpop.permute.xlu0 %11114  ;;  %v11119_v57 = vpop.permute.xlu1 %11118  ;;  %v29568_v36 = vsel %vm4370_vm12, %v10763_v41, %v10749_v35 }
 0x482   : > { %10941 = vmatprep.subr.mxu0 %v29556_v19  ;;  %10716 = vmatprep.mubr.f32.mxu1 %v28052_v0  ;;  %34465 = vst [vmem:[#allocation9_spill] sm:$0xff] %v29568_v36  ;;  %v24095_v19 = vld [vmem:[%s34421_s3 + $0x60] sm:$0xff]  ;;  %v29583_v35 = vsel %vm5032_vm14, %v11117_v37, %v11119_v57  ;;  %v29604_v32 = vsel %vm5032_vm14, %v11115_v9, %v11117_v37 }
 0x483   : > { %34467 = vst [vmem:[#allocation11_spill] sm:$0xff] %v29583_v35  ;;  %34470 = vst [vmem:[#allocation14_spill] sm:$0xff] %v29604_v32 }
 0x484   : > { %24092 = vmatmul.mubr.msk.f32.gmra.mrb[10].mxu0 %vm467_vm1, %v24086_v33  ;;  %24093 = vmatmul.mubr.msk.f32.vlgmr.msra.gmra.mrb[10].mxu1 %vm467_vm1, %v24085_v17 }
 0x485   : > { %10865 = vmatpush1.msra.mxu1 %v29564_v48  ;;  %10722 = vmatprep.mubr.f32.mxu1 %v28052_v0  ;;  %v11123_v14 = vpop.permute.xlu0 %11122  ;;  %v11121_v34 = vpop.permute.xlu1 %11120 }
 0x486   : > { %11018 = vmatprep.subr.mxu1 %v29568_v36  ;;  %10851 = vmatprep.mubr.f32.mxu0 %v28052_v0  ;;  %v29616_v37 = vsel %vm5032_vm14, %v11119_v57, %v11121_v34 }
 0x488   : > { %24094 = vmatmul.mubr.msk.f32.gmra.mrb[12].mxu1 %vm467_vm1, %v24086_v33  ;;  %24097 = vmatmul.mubr.msk.f32.vlgmr.msra.gmra.mrb[4].mxu0 %vm467_vm1, %v24095_v19  ;;  %v29598_v33 = vsel %vm5032_vm14, %v11121_v34, %v11123_v14 }
 0x489   : > { %10942 = vmatpush1.msra.mxu0 %v29577_v46  ;;  %10857 = vmatprep.mubr.f32.mxu0 %v28052_v0  ;;  %v11127_v17 = vpop.permute.xlu0 %11126  ;;  %v11125_v36 = vpop.permute.xlu1 %11124  ;;  %34469 = vst [vmem:[#allocation13_spill] sm:$0xff] %v29598_v33 }
 0x48a   : > { %11153 = vmatprep.subr.mxu0 %v29583_v35  ;;  %10928 = vmatprep.mubr.f32.mxu1 %v28052_v0  ;;  %v29610_v41 = vsel %vm5032_vm14, %v11125_v36, %v11127_v17  ;;  %v29631_v34 = vsel %vm5032_vm14, %v11123_v14, %v11125_v36 }
 0x48b   : > { %34471 = vst [vmem:[#allocation15_spill] sm:$0xff] %v29610_v41  ;;  %34473 = vst [vmem:[#allocation17_spill] sm:$0xff] %v29631_v34 }
 0x48c   : > { %24098 = vmatmul.mubr.msk.f32.gmra.mrb[6].mxu0 %vm467_vm1, %v24096_v20  ;;  %24099 = vmatmul.mubr.msk.f32.vlgmr.msra.gmra.mrb[6].mxu1 %vm467_vm1, %v24095_v19 }
 0x48d   : > { %11019 = vmatpush1.msra.mxu1 %v29592_v12  ;;  %10934 = vmatprep.mubr.f32.mxu1 %v28052_v0  ;;  %v11483_v62 = vpop.permute.xlu0 %11482  ;;  %v11129_v46 = vpop.permute.xlu1 %11128 }
 0x48e   : > { %11230 = vmatprep.subr.mxu1 %v29598_v33  ;;  %11005 = vmatprep.mubr.f32.mxu0 %v28052_v0  ;;  %v29646_v14 = vsel %vm5032_vm14, %v11127_v17, %v11129_v46 }
 0x490   : > { %24100 = vmatmul.mubr.msk.f32.gmra.mrb[8].mxu1 %vm467_vm1, %v24096_v20  ;;  %24101 = vmatmul.mubr.msk.f32.vlgmr.msra.gmra.mrb[8].mxu0 %vm467_vm1, %v24095_v19 }
 0x491   : > { %11154 = vmatpush1.msra.mxu0 %v29604_v32  ;;  %11011 = vmatprep.mubr.f32.mxu0 %v28052_v0  ;;  %v11481_v35 = vpop.permute.xlu0 %11480  ;;  %v11485_v12 = vpop.permute.xlu1 %11484  ;;  %v29622_v32 = vsel %vm5032_vm14, %v11129_v46, %v11115_v9 }
 0x492   : > { %11307 = vmatprep.subr.mxu0 %v29610_v41  ;;  %11082 = vmatprep.mubr.f32.mxu1 %v28052_v0  ;;  %34472 = vst [vmem:[#allocation16_spill] sm:$0xff] %v29622_v32  ;;  %v24105_v41 = vld [vmem:[%s34421_s3 + $0x70] sm:$0xff]  ;;  %v29637_v57 = vsel %vm11496_vm5, %v11483_v62, %v11485_v12  ;;  %v29658_v46 = vsel %vm11496_vm5, %v11481_v35, %v11483_v62 }
 0x493   : > { %34474 = vst [vmem:[#allocation18_spill] sm:$0xff] %v29637_v57  ;;  %34476 = vst [vmem:[#allocation20_spill] sm:$0xff] %v29658_v46 }
 0x494   : > { %24102 = vmatmul.mubr.msk.f32.gmra.mrb[10].mxu0 %vm467_vm1, %v24096_v20  ;;  %24103 = vmatmul.mubr.msk.f32.vlgmr.msra.gmra.mrb[10].mxu1 %vm467_vm1, %v24095_v19  ;;  %v24106_v19 = vld [vmem:[%s34421_s3 + $0x78] sm:$0xff] }
 0x495   : > { %11231 = vmatpush1.msra.mxu1 %v29616_v37  ;;  %11088 = vmatprep.mubr.f32.mxu1 %v28052_v0  ;;  %v11489_v33 = vpop.permute.xlu0 %11488  ;;  %v11487_v48 = vpop.permute.xlu1 %11486 }
 0x496   : > { %11384 = vmatprep.subr.mxu1 %v29622_v32  ;;  %11217 = vmatprep.mubr.f32.mxu0 %v28052_v0  ;;  %v29652_v36 = vsel %vm11496_vm5, %v11487_v48, %v11489_v33  ;;  %v29670_v62 = vsel %vm11496_vm5, %v11485_v12, %v11487_v48 }
 0x497   : > { %34475 = vst [vmem:[#allocation19_spill] sm:$0xff] %v29652_v36 }
 0x498   : > { %24104 = vmatmul.mubr.msk.f32.gmra.mrb[12].mxu1 %vm467_vm1, %v24096_v20  ;;  %24107 = vmatmul.mubr.msk.f32.vlgmr.msra.gmra.mrb[4].mxu0 %vm467_vm1, %v24105_v41 }
 0x499   : > { %11308 = vmatpush1.msra.mxu0 %v29631_v34  ;;  %11223 = vmatprep.mubr.f32.mxu0 %v28052_v0  ;;  %v11493_v9 = vpop.permute.xlu0 %11492  ;;  %v11491_v32 = vpop.permute.xlu1 %11490 }
 0x49a   : > { %11520 = vmatprep.subr.mxu0 %v29637_v57  ;;  %11294 = vmatprep.mubr.f32.mxu1 %v28052_v0  ;;  %v29664_v17 = vsel %vm11496_vm5, %v11491_v32, %v11493_v9  ;;  %v29685_v12 = vsel %vm11496_vm5, %v11489_v33, %v11491_v32 }
 0x49b   : > { %34477 = vst [vmem:[#allocation21_spill] sm:$0xff] %v29664_v17  ;;  %34479 = vst [vmem:[#allocation23_spill] sm:$0xff] %v29685_v12 }
 0x49c   : > { %24108 = vmatmul.mubr.msk.f32.gmra.mrb[6].mxu0 %vm467_vm1, %v24106_v19  ;;  %24109 = vmatmul.mubr.msk.f32.vlgmr.msra.gmra.mrb[6].mxu1 %vm467_vm1, %v24105_v41 }
 0x49d   : > { %11385 = vmatpush1.msra.mxu1 %v29646_v14  ;;  %11300 = vmatprep.mubr.f32.mxu1 %v28052_v0  ;;  %v11850_v20 = vpop.permute.xlu0 %11849  ;;  %v11495_v34 = vpop.permute.xlu1 %11494 }
 0x49e   : > { %11597 = vmatprep.subr.mxu1 %v29652_v36  ;;  %11371 = vmatprep.mubr.f32.mxu0 %v28052_v0  ;;  %v29700_v33 = vsel %vm11496_vm5, %v11493_v9, %v11495_v34 }
 0x4a0   : > { %24110 = vmatmul.mubr.msk.f32.gmra.mrb[8].mxu1 %vm467_vm1, %v24106_v19  ;;  %24111 = vmatmul.mubr.msk.f32.vlgmr.msra.gmra.mrb[8].mxu0 %vm467_vm1, %v24105_v41 }
 0x4a1   : > { %11521 = vmatpush1.msra.mxu0 %v29658_v46  ;;  %11377 = vmatprep.mubr.f32.mxu0 %v28052_v0  ;;  %v11852_v57 = vpop.permute.xlu1 %11851  ;;  %v29676_v46 = vsel %vm11496_vm5, %v11495_v34, %v11481_v35 }
 0x4a2   : > { %11674 = vmatprep.subr.mxu0 %v29664_v17  ;;  %11448 = vmatprep.mubr.f32.mxu1 %v28052_v0  ;;  %v11848_v36 = vpop.permute.xlu0 %11847  ;;  %34478 = vst [vmem:[#allocation22_spill] sm:$0xff] %v29676_v46  ;;  %v24115_v17 = vld [vmem:[%s34421_s3 + $0x80] sm:$0xff]  ;;  %v29691_v35 = vsel %vm11863_vm9, %v11850_v20, %v11852_v57 }
 0x4a3   : > { %34480 = vst [vmem:[#allocation24_spill] sm:$0xff] %v29691_v35  ;;  %v29712_v34 = vsel %vm11863_vm9, %v11848_v36, %v11850_v20 }
 0x4a4   : > { %24112 = vmatmul.mubr.msk.f32.gmra.mrb[10].mxu0 %vm467_vm1, %v24106_v19  ;;  %24113 = vmatmul.mubr.msk.f32.vlgmr.msra.gmra.mrb[10].mxu1 %vm467_vm1, %v24105_v41 }
 0x4a5   : > { %11598 = vmatpush1.msra.mxu1 %v29670_v62  ;;  %11454 = vmatprep.mubr.f32.mxu1 %v28052_v0 }
 0x4a6   : > { %11751 = vmatprep.subr.mxu1 %v29676_v46  ;;  %11584 = vmatprep.mubr.f32.mxu0 %v28052_v0  ;;  %v24116_v46 = vld [vmem:[%s34421_s3 + $0x88] sm:$0xff] }
 0x4a7   : > { %v11854_v48 = vpop.permute.xlu1 %11853 }
 0x4a8   : > { %v11856_v41 = vpop.permute.xlu0 %11855  ;;  %24114 = vmatmul.mubr.msk.f32.gmra.mrb[12].mxu1 %vm467_vm1, %v24106_v19  ;;  %24117 = vmatmul.mubr.msk.f32.vlgmr.msra.gmra.mrb[4].mxu0 %vm467_vm1, %v24115_v17 }
 0x4a9   : > { %11675 = vmatpush1.msra.mxu0 %v29685_v12  ;;  %11590 = vmatprep.mubr.f32.mxu0 %v28052_v0  ;;  %v29706_v19 = vsel %vm11863_vm9, %v11854_v48, %v11856_v41 }
 0x4aa   : > { %11887 = vmatprep.subr.mxu0 %v29691_v35  ;;  %11661 = vmatprep.mubr.f32.mxu1 %v28052_v0  ;;  %34481 = vst [vmem:[#allocation25_spill] sm:$0xff] %v29706_v19 }
 0x4ab   : > { %v11858_v32 = vpop.permute.xlu1 %11857 }
 0x4ac   : > { %24118 = vmatmul.mubr.msk.f32.gmra.mrb[6].mxu0 %vm467_vm1, %v24116_v46  ;;  %24119 = vmatmul.mubr.msk.f32.vlgmr.msra.gmra.mrb[6].mxu1 %vm467_vm1, %v24115_v17  ;;  %v11860_v12 = vpop.permute.xlu0 %11859 }
 0x4ad   : > { %11752 = vmatpush1.msra.mxu1 %v29700_v33  ;;  %11667 = vmatprep.mubr.f32.mxu1 %v28052_v0  ;;  %v29718_v9 = vsel %vm11863_vm9, %v11858_v32, %v11860_v12 }
 0x4ae   : > { %11964 = vmatprep.subr.mxu1 %v29706_v19  ;;  %11738 = vmatprep.mubr.f32.mxu0 %v28052_v0  ;;  %34482 = vst [vmem:[#allocation26_spill] sm:$0xff] %v29718_v9  ;;  %v29724_v19 = vsel %vm11863_vm9, %v11852_v57, %v11854_v48  ;;  %v29739_v57 = vsel %vm11863_vm9, %v11856_v41, %v11858_v32  ;;  %v24136_v48 = vld [vmem:[%s34421_s3 + $0xa8] sm:$0xff]  ;;  %v24146_v41 = vld [vmem:[%s34421_s3 + $0xb8] sm:$0xff] }
 0x4af   : > { %v11862_v35 = vpop.permute.xlu1 %11861  ;;  %v24156_v32 = vld [vmem:[%s34421_s3 + $0xc8] sm:$0xff] }
 0x4b0   : > { %24120 = vmatmul.mubr.msk.f32.gmra.mrb[8].mxu1 %vm467_vm1, %v24116_v46  ;;  %24121 = vmatmul.mubr.msk.f32.vlgmr.msra.gmra.mrb[8].mxu0 %vm467_vm1, %v24115_v17  ;;  %v29730_v20 = vsel %vm11863_vm9, %v11862_v35, %v11848_v36  ;;  %v24126_v36 = vld [vmem:[%s34421_s3 + $0x98] sm:$0xff] }
 0x4b1   : > { %11888 = vmatpush1.msra.mxu0 %v29712_v34  ;;  %11744 = vmatprep.mubr.f32.mxu0 %v28052_v0 }
 0x4b2   : > { %12041 = vmatprep.subr.mxu0 %v29718_v9  ;;  %11815 = vmatprep.mubr.f32.mxu1 %v28052_v0  ;;  %v24125_v9 = vld [vmem:[%s34421_s3 + $0x90] sm:$0xff] }
 0x4b4   : > { %24122 = vmatmul.mubr.msk.f32.gmra.mrb[10].mxu0 %vm467_vm1, %v24116_v46  ;;  %24123 = vmatmul.mubr.msk.f32.vlgmr.msra.gmra.mrb[10].mxu1 %vm467_vm1, %v24115_v17  ;;  %v29751_v17 = vsel %vm11863_vm9, %v11860_v12, %v11862_v35  ;;  %v24145_v12 = vld [vmem:[%s34421_s3 + $0xb0] sm:$0xff]  ;;  %v24155_v35 = vld [vmem:[%s34421_s3 + $0xc0] sm:$0xff] }
 0x4b5   : > { %11965 = vmatpush1.msra.mxu1 %v29724_v19  ;;  %11821 = vmatprep.mubr.f32.mxu1 %v28052_v0 }
 0x4b6   : > { %12118 = vmatprep.subr.mxu1 %v29730_v20  ;;  %11951 = vmatprep.mubr.f32.mxu0 %v28052_v0 }
 0x4b8   : > { %24124 = vmatmul.mubr.msk.f32.gmra.mrb[12].mxu1 %vm467_vm1, %v24116_v46  ;;  %24127 = vmatmul.mubr.msk.f32.vlgmr.msra.gmra.mrb[4].mxu0 %vm467_vm1, %v24125_v9  ;;  %v24135_v46 = vld [vmem:[%s34421_s3 + $0xa0] sm:$0xff] }
 0x4b9   : > { %12042 = vmatpush1.msra.mxu0 %v29739_v57  ;;  %11957 = vmatprep.mubr.f32.mxu0 %v28052_v0 }
 0x4ba   : > { %12220 = vmatprep.subr.mxu0 %v29089_v13  ;;  %12028 = vmatprep.mubr.f32.mxu1 %v28052_v0 }
 0x4bc   : > { %24128 = vmatmul.mubr.msk.f32.gmra.mrb[6].mxu0 %vm467_vm1, %v24126_v36  ;;  %24129 = vmatmul.mubr.msk.f32.vlgmr.msra.gmra.mrb[6].mxu1 %vm467_vm1, %v24125_v9 }
 0x4bd   : > { %12119 = vmatpush1.msra.mxu1 %v29751_v17  ;;  %12034 = vmatprep.mubr.f32.mxu1 %v28052_v0 }
 0x4be   : > { %12297 = vmatprep.subr.mxu1 %v29099_v24  ;;  %12105 = vmatprep.mubr.f32.mxu0 %v28052_v0 }
 0x4c0   : > { %24130 = vmatmul.mubr.msk.f32.gmra.mrb[8].mxu1 %vm467_vm1, %v24126_v36  ;;  %24131 = vmatmul.mubr.msk.f32.vlgmr.msra.gmra.mrb[8].mxu0 %vm467_vm1, %v24125_v9 }
 0x4c1   : > { %12221 = vmatpush1.msra.mxu0 %v29087_v1  ;;  %12111 = vmatprep.mubr.f32.mxu0 %v28052_v0 }
 0x4c2   : > { %12374 = vmatprep.subr.mxu0 %v29109_v39  ;;  %12182 = vmatprep.mubr.f32.mxu1 %v28052_v0 }
 0x4c4   : > { %24132 = vmatmul.mubr.msk.f32.gmra.mrb[10].mxu0 %vm467_vm1, %v24126_v36  ;;  %24133 = vmatmul.mubr.msk.f32.vlgmr.msra.gmra.mrb[10].mxu1 %vm467_vm1, %v24125_v9  ;;  %v24165_v9 = vld [vmem:[%s34421_s3 + $0xd0] sm:$0xff] }
 0x4c5   : > { %12298 = vmatpush1.msra.mxu1 %v29097_v23  ;;  %12188 = vmatprep.mubr.f32.mxu1 %v28052_v0 }
 0x4c6   : > { %12451 = vmatprep.subr.mxu1 %v29081_v43  ;;  %12284 = vmatprep.mubr.f32.mxu0 %v28052_v0 }
 0x4c8   : > { %24134 = vmatmul.mubr.msk.f32.gmra.mrb[12].mxu1 %vm467_vm1, %v24126_v36  ;;  %24137 = vmatmul.mubr.msk.f32.vlgmr.msra.gmra.mrb[4].mxu0 %vm467_vm1, %v24135_v46  ;;  %v24166_v36 = vld [vmem:[%s34421_s3 + $0xd8] sm:$0xff] }
 0x4c9   : > { %12375 = vmatpush1.msra.mxu0 %v29107_v38  ;;  %12290 = vmatprep.mubr.f32.mxu0 %v28052_v0 }
 0x4ca   : > { %12553 = vmatprep.subr.mxu0 %v29242_v63  ;;  %12361 = vmatprep.mubr.f32.mxu1 %v28052_v0 }
 0x4cc   : > { %24138 = vmatmul.mubr.msk.f32.gmra.mrb[6].mxu0 %vm467_vm1, %v24136_v48  ;;  %24139 = vmatmul.mubr.msk.f32.vlgmr.msra.gmra.mrb[6].mxu1 %vm467_vm1, %v24135_v46 }
 0x4cd   : > { %12452 = vmatpush1.msra.mxu1 %v29116_v42  ;;  %12367 = vmatprep.mubr.f32.mxu1 %v28052_v0 }
 0x4ce   : > { %12630 = vmatprep.subr.mxu1 %v29260_v28  ;;  %12438 = vmatprep.mubr.f32.mxu0 %v28052_v0 }
 0x4d0   : > { %24140 = vmatmul.mubr.msk.f32.gmra.mrb[8].mxu1 %vm467_vm1, %v24136_v48  ;;  %24141 = vmatmul.mubr.msk.f32.vlgmr.msra.gmra.mrb[8].mxu0 %vm467_vm1, %v24135_v46 }
 0x4d1   : > { %12554 = vmatpush1.msra.mxu0 %v29223_v53  ;;  %12444 = vmatprep.mubr.f32.mxu0 %v28052_v0 }
 0x4d2   : > { %12707 = vmatprep.subr.mxu0 %v29279_v52  ;;  %12515 = vmatprep.mubr.f32.mxu1 %v28052_v0 }
 0x4d4   : > { %24142 = vmatmul.mubr.msk.f32.gmra.mrb[10].mxu0 %vm467_vm1, %v24136_v48  ;;  %24143 = vmatmul.mubr.msk.f32.vlgmr.msra.gmra.mrb[10].mxu1 %vm467_vm1, %v24135_v46  ;;  %v24175_v46 = vld [vmem:[%s34421_s3 + $0xe0] sm:$0xff] }
 0x4d5   : > { %12631 = vmatpush1.msra.mxu1 %v29239_v60  ;;  %12521 = vmatprep.mubr.f32.mxu1 %v28052_v0 }
 0x4d6   : > { %12784 = vmatprep.subr.mxu1 %v29226_v54  ;;  %12617 = vmatprep.mubr.f32.mxu0 %v28052_v0 }
 0x4d8   : > { %24144 = vmatmul.mubr.msk.f32.gmra.mrb[12].mxu1 %vm467_vm1, %v24136_v48  ;;  %24147 = vmatmul.mubr.msk.f32.vlgmr.msra.gmra.mrb[4].mxu0 %vm467_vm1, %v24145_v12  ;;  %v24176_v48 = vld [vmem:[%s34421_s3 + $0xe8] sm:$0xff] }
 0x4d9   : > { %12708 = vmatpush1.msra.mxu0 %v29257_v27  ;;  %12623 = vmatprep.mubr.f32.mxu0 %v28052_v0 }
 0x4da   : > { %12886 = vmatprep.subr.mxu0 %v29348_v5  ;;  %12694 = vmatprep.mubr.f32.mxu1 %v28052_v0 }
 0x4dc   : > { %24148 = vmatmul.mubr.msk.f32.gmra.mrb[6].mxu0 %vm467_vm1, %v24146_v41  ;;  %24149 = vmatmul.mubr.msk.f32.vlgmr.msra.gmra.mrb[6].mxu1 %vm467_vm1, %v24145_v12 }
 0x4dd   : > { %12785 = vmatpush1.msra.mxu1 %v29273_v3  ;;  %12700 = vmatprep.mubr.f32.mxu1 %v28052_v0 }
 0x4de   : > { %12963 = vmatprep.subr.mxu1 %v29363_v7  ;;  %12771 = vmatprep.mubr.f32.mxu0 %v28052_v0 }
 0x4e0   : > { %24150 = vmatmul.mubr.msk.f32.gmra.mrb[8].mxu1 %vm467_vm1, %v24146_v41  ;;  %24151 = vmatmul.mubr.msk.f32.vlgmr.msra.gmra.mrb[8].mxu0 %vm467_vm1, %v24145_v12 }
 0x4e1   : > { %12887 = vmatpush1.msra.mxu0 %v29307_v2  ;;  %12777 = vmatprep.mubr.f32.mxu0 %v28052_v0 }
 0x4e2   : > { %13040 = vmatprep.subr.mxu0 %v29378_v15  ;;  %12848 = vmatprep.mubr.f32.mxu1 %v28052_v0 }
 0x4e4   : > { %24152 = vmatmul.mubr.msk.f32.gmra.mrb[10].mxu0 %vm467_vm1, %v24146_v41  ;;  %24153 = vmatmul.mubr.msk.f32.vlgmr.msra.gmra.mrb[10].mxu1 %vm467_vm1, %v24145_v12  ;;  %v34487_v12 = vld [vmem:[#allocation4_spill] sm:$0xff] }
 0x4e5   : > { %12964 = vmatpush1.msra.mxu1 %v29326_v61  ;;  %12854 = vmatprep.mubr.f32.mxu1 %v28052_v0 }
 0x4e6   : > { %13117 = vmatprep.subr.mxu1 %v29336_v11  ;;  %12950 = vmatprep.mubr.f32.mxu0 %v28052_v0 }
 0x4e8   : > { %24154 = vmatmul.mubr.msk.f32.gmra.mrb[12].mxu1 %vm467_vm1, %v24146_v41  ;;  %24157 = vmatmul.mubr.msk.f32.vlgmr.msra.gmra.mrb[4].mxu0 %vm467_vm1, %v24155_v35  ;;  %v34488_v41 = vld [vmem:[#allocation12_spill] sm:$0xff] }
 0x4e9   : > { %13041 = vmatpush1.msra.mxu0 %v29340_v16  ;;  %12956 = vmatprep.mubr.f32.mxu0 %v28052_v0 }
 0x4ea   : > { %13219 = vmatprep.subr.mxu0 %v29402_v40  ;;  %13027 = vmatprep.mubr.f32.mxu1 %v28052_v0 }
 0x4ec   : > { %24158 = vmatmul.mubr.msk.f32.gmra.mrb[6].mxu0 %vm467_vm1, %v24156_v32  ;;  %24159 = vmatmul.mubr.msk.f32.vlgmr.msra.gmra.mrb[6].mxu1 %vm467_vm1, %v24155_v35 }
 0x4ed   : > { %13118 = vmatpush1.msra.mxu1 %v29352_v6  ;;  %13033 = vmatprep.mubr.f32.mxu1 %v28052_v0 }
 0x4ee   : > { %13296 = vmatprep.subr.mxu1 %v29417_v58  ;;  %13104 = vmatprep.mubr.f32.mxu0 %v28052_v0 }
 0x4f0   : > { %24160 = vmatmul.mubr.msk.f32.gmra.mrb[8].mxu1 %vm467_vm1, %v24156_v32  ;;  %24161 = vmatmul.mubr.msk.f32.vlgmr.msra.gmra.mrb[8].mxu0 %vm467_vm1, %v24155_v35 }
 0x4f1   : > { %13220 = vmatpush1.msra.mxu0 %v29367_v8  ;;  %13110 = vmatprep.mubr.f32.mxu0 %v28052_v0 }
 0x4f2   : > { %13373 = vmatprep.subr.mxu0 %v29432_v29  ;;  %13181 = vmatprep.mubr.f32.mxu1 %v28052_v0 }
 0x4f4   : > { %24162 = vmatmul.mubr.msk.f32.gmra.mrb[10].mxu0 %vm467_vm1, %v24156_v32  ;;  %24163 = vmatmul.mubr.msk.f32.vlgmr.msra.gmra.mrb[10].mxu1 %vm467_vm1, %v24155_v35  ;;  %v34489_v35 = vld [vmem:[#allocation5_spill] sm:$0xff] }
 0x4f5   : > { %13297 = vmatpush1.msra.mxu1 %v29382_v18  ;;  %13187 = vmatprep.mubr.f32.mxu1 %v28052_v0 }
 0x4f6   : > { %13450 = vmatprep.subr.mxu1 %v29390_v25  ;;  %13283 = vmatprep.mubr.f32.mxu0 %v28052_v0 }
 0x4f8   : > { %24164 = vmatmul.mubr.msk.f32.gmra.mrb[12].mxu1 %vm467_vm1, %v24156_v32  ;;  %24167 = vmatmul.mubr.msk.f32.vlgmr.msra.gmra.mrb[4].mxu0 %vm467_vm1, %v24165_v9  ;;  %v24195_v32 = vld [vmem:[%s34421_s3 + $0x100] sm:$0xff] }
 0x4f9   : > { %13374 = vmatpush1.msra.mxu0 %v29394_v31  ;;  %13289 = vmatprep.mubr.f32.mxu0 %v28052_v0 }
 0x4fa   : > { %13552 = vmatprep.subr.mxu0 %v29456_v50  ;;  %13360 = vmatprep.mubr.f32.mxu1 %v28052_v0 }
 0x4fc   : > { %24168 = vmatmul.mubr.msk.f32.gmra.mrb[6].mxu0 %vm467_vm1, %v24166_v36  ;;  %24169 = vmatmul.mubr.msk.f32.vlgmr.msra.gmra.mrb[6].mxu1 %vm467_vm1, %v24165_v9 }
 0x4fd   : > { %13451 = vmatpush1.msra.mxu1 %v29406_v45  ;;  %13366 = vmatprep.mubr.f32.mxu1 %v28052_v0 }
 0x4fe   : > { %13629 = vmatprep.subr.mxu1 %v29471_v21  ;;  %13437 = vmatprep.mubr.f32.mxu0 %v28052_v0 }
 0x500   : > { %24170 = vmatmul.mubr.msk.f32.gmra.mrb[8].mxu1 %vm467_vm1, %v24166_v36  ;;  %24171 = vmatmul.mubr.msk.f32.vlgmr.msra.gmra.mrb[8].mxu0 %vm467_vm1, %v24165_v9 }
 0x501   : > { %13553 = vmatpush1.msra.mxu0 %v29421_v59  ;;  %13443 = vmatprep.mubr.f32.mxu0 %v28052_v0 }
 0x502   : > { %13706 = vmatprep.subr.mxu0 %v29486_v44  ;;  %13514 = vmatprep.mubr.f32.mxu1 %v28052_v0 }
 0x504   : > { %24172 = vmatmul.mubr.msk.f32.gmra.mrb[10].mxu0 %vm467_vm1, %v24166_v36  ;;  %24173 = vmatmul.mubr.msk.f32.vlgmr.msra.gmra.mrb[10].mxu1 %vm467_vm1, %v24165_v9  ;;  %v34490_v9 = vld [vmem:[#allocation6_spill] sm:$0xff] }
 0x505   : > { %13630 = vmatpush1.msra.mxu1 %v29436_v30  ;;  %13520 = vmatprep.mubr.f32.mxu1 %v28052_v0 }
 0x506   : > { %13783 = vmatprep.subr.mxu1 %v29444_v10  ;;  %13616 = vmatprep.mubr.f32.mxu0 %v28052_v0 }
 0x508   : > { %24174 = vmatmul.mubr.msk.f32.gmra.mrb[12].mxu1 %vm467_vm1, %v24166_v36  ;;  %24177 = vmatmul.mubr.msk.f32.vlgmr.msra.gmra.mrb[4].mxu0 %vm467_vm1, %v24175_v46  ;;  %v34491_v36 = vld [vmem:[#allocation7_spill] sm:$0xff] }
 0x509   : > { %13707 = vmatpush1.msra.mxu0 %v29448_v4  ;;  %13622 = vmatprep.mubr.f32.mxu0 %v28052_v0 }
 0x50a   : > { %13885 = vmatprep.subr.mxu0 %v29510_v49  ;;  %13693 = vmatprep.mubr.f32.mxu1 %v28052_v0  ;;  %v24185_v49 = vld [vmem:[%s34421_s3 + $0xf0] sm:$0xff] }
 0x50c   : > { %24178 = vmatmul.mubr.msk.f32.gmra.mrb[6].mxu0 %vm467_vm1, %v24176_v48  ;;  %24179 = vmatmul.mubr.msk.f32.vlgmr.msra.gmra.mrb[6].mxu1 %vm467_vm1, %v24175_v46 }
 0x50d   : > { %13784 = vmatpush1.msra.mxu1 %v29460_v51  ;;  %13699 = vmatprep.mubr.f32.mxu1 %v28052_v0 }
 0x50e   : > { %13962 = vmatprep.subr.mxu1 %v29525_v55  ;;  %13770 = vmatprep.mubr.f32.mxu0 %v28052_v0  ;;  %v34484_v55 = vld [vmem:[#allocation8_spill] sm:$0xff] }
 0x510   : > { %24180 = vmatmul.mubr.msk.f32.gmra.mrb[8].mxu1 %vm467_vm1, %v24176_v48  ;;  %24181 = vmatmul.mubr.msk.f32.vlgmr.msra.gmra.mrb[8].mxu0 %vm467_vm1, %v24175_v46 }
 0x511   : > { %13886 = vmatpush1.msra.mxu0 %v29475_v26  ;;  %13776 = vmatprep.mubr.f32.mxu0 %v28052_v0  ;;  %v34483_v26 = vld [vmem:[#allocation2_spill] sm:$0xff] }
 0x512   : > { %14039 = vmatprep.subr.mxu0 %v29540_v56  ;;  %13847 = vmatprep.mubr.f32.mxu1 %v28052_v0  ;;  %v34486_v56 = vld [vmem:[#allocation10_spill] sm:$0xff] }
 0x514   : > { %24182 = vmatmul.mubr.msk.f32.gmra.mrb[10].mxu0 %vm467_vm1, %v24176_v48  ;;  %24183 = vmatmul.mubr.msk.f32.vlgmr.msra.gmra.mrb[10].mxu1 %vm467_vm1, %v24175_v46  ;;  %v24196_v46 = vld [vmem:[%s34421_s3 + $0x108] sm:$0xff] }
 0x515   : > { %13963 = vmatpush1.msra.mxu1 %v29490_v47  ;;  %13853 = vmatprep.mubr.f32.mxu1 %v28052_v0  ;;  %v24186_v47 = vld [vmem:[%s34421_s3 + $0xf8] sm:$0xff] }
 0x516   : > { %14116 = vmatprep.subr.mxu1 %v29498_v22  ;;  %13949 = vmatprep.mubr.f32.mxu0 %v28052_v0  ;;  %v34485_v22 = vld [vmem:[#allocation3_spill] sm:$0xff] }
 0x518   : > { %24184 = vmatmul.mubr.msk.f32.gmra.mrb[12].mxu1 %vm467_vm1, %v24176_v48  ;;  %24187 = vmatmul.mubr.msk.f32.vlgmr.msra.gmra.mrb[4].mxu0 %vm467_vm1, %v24185_v49  ;;  %v34492_v48 = vld [vmem:[#allocation9_spill] sm:$0xff] }
 0x519   : > { %14040 = vmatpush1.msra.mxu0 %v34483_v26  ;;  %13955 = vmatprep.mubr.f32.mxu0 %v28052_v0  ;;  %v34494_v26 = vld [vmem:[#allocation11_spill] sm:$0xff] }
 0x51a   : > { %14218 = vmatprep.subr.mxu0 %v34484_v55  ;;  %14026 = vmatprep.mubr.f32.mxu1 %v28052_v0  ;;  %v34496_v55 = vld [vmem:[#allocation14_spill] sm:$0xff] }
 0x51c   : > { %24188 = vmatmul.mubr.msk.f32.gmra.mrb[6].mxu0 %vm467_vm1, %v24186_v47  ;;  %24189 = vmatmul.mubr.msk.f32.vlgmr.msra.gmra.mrb[6].mxu1 %vm467_vm1, %v24185_v49 }
 0x51d   : > { %14117 = vmatpush1.msra.mxu1 %v34485_v22  ;;  %14032 = vmatprep.mubr.f32.mxu1 %v28052_v0  ;;  %v34497_v22 = vld [vmem:[#allocation15_spill] sm:$0xff] }
 0x51e   : > { %14295 = vmatprep.subr.mxu1 %v34486_v56  ;;  %14103 = vmatprep.mubr.f32.mxu0 %v28052_v0  ;;  %v24206_v56 = vld [vmem:[%s34421_s3 + $0x118] sm:$0xff] }
 0x520   : > { %24190 = vmatmul.mubr.msk.f32.gmra.mrb[8].mxu1 %vm467_vm1, %v24186_v47  ;;  %24191 = vmatmul.mubr.msk.f32.vlgmr.msra.gmra.mrb[8].mxu0 %vm467_vm1, %v24185_v49 }
 0x521   : > { %14219 = vmatpush1.msra.mxu0 %v34487_v12  ;;  %14109 = vmatprep.mubr.f32.mxu0 %v28052_v0  ;;  %v34498_v12 = vld [vmem:[#allocation16_spill] sm:$0xff] }
 0x522   : > { %14372 = vmatprep.subr.mxu0 %v34488_v41  ;;  %14180 = vmatprep.mubr.f32.mxu1 %v28052_v0  ;;  %v34499_v41 = vld [vmem:[#allocation23_spill] sm:$0xff] }
 0x524   : > { %24192 = vmatmul.mubr.msk.f32.gmra.mrb[10].mxu0 %vm467_vm1, %v24186_v47  ;;  %24193 = vmatmul.mubr.msk.f32.vlgmr.msra.gmra.mrb[10].mxu1 %vm467_vm1, %v24185_v49  ;;  %v34493_v49 = vld [vmem:[#allocation17_spill] sm:$0xff] }
 0x525   : > { %14296 = vmatpush1.msra.mxu1 %v34489_v35  ;;  %14186 = vmatprep.mubr.f32.mxu1 %v28052_v0  ;;  %v34501_v35 = vld [vmem:[#allocation19_spill] sm:$0xff] }
 0x526   : > { %14449 = vmatprep.subr.mxu1 %v34490_v9  ;;  %14282 = vmatprep.mubr.f32.mxu0 %v28052_v0  ;;  %v34502_v9 = vld [vmem:[#allocation20_spill] sm:$0xff] }
 0x528   : > { %24194 = vmatmul.mubr.msk.f32.gmra.mrb[12].mxu1 %vm467_vm1, %v24186_v47  ;;  %24197 = vmatmul.mubr.msk.f32.vlgmr.msra.gmra.mrb[4].mxu0 %vm467_vm1, %v24195_v32  ;;  %v24205_v47 = vld [vmem:[%s34421_s3 + $0x110] sm:$0xff] }
 0x529   : > { %14373 = vmatpush1.msra.mxu0 %v34491_v36  ;;  %14288 = vmatprep.mubr.f32.mxu0 %v28052_v0  ;;  %v24216_v36 = vld [vmem:[%s34421_s3 + $0x128] sm:$0xff] }
 0x52a   : > { %14551 = vmatprep.subr.mxu0 %v29616_v37  ;;  %14359 = vmatprep.mubr.f32.mxu1 %v28052_v0  ;;  %v34495_v37 = vld [vmem:[#allocation13_spill] sm:$0xff] }
 0x52c   : > { %24198 = vmatmul.mubr.msk.f32.gmra.mrb[6].mxu0 %vm467_vm1, %v24196_v46  ;;  %24199 = vmatmul.mubr.msk.f32.vlgmr.msra.gmra.mrb[6].mxu1 %vm467_vm1, %v24195_v32 }
 0x52d   : > { %14450 = vmatpush1.msra.mxu1 %v34492_v48  ;;  %14365 = vmatprep.mubr.f32.mxu1 %v28052_v0  ;;  %v34505_v48 = vld [vmem:[#allocation24_spill] sm:$0xff] }
 0x52e   : > { %14628 = vmatprep.subr.mxu1 %v34493_v49  ;;  %14436 = vmatprep.mubr.f32.mxu0 %v28052_v0  ;;  %v24226_v49 = vld [vmem:[%s34421_s3 + $0x138] sm:$0xff] }
 0x530   : > { %24200 = vmatmul.mubr.msk.f32.gmra.mrb[8].mxu1 %vm467_vm1, %v24196_v46  ;;  %24201 = vmatmul.mubr.msk.f32.vlgmr.msra.gmra.mrb[8].mxu0 %vm467_vm1, %v24195_v32 }
 0x531   : > { %14552 = vmatpush1.msra.mxu0 %v34494_v26  ;;  %14442 = vmatprep.mubr.f32.mxu0 %v28052_v0 }
 0x532   : > { %14705 = vmatprep.subr.mxu0 %v29646_v14  ;;  %14513 = vmatprep.mubr.f32.mxu1 %v28052_v0  ;;  %v17207_v14 = vld [vmem:[%s34422_s4 + $0x8] sm:$0xff] }
 0x533   : > { %17215 = vperm.xlu1 %27840, %v17207_v14  }
 0x534   : > { %24202 = vmatmul.mubr.msk.f32.gmra.mrb[10].mxu0 %vm467_vm1, %v24196_v46  ;;  %24203 = vmatmul.mubr.msk.f32.vlgmr.msra.gmra.mrb[10].mxu1 %vm467_vm1, %v24195_v32  ;;  %v24215_v32 = vld [vmem:[%s34421_s3 + $0x120] sm:$0xff] }
 0x535   : > { %14629 = vmatpush1.msra.mxu1 %v34495_v37  ;;  %14519 = vmatprep.mubr.f32.mxu1 %v28052_v0 }
 0x536   : > { %14782 = vmatprep.subr.mxu1 %v34496_v55  ;;  %14615 = vmatprep.mubr.f32.mxu0 %v28052_v0 }
 0x538   : > { %24204 = vmatmul.mubr.msk.f32.gmra.mrb[12].mxu1 %vm467_vm1, %v24196_v46  ;;  %24207 = vmatmul.mubr.msk.f32.vlgmr.msra.gmra.mrb[4].mxu0 %vm467_vm1, %v24205_v47  ;;  %v34504_v46 = vld [vmem:[#allocation22_spill] sm:$0xff] }
 0x539   : > { %14706 = vmatpush1.msra.mxu0 %v34497_v22  ;;  %14621 = vmatprep.mubr.f32.mxu0 %v28052_v0 }
 0x53a   : > { %14884 = vmatprep.subr.mxu0 %v29670_v62  ;;  %14692 = vmatprep.mubr.f32.mxu1 %v28052_v0  ;;  %v34500_v62 = vld [vmem:[#allocation18_spill] sm:$0xff] }
 0x53c   : > { %24208 = vmatmul.mubr.msk.f32.gmra.mrb[6].mxu0 %vm467_vm1, %v24206_v56  ;;  %24209 = vmatmul.mubr.msk.f32.vlgmr.msra.gmra.mrb[6].mxu1 %vm467_vm1, %v24205_v47 }
 0x53d   : > { %14783 = vmatpush1.msra.mxu1 %v34498_v12  ;;  %14698 = vmatprep.mubr.f32.mxu1 %v28052_v0 }
 0x53e   : > { %14961 = vmatprep.subr.mxu1 %v34499_v41  ;;  %14769 = vmatprep.mubr.f32.mxu0 %v28052_v0 }
 0x540   : > { %24210 = vmatmul.mubr.msk.f32.gmra.mrb[8].mxu1 %vm467_vm1, %v24206_v56  ;;  %24211 = vmatmul.mubr.msk.f32.vlgmr.msra.gmra.mrb[8].mxu0 %vm467_vm1, %v24205_v47 }
 0x541   : > { %14885 = vmatpush1.msra.mxu0 %v34500_v62  ;;  %14775 = vmatprep.mubr.f32.mxu0 %v28052_v0 }
 0x542   : > { %15038 = vmatprep.subr.mxu0 %v29700_v33  ;;  %14846 = vmatprep.mubr.f32.mxu1 %v28052_v0  ;;  %v34503_v33 = vld [vmem:[#allocation21_spill] sm:$0xff] }
 0x544   : > { %24212 = vmatmul.mubr.msk.f32.gmra.mrb[10].mxu0 %vm467_vm1, %v24206_v56  ;;  %24213 = vmatmul.mubr.msk.f32.vlgmr.msra.gmra.mrb[10].mxu1 %vm467_vm1, %v24205_v47 }
 0x545   : > { %14962 = vmatpush1.msra.mxu1 %v34501_v35  ;;  %14852 = vmatprep.mubr.f32.mxu1 %v28052_v0 }
 0x546   : > { %15115 = vmatprep.subr.mxu1 %v34502_v9  ;;  %14948 = vmatprep.mubr.f32.mxu0 %v28052_v0 }
 0x548   : > { %24214 = vmatmul.mubr.msk.f32.gmra.mrb[12].mxu1 %vm467_vm1, %v24206_v56  ;;  %24217 = vmatmul.mubr.msk.f32.vlgmr.msra.gmra.mrb[4].mxu0 %vm467_vm1, %v24215_v32 }
 0x549   : > { %15039 = vmatpush1.msra.mxu0 %v34503_v33  ;;  %14954 = vmatprep.mubr.f32.mxu0 %v28052_v0 }
 0x54a   : > { %15217 = vmatprep.subr.mxu0 %v29724_v19  ;;  %15025 = vmatprep.mubr.f32.mxu1 %v28052_v0  ;;  %v34506_v19 = vld [vmem:[#allocation25_spill] sm:$0xff] }
 0x54c   : > { %24218 = vmatmul.mubr.msk.f32.gmra.mrb[6].mxu0 %vm467_vm1, %v24216_v36  ;;  %24219 = vmatmul.mubr.msk.f32.vlgmr.msra.gmra.mrb[6].mxu1 %vm467_vm1, %v24215_v32 }
 0x54d   : > { %15116 = vmatpush1.msra.mxu1 %v34504_v46  ;;  %15031 = vmatprep.mubr.f32.mxu1 %v28052_v0 }
 0x54e   : > { %15294 = vmatprep.subr.mxu1 %v29739_v57  ;;  %15102 = vmatprep.mubr.f32.mxu0 %v28052_v0  ;;  %v24225_v57 = vld [vmem:[%s34421_s3 + $0x130] sm:$0xff] }
 0x550   : > { %24220 = vmatmul.mubr.msk.f32.gmra.mrb[8].mxu1 %vm467_vm1, %v24216_v36  ;;  %24221 = vmatmul.mubr.msk.f32.vlgmr.msra.gmra.mrb[8].mxu0 %vm467_vm1, %v24215_v32 }
 0x551   : > { %15218 = vmatpush1.msra.mxu0 %v34505_v48  ;;  %15108 = vmatprep.mubr.f32.mxu0 %v28052_v0 }
 0x552   : > { %15371 = vmatprep.subr.mxu0 %v29751_v17  ;;  %15179 = vmatprep.mubr.f32.mxu1 %v28052_v0  ;;  %v34507_v17 = vld [vmem:[#allocation26_spill] sm:$0xff] }
 0x554   : > { %24222 = vmatmul.mubr.msk.f32.gmra.mrb[10].mxu0 %vm467_vm1, %v24216_v36  ;;  %24223 = vmatmul.mubr.msk.f32.vlgmr.msra.gmra.mrb[10].mxu1 %vm467_vm1, %v24215_v32 }
 0x555   : > { %15295 = vmatpush1.msra.mxu1 %v34506_v19  ;;  %15185 = vmatprep.mubr.f32.mxu1 %v28052_v0 }
 0x556   : > { %15448 = vmatprep.subr.mxu1 %v29712_v34  ;;  %15281 = vmatprep.mubr.f32.mxu0 %v28052_v0 }
 0x558   : > { %24224 = vmatmul.mubr.msk.f32.gmra.mrb[12].mxu1 %vm467_vm1, %v24216_v36  ;;  %24227 = vmatmul.mubr.msk.f32.vlgmr.msra.gmra.mrb[4].mxu0 %vm467_vm1, %v24225_v57 }
 0x559   : > { %15372 = vmatpush1.msra.mxu0 %v34507_v17  ;;  %15287 = vmatprep.mubr.f32.mxu0 %v28052_v0 }
 0x55a   : > { %15550 = vmatprep.subr.mxu0 %v29097_v23  ;;  %15358 = vmatprep.mubr.f32.mxu1 %v28052_v0  ;;  %v24235_v23 = vld [vmem:[%s34421_s3 + $0x140] sm:$0xff] }
 0x55c   : > { %24228 = vmatmul.mubr.msk.f32.gmra.mrb[6].mxu0 %vm467_vm1, %v24226_v49  ;;  %24229 = vmatmul.mubr.msk.f32.vlgmr.msra.gmra.mrb[6].mxu1 %vm467_vm1, %v24225_v57 }
 0x55d   : > { %15449 = vmatpush1.msra.mxu1 %v29730_v20  ;;  %15364 = vmatprep.mubr.f32.mxu1 %v28052_v0 }
 0x55e   : > { %15627 = vmatprep.subr.mxu1 %v29107_v38  ;;  %15435 = vmatprep.mubr.f32.mxu0 %v28052_v0  ;;  %v24256_v38 = vld [vmem:[%s34421_s3 + $0x168] sm:$0xff] }
 0x560   : > { %24230 = vmatmul.mubr.msk.f32.gmra.mrb[8].mxu1 %vm467_vm1, %v24226_v49  ;;  %24231 = vmatmul.mubr.msk.f32.vlgmr.msra.gmra.mrb[8].mxu0 %vm467_vm1, %v24225_v57 }
 0x561   : > { %15551 = vmatpush1.msra.mxu0 %v29089_v13  ;;  %15441 = vmatprep.mubr.f32.mxu0 %v28052_v0  ;;  %v24236_v13 = vld [vmem:[%s34421_s3 + $0x148] sm:$0xff] }
 0x562   : > { %15704 = vmatprep.subr.mxu0 %v29116_v42  ;;  %15512 = vmatprep.mubr.f32.mxu1 %v28052_v0  ;;  %v24266_v42 = vld [vmem:[%s34421_s3 + $0x178] sm:$0xff] }
 0x564   : > { %24232 = vmatmul.mubr.msk.f32.gmra.mrb[10].mxu0 %vm467_vm1, %v24226_v49  ;;  %24233 = vmatmul.mubr.msk.f32.vlgmr.msra.gmra.mrb[10].mxu1 %vm467_vm1, %v24225_v57 }
 0x565   : > { %15628 = vmatpush1.msra.mxu1 %v29099_v24  ;;  %15518 = vmatprep.mubr.f32.mxu1 %v28052_v0  ;;  %v24255_v24 = vld [vmem:[%s34421_s3 + $0x160] sm:$0xff] }
 0x566   : > { %15781 = vmatprep.subr.mxu1 %v29087_v1  ;;  %15614 = vmatprep.mubr.f32.mxu0 %v28052_v0  ;;  %v24246_v1 = vld [vmem:[%s34421_s3 + $0x158] sm:$0xff] }
 0x568   : > { %24234 = vmatmul.mubr.msk.f32.gmra.mrb[12].mxu1 %vm467_vm1, %v24226_v49  ;;  %24237 = vmatmul.mubr.msk.f32.vlgmr.msra.gmra.mrb[4].mxu0 %vm467_vm1, %v24235_v23 }
 0x569   : > { %15705 = vmatpush1.msra.mxu0 %v29109_v39  ;;  %15620 = vmatprep.mubr.f32.mxu0 %v28052_v0  ;;  %v24265_v39 = vld [vmem:[%s34421_s3 + $0x170] sm:$0xff] }
 0x56a   : > { %15883 = vmatprep.subr.mxu0 %v29239_v60  ;;  %15691 = vmatprep.mubr.f32.mxu1 %v28052_v0 }
 0x56c   : > { %24238 = vmatmul.mubr.msk.f32.gmra.mrb[6].mxu0 %vm467_vm1, %v24236_v13  ;;  %24239 = vmatmul.mubr.msk.f32.vlgmr.msra.gmra.mrb[6].mxu1 %vm467_vm1, %v24235_v23 }
 0x56d   : > { %15782 = vmatpush1.msra.mxu1 %v29081_v43  ;;  %15697 = vmatprep.mubr.f32.mxu1 %v28052_v0  ;;  %v24245_v43 = vld [vmem:[%s34421_s3 + $0x150] sm:$0xff] }
 0x56e   : > { %15960 = vmatprep.subr.mxu1 %v29257_v27  ;;  %15768 = vmatprep.mubr.f32.mxu0 %v28052_v0  ;;  %v17211_v27 = vpop.permute.xlu0 %17210 }
 0x570   : > { %24240 = vmatmul.mubr.msk.f32.gmra.mrb[8].mxu1 %vm467_vm1, %v24236_v13  ;;  %24241 = vmatmul.mubr.msk.f32.vlgmr.msra.gmra.mrb[8].mxu0 %vm467_vm1, %v24235_v23 }
 0x571   : > { %15884 = vmatpush1.msra.mxu0 %v29242_v63  ;;  %15774 = vmatprep.mubr.f32.mxu0 %v28052_v0 }
 0x572   : > { %16037 = vmatprep.subr.mxu0 %v29273_v3  ;;  %15845 = vmatprep.mubr.f32.mxu1 %v28052_v0 }
 0x574   : > { %24242 = vmatmul.mubr.msk.f32.gmra.mrb[10].mxu0 %vm467_vm1, %v24236_v13  ;;  %24243 = vmatmul.mubr.msk.f32.vlgmr.msra.gmra.mrb[10].mxu1 %vm467_vm1, %v24235_v23 }
 0x575   : > { %15961 = vmatpush1.msra.mxu1 %v29260_v28  ;;  %15851 = vmatprep.mubr.f32.mxu1 %v28052_v0 }
 0x576   : > { %16114 = vmatprep.subr.mxu1 %v29223_v53  ;;  %15947 = vmatprep.mubr.f32.mxu0 %v28052_v0  ;;  %v24275_v53 = vld [vmem:[%s34421_s3 + $0x180] sm:$0xff] }
 0x578   : > { %24244 = vmatmul.mubr.msk.f32.gmra.mrb[12].mxu1 %vm467_vm1, %v24236_v13  ;;  %24247 = vmatmul.mubr.msk.f32.vlgmr.msra.gmra.mrb[4].mxu0 %vm467_vm1, %v24245_v43 }
 0x579   : > { %16038 = vmatpush1.msra.mxu0 %v29279_v52  ;;  %15953 = vmatprep.mubr.f32.mxu0 %v28052_v0 }
 0x57a   : > { %16216 = vmatprep.subr.mxu0 %v29326_v61  ;;  %16024 = vmatprep.mubr.f32.mxu1 %v28052_v0 }
 0x57c   : > { %24248 = vmatmul.mubr.msk.f32.gmra.mrb[6].mxu0 %vm467_vm1, %v24246_v1  ;;  %24249 = vmatmul.mubr.msk.f32.vlgmr.msra.gmra.mrb[6].mxu1 %vm467_vm1, %v24245_v43 }
 0x57d   : > { %16115 = vmatpush1.msra.mxu1 %v29226_v54  ;;  %16030 = vmatprep.mubr.f32.mxu1 %v28052_v0  ;;  %v24276_v54 = vld [vmem:[%s34421_s3 + $0x188] sm:$0xff] }
 0x57e   : > { %16293 = vmatprep.subr.mxu1 %v29340_v16  ;;  %16101 = vmatprep.mubr.f32.mxu0 %v28052_v0 }
 0x580   : > { %24250 = vmatmul.mubr.msk.f32.gmra.mrb[8].mxu1 %vm467_vm1, %v24246_v1  ;;  %24251 = vmatmul.mubr.msk.f32.vlgmr.msra.gmra.mrb[8].mxu0 %vm467_vm1, %v24245_v43 }
 0x581   : > { %16217 = vmatpush1.msra.mxu0 %v29348_v5  ;;  %16107 = vmatprep.mubr.f32.mxu0 %v28052_v0 }
 0x582   : > { %16370 = vmatprep.subr.mxu0 %v29352_v6  ;;  %16178 = vmatprep.mubr.f32.mxu1 %v28052_v0 }
 0x584   : > { %24252 = vmatmul.mubr.msk.f32.gmra.mrb[10].mxu0 %vm467_vm1, %v24246_v1  ;;  %24253 = vmatmul.mubr.msk.f32.vlgmr.msra.gmra.mrb[10].mxu1 %vm467_vm1, %v24245_v43 }
 0x585   : > { %16294 = vmatpush1.msra.mxu1 %v29363_v7  ;;  %16184 = vmatprep.mubr.f32.mxu1 %v28052_v0 }
 0x586   : > { %16447 = vmatprep.subr.mxu1 %v29307_v2  ;;  %16280 = vmatprep.mubr.f32.mxu0 %v28052_v0 }
 0x588   : > { %24254 = vmatmul.mubr.msk.f32.gmra.mrb[12].mxu1 %vm467_vm1, %v24246_v1  ;;  %24257 = vmatmul.mubr.msk.f32.vlgmr.msra.gmra.mrb[4].mxu0 %vm467_vm1, %v24255_v24 }
 0x589   : > { %16371 = vmatpush1.msra.mxu0 %v29378_v15  ;;  %16286 = vmatprep.mubr.f32.mxu0 %v28052_v0 }
 0x58a   : > { %16549 = vmatprep.subr.mxu0 %v29382_v18  ;;  %16357 = vmatprep.mubr.f32.mxu1 %v28052_v0 }
 0x58c   : > { %24258 = vmatmul.mubr.msk.f32.gmra.mrb[6].mxu0 %vm467_vm1, %v24256_v38  ;;  %24259 = vmatmul.mubr.msk.f32.vlgmr.msra.gmra.mrb[6].mxu1 %vm467_vm1, %v24255_v24 }
 0x58d   : > { %16448 = vmatpush1.msra.mxu1 %v29336_v11  ;;  %16363 = vmatprep.mubr.f32.mxu1 %v28052_v0 }
 0x58e   : > { %16626 = vmatprep.subr.mxu1 %v29394_v31  ;;  %16434 = vmatprep.mubr.f32.mxu0 %v28052_v0 }
 0x590   : > { %24260 = vmatmul.mubr.msk.f32.gmra.mrb[8].mxu1 %vm467_vm1, %v24256_v38  ;;  %24261 = vmatmul.mubr.msk.f32.vlgmr.msra.gmra.mrb[8].mxu0 %vm467_vm1, %v24255_v24 }
 0x591   : > { %16550 = vmatpush1.msra.mxu0 %v29402_v40  ;;  %16440 = vmatprep.mubr.f32.mxu0 %v28052_v0 }
 0x592   : > { %16703 = vmatprep.subr.mxu0 %v29406_v45  ;;  %16511 = vmatprep.mubr.f32.mxu1 %v28052_v0 }
 0x594   : > { %24262 = vmatmul.mubr.msk.f32.gmra.mrb[10].mxu0 %vm467_vm1, %v24256_v38  ;;  %24263 = vmatmul.mubr.msk.f32.vlgmr.msra.gmra.mrb[10].mxu1 %vm467_vm1, %v24255_v24 }
 0x595   : > { %16627 = vmatpush1.msra.mxu1 %v29417_v58  ;;  %16517 = vmatprep.mubr.f32.mxu1 %v28052_v0 }
 0x596   : > { %16780 = vmatprep.subr.mxu1 %v29367_v8  ;;  %16613 = vmatprep.mubr.f32.mxu0 %v28052_v0 }
 0x598   : > { %24264 = vmatmul.mubr.msk.f32.gmra.mrb[12].mxu1 %vm467_vm1, %v24256_v38  ;;  %24267 = vmatmul.mubr.msk.f32.vlgmr.msra.gmra.mrb[4].mxu0 %vm467_vm1, %v24265_v39  ;;  %v17462_v38 = vld [vmem:[%s34423_s5 + $0x80] sm:$0xff] }
 0x599   : > { %16704 = vmatpush1.msra.mxu0 %v29432_v29  ;;  %16619 = vmatprep.mubr.f32.mxu0 %v28052_v0 }
 0x59a   : > { %16882 = vmatprep.subr.mxu0 %v29436_v30  ;;  %16690 = vmatprep.mubr.f32.mxu1 %v28052_v0 }
 0x59c   : > { %24268 = vmatmul.mubr.msk.f32.gmra.mrb[6].mxu0 %vm467_vm1, %v24266_v42  ;;  %24269 = vmatmul.mubr.msk.f32.vlgmr.msra.gmra.mrb[6].mxu1 %vm467_vm1, %v24265_v39 }
 0x59d   : > { %16781 = vmatpush1.msra.mxu1 %v29390_v25  ;;  %16696 = vmatprep.mubr.f32.mxu1 %v28052_v0 }
 0x59e   : > { %16959 = vmatprep.subr.mxu1 %v29448_v4  ;;  %16767 = vmatprep.mubr.f32.mxu0 %v28052_v0 }
 0x5a0   : > { %24270 = vmatmul.mubr.msk.f32.gmra.mrb[8].mxu1 %vm467_vm1, %v24266_v42  ;;  %24271 = vmatmul.mubr.msk.f32.vlgmr.msra.gmra.mrb[8].mxu0 %vm467_vm1, %v24265_v39 }
 0x5a1   : > { %16883 = vmatpush1.msra.mxu0 %v29456_v50  ;;  %16773 = vmatprep.mubr.f32.mxu0 %v28052_v0 }
 0x5a2   : > { %17036 = vmatprep.subr.mxu0 %v29460_v51  ;;  %16844 = vmatprep.mubr.f32.mxu1 %v28052_v0 }
 0x5a4   : > { %24272 = vmatmul.mubr.msk.f32.gmra.mrb[10].mxu0 %vm467_vm1, %v24266_v42  ;;  %24273 = vmatmul.mubr.msk.f32.vlgmr.msra.gmra.mrb[10].mxu1 %vm467_vm1, %v24265_v39  ;;  %v17463_v39 = vld [vmem:[%s34423_s5 + $0x88] sm:$0xff] }
 0x5a5   : > { %16960 = vmatpush1.msra.mxu1 %v29471_v21  ;;  %16850 = vmatprep.mubr.f32.mxu1 %v28052_v0 }
 0x5a6   : > { %17113 = vmatprep.subr.mxu1 %v29421_v59  ;;  %16946 = vmatprep.mubr.f32.mxu0 %v28052_v0 }
 0x5a8   : > { %24274 = vmatmul.mubr.msk.f32.gmra.mrb[12].mxu1 %vm467_vm1, %v24266_v42  ;;  %24277 = vmatmul.mubr.msk.f32.vlgmr.msra.gmra.mrb[4].mxu0 %vm467_vm1, %v24275_v53  ;;  %v17446_v42 = vld [vmem:[%s34423_s5] sm:$0xff] }
 0x5a9   : > { %17037 = vmatpush1.msra.mxu0 %v29486_v44  ;;  %16952 = vmatprep.mubr.f32.mxu0 %v28052_v0 }
 0x5aa   : > { %17023 = vmatprep.mubr.f32.mxu1 %v28052_v0 }
 0x5ac   : > { %24278 = vmatmul.mubr.msk.f32.gmra.mrb[6].mxu0 %vm467_vm1, %v24276_v54  ;;  %24279 = vmatmul.mubr.msk.f32.vlgmr.msra.gmra.mrb[6].mxu1 %vm467_vm1, %v24275_v53 }
 0x5ad   : > { %17114 = vmatpush1.msra.mxu1 %v29444_v10  ;;  %17029 = vmatprep.mubr.f32.mxu1 %v28052_v0 }
 0x5ae   : > { %17100 = vmatprep.mubr.f32.mxu0 %v28052_v0 }
 0x5b0   : > { %24280 = vmatmul.mubr.msk.f32.gmra.mrb[8].mxu1 %vm467_vm1, %v24276_v54  ;;  %24281 = vmatmul.mubr.msk.f32.vlgmr.msra.gmra.mrb[8].mxu0 %vm467_vm1, %v24275_v53 }
 0x5b1   : > { %17106 = vmatprep.mubr.f32.mxu0 %v28052_v0  ;;  %17177 = vmatprep.mubr.f32.mxu1 %v28052_v0 }
 0x5b2   : > { %v17216_v3 = vpop.permute.xlu1 %17215 }
 0x5b4   : > { %24282 = vmatmul.mubr.msk.f32.gmra.mrb[10].mxu0 %vm467_vm1, %v24276_v54  ;;  %24283 = vmatmul.mubr.msk.f32.vlgmr.msra.gmra.mrb[10].mxu1 %vm467_vm1, %v24275_v53  ;;  %v26966_v53 = vpack.c.bf16 %v17463_v39, %v17462_v38  ;;  %v17482_v38 = vld [vmem:[%s34423_s5 + $0x120] sm:$0xff] }
 0x5b5   : > { %17183 = vmatprep.mubr.f32.mxu1 %v28052_v0 }
 0x5b6   : > { %26967 = vmatprep.subr.bf16.mxu0 %v26966_v53  ;;  %v17483_v53 = vld [vmem:[%s34423_s5 + $0x128] sm:$0xff] }
 0x5b8   : > { %24284 = vmatmul.mubr.msk.f32.gmra.mrb[12].mxu1 %vm467_vm1, %v24276_v54  ;;  %v17447_v54 = vld [vmem:[%s34423_s5 + $0x8] sm:$0xff]  ;;  %vm28078_vm1 = vmmov 0  }
 0x67b   : > { %v16948_v60 = vpop.f32.mrb[4].mxu0 }
 0x67c   : > { %v16950_v63 = vpop.f32.mrb[5].mxu0  ;;  %v30220_v52 = vadd.f32 %v17211_v27, %v16948_v60  ;;  %v17494_v60 = vld [vmem:[%s34423_s5 + $0x180] sm:$0xff] }
 0x67d   : > { %v30218_v28 = vadd.f32 %v17211_v27, %v16950_v63  ;;  %v26968_v63 = vpack.c.bf16 %v17447_v54, %v17446_v42  ;;  %v17468_v54 = vld [vmem:[%s34423_s5 + $0xb0] sm:$0xff] }
 0x67e   : > { %v17234_v18 = vmax.f32 %v30220_v52, 0.0 }
 0x67f   : > { %v16954_v2 = vpop.f32.mrb[6].mxu0  ;;  %v17025_v61 = vpop.f32.mrb[6].mxu1  ;;  %v17235_v7 = vmax.f32 %v30218_v28, 0.0  ;;  %26969 = vmatpush3.bf16.msra.mxu0 %v26968_v63 }
 0x680   : > { %v30222_v11 = vadd.f32 %v17211_v27, %v17025_v61  ;;  %v16956_v16 = vpop.f32.mrb[7].mxu0  ;;  %v17027_v5 = vpop.f32.mrb[7].mxu1  ;;  %v30251_v34 = vadd.f32 %v17216_v3, %v16954_v2  ;;  %v17479_v2 = vld [vmem:[%s34423_s5 + $0x108] sm:$0xff] }
 0x681   : > { %v30224_v6 = vadd.f32 %v17211_v27, %v17027_v5  ;;  %v30228_v15 = vadd.f32 %v17216_v3, %v16956_v16  ;;  %v17464_v5 = vld [vmem:[%s34423_s5 + $0x90] sm:$0xff] }
 0x682   : > { %v17236_v8 = vmax.f32 %v30222_v11, 0.0  ;;  %v17242_v32 = vmax.f32 %v30251_v34, 0.0 }
 0x683   : > { %v17237_v25 = vmax.f32 %v30224_v6, 0.0  ;;  %v17031_v31 = vpop.f32.mrb[8].mxu1  ;;  %v17102_v40 = vpop.f32.mrb[8].mxu0  ;;  %v17243_v51 = vmax.f32 %v30228_v15, 0.0 }
 0x684   : > { %v27841_v45 = vpack.i.bf16 %v17236_v8, %v17235_v7  ;;  %v30236_v58 = vadd.f32 %v17216_v3, %v17031_v31  ;;  %v30238_v59 = vadd.f32 %v17211_v27, %v17102_v40  ;;  %v17033_v29 = vpop.f32.mrb[9].mxu1  ;;  %v17104_v30 = vpop.f32.mrb[9].mxu0  ;;  %v17465_v31 = vld [vmem:[%s34423_s5 + $0x98] sm:$0xff]  ;;  %v17448_v40 = vld [vmem:[%s34423_s5 + $0x10] sm:$0xff] }
 0x685   : > { %v27846_v10 = vpack.i.bf16 %v17234_v18, %v17237_v25  ;;  %v30244_v4 = vadd.f32 %v17216_v3, %v17033_v29  ;;  %v30246_v50 = vadd.f32 %v17211_v27, %v17104_v30  ;;  %v17449_v29 = vld [vmem:[%s34423_s5 + $0x18] sm:$0xff]  ;;  %v17496_v30 = vld [vmem:[%s34423_s5 + $0x190] sm:$0xff] }
 0x686   : > { %v17244_v21 = vmax.f32 %v30236_v58, 0.0  ;;  %v17238_v44 = vmax.f32 %v30238_v59, 0.0  ;;  %27842 = vrot.lane.b32.xlu0 %v27841_v45, %s28054_s28  ;;  %v26970_v45 = vpack.c.bf16 %v17465_v31, %v17464_v5  ;;  %v17484_v5 = vld [vmem:[%s34423_s5 + $0x130] sm:$0xff] }
 0x687   : > { %v17239_v20 = vmax.f32 %v30246_v50, 0.0  ;;  %v17108_v26 = vpop.f32.mrb[10].mxu0  ;;  %27847 = vrot.lane.b32.xlu1 %v27846_v10, %s28054_s28  ;;  %v17179_v37 = vpop.f32.mrb[10].mxu1  ;;  %v17245_v55 = vmax.f32 %v30244_v4, 0.0  ;;  %v17497_v10 = vld [vmem:[%s34423_s5 + $0x198] sm:$0xff] }
 0x688   : > { %v27856_v47 = vpack.i.bf16 %v17244_v21, %v17243_v51  ;;  %v30261_v14 = vadd.f32 %v17216_v3, %v17108_v26  ;;  %v17110_v22 = vpop.f32.mrb[11].mxu0  ;;  %v17181_v56 = vpop.f32.mrb[11].mxu1  ;;  %v30267_v41 = vadd.f32 %v17211_v27, %v17179_v37  ;;  %v26972_v26 = vpack.c.bf16 %v17449_v29, %v17448_v40  ;;  %26971 = vmatprep.subr.bf16.mxu0 %v26970_v45  ;;  %v17485_v40 = vld [vmem:[%s34423_s5 + $0x138] sm:$0xff]  ;;  %v17470_v45 = vld [vmem:[%s34423_s5 + $0xc0] sm:$0xff]  ;;  %v17471_v29 = vld [vmem:[%s34423_s5 + $0xc8] sm:$0xff] }
 0x689   : > { %v27851_v12 = vpack.i.bf16 %v17239_v20, %v17238_v44  ;;  %v30269_v62 = vadd.f32 %v17216_v3, %v17110_v22  ;;  %v30271_v35 = vadd.f32 %v17211_v27, %v17181_v56  ;;  %v27861_v46 = vpack.i.bf16 %v17242_v32, %v17245_v55  ;;  %v17495_v27 = vld [vmem:[%s34423_s5 + $0x188] sm:$0xff]  ;;  %v17481_v22 = vld [vmem:[%s34423_s5 + $0x118] sm:$0xff]  ;;  %v17466_v56 = vld [vmem:[%s34423_s5 + $0xa0] sm:$0xff] }
 0x68a   : > { %v17246_v9 = vmax.f32 %v30261_v14, 0.0  ;;  %v17240_v57 = vmax.f32 %v30267_v41, 0.0  ;;  %v26998_v61 = vpack.c.bf16 %v17495_v27, %v17494_v60  ;;  %v27002_v37 = vpack.c.bf16 %v17497_v10, %v17496_v30  ;;  %26973 = vmatpush3.bf16.msra.mxu0 %v26972_v26  ;;  %v17469_v60 = vld [vmem:[%s34423_s5 + $0xb8] sm:$0xff]  ;;  %v17452_v27 = vld [vmem:[%s34423_s5 + $0x30] sm:$0xff]  ;;  %v17502_v10 = vld [vmem:[%s34423_s5 + $0x1c0] sm:$0xff] }
 0x68b   : > { %v17247_v33 = vmax.f32 %v30269_v62, 0.0  ;;  %27852 = vrot.lane.b32.xlu0 %v27851_v12, %s28054_s28  ;;  %v17185_v36 = vpop.f32.mrb[12].mxu1  ;;  %27857 = vrot.lane.b32.xlu1 %v27856_v47, %s28054_s28  ;;  %v17241_v49 = vmax.f32 %v30271_v35, 0.0  ;;  %v17480_v47 = vld [vmem:[%s34423_s5 + $0x110] sm:$0xff]  ;;  %v26978_v63 = vpack.c.bf16 %v17469_v60, %v17468_v54  ;;  %v17503_v26 = vld [vmem:[%s34423_s5 + $0x1c8] sm:$0xff] }
 0x68c   : > { %v30282_v48 = vadd.f32 %v17216_v3, %v17185_v36  ;;  %v17187_v19 = vpop.f32.mrb[13].mxu1  ;;  %26999 = vmatprep.subr.bf16.mxu1 %v26998_v61  ;;  %v27004_v12 = vpack.c.bf16 %v17481_v22, %v17480_v47  ;;  %v17467_v36 = vld [vmem:[%s34423_s5 + $0xa8] sm:$0xff]  ;;  %v27008_v61 = vpack.c.bf16 %v17483_v53, %v17482_v38  ;;  %v17454_v47 = vld [vmem:[%s34423_s5 + $0x40] sm:$0xff]  ;;  %v17505_v38 = vld [vmem:[%s34423_s5 + $0x1d8] sm:$0xff] }
 0x68d   : > { %v27866_v17 = vpack.i.bf16 %v17247_v33, %v17246_v9  ;;  %v30290_v23 = vadd.f32 %v17216_v3, %v17187_v19  ;;  %v27871_v1 = vpack.i.bf16 %v17241_v49, %v17240_v57  ;;  %v17478_v3 = vld [vmem:[%s34423_s5 + $0x100] sm:$0xff]  ;;  %v17451_v19 = vld [vmem:[%s34423_s5 + $0x28] sm:$0xff]  ;;  %v17457_v53 = vld [vmem:[%s34423_s5 + $0x58] sm:$0xff] }
 0x68e   : > { %v17248_v13 = vmax.f32 %v30282_v48, 0.0  ;;  %v27000_v16 = vpack.c.bf16 %v17479_v2, %v17478_v3  ;;  %v17453_v3 = vld [vmem:[%s34423_s5 + $0x38] sm:$0xff]  ;;  %v17500_v2 = vld [vmem:[%s34423_s5 + $0x1b0] sm:$0xff]  ;;  %v17455_v22 = vld [vmem:[%s34423_s5 + $0x48] sm:$0xff] }
 0x68f   : > { %v17249_v43 = vmax.f32 %v30290_v23, 0.0  ;;  %27867 = vrot.lane.b32.xlu1 %v27866_v17, %s28054_s28  ;;  %27862 = vrot.lane.b32.xlu0 %v27861_v46, %s28054_s28  ;;  %v17450_v46 = vld [vmem:[%s34423_s5 + $0x20] sm:$0xff]  ;;  %v26974_v17 = vpack.c.bf16 %v17467_v36, %v17466_v56  ;;  %v26980_v30 = vpack.c.bf16 %v17453_v3, %v17452_v27  ;;  %v27012_v56 = vpack.c.bf16 %v17485_v40, %v17484_v5  ;;  %v17473_v36 = vld [vmem:[%s34423_s5 + $0xd8] sm:$0xff] }
 0x690   : > { %27001 = vmatpush3.bf16.msra.mxu1 %v27000_v16  ;;  %v26976_v39 = vpack.c.bf16 %v17451_v19, %v17450_v46  ;;  %v17501_v16 = vld [vmem:[%s34423_s5 + $0x1b8] sm:$0xff]  ;;  %v27014_v46 = vpack.c.bf16 %v17503_v26, %v17502_v10  ;;  %v17486_v19 = vld [vmem:[%s34423_s5 + $0x140] sm:$0xff]  ;;  %v17459_v40 = vld [vmem:[%s34423_s5 + $0x68] sm:$0xff] }
 0x691   : > { %v27876_v24 = vpack.i.bf16 %v17249_v43, %v17248_v13  ;;  %27003 = vmatprep.subr.bf16.mxu1 %v27002_v37  ;;  %26975 = vmatprep.subr.bf16.mxu0 %v26974_v17  ;;  %v27010_v31 = vpack.c.bf16 %v17501_v16, %v17500_v2  ;;  %v26982_v37 = vpack.c.bf16 %v17471_v29, %v17470_v45  ;;  %v17487_v17 = vld [vmem:[%s34423_s5 + $0x148] sm:$0xff]  ;;  %v17489_v27 = vld [vmem:[%s34423_s5 + $0x158] sm:$0xff]  ;;  %v17506_v45 = vld [vmem:[%s34423_s5 + $0x1e0] sm:$0xff] }
 0x692   : > { %26977 = vmatpush3.bf16.msra.mxu0 %v26976_v39  ;;  %v27016_v54 = vpack.c.bf16 %v17487_v17, %v17486_v19  ;;  %v17475_v16 = vld [vmem:[%s34423_s5 + $0xe8] sm:$0xff]  ;;  %v17490_v10 = vld [vmem:[%s34423_s5 + $0x160] sm:$0xff]  ;;  %v17461_v19 = vld [vmem:[%s34423_s5 + $0x78] sm:$0xff] }
 0x693   : > { %27877 = vrot.lane.b32.xlu1 %v27876_v24, %s28054_s28  ;;  %27872 = vrot.lane.b32.xlu0 %v27871_v1, %s28054_s28  ;;  %v17498_v1 = vld [vmem:[%s34423_s5 + $0x1a0] sm:$0xff]  ;;  %v17499_v24 = vld [vmem:[%s34423_s5 + $0x1a8] sm:$0xff] }
 0x694   : > { %v27006_v42 = vpack.c.bf16 %v17499_v24, %v17498_v1  ;;  %27005 = vmatpush3.bf16.msra.mxu1 %v27004_v12  ;;  %26979 = vmatprep.subr.bf16.mxu0 %v26978_v63  ;;  %v17472_v12 = vld [vmem:[%s34423_s5 + $0xd0] sm:$0xff]  ;;  %v26984_v1 = vpack.c.bf16 %v17455_v22, %v17454_v47  ;;  %v17491_v26 = vld [vmem:[%s34423_s5 + $0x168] sm:$0xff] }
 0x695   : > { %v17504_v24 = vld [vmem:[%s34423_s5 + $0x1d0] sm:$0xff]  ;;  %v26986_v39 = vpack.c.bf16 %v17473_v36, %v17472_v12  ;;  %v27024_v47 = vpack.c.bf16 %v17491_v26, %v17490_v10  ;;  %v17511_v23 = vld [vmem:[%s34423_s5 + $0x208] sm:$0xff] }
 0x696   : > { %27007 = vmatprep.subr.bf16.mxu1 %v27006_v42  ;;  %26981 = vmatpush3.bf16.msra.mxu0 %v26980_v30  ;;  %v17456_v42 = vld [vmem:[%s34423_s5 + $0x50] sm:$0xff]  ;;  %v27018_v60 = vpack.c.bf16 %v17505_v38, %v17504_v24  ;;  %v17507_v30 = vld [vmem:[%s34423_s5 + $0x1e8] sm:$0xff] }
 0x697   : > { %26983 = vmatprep.subr.bf16.mxu0 %v26982_v37  ;;  %v17488_v63 = vld [vmem:[%s34423_s5 + $0x150] sm:$0xff]  ;;  %v26988_v3 = vpack.c.bf16 %v17457_v53, %v17456_v42  ;;  %v27022_v37 = vpack.c.bf16 %v17507_v30, %v17506_v45  ;;  %v17509_v42 = vld [vmem:[%s34423_s5 + $0x1f8] sm:$0xff]  ;;  %v17558_v45 = vld [vmem:[%s34423_s5 + $0x380] sm:$0xff] }
 0x698   : > { %27009 = vmatpush3.bf16.msra.mxu1 %v27008_v61  ;;  %v27020_v2 = vpack.c.bf16 %v17489_v27, %v17488_v63  ;;  %v17474_v61 = vld [vmem:[%s34423_s5 + $0xe0] sm:$0xff]  ;;  %v17476_v22 = vld [vmem:[%s34423_s5 + $0xf0] sm:$0xff] }
 0x699   : > { %27011 = vmatprep.subr.bf16.mxu1 %v27010_v31  ;;  %v26990_v5 = vpack.c.bf16 %v17475_v16, %v17474_v61  ;;  %v17458_v31 = vld [vmem:[%s34423_s5 + $0x60] sm:$0xff]  ;;  %v17508_v17 = vld [vmem:[%s34423_s5 + $0x1f0] sm:$0xff]  ;;  %v17527_v16 = vld [vmem:[%s34423_s5 + $0x288] sm:$0xff] }
 0x69a   : > { %26985 = vmatpush3.bf16.msra.mxu0 %v26984_v1  ;;  %v26992_v29 = vpack.c.bf16 %v17459_v40, %v17458_v31  ;;  %v17492_v53 = vld [vmem:[%s34423_s5 + $0x170] sm:$0xff]  ;;  %v27026_v27 = vpack.c.bf16 %v17509_v42, %v17508_v17  ;;  %v17526_v61 = vld [vmem:[%s34423_s5 + $0x280] sm:$0xff] }
 0x69b   : > { %26987 = vmatprep.subr.bf16.mxu0 %v26986_v39  ;;  %v27030_v40 = vpack.c.bf16 %v17527_v16, %v17526_v61 }
 0x69c   : > { %27013 = vmatpush3.bf16.msra.mxu1 %v27012_v56  ;;  %v17477_v56 = vld [vmem:[%s34423_s5 + $0xf8] sm:$0xff] }
 0x69d   : > { %27015 = vmatprep.subr.bf16.mxu1 %v27014_v46  ;;  %v26994_v36 = vpack.c.bf16 %v17477_v56, %v17476_v22  ;;  %v17460_v46 = vld [vmem:[%s34423_s5 + $0x70] sm:$0xff] }
 0x69e   : > { %26989 = vmatpush3.bf16.msra.mxu0 %v26988_v3  ;;  %v26996_v39 = vpack.c.bf16 %v17461_v19, %v17460_v46 }
 0x69f   : > { %26991 = vmatprep.subr.bf16.mxu0 %v26990_v5 }
 0x6a0   : > { %27017 = vmatpush3.bf16.msra.mxu1 %v27016_v54  ;;  %v17493_v54 = vld [vmem:[%s34423_s5 + $0x178] sm:$0xff] }
 0x6a1   : > { %27019 = vmatprep.subr.bf16.mxu1 %v27018_v60  ;;  %v27028_v3 = vpack.c.bf16 %v17493_v54, %v17492_v53 }
 0x6a2   : > { %26993 = vmatpush3.bf16.msra.mxu0 %v26992_v29 }
 0x6a3   : > { %26995 = vmatprep.subr.bf16.mxu0 %v26994_v36 }
 0x6a4   : > { %27021 = vmatpush3.bf16.msra.mxu1 %v27020_v2 }
 0x6a5   : > { %27023 = vmatprep.subr.bf16.mxu1 %v27022_v37 }
 0x6a6   : > { %26997 = vmatpush3.bf16.msra.mxu0 %v26996_v39 }
 0x6a7   : > { %27031 = vmatprep.subr.bf16.mxu0 %v27030_v40 }
 0x6a8   : > { %27025 = vmatpush3.bf16.msra.mxu1 %v27024_v47 }
 0x6a9   : > { %27027 = vmatprep.subr.bf16.mxu1 %v27026_v27 }
 0x6ac   : > { %27029 = vmatpush3.bf16.msra.mxu1 %v27028_v3 }
 0x6f8   : > { %v27843_v12 = vpop.permute.xlu0 %27842 }
 0x6f9   : > { %v27845_v1 = vunpack.i.h.bf16 %v27843_v12  ;;  %v27844_v24 = vunpack.i.l.bf16 %v27843_v12  ;;  %v30489_v38 = vpop.permute.xlu1 %27847 }
 0x6fa   : > { %v27850_v60 = vunpack.i.h.bf16 %v30489_v38  ;;  %v27849_v63 = vunpack.i.l.bf16 %v30489_v38 }
 0x6fb   : > { %v17299_v2 = vsel %vm1060_vm2, %v27844_v24, %v27845_v1 }
 0x6fc   : > { %v30511_v5 = vmax.f32 %v17235_v7, %v17299_v2  ;;  %v17300_v31 = vsel %vm1060_vm2, %v27845_v1, %v27849_v63  ;;  %v17298_v29 = vsel %vm1060_vm2, %v27850_v60, %v27844_v24  ;;  %v17559_v7 = vld [vmem:[%s34423_s5 + $0x388] sm:$0xff] }
 0x6fd   : > { %v30522_v30 = vmax.f32 %v17236_v8, %v17300_v31  ;;  %v27853_v10 = vpop.permute.xlu0 %27852  ;;  %v27858_v28 = vpop.permute.xlu1 %27857  ;;  %v27062_v12 = vpack.c.bf16 %v17559_v7, %v17558_v45  ;;  %v30533_v36 = vmax.f32 %v17234_v18, %v17298_v29  ;;  %v17543_v7 = vld [vmem:[%s34423_s5 + $0x308] sm:$0xff] }
 0x6fe   : > { %v27855_v26 = vunpack.i.h.bf16 %v27853_v10  ;;  %v27854_v37 = vunpack.i.l.bf16 %v27853_v10  ;;  %v27860_v47 = vunpack.i.h.bf16 %v27858_v28  ;;  %v27859_v22 = vunpack.i.l.bf16 %v27858_v28  ;;  %v17542_v28 = vld [vmem:[%s34423_s5 + $0x300] sm:$0xff] }
 0x6ff   : > { %v27881_v56 = vpack.i.bf16 %v30522_v30, %v30511_v5  ;;  %27063 = vmatprep.subr.bf16.mxu1 %v27062_v12  ;;  %v17560_v12 = vld [vmem:[%s34423_s5 + $0x390] sm:$0xff] }
 0x700   : > { %v17301_v11 = vsel %vm1060_vm2, %v27849_v63, %v27854_v37  ;;  %v17302_v8 = vsel %vm1060_vm2, %v27854_v37, %v27855_v26  ;;  %v17306_v19 = vsel %vm1060_vm2, %v27859_v22, %v27860_v47 }
 0x701   : > { %v30537_v46 = vmax.f32 %v17237_v25, %v17301_v11  ;;  %v27863_v17 = vpop.permute.xlu0 %27862  ;;  %v27868_v1 = vpop.permute.xlu1 %27867  ;;  %27882 = vrot.lane.b32.xlu0 %v27881_v56, %s28062_s14  ;;  %v30543_v52 = vmax.f32 %v17238_v44, %v17302_v8  ;;  %v30549_v18 = vmax.f32 %v17243_v51, %v17306_v19  ;;  %v17561_v11 = vld [vmem:[%s34423_s5 + $0x398] sm:$0xff] }
 0x702   : > { %v27865_v24 = vunpack.i.h.bf16 %v27863_v17  ;;  %v27864_v39 = vunpack.i.l.bf16 %v27863_v17  ;;  %v27870_v42 = vunpack.i.h.bf16 %v27868_v1  ;;  %v27869_v53 = vunpack.i.l.bf16 %v27868_v1 }
 0x703   : > { %v27886_v6 = vpack.i.bf16 %v30537_v46, %v30533_v36  ;;  %v27064_v1 = vpack.c.bf16 %v17543_v7, %v17542_v28  ;;  %v17533_v7 = vld [vmem:[%s34423_s5 + $0x2b8] sm:$0xff] }
 0x704   : > { %v17305_v25 = vsel %vm1060_vm2, %v27865_v24, %v27859_v22  ;;  %v17307_v54 = vsel %vm1060_vm2, %v27860_v47, %v27864_v39  ;;  %v17308_v63 = vsel %vm1060_vm2, %v27864_v39, %v27869_v53  ;;  %v17309_v44 = vsel %vm1060_vm2, %v27869_v53, %v27870_v42  ;;  %v17528_v22 = vld [vmem:[%s34423_s5 + $0x290] sm:$0xff] }
 0x705   : > { %v30556_v27 = vmax.f32 %v17242_v32, %v17305_v25  ;;  %v30560_v59 = vmax.f32 %v17244_v21, %v17307_v54  ;;  %v30565_v15 = vmax.f32 %v17245_v55, %v17308_v63  ;;  %v27873_v51 = vpop.permute.xlu0 %27872  ;;  %v27878_v3 = vpop.permute.xlu1 %27877  ;;  %27887 = vrot.lane.b32.xlu1 %v27886_v6, %s28062_s14  ;;  %17372 = vrot.lane.b32.xlu0 %v30543_v52, %s28062_s14  ;;  %v17513_v54 = vld [vmem:[%s34423_s5 + $0x218] sm:$0xff]  ;;  %v17544_v63 = vld [vmem:[%s34423_s5 + $0x310] sm:$0xff] }
 0x706   : > { %v27875_v2 = vunpack.i.h.bf16 %v27873_v51  ;;  %v27874_v61 = vunpack.i.l.bf16 %v27873_v51  ;;  %v27880_v16 = vunpack.i.h.bf16 %v27878_v3  ;;  %v27879_v34 = vunpack.i.l.bf16 %v27878_v3 }
 0x707   : > { %v27891_v58 = vpack.i.bf16 %v30560_v59, %v30549_v18  ;;  %v27896_v21 = vpack.i.bf16 %v30565_v15, %v30556_v27  ;;  %v30581_v31 = vmax.f32 %v17246_v9, %v17309_v44  ;;  %v17545_v44 = vld [vmem:[%s34423_s5 + $0x318] sm:$0xff] }
 0x708   : > { %v17303_v4 = vsel %vm1060_vm2, %v27855_v26, %v27874_v61  ;;  %v17304_v55 = vsel %vm1060_vm2, %v27874_v61, %v27875_v2  ;;  %v17330_v32 = vsel %vm1060_vm2, %v27875_v2, %v27850_v60  ;;  %v17310_v38 = vsel %vm1060_vm2, %v27870_v42, %v27879_v34  ;;  %v17510_v60 = vld [vmem:[%s34423_s5 + $0x200] sm:$0xff]  ;;  %v17531_v2 = vld [vmem:[%s34423_s5 + $0x2a8] sm:$0xff] }
 0x709   : > { %v30585_v40 = vmax.f32 %v17239_v20, %v17303_v4  ;;  %v30589_v45 = vmax.f32 %v17240_v57, %v17304_v55  ;;  %v30593_v29 = vmax.f32 %v17241_v49, %v17330_v32  ;;  %27892 = vrot.lane.b32.xlu1 %v27891_v58, %s28062_s14  ;;  %v17311_v14 = vsel %vm1060_vm2, %v27879_v34, %v27880_v16  ;;  %v17562_v34 = vld [vmem:[%s34423_s5 + $0x3a0] sm:$0xff]  ;;  %v17563_v58 = vld [vmem:[%s34423_s5 + $0x3a8] sm:$0xff] }
 0x70a   : > { %27897 = vrot.lane.b32.xlu0 %v27896_v21, %s28062_s14  ;;  %v30601_v50 = vmax.f32 %v17247_v33, %v17310_v38  ;;  %v30605_v20 = vmax.f32 %v17248_v13, %v17311_v14  ;;  %v17331_v9 = vsel %vm1060_vm2, %v27880_v16, %v27865_v24  ;;  %v27032_v56 = vpack.c.bf16 %v17511_v23, %v17510_v60  ;;  %v17512_v24 = vld [vmem:[%s34423_s5 + $0x210] sm:$0xff]  ;;  %v17547_v60 = vld [vmem:[%s34423_s5 + $0x328] sm:$0xff] }
 0x70b   : > { %v27901_v41 = vpack.i.bf16 %v30585_v40, %v30581_v31  ;;  %v27906_v35 = vpack.i.bf16 %v30593_v29, %v30589_v45  ;;  %v30618_v33 = vmax.f32 %v17249_v43, %v17331_v9  ;;  %v27036_v4 = vpack.c.bf16 %v17513_v54, %v17512_v24  ;;  %v17515_v9 = vld [vmem:[%s34423_s5 + $0x228] sm:$0xff]  ;;  %v17566_v54 = vld [vmem:[%s34423_s5 + $0x3c0] sm:$0xff] }
 0x70c   : > { %v27911_v62 = vpack.i.bf16 %v30605_v20, %v30601_v50  ;;  %v27068_v55 = vpack.c.bf16 %v17545_v44, %v17544_v63  ;;  %v17567_v63 = vld [vmem:[%s34423_s5 + $0x3c8] sm:$0xff]  ;;  %vm17913_vm2 = vcmask 130048  }
 0x70d   : > { %27902 = vrot.lane.b32.xlu1 %v27901_v41, %s28062_s14 }
 0x70e   : > { %27907 = vrot.lane.b32.xlu0 %v27906_v35, %s28062_s14  ;;  %v17514_v35 = vld [vmem:[%s34423_s5 + $0x220] sm:$0xff] }
 0x711   : > { %27912 = vrot.lane.b32.xlu1 %v27911_v62, %s28062_s14 }
 0x712   : > { %17394 = vrot.lane.b32.xlu0 %v30618_v33, %s28062_s14 }
 0x773   : > { %v27883_v48 = vpop.permute.xlu0 %27882 }
 0x774   : > { %v27885_v57 = vunpack.i.h.bf16 %v27883_v48  ;;  %v27884_v49 = vunpack.i.l.bf16 %v27883_v48 }
 0x776   : > { %v17397_v13 = vsel %vm3708_vm10, %v27884_v49, %v27885_v57 }
 0x777   : > { %v30630_v43 = vpop.permute.xlu1 %27887  ;;  %v17431_v10 = vmax.f32 %v30511_v5, %v17397_v13  ;;  %v30641_v47 = vpop.permute.xlu0 %17372  ;;  %v17529_v5 = vld [vmem:[%s34423_s5 + $0x298] sm:$0xff]  ;;  %v17546_v13 = vld [vmem:[%s34423_s5 + $0x320] sm:$0xff] }
 0x778   : > { %v27890_v26 = vunpack.i.h.bf16 %v30630_v43  ;;  %v27889_v37 = vunpack.i.l.bf16 %v30630_v43  ;;  %v27034_v25 = vpack.c.bf16 %v17529_v5, %v17528_v22  ;;  %v27040_v22 = vpack.c.bf16 %v17515_v9, %v17514_v35  ;;  %v17564_v5 = vld [vmem:[%s34423_s5 + $0x3b0] sm:$0xff]  ;;  %v17553_v9 = vld [vmem:[%s34423_s5 + $0x358] sm:$0xff] }
 0x779   : > { %17638 = vmatprep.mubr.f32.mxu0 %v17431_v10 }
 0x77a   : > { %v17396_v8 = vsel %vm3708_vm10, %v27889_v37, %v27884_v49  ;;  %v17398_v19 = vsel %vm3708_vm10, %v27885_v57, %v27890_v26  ;;  %v17399_v17 = vsel %vm3708_vm10, %v27890_v26, %v30641_v47  ;;  %v27070_v49 = vpack.c.bf16 %v17563_v58, %v17562_v34  ;;  %v17568_v34 = vld [vmem:[%s34423_s5 + $0x3d0] sm:$0xff]  ;;  %v17569_v58 = vld [vmem:[%s34423_s5 + $0x3d8] sm:$0xff] }
 0x77b   : > { %v17430_v39 = vmax.f32 %v30533_v36, %v17396_v8  ;;  %v17432_v42 = vmax.f32 %v30522_v30, %v17398_v19  ;;  %v17433_v53 = vmax.f32 %v30537_v46, %v17399_v17  ;;  %v27893_v6 = vpop.permute.xlu1 %27892  ;;  %v27066_v30 = vpack.c.bf16 %v17561_v11, %v17560_v12  ;;  %v17530_v46 = vld [vmem:[%s34423_s5 + $0x2a0] sm:$0xff]  ;;  %v17516_v8 = vld [vmem:[%s34423_s5 + $0x230] sm:$0xff]  ;;  %v17517_v19 = vld [vmem:[%s34423_s5 + $0x238] sm:$0xff] }
 0x77c   : > { %v27895_v51 = vunpack.i.h.bf16 %v27893_v6  ;;  %v27894_v36 = vunpack.i.l.bf16 %v27893_v6  ;;  %v30676_v3 = vpop.permute.xlu0 %27897  ;;  %v27038_v41 = vpack.c.bf16 %v17531_v2, %v17530_v46  ;;  %v27072_v11 = vpack.c.bf16 %v17547_v60, %v17546_v13  ;;  %v17548_v17 = vld [vmem:[%s34423_s5 + $0x330] sm:$0xff]  ;;  %v17551_v46 = vld [vmem:[%s34423_s5 + $0x348] sm:$0xff]  ;;  %v17570_v13 = vld [vmem:[%s34423_s5 + $0x3e0] sm:$0xff] }
 0x77d   : > { %v27900_v61 = vunpack.i.h.bf16 %v30676_v3  ;;  %v27899_v16 = vunpack.i.l.bf16 %v30676_v3  ;;  %17639 = vmatmul.mubr.f32.vlgmr.msra.gmra.mrb[12].mxu0 %v17430_v39  ;;  %17713 = vmatprep.mubr.f32.mxu1 %v17433_v53  ;;  %v17549_v39 = vld [vmem:[%s34423_s5 + $0x338] sm:$0xff]  ;;  %v17535_v53 = vld [vmem:[%s34423_s5 + $0x2c8] sm:$0xff]  ;;  %v17536_v2 = vld [vmem:[%s34423_s5 + $0x2d0] sm:$0xff]  ;;  %v27082_v35 = vpack.c.bf16 %v17569_v58, %v17568_v34 }
 0x77e   : > { %27033 = vmatpush3.bf16.msra.mxu0 %v27032_v56  ;;  %17714 = vmatmul.mubr.f32.vlgmr.msra.gmra.mrb[14].mxu1 %v17432_v42  ;;  %v17404_v21 = vsel %vm3708_vm10, %v27894_v36, %v27895_v51  ;;  %v17565_v56 = vld [vmem:[%s34423_s5 + $0x3b8] sm:$0xff]  ;;  %v17534_v42 = vld [vmem:[%s34423_s5 + $0x2c0] sm:$0xff]  ;;  %v27076_v43 = vpack.c.bf16 %v17549_v39, %v17548_v17  ;;  %v17571_v60 = vld [vmem:[%s34423_s5 + $0x3e8] sm:$0xff] }
 0x77f   : > { %27065 = vmatpush3.bf16.msra.mxu1 %v27064_v1  ;;  %v30693_v32 = vpop.permute.xlu1 %27902  ;;  %27035 = vmatprep.subr.bf16.mxu0 %v27034_v25  ;;  %v17439_v38 = vmax.f32 %v30549_v18, %v17404_v21  ;;  %v17403_v14 = vsel %vm3708_vm10, %v27899_v16, %v27894_v36  ;;  %v17405_v28 = vsel %vm3708_vm10, %v27895_v51, %v27900_v61  ;;  %v17519_v36 = vld [vmem:[%s34423_s5 + $0x248] sm:$0xff]  ;;  %v17573_v17 = vld [vmem:[%s34423_s5 + $0x3f8] sm:$0xff] }
 0x780   : > { %v27905_v62 = vunpack.i.h.bf16 %v30693_v32  ;;  %v27904_v48 = vunpack.i.l.bf16 %v30693_v32  ;;  %v30707_v57 = vpop.permute.xlu0 %27907  ;;  %27067 = vmatprep.subr.bf16.mxu1 %v27066_v30  ;;  %v17438_v18 = vmax.f32 %v30556_v27, %v17403_v14  ;;  %v17532_v27 = vld [vmem:[%s34423_s5 + $0x2b0] sm:$0xff]  ;;  %v17440_v1 = vmax.f32 %v30560_v59, %v17405_v28  ;;  %v17550_v30 = vld [vmem:[%s34423_s5 + $0x340] sm:$0xff]  ;;  %v17521_v14 = vld [vmem:[%s34423_s5 + $0x258] sm:$0xff] }
 0x781   : > { %v27910_v23 = vunpack.i.h.bf16 %v30707_v57  ;;  %v27909_v10 = vunpack.i.l.bf16 %v30707_v57  ;;  %17643 = vmatprep.mubr.f32.mxu0 %v17439_v38  ;;  %v27042_v24 = vpack.c.bf16 %v17533_v7, %v17532_v27  ;;  %v27074_v25 = vpack.c.bf16 %v17565_v56, %v17564_v5  ;;  %v17520_v38 = vld [vmem:[%s34423_s5 + $0x250] sm:$0xff]  ;;  %v17554_v5 = vld [vmem:[%s34423_s5 + $0x360] sm:$0xff] }
 0x782   : > { %27037 = vmatpush3.bf16.msra.mxu0 %v27036_v4  ;;  %v17406_v26 = vsel %vm3708_vm10, %v27900_v61, %v27904_v48  ;;  %v27046_v51 = vpack.c.bf16 %v17535_v53, %v17534_v42  ;;  %v17537_v61 = vld [vmem:[%s34423_s5 + $0x2d8] sm:$0xff]  ;;  %v27080_v4 = vpack.c.bf16 %v17551_v46, %v17550_v30  ;;  %v27052_v28 = vpack.c.bf16 %v17521_v14, %v17520_v38  ;;  %v17524_v42 = vld [vmem:[%s34423_s5 + $0x270] sm:$0xff] }
 0x783   : > { %17644 = vmatmul.mubr.f32.gmra.mrb[14].mxu0 %v17438_v18  ;;  %27069 = vmatpush3.bf16.msra.mxu1 %v27068_v55  ;;  %v17441_v12 = vmax.f32 %v30565_v15, %v17406_v26  ;;  %v17401_v15 = vsel %vm3708_vm10, %v27905_v62, %v27909_v10  ;;  %v17428_v59 = vsel %vm3708_vm10, %v27910_v23, %v27889_v37  ;;  %v17518_v37 = vld [vmem:[%s34423_s5 + $0x240] sm:$0xff]  ;;  %v17525_v53 = vld [vmem:[%s34423_s5 + $0x278] sm:$0xff] }
 0x784   : > { %27039 = vmatprep.subr.bf16.mxu0 %v27038_v41  ;;  %27071 = vmatprep.subr.bf16.mxu1 %v27070_v49  ;;  %v17435_v6 = vmax.f32 %v30585_v40, %v17401_v15  ;;  %v17437_v44 = vmax.f32 %v30593_v29, %v17428_v59  ;;  %v27044_v40 = vpack.c.bf16 %v17517_v19, %v17516_v8  ;;  %v17552_v41 = vld [vmem:[%s34423_s5 + $0x350] sm:$0xff]  ;;  %v17538_v18 = vld [vmem:[%s34423_s5 + $0x2e0] sm:$0xff]  ;;  %v17539_v49 = vld [vmem:[%s34423_s5 + $0x2e8] sm:$0xff]  ;;  %v27913_v15 = vpop.permute.xlu1 %27912 }
 0x785   : > { %17718 = vmatprep.mubr.f32.mxu1 %v17441_v12  ;;  %v27078_v29 = vpack.c.bf16 %v17567_v63, %v17566_v54  ;;  %v27048_v21 = vpack.c.bf16 %v17519_v36, %v17518_v37  ;;  %v27050_v55 = vpack.c.bf16 %v17537_v61, %v17536_v2  ;;  %v27084_v27 = vpack.c.bf16 %v17553_v9, %v17552_v41  ;;  %v17522_v26 = vld [vmem:[%s34423_s5 + $0x260] sm:$0xff]  ;;  %v17555_v12 = vld [vmem:[%s34423_s5 + $0x368] sm:$0xff]  ;;  %v17541_v8 = vld [vmem:[%s34423_s5 + $0x2f8] sm:$0xff] }
 0x786   : > { %27041 = vmatpush3.bf16.msra.mxu0 %v27040_v22  ;;  %17719 = vmatmul.mubr.f32.gmra.mrb[16].mxu1 %v17440_v1  ;;  %v27054_v7 = vpack.c.bf16 %v17539_v49, %v17538_v18  ;;  %v17523_v22 = vld [vmem:[%s34423_s5 + $0x268] sm:$0xff]  ;;  %v27086_v56 = vpack.c.bf16 %v17571_v60, %v17570_v13  ;;  %v17572_v19 = vld [vmem:[%s34423_s5 + $0x3f0] sm:$0xff]  ;;  %v27915_v54 = vunpack.i.h.bf16 %v27913_v15  ;;  %v27914_v63 = vunpack.i.l.bf16 %v27913_v15  ;;  %v17878_v15 = vld [vmem:[%s34424_s6 + $0x20] sm:$0xff] }
 0x787   : > { %17788 = vmatprep.mubr.f32.mxu0 %v17435_v6  ;;  %27073 = vmatpush3.bf16.msra.mxu1 %v27072_v11  ;;  %v17540_v11 = vld [vmem:[%s34423_s5 + $0x2f0] sm:$0xff]  ;;  %v27056_v1 = vpack.c.bf16 %v17523_v22, %v17522_v26  ;;  %v27090_v6 = vpack.c.bf16 %v17573_v17, %v17572_v19  ;;  %v17402_v37 = vsel %vm3708_vm10, %v27909_v10, %v27910_v23  ;;  %v17877_v17 = vld [vmem:[%s34424_s6 + $0x18] sm:$0xff] }
 0x788   : > { %17863 = vmatprep.mubr.f32.mxu1 %v17437_v44  ;;  %27043 = vmatprep.subr.bf16.mxu0 %v27042_v24  ;;  %v27088_v24 = vpack.c.bf16 %v17555_v12, %v17554_v5  ;;  %v27058_v39 = vpack.c.bf16 %v17541_v8, %v17540_v11  ;;  %v17556_v59 = vld [vmem:[%s34423_s5 + $0x370] sm:$0xff]  ;;  %v27060_v44 = vpack.c.bf16 %v17525_v53, %v17524_v42  ;;  %v17874_v11 = vld [vmem:[%s34424_s6] sm:$0xff]  ;;  %v17875_v8 = vld [vmem:[%s34424_s6 + $0x8] sm:$0xff] }
 0x789   : > { %27075 = vmatprep.subr.bf16.mxu1 %v27074_v25  ;;  %v17557_v25 = vld [vmem:[%s34423_s5 + $0x378] sm:$0xff]  ;;  %v17408_v36 = vsel %vm3708_vm10, %v27914_v63, %v27915_v54  ;;  %v17436_v46 = vmax.f32 %v30589_v45, %v17402_v37  ;;  %v28077_v45 = vmov 0.0|0.0   ;;  %v17876_v19 = vld [vmem:[%s34424_s6 + $0x10] sm:$0xff]  ;;  %v17882_v42 = vld [vmem:[%s34424_s6 + $0x40] sm:$0xff] }
 0x78a   : > { %27045 = vmatpush3.bf16.msra.mxu0 %v27044_v40  ;;  %v17395_v40 = vpop.permute.xlu0 %17394  ;;  %v17883_v53 = vld [vmem:[%s34424_s6 + $0x48] sm:$0xff] }
 0x78b   : > { %27077 = vmatpush3.bf16.msra.mxu1 %v27076_v43  ;;  %27047 = vmatprep.subr.bf16.mxu0 %v27046_v51  ;;  %v27092_v43 = vpack.c.bf16 %v17557_v25, %v17556_v59  ;;  %v17400_v51 = vsel %vm3708_vm10, %v30641_v47, %v27905_v62  ;;  %v17429_v30 = vsel %vm3708_vm10, %v17395_v40, %v27899_v16  ;;  %v23391_v59 = vld [vmem:[%s34425_s7 + $0x8] sm:$0xff]  ;;  %v23390_v25 = vld [vmem:[%s34425_s7] sm:$0xff] }
 0x78c   : > { %27079 = vmatprep.subr.bf16.mxu1 %v27078_v29  ;;  %v17434_v29 = vmax.f32 %v30543_v52, %v17400_v51  ;;  %v17443_v47 = vmax.f32 %v30601_v50, %v17408_v36  ;;  %v17407_v62 = vsel %vm3708_vm10, %v27904_v48, %v27914_v63  ;;  %v17409_v57 = vsel %vm3708_vm10, %v27915_v54, %v17395_v40  ;;  %v17885_v54 = vld [vmem:[%s34424_s6 + $0x58] sm:$0xff]  ;;  %v17886_v40 = vld [vmem:[%s34424_s6 + $0x60] sm:$0xff]  ;;  %v17887_v37 = vld [vmem:[%s34424_s6 + $0x68] sm:$0xff] }
 0x78d   : > { %v17445_v23 = vmax.f32 %v30618_v33, %v17429_v30  ;;  %v17442_v3 = vmax.f32 %v30581_v31, %v17407_v62  ;;  %v17444_v52 = vmax.f32 %v30605_v20, %v17409_v57  ;;  %v23393_v63 = vld [vmem:[%s34425_s7 + $0x18] sm:$0xff]  ;;  %v23394_v51 = vld [vmem:[%s34425_s7 + $0x20] sm:$0xff]  ;;  %v23396_v30 = vld [vmem:[%s34425_s7 + $0x30] sm:$0xff]  ;;  %vm23765_vm10 = vcmask 719872  }
 0x78e   : > { %27049 = vmatpush3.bf16.msra.mxu0 %v27048_v21  ;;  %v23397_v36 = vld [vmem:[%s34425_s7 + $0x38] sm:$0xff]  ;;  %v23400_v57 = vld [vmem:[%s34425_s7 + $0x50] sm:$0xff] }
 0x78f   : > { %27081 = vmatpush3.bf16.msra.mxu1 %v27080_v4  ;;  %27051 = vmatprep.subr.bf16.mxu0 %v27050_v55  ;;  %v23401_v62 = vld [vmem:[%s34425_s7 + $0x58] sm:$0xff] }
 0x790   : > { %27083 = vmatprep.subr.bf16.mxu1 %v27082_v35 }
 0x792   : > { %27053 = vmatpush3.bf16.msra.mxu0 %v27052_v28 }
 0x793   : > { %27085 = vmatpush3.bf16.msra.mxu1 %v27084_v27  ;;  %27055 = vmatprep.subr.bf16.mxu0 %v27054_v7 }
 0x794   : > { %27087 = vmatprep.subr.bf16.mxu1 %v27086_v56 }
 0x796   : > { %27057 = vmatpush3.bf16.msra.mxu0 %v27056_v1  ;;  %v17879_v1 = vld [vmem:[%s34424_s6 + $0x28] sm:$0xff] }
 0x797   : > { %27089 = vmatpush3.bf16.msra.mxu1 %v27088_v24  ;;  %27059 = vmatprep.subr.bf16.mxu0 %v27058_v39  ;;  %v17880_v24 = vld [vmem:[%s34424_s6 + $0x30] sm:$0xff]  ;;  %v17881_v39 = vld [vmem:[%s34424_s6 + $0x38] sm:$0xff] }
 0x798   : > { %27091 = vmatprep.subr.bf16.mxu1 %v27090_v6  ;;  %v17884_v6 = vld [vmem:[%s34424_s6 + $0x50] sm:$0xff] }
 0x79a   : > { %27061 = vmatpush3.bf16.msra.mxu0 %v27060_v44  ;;  %v23392_v44 = vld [vmem:[%s34425_s7 + $0x10] sm:$0xff] }
 0x79b   : > { %27093 = vmatpush3.bf16.msra.mxu1 %v27092_v43  ;;  %27094 = vmatprep.subr.bf16.mxu0 %v28077_v45  ;;  %v23395_v43 = vld [vmem:[%s34425_s7 + $0x28] sm:$0xff] }
 0x79c   : > { %27097 = vmatprep.subr.bf16.mxu1 %v28077_v45 }
 0x79d   : > { %17789 = vmatmul.mubr.f32.vlgmr.msra.gmra.mrb[16].mxu0 %v17434_v29  ;;  %v17888_v29 = vld [vmem:[%s34424_s6 + $0x70] sm:$0xff] }
 0x79e   : > { %17793 = vmatprep.mubr.f32.mxu0 %v17443_v47  ;;  %17864 = vmatmul.mubr.f32.vlgmr.msra.gmra.mrb[18].mxu1 %v17436_v46  ;;  %v23399_v46 = vld [vmem:[%s34425_s7 + $0x48] sm:$0xff]  ;;  %v23398_v47 = vld [vmem:[%s34425_s7 + $0x40] sm:$0xff] }
 0x79f   : > { %17868 = vmatprep.mubr.f32.mxu1 %v17445_v23  ;;  %v23403_v23 = vld [vmem:[%s34425_s7 + $0x68] sm:$0xff] }
 0x7a1   : > { %17794 = vmatmul.mubr.f32.gmra.mrb[18].mxu0 %v17442_v3  ;;  %v23402_v3 = vld [vmem:[%s34425_s7 + $0x60] sm:$0xff] }
 0x7a2   : > { %17869 = vmatmul.mubr.f32.gmra.mrb[20].mxu1 %v17444_v52  ;;  %25657 = vmatprep.mubr.msk.f32.mxu0 %vm28078_vm1, %v28052_v0  ;;  %v23521_v52 = vld [vmem:[%s34427_s9] sm:$0xff] }
 0x7a3   : > { %25706 = vmatprep.mubr.msk.f32.mxu1 %vm28078_vm1, %v28052_v0 }
 0x850   : > { %v25069_v50 = vpop.f32.mrb[12].mxu0 }
 0x851   : > { %v25070_v33 = vpop.f32.mrb[13].mxu0  ;;  %v25107_v16 = vpop.f32.mrb[14].mxu1 }
 0x852   : > { %v25071_v31 = vadd.f32 %v25070_v33, %v25069_v50  ;;  %v25108_v32 = vpop.f32.mrb[15].mxu1  ;;  %v23404_v50 = vld [vmem:[%s34425_s7 + $0x70] sm:$0xff] }
 0x853   : > { %v25109_v20 = vadd.f32 %v25108_v32, %v25107_v16  ;;  %v23523_v33 = vld [vmem:[%s34427_s9 + $0x10] sm:$0xff]  ;;  %v23522_v16 = vld [vmem:[%s34427_s9 + $0x8] sm:$0xff]  ;;  %v23524_v32 = vld [vmem:[%s34427_s9 + $0x18] sm:$0xff] }
 0x855   : > { %v17716_v48 = vadd.f32 %v25109_v20, %v25071_v31  ;;  %v23525_v31 = vld [vmem:[%s34427_s9 + $0x20] sm:$0xff]  ;;  %v23527_v20 = vld [vmem:[%s34427_s9 + $0x30] sm:$0xff] }
 0x856   : > { %v25072_v10 = vpop.f32.mrb[14].mxu0 }
 0x857   : > { %v25073_v2 = vpop.f32.mrb[15].mxu0 }
 0x858   : > { %v25074_v61 = vadd.f32 %v25073_v2, %v25072_v10  ;;  %v23529_v10 = vld [vmem:[%s34427_s9 + $0x40] sm:$0xff]  ;;  %v23528_v2 = vld [vmem:[%s34427_s9 + $0x38] sm:$0xff] }
 0x859   : > { %v25110_v34 = vpop.f32.mrb[16].mxu1 }
 0x85a   : > { %v25111_v58 = vpop.f32.mrb[17].mxu1 }
 0x85b   : > { %v25112_v21 = vadd.f32 %v25111_v58, %v25110_v34  ;;  %v23530_v34 = vld [vmem:[%s34427_s9 + $0x48] sm:$0xff] }
 0x85c   : > { %v23754_v58 = vld [vmem:[%s34429_s11 + $0x8] sm:$0xff] }
 0x85d   : > { %v17721_v4 = vadd.f32 %v25112_v21, %v25074_v61  ;;  %v23531_v61 = vld [vmem:[%s34427_s9 + $0x50] sm:$0xff]  ;;  %v23753_v21 = vld [vmem:[%s34429_s11] sm:$0xff] }
 0x870   : > { %v25145_v55 = vpop.f32.mrb[16].mxu0 }
 0x871   : > { %v25146_v38 = vpop.f32.mrb[17].mxu0  ;;  %v25183_v14 = vpop.f32.mrb[18].mxu1 }
 0x872   : > { %v25147_v41 = vadd.f32 %v25146_v38, %v25145_v55  ;;  %v25184_v35 = vpop.f32.mrb[19].mxu1 }
 0x873   : > { %v25185_v9 = vadd.f32 %v25184_v35, %v25183_v14 }
 0x874   : > { %v17791_v18 = vadd.f32 %v25147_v41, %v17716_v48  ;;  %v25148_v49 = vpop.f32.mrb[18].mxu0  ;;  %v23526_v48 = vld [vmem:[%s34427_s9 + $0x28] sm:$0xff] }
 0x875   : > { %v25149_v13 = vpop.f32.mrb[19].mxu0  ;;  %v25186_v60 = vpop.f32.mrb[20].mxu1 }
 0x876   : > { %v17866_v28 = vadd.f32 %v25185_v9, %v17791_v18  ;;  %v25150_v27 = vadd.f32 %v25149_v13, %v25148_v49  ;;  %v25187_v7 = vpop.f32.mrb[21].mxu1 }
 0x877   : > { %v25188_v26 = vadd.f32 %v25187_v7, %v25186_v60  ;;  %v24285_v60 = vld [vmem:[%s34424_s6 + $0x78] sm:$0xff] }
 0x878   : > { %v17796_v22 = vadd.f32 %v25150_v27, %v17721_v4 }
 0x87a   : > { %v17871_v5 = vadd.f32 %v25188_v26, %v17796_v22 }
 0x87c   : > { %v30885_v56 = vpack.i.bf16 %v17871_v5, %v17866_v28  ;;  %v27098_v12 = vpack.c.bf16 %v17871_v5, %v17866_v28  ;;  %v24286_v5 = vld [vmem:[%s34424_s6 + $0x80] sm:$0xff] }
 0x87e   : > { %27922 = vrot.lane.b32.xlu0 %v30885_v56, %s28054_s28  ;;  %27917 = vrot.lane.b32.xlu1 %v30885_v56, %s28053_s27 }
 0x87f   : > { %27099 = vmatpush3.bf16.msra.mxu1 %v27098_v12 }
 0x880   : > { %27103 = vmatprep.subr.bf16.mxu1 %v28077_v45 }
 0x882   : > { %27932 = vrot.lane.b32.xlu0 %v30885_v56, %s28056_s30  ;;  %27927 = vrot.lane.b32.xlu1 %v30885_v56, %s28055_s29 }
 0x883   : > { %25707 = vmatmul.mubr.msk.f32.vlgmr.msra.gmra.mrb[22].mxu1 %vm17913_vm2, %v17874_v11  ;;  %v24287_v11 = vld [vmem:[%s34424_s6 + $0x88] sm:$0xff] }
 0x884   : > { %25709 = vmatprep.mubr.msk.f32.mxu1 %vm28078_vm1, %v28052_v0 }
 0x886   : > { %27942 = vrot.lane.b32.xlu0 %v30885_v56, %s34508_s16  ;;  %27937 = vrot.lane.b32.xlu1 %v30885_v56, %s28079_s18  ;;  %s28085_s16 = smov 114   ;;  %s28086_s18 = smov 115  }
 0x887   : > { %25710 = vmatmul.mubr.msk.f32.gmra.mrb[24].mxu1 %vm17913_vm2, %v17875_v8  ;;  %v24361_v8 = vld [vmem:[%s34424_s6 + $0x170] sm:$0xff] }
 0x888   : > { %25712 = vmatprep.mubr.msk.f32.mxu1 %vm28078_vm1, %v28052_v0 }
 0x88a   : > { %27952 = vrot.lane.b32.xlu0 %v30885_v56, %s34509_s13  ;;  %27947 = vrot.lane.b32.xlu1 %v30885_v56, %s28080_s26  ;;  %s28087_s13 = smov 112   ;;  %s28088_s26 = smov 113  }
 0x88b   : > { %25713 = vmatmul.mubr.msk.f32.gmra.mrb[26].mxu1 %vm17913_vm2, %v17876_v19  ;;  %v24288_v19 = vld [vmem:[%s34424_s6 + $0x90] sm:$0xff] }
 0x88c   : > { %25715 = vmatprep.mubr.msk.f32.mxu1 %vm28078_vm1, %v28052_v0 }
 0x88e   : > { %27962 = vrot.lane.b32.xlu0 %v30885_v56, %s28081_s23  ;;  %27957 = vrot.lane.b32.xlu1 %v30885_v56, %s28082_s24  ;;  %s28089_s23 = smov 110   ;;  %s28090_s24 = smov 111  }
 0x88f   : > { %25716 = vmatmul.mubr.msk.f32.gmra.mrb[28].mxu1 %vm17913_vm2, %v17877_v17  ;;  %v24362_v17 = vld [vmem:[%s34424_s6 + $0x178] sm:$0xff] }
 0x890   : > { %25718 = vmatprep.mubr.msk.f32.mxu1 %vm28078_vm1, %v28052_v0 }
 0x892   : > { %27972 = vrot.lane.b32.xlu0 %v30885_v56, %s28083_s25  ;;  %27967 = vrot.lane.b32.xlu1 %v30885_v56, %s28084_s15  ;;  %s28091_s25 = smov 108   ;;  %s28092_s15 = smov 109  }
 0x893   : > { %25719 = vmatmul.mubr.msk.f32.gmra.mrb[30].mxu1 %vm17913_vm2, %v17878_v15  ;;  %v24289_v15 = vld [vmem:[%s34424_s6 + $0x98] sm:$0xff] }
 0x894   : > { %25721 = vmatprep.mubr.msk.f32.mxu1 %vm28078_vm1, %v28052_v0 }
 0x896   : > { %27982 = vrot.lane.b32.xlu0 %v30885_v56, %s28085_s16  ;;  %27977 = vrot.lane.b32.xlu1 %v30885_v56, %s28086_s18  ;;  %s28093_s16 = smov 106   ;;  %s28094_s18 = smov 107  }
 0x897   : > { %25722 = vmatmul.mubr.msk.f32.gmra.mrb[32].mxu1 %vm17913_vm2, %v17879_v1  ;;  %v24363_v1 = vld [vmem:[%s34424_s6 + $0x180] sm:$0xff] }
 0x898   : > { %25724 = vmatprep.mubr.msk.f32.mxu1 %vm28078_vm1, %v28052_v0 }
 0x89a   : > { %27992 = vrot.lane.b32.xlu0 %v30885_v56, %s28087_s13  ;;  %27987 = vrot.lane.b32.xlu1 %v30885_v56, %s28088_s26  ;;  %s28095_s13 = smov 104   ;;  %s28096_s26 = smov 105  }
 0x89b   : > { %25725 = vmatmul.mubr.msk.f32.gmra.mrb[34].mxu1 %vm17913_vm2, %v17880_v24  ;;  %v24290_v24 = vld [vmem:[%s34424_s6 + $0xa0] sm:$0xff] }
 0x89c   : > { %25727 = vmatprep.mubr.msk.f32.mxu1 %vm28078_vm1, %v28052_v0 }
 0x89e   : > { %28002 = vrot.lane.b32.xlu0 %v30885_v56, %s28089_s23  ;;  %27997 = vrot.lane.b32.xlu1 %v30885_v56, %s28090_s24 }
 0x89f   : > { %25728 = vmatmul.mubr.msk.f32.gmra.mrb[36].mxu1 %vm17913_vm2, %v17881_v39  ;;  %v24364_v39 = vld [vmem:[%s34424_s6 + $0x188] sm:$0xff] }
 0x8a0   : > { %25730 = vmatprep.mubr.msk.f32.mxu1 %vm28078_vm1, %v28052_v0 }
 0x8a2   : > { %28012 = vrot.lane.b32.xlu0 %v30885_v56, %s28091_s25  ;;  %28007 = vrot.lane.b32.xlu1 %v30885_v56, %s28092_s15 }
 0x8a3   : > { %25731 = vmatmul.mubr.msk.f32.gmra.mrb[38].mxu1 %vm17913_vm2, %v17882_v42  ;;  %v24291_v42 = vld [vmem:[%s34424_s6 + $0xa8] sm:$0xff] }
 0x8a4   : > { %25733 = vmatprep.mubr.msk.f32.mxu1 %vm28078_vm1, %v28052_v0 }
 0x8a6   : > { %28022 = vrot.lane.b32.xlu0 %v30885_v56, %s28093_s16  ;;  %28017 = vrot.lane.b32.xlu1 %v30885_v56, %s28094_s18  ;;  %s25036_s16 = sshll.u32 %s34511_s22, 4 }
 0x8a7   : > { %25734 = vmatmul.mubr.msk.f32.gmra.mrb[40].mxu1 %vm17913_vm2, %v17883_v53  ;;  %v24365_v53 = vld [vmem:[%s34424_s6 + $0x190] sm:$0xff]  ;;  %s413_s30 = scalar_lea.vmem %s34430_s12, %s25036_s16 }
 0x8a8   : > { %25736 = vmatprep.mubr.msk.f32.mxu1 %vm28078_vm1, %v28052_v0 }
 0x8aa   : > { %28032 = vrot.lane.b32.xlu0 %v30885_v56, %s28095_s13  ;;  %28027 = vrot.lane.b32.xlu1 %v30885_v56, %s28096_s26  ;;  %v24360_v56 = vld [vmem:[%s34424_s6 + $0x168] sm:$0xff] }
 0x8ab   : > { %25737 = vmatmul.mubr.msk.f32.gmra.mrb[42].mxu1 %vm17913_vm2, %v17884_v6  ;;  %v24292_v6 = vld [vmem:[%s34424_s6 + $0xb0] sm:$0xff] }
 0x8ac   : > { %25739 = vmatprep.mubr.msk.f32.mxu1 %vm28078_vm1, %v28052_v0 }
 0x8ae   : > { %23412 = vperm.xlu0 %27839, %v23391_v59   ;;  %23407 = vperm.xlu1 %27840, %v23390_v25   ;;  %v24366_v59 = vld [vmem:[%s34424_s6 + $0x198] sm:$0xff] }
 0x8af   : > { %25740 = vmatmul.mubr.msk.f32.gmra.mrb[44].mxu1 %vm17913_vm2, %v17885_v54  ;;  %v24293_v25 = vld [vmem:[%s34424_s6 + $0xb8] sm:$0xff]  ;;  %v24367_v54 = vld [vmem:[%s34424_s6 + $0x1a0] sm:$0xff] }
 0x8b0   : > { %25742 = vmatprep.mubr.msk.f32.mxu1 %vm28078_vm1, %v28052_v0 }
 0x8b2   : > { %23422 = vperm.xlu0 %27839, %v23393_v63   ;;  %23417 = vperm.xlu1 %27840, %v23392_v44   ;;  %v24294_v63 = vld [vmem:[%s34424_s6 + $0xc0] sm:$0xff]  ;;  %v24368_v44 = vld [vmem:[%s34424_s6 + $0x1a8] sm:$0xff] }
 0x8b3   : > { %25743 = vmatmul.mubr.msk.f32.gmra.mrb[46].mxu1 %vm17913_vm2, %v17886_v40  ;;  %v24295_v40 = vld [vmem:[%s34424_s6 + $0xc8] sm:$0xff] }
 0x8b4   : > { %25745 = vmatprep.mubr.msk.f32.mxu1 %vm28078_vm1, %v28052_v0 }
 0x8b6   : > { %23432 = vperm.xlu0 %27839, %v23395_v43   ;;  %23427 = vperm.xlu1 %27840, %v23394_v51   ;;  %v24369_v43 = vld [vmem:[%s34424_s6 + $0x1b0] sm:$0xff] }
 0x8b7   : > { %25746 = vmatmul.mubr.msk.f32.gmra.mrb[48].mxu1 %vm17913_vm2, %v17887_v37  ;;  %v24296_v51 = vld [vmem:[%s34424_s6 + $0xd0] sm:$0xff]  ;;  %v24370_v37 = vld [vmem:[%s34424_s6 + $0x1b8] sm:$0xff] }
 0x8b8   : > { %25748 = vmatprep.mubr.msk.f32.mxu1 %vm28078_vm1, %v28052_v0 }
 0x8ba   : > { %23442 = vperm.xlu0 %27839, %v23397_v36   ;;  %23437 = vperm.xlu1 %27840, %v23396_v30   ;;  %v24297_v36 = vld [vmem:[%s34424_s6 + $0xd8] sm:$0xff]  ;;  %v24371_v30 = vld [vmem:[%s34424_s6 + $0x1c0] sm:$0xff] }
 0x8bb   : > { %25749 = vmatmul.mubr.msk.f32.gmra.mrb[50].mxu1 %vm17913_vm2, %v17888_v29  ;;  %v24298_v29 = vld [vmem:[%s34424_s6 + $0xe0] sm:$0xff] }
 0x8bc   : > { %25804 = vmatprep.mubr.msk.f32.mxu1 %vm28078_vm1, %v28052_v0 }
 0x8be   : > { %23452 = vperm.xlu0 %27839, %v23399_v46   ;;  %23447 = vperm.xlu1 %27840, %v23398_v47   ;;  %v24372_v46 = vld [vmem:[%s34424_s6 + $0x1c8] sm:$0xff] }
 0x8c2   : > { %23462 = vperm.xlu0 %27839, %v23401_v62   ;;  %23457 = vperm.xlu1 %27840, %v23400_v57   ;;  %v24299_v62 = vld [vmem:[%s34424_s6 + $0xe8] sm:$0xff]  ;;  %v24373_v57 = vld [vmem:[%s34424_s6 + $0x1d0] sm:$0xff] }
 0x8c6   : > { %23472 = vperm.xlu0 %27839, %v23403_v23   ;;  %23467 = vperm.xlu1 %27840, %v23402_v3  }
 0x8ca   : > { %23534 = vperm.xlu0 %27839, %v23521_v52   ;;  %23477 = vperm.xlu1 %27840, %v23404_v50   ;;  %v24330_v50 = vld [vmem:[%s34424_s6 + $0xf0] sm:$0xff] }
 0x8ce   : > { %23544 = vperm.xlu0 %27839, %v23523_v33   ;;  %23539 = vperm.xlu1 %27840, %v23522_v16   ;;  %v24374_v33 = vld [vmem:[%s34424_s6 + $0x1d8] sm:$0xff] }
 0x8d2   : > { %23554 = vperm.xlu0 %27839, %v23525_v31   ;;  %23549 = vperm.xlu1 %27840, %v23524_v32  }
 0x8d6   : > { %23564 = vperm.xlu0 %27839, %v23527_v20   ;;  %23559 = vperm.xlu1 %27840, %v23526_v48   ;;  %v24331_v20 = vld [vmem:[%s34424_s6 + $0xf8] sm:$0xff] }
 0x8d7   : > { %v24420_v48 = vld [vmem:[%s34424_s6 + $0x258] sm:$0xff] }
 0x8da   : > { %23574 = vperm.xlu0 %27839, %v23529_v10   ;;  %23569 = vperm.xlu1 %27840, %v23528_v2   ;;  %v24332_v2 = vld [vmem:[%s34424_s6 + $0x100] sm:$0xff] }
 0x8de   : > { %23584 = vperm.xlu0 %27839, %v23531_v61   ;;  %23579 = vperm.xlu1 %27840, %v23530_v34   ;;  %v24421_v61 = vld [vmem:[%s34424_s6 + $0x260] sm:$0xff]  ;;  %v24333_v34 = vld [vmem:[%s34424_s6 + $0x108] sm:$0xff] }
 0x8e2   : > { %23762 = vperm.xlu0 %27839, %v23754_v58   ;;  %23757 = vperm.xlu1 %27840, %v23753_v21   ;;  %v24422_v58 = vld [vmem:[%s34424_s6 + $0x268] sm:$0xff]  ;;  %v24334_v21 = vld [vmem:[%s34424_s6 + $0x110] sm:$0xff] }
 0x8f0   : > { %v27923_v4 = vpop.permute.xlu0 %27922  ;;  %v27918_v55 = vpop.permute.xlu1 %27917 }
 0x8f1   : > { %v27920_v38 = vunpack.i.h.bf16 %v27918_v55  ;;  %v27919_v14 = vunpack.i.l.bf16 %v27918_v55  ;;  %v27925_v41 = vunpack.i.h.bf16 %v27923_v4  ;;  %v27924_v35 = vunpack.i.l.bf16 %v27923_v4  ;;  %v24423_v4 = vld [vmem:[%s34424_s6 + $0x270] sm:$0xff]  ;;  %v24335_v55 = vld [vmem:[%s34424_s6 + $0x118] sm:$0xff] }
 0x8f3   : > { %v27095_v9 = vpack.c.bf16 %v27920_v38, %v27919_v14  ;;  %v27101_v28 = vpack.c.bf16 %v27925_v41, %v27924_v35  ;;  %v24424_v38 = vld [vmem:[%s34424_s6 + $0x278] sm:$0xff]  ;;  %v24336_v14 = vld [vmem:[%s34424_s6 + $0x120] sm:$0xff]  ;;  %v24337_v35 = vld [vmem:[%s34424_s6 + $0x128] sm:$0xff] }
 0x8f4   : > { %v27928_v18 = vpop.permute.xlu1 %27927  ;;  %v27933_v47 = vpop.permute.xlu0 %27932  ;;  %v24425_v41 = vld [vmem:[%s34424_s6 + $0x280] sm:$0xff] }
 0x8f5   : > { %v27930_v49 = vunpack.i.h.bf16 %v27928_v18  ;;  %v27929_v13 = vunpack.i.l.bf16 %v27928_v18  ;;  %27096 = vmatpush3.bf16.msra.mxu0 %v27095_v9  ;;  %v27935_v23 = vunpack.i.h.bf16 %v27933_v47  ;;  %v27934_v3 = vunpack.i.l.bf16 %v27933_v47  ;;  %v24426_v9 = vld [vmem:[%s34424_s6 + $0x288] sm:$0xff]  ;;  %v24338_v18 = vld [vmem:[%s34424_s6 + $0x130] sm:$0xff] }
 0x8f6   : > { %27100 = vmatprep.subr.bf16.mxu0 %v28077_v45 }
 0x8f7   : > { %v27104_v27 = vpack.c.bf16 %v27930_v49, %v27929_v13  ;;  %v27107_v16 = vpack.c.bf16 %v27935_v23, %v27934_v3  ;;  %v24427_v49 = vld [vmem:[%s34424_s6 + $0x290] sm:$0xff]  ;;  %v24339_v13 = vld [vmem:[%s34424_s6 + $0x138] sm:$0xff] }
 0x8f8   : > { %v27938_v7 = vpop.permute.xlu1 %27937  ;;  %25658 = vmatmul.mubr.msk.f32.vlgmr.msra.gmra.mrb[20].mxu0 %vm17913_vm2, %v24285_v60  ;;  %v24428_v60 = vld [vmem:[%s34424_s6 + $0x298] sm:$0xff] }
 0x8f9   : > { %v27940_v26 = vunpack.i.h.bf16 %v27938_v7  ;;  %v27939_v22 = vunpack.i.l.bf16 %v27938_v7  ;;  %27102 = vmatpush3.bf16.msra.mxu0 %v27101_v28  ;;  %27105 = vmatpush3.bf16.msra.mxu1 %v27104_v27  ;;  %v24340_v7 = vld [vmem:[%s34424_s6 + $0x140] sm:$0xff] }
 0x8fa   : > { %25660 = vmatprep.mubr.msk.f32.mxu0 %vm28078_vm1, %v28052_v0  ;;  %27109 = vmatprep.subr.bf16.mxu1 %v28077_v45 }
 0x8fb   : > { %v27110_v12 = vpack.c.bf16 %v27940_v26, %v27939_v22  ;;  %27106 = vmatprep.subr.bf16.mxu0 %v28077_v45  ;;  %v24429_v26 = vld [vmem:[%s34424_s6 + $0x2a0] sm:$0xff] }
 0x8fc   : > { %25661 = vmatmul.mubr.msk.f32.gmra.mrb[22].mxu0 %vm17913_vm2, %v24286_v5  ;;  %25805 = vmatmul.mubr.msk.f32.vlgmr.msra.gmra.mrb[52].mxu1 %vm17913_vm2, %v24360_v56  ;;  %v27948_v52 = vpop.permute.xlu1 %27947  ;;  %v24341_v56 = vld [vmem:[%s34424_s6 + $0x148] sm:$0xff] }
 0x8fd   : > { %27111 = vmatpush3.bf16.msra.mxu1 %v27110_v12  ;;  %25663 = vmatprep.mubr.msk.f32.mxu0 %vm28078_vm1, %v28052_v0  ;;  %v27950_v31 = vunpack.i.h.bf16 %v27948_v52  ;;  %v27949_v32 = vunpack.i.l.bf16 %v27948_v52  ;;  %v24430_v12 = vld [vmem:[%s34424_s6 + $0x2a8] sm:$0xff] }
 0x8fe   : > { %25807 = vmatprep.mubr.msk.f32.mxu1 %vm28078_vm1, %v28052_v0  ;;  %27115 = vmatprep.subr.bf16.mxu1 %v28077_v45 }
 0x8ff   : > { %v27116_v10 = vpack.c.bf16 %v27950_v31, %v27949_v32  ;;  %v24393_v32 = vld [vmem:[%s34424_s6 + $0x1f8] sm:$0xff] }
 0x900   : > { %25664 = vmatmul.mubr.msk.f32.gmra.mrb[24].mxu0 %vm17913_vm2, %v24287_v11  ;;  %25808 = vmatmul.mubr.msk.f32.gmra.mrb[54].mxu1 %vm17913_vm2, %v24361_v8 }
 0x901   : > { %25666 = vmatprep.mubr.msk.f32.mxu0 %vm28078_vm1, %v28052_v0  ;;  %25810 = vmatprep.mubr.msk.f32.mxu1 %vm28078_vm1, %v28052_v0 }
 0x904   : > { %25667 = vmatmul.mubr.msk.f32.gmra.mrb[26].mxu0 %vm17913_vm2, %v24288_v19  ;;  %25811 = vmatmul.mubr.msk.f32.gmra.mrb[56].mxu1 %vm17913_vm2, %v24362_v17  ;;  %v24342_v19 = vld [vmem:[%s34424_s6 + $0x150] sm:$0xff] }
 0x905   : > { %25669 = vmatprep.mubr.msk.f32.mxu0 %vm28078_vm1, %v28052_v0  ;;  %25813 = vmatprep.mubr.msk.f32.mxu1 %vm28078_vm1, %v28052_v0  ;;  %v24431_v17 = vld [vmem:[%s34424_s6 + $0x2b0] sm:$0xff] }
 0x908   : > { %25670 = vmatmul.mubr.msk.f32.gmra.mrb[28].mxu0 %vm17913_vm2, %v24289_v15  ;;  %25814 = vmatmul.mubr.msk.f32.gmra.mrb[58].mxu1 %vm17913_vm2, %v24363_v1 }
 0x909   : > { %25672 = vmatprep.mubr.msk.f32.mxu0 %vm28078_vm1, %v28052_v0  ;;  %25816 = vmatprep.mubr.msk.f32.mxu1 %vm28078_vm1, %v28052_v0 }
 0x90c   : > { %25673 = vmatmul.mubr.msk.f32.gmra.mrb[30].mxu0 %vm17913_vm2, %v24290_v24  ;;  %25817 = vmatmul.mubr.msk.f32.gmra.mrb[60].mxu1 %vm17913_vm2, %v24364_v39  ;;  %v24343_v24 = vld [vmem:[%s34424_s6 + $0x158] sm:$0xff] }
 0x90d   : > { %25675 = vmatprep.mubr.msk.f32.mxu0 %vm28078_vm1, %v28052_v0  ;;  %25819 = vmatprep.mubr.msk.f32.mxu1 %vm28078_vm1, %v28052_v0  ;;  %v24432_v39 = vld [vmem:[%s34424_s6 + $0x2b8] sm:$0xff] }
 0x910   : > { %25676 = vmatmul.mubr.msk.f32.gmra.mrb[32].mxu0 %vm17913_vm2, %v24291_v42  ;;  %25820 = vmatmul.mubr.msk.f32.gmra.mrb[62].mxu1 %vm17913_vm2, %v24365_v53 }
 0x911   : > { %25678 = vmatprep.mubr.msk.f32.mxu0 %vm28078_vm1, %v28052_v0  ;;  %25822 = vmatprep.mubr.msk.f32.mxu1 %vm28078_vm1, %v28052_v0 }
 0x914   : > { %25679 = vmatmul.mubr.msk.f32.gmra.mrb[34].mxu0 %vm17913_vm2, %v24292_v6  ;;  %25823 = vmatmul.mubr.msk.f32.gmra.mrb[64].mxu1 %vm17913_vm2, %v24366_v59  ;;  %v27943_v6 = vpop.permute.xlu0 %27942  ;;  %v24344_v59 = vld [vmem:[%s34424_s6 + $0x160] sm:$0xff] }
 0x915   : > { %25681 = vmatprep.mubr.msk.f32.mxu0 %vm28078_vm1, %v28052_v0  ;;  %25825 = vmatprep.mubr.msk.f32.mxu1 %vm28078_vm1, %v28052_v0 }
 0x918   : > { %25682 = vmatmul.mubr.msk.f32.gmra.mrb[36].mxu0 %vm17913_vm2, %v24293_v25  ;;  %25826 = vmatmul.mubr.msk.f32.gmra.mrb[66].mxu1 %vm17913_vm2, %v24367_v54  ;;  %v24433_v25 = vld [vmem:[%s34424_s6 + $0x2c0] sm:$0xff] }
 0x919   : > { %25684 = vmatprep.mubr.msk.f32.mxu0 %vm28078_vm1, %v28052_v0  ;;  %25828 = vmatprep.mubr.msk.f32.mxu1 %vm28078_vm1, %v28052_v0 }
 0x91c   : > { %25685 = vmatmul.mubr.msk.f32.gmra.mrb[38].mxu0 %vm17913_vm2, %v24294_v63  ;;  %25829 = vmatmul.mubr.msk.f32.gmra.mrb[68].mxu1 %vm17913_vm2, %v24368_v44  ;;  %v27945_v63 = vunpack.i.h.bf16 %v27943_v6  ;;  %v27944_v44 = vunpack.i.l.bf16 %v27943_v6  ;;  %v24492_v6 = vld [vmem:[%s34424_s6 + $0x3a8] sm:$0xff] }
 0x91d   : > { %25687 = vmatprep.mubr.msk.f32.mxu0 %vm28078_vm1, %v28052_v0  ;;  %25831 = vmatprep.mubr.msk.f32.mxu1 %vm28078_vm1, %v28052_v0 }
 0x920   : > { %25688 = vmatmul.mubr.msk.f32.gmra.mrb[40].mxu0 %vm17913_vm2, %v24295_v40  ;;  %25832 = vmatmul.mubr.msk.f32.gmra.mrb[70].mxu1 %vm17913_vm2, %v24369_v43  ;;  %v27958_v43 = vpop.permute.xlu1 %27957 }
 0x921   : > { %25690 = vmatprep.mubr.msk.f32.mxu0 %vm28078_vm1, %v28052_v0  ;;  %25834 = vmatprep.mubr.msk.f32.mxu1 %vm28078_vm1, %v28052_v0 }
 0x924   : > { %25691 = vmatmul.mubr.msk.f32.gmra.mrb[42].mxu0 %vm17913_vm2, %v24296_v51  ;;  %25835 = vmatmul.mubr.msk.f32.gmra.mrb[72].mxu1 %vm17913_vm2, %v24370_v37  ;;  %v24390_v51 = vld [vmem:[%s34424_s6 + $0x1e0] sm:$0xff]  ;;  %v24434_v37 = vld [vmem:[%s34424_s6 + $0x2c8] sm:$0xff] }
 0x925   : > { %25693 = vmatprep.mubr.msk.f32.mxu0 %vm28078_vm1, %v28052_v0  ;;  %25837 = vmatprep.mubr.msk.f32.mxu1 %vm28078_vm1, %v28052_v0 }
 0x928   : > { %25694 = vmatmul.mubr.msk.f32.gmra.mrb[44].mxu0 %vm17913_vm2, %v24297_v36  ;;  %25838 = vmatmul.mubr.msk.f32.gmra.mrb[74].mxu1 %vm17913_vm2, %v24371_v30  ;;  %v27113_v30 = vpack.c.bf16 %v27945_v63, %v27944_v44  ;;  %v24493_v63 = vld [vmem:[%s34424_s6 + $0x3b0] sm:$0xff] }
 0x929   : > { %25696 = vmatprep.mubr.msk.f32.mxu0 %vm28078_vm1, %v28052_v0  ;;  %25840 = vmatprep.mubr.msk.f32.mxu1 %vm28078_vm1, %v28052_v0 }
 0x92c   : > { %25697 = vmatmul.mubr.msk.f32.gmra.mrb[46].mxu0 %vm17913_vm2, %v24298_v29  ;;  %25841 = vmatmul.mubr.msk.f32.gmra.mrb[76].mxu1 %vm17913_vm2, %v24372_v46  ;;  %v27960_v29 = vunpack.i.h.bf16 %v27958_v43  ;;  %v27959_v46 = vunpack.i.l.bf16 %v27958_v43  ;;  %v27968_v43 = vpop.permute.xlu1 %27967 }
 0x92d   : > { %25699 = vmatprep.mubr.msk.f32.mxu0 %vm28078_vm1, %v28052_v0  ;;  %25843 = vmatprep.mubr.msk.f32.mxu1 %vm28078_vm1, %v28052_v0 }
 0x92e   : > { %v27122_v3 = vpack.c.bf16 %v27960_v29, %v27959_v46  ;;  %v27970_v29 = vunpack.i.h.bf16 %v27968_v43  ;;  %v27969_v46 = vunpack.i.l.bf16 %v27968_v43 }
 0x930   : > { %25700 = vmatmul.mubr.msk.f32.gmra.mrb[48].mxu0 %vm17913_vm2, %v24299_v62  ;;  %25844 = vmatmul.mubr.msk.f32.gmra.mrb[78].mxu1 %vm17913_vm2, %v24373_v57  ;;  %v24391_v62 = vld [vmem:[%s34424_s6 + $0x1e8] sm:$0xff] }
 0x931   : > { %25755 = vmatprep.mubr.msk.f32.mxu0 %vm28078_vm1, %v28052_v0  ;;  %25846 = vmatprep.mubr.msk.f32.mxu1 %vm28078_vm1, %v28052_v0  ;;  %v24480_v57 = vld [vmem:[%s34424_s6 + $0x348] sm:$0xff] }
 0x934   : > { %25756 = vmatmul.mubr.msk.f32.vlgmr.msra.gmra.mrb[50].mxu0 %vm17913_vm2, %v24330_v50  ;;  %25847 = vmatmul.mubr.msk.f32.gmra.mrb[80].mxu1 %vm17913_vm2, %v24374_v33  ;;  %v24392_v50 = vld [vmem:[%s34424_s6 + $0x1f0] sm:$0xff] }
 0x935   : > { %27108 = vmatpush3.bf16.msra.mxu0 %v27107_v16  ;;  %25758 = vmatprep.mubr.msk.f32.mxu0 %vm28078_vm1, %v28052_v0  ;;  %v24481_v33 = vld [vmem:[%s34424_s6 + $0x350] sm:$0xff] }
 0x936   : > { %25902 = vmatprep.mubr.msk.f32.mxu1 %vm28078_vm1, %v28052_v0  ;;  %27112 = vmatprep.subr.bf16.mxu0 %v28077_v45 }
 0x938   : > { %25759 = vmatmul.mubr.msk.f32.gmra.mrb[52].mxu0 %vm17913_vm2, %v24331_v20  ;;  %25903 = vmatmul.mubr.msk.f32.vlgmr.msra.gmra.mrb[82].mxu1 %vm17913_vm2, %v24420_v48  ;;  %v24482_v20 = vld [vmem:[%s34424_s6 + $0x358] sm:$0xff] }
 0x939   : > { %27117 = vmatpush3.bf16.msra.mxu1 %v27116_v10  ;;  %25761 = vmatprep.mubr.msk.f32.mxu0 %vm28078_vm1, %v28052_v0 }
 0x93a   : > { %25905 = vmatprep.mubr.msk.f32.mxu1 %vm28078_vm1, %v28052_v0  ;;  %27121 = vmatprep.subr.bf16.mxu1 %v28077_v45 }
 0x93c   : > { %25762 = vmatmul.mubr.msk.f32.gmra.mrb[54].mxu0 %vm17913_vm2, %v24332_v2  ;;  %25906 = vmatmul.mubr.msk.f32.gmra.mrb[84].mxu1 %vm17913_vm2, %v24421_v61  ;;  %v24394_v2 = vld [vmem:[%s34424_s6 + $0x200] sm:$0xff] }
 0x93d   : > { %25764 = vmatprep.mubr.msk.f32.mxu0 %vm28078_vm1, %v28052_v0  ;;  %25908 = vmatprep.mubr.msk.f32.mxu1 %vm28078_vm1, %v28052_v0  ;;  %v24483_v61 = vld [vmem:[%s34424_s6 + $0x360] sm:$0xff] }
 0x940   : > { %25765 = vmatmul.mubr.msk.f32.gmra.mrb[56].mxu0 %vm17913_vm2, %v24333_v34  ;;  %25909 = vmatmul.mubr.msk.f32.gmra.mrb[86].mxu1 %vm17913_vm2, %v24422_v58 }
 0x941   : > { %25767 = vmatprep.mubr.msk.f32.mxu0 %vm28078_vm1, %v28052_v0  ;;  %25911 = vmatprep.mubr.msk.f32.mxu1 %vm28078_vm1, %v28052_v0 }
 0x944   : > { %25768 = vmatmul.mubr.msk.f32.gmra.mrb[58].mxu0 %vm17913_vm2, %v24334_v21  ;;  %25912 = vmatmul.mubr.msk.f32.gmra.mrb[88].mxu1 %vm17913_vm2, %v24423_v4  ;;  %v24395_v21 = vld [vmem:[%s34424_s6 + $0x208] sm:$0xff] }
 0x945   : > { %25770 = vmatprep.mubr.msk.f32.mxu0 %vm28078_vm1, %v28052_v0  ;;  %25914 = vmatprep.mubr.msk.f32.mxu1 %vm28078_vm1, %v28052_v0  ;;  %v24484_v4 = vld [vmem:[%s34424_s6 + $0x368] sm:$0xff] }
 0x948   : > { %25771 = vmatmul.mubr.msk.f32.gmra.mrb[60].mxu0 %vm17913_vm2, %v24335_v55  ;;  %25915 = vmatmul.mubr.msk.f32.gmra.mrb[90].mxu1 %vm17913_vm2, %v24424_v38 }
 0x949   : > { %25773 = vmatprep.mubr.msk.f32.mxu0 %vm28078_vm1, %v28052_v0  ;;  %25917 = vmatprep.mubr.msk.f32.mxu1 %vm28078_vm1, %v28052_v0 }
 0x94c   : > { %25774 = vmatmul.mubr.msk.f32.gmra.mrb[62].mxu0 %vm17913_vm2, %v24336_v14  ;;  %25918 = vmatmul.mubr.msk.f32.gmra.mrb[92].mxu1 %vm17913_vm2, %v24425_v41  ;;  %v24396_v14 = vld [vmem:[%s34424_s6 + $0x210] sm:$0xff] }
 0x94d   : > { %25776 = vmatprep.mubr.msk.f32.mxu0 %vm28078_vm1, %v28052_v0  ;;  %25920 = vmatprep.mubr.msk.f32.mxu1 %vm28078_vm1, %v28052_v0  ;;  %v24485_v41 = vld [vmem:[%s34424_s6 + $0x370] sm:$0xff] }
 0x950   : > { %25777 = vmatmul.mubr.msk.f32.gmra.mrb[64].mxu0 %vm17913_vm2, %v24337_v35  ;;  %25921 = vmatmul.mubr.msk.f32.gmra.mrb[94].mxu1 %vm17913_vm2, %v24426_v9 }
 0x951   : > { %25779 = vmatprep.mubr.msk.f32.mxu0 %vm28078_vm1, %v28052_v0  ;;  %25923 = vmatprep.mubr.msk.f32.mxu1 %vm28078_vm1, %v28052_v0 }
 0x954   : > { %25780 = vmatmul.mubr.msk.f32.gmra.mrb[66].mxu0 %vm17913_vm2, %v24338_v18  ;;  %25924 = vmatmul.mubr.msk.f32.gmra.mrb[96].mxu1 %vm17913_vm2, %v24427_v49  ;;  %v24397_v18 = vld [vmem:[%s34424_s6 + $0x218] sm:$0xff] }
 0x955   : > { %25782 = vmatprep.mubr.msk.f32.mxu0 %vm28078_vm1, %v28052_v0  ;;  %25926 = vmatprep.mubr.msk.f32.mxu1 %vm28078_vm1, %v28052_v0  ;;  %v24486_v49 = vld [vmem:[%s34424_s6 + $0x378] sm:$0xff] }
 0x956   : > { %v31386_v28 = vpop.f32.mrb[22].mxu1 }
 0x957   : > { %v25708_v27 = vpop.f32.mrb[23].mxu1 }
 0x958   : > { %25783 = vmatmul.mubr.msk.f32.gmra.mrb[68].mxu0 %vm17913_vm2, %v24339_v13  ;;  %25927 = vmatmul.mubr.msk.f32.gmra.mrb[98].mxu1 %vm17913_vm2, %v24428_v60  ;;  %v24398_v27 = vld [vmem:[%s34424_s6 + $0x220] sm:$0xff] }
 0x959   : > { %25785 = vmatprep.mubr.msk.f32.mxu0 %vm28078_vm1, %v28052_v0  ;;  %25929 = vmatprep.mubr.msk.f32.mxu1 %vm28078_vm1, %v28052_v0 }
 0x95a   : > { %v31400_v22 = vpop.f32.mrb[24].mxu1 }
 0x95b   : > { %v25711_v5 = vpop.f32.mrb[25].mxu1 }
 0x95c   : > { %25786 = vmatmul.mubr.msk.f32.gmra.mrb[70].mxu0 %vm17913_vm2, %v24340_v7  ;;  %25930 = vmatmul.mubr.msk.f32.gmra.mrb[100].mxu1 %vm17913_vm2, %v24429_v26  ;;  %v24487_v7 = vld [vmem:[%s34424_s6 + $0x380] sm:$0xff] }
 0x95d   : > { %25788 = vmatprep.mubr.msk.f32.mxu0 %vm28078_vm1, %v28052_v0  ;;  %25932 = vmatprep.mubr.msk.f32.mxu1 %vm28078_vm1, %v28052_v0 }
 0x95e   : > { %v31414_v11 = vpop.f32.mrb[26].mxu1 }
 0x95f   : > { %v25714_v8 = vpop.f32.mrb[27].mxu1 }
 0x960   : > { %25789 = vmatmul.mubr.msk.f32.gmra.mrb[72].mxu0 %vm17913_vm2, %v24341_v56  ;;  %25933 = vmatmul.mubr.msk.f32.gmra.mrb[102].mxu1 %vm17913_vm2, %v24430_v12  ;;  %v24399_v56 = vld [vmem:[%s34424_s6 + $0x228] sm:$0xff]  ;;  %v24400_v8 = vld [vmem:[%s34424_s6 + $0x230] sm:$0xff] }
 0x961   : > { %25791 = vmatprep.mubr.msk.f32.mxu0 %vm28078_vm1, %v28052_v0  ;;  %25935 = vmatprep.mubr.msk.f32.mxu1 %vm28078_vm1, %v28052_v0  ;;  %v24488_v12 = vld [vmem:[%s34424_s6 + $0x388] sm:$0xff] }
 0x962   : > { %v31428_v15 = vpop.f32.mrb[28].mxu1 }
 0x963   : > { %v25717_v1 = vpop.f32.mrb[29].mxu1 }
 0x964   : > { %25792 = vmatmul.mubr.msk.f32.gmra.mrb[74].mxu0 %vm17913_vm2, %v24342_v19  ;;  %25936 = vmatmul.mubr.msk.f32.gmra.mrb[104].mxu1 %vm17913_vm2, %v24431_v17  ;;  %v24489_v19 = vld [vmem:[%s34424_s6 + $0x390] sm:$0xff]  ;;  %v24401_v17 = vld [vmem:[%s34424_s6 + $0x238] sm:$0xff] }
 0x965   : > { %25794 = vmatprep.mubr.msk.f32.mxu0 %vm28078_vm1, %v28052_v0  ;;  %25938 = vmatprep.mubr.msk.f32.mxu1 %vm28078_vm1, %v28052_v0  ;;  %v24490_v1 = vld [vmem:[%s34424_s6 + $0x398] sm:$0xff] }
 0x966   : > { %v31442_v42 = vpop.f32.mrb[30].mxu1 }
 0x967   : > { %v25720_v53 = vpop.f32.mrb[31].mxu1 }
 0x968   : > { %25795 = vmatmul.mubr.msk.f32.gmra.mrb[76].mxu0 %vm17913_vm2, %v24343_v24  ;;  %25939 = vmatmul.mubr.msk.f32.gmra.mrb[106].mxu1 %vm17913_vm2, %v24432_v39  ;;  %v24402_v24 = vld [vmem:[%s34424_s6 + $0x240] sm:$0xff]  ;;  %v24403_v53 = vld [vmem:[%s34424_s6 + $0x248] sm:$0xff] }
 0x969   : > { %25797 = vmatprep.mubr.msk.f32.mxu0 %vm28078_vm1, %v28052_v0  ;;  %25941 = vmatprep.mubr.msk.f32.mxu1 %vm28078_vm1, %v28052_v0  ;;  %v24491_v39 = vld [vmem:[%s34424_s6 + $0x3a0] sm:$0xff] }
 0x96a   : > { %v31456_v54 = vpop.f32.mrb[32].mxu1 }
 0x96b   : > { %v25723_v40 = vpop.f32.mrb[33].mxu1 }
 0x96c   : > { %25798 = vmatmul.mubr.msk.f32.gmra.mrb[78].mxu0 %vm17913_vm2, %v24344_v59  ;;  %25942 = vmatmul.mubr.msk.f32.gmra.mrb[108].mxu1 %vm17913_vm2, %v24433_v25  ;;  %v27953_v59 = vpop.permute.xlu0 %27952  ;;  %v24404_v25 = vld [vmem:[%s34424_s6 + $0x250] sm:$0xff] }
 0x96d   : > { %25853 = vmatprep.mubr.msk.f32.mxu0 %vm28078_vm1, %v28052_v0  ;;  %25944 = vmatprep.mubr.msk.f32.mxu1 %vm28078_vm1, %v28052_v0  ;;  %v27955_v44 = vunpack.i.h.bf16 %v27953_v59  ;;  %v27954_v40 = vunpack.i.l.bf16 %v27953_v59 }
 0x96e   : > { %v31470_v36 = vpop.f32.mrb[34].mxu1 }
 0x96f   : > { %v25726_v47 = vpop.f32.mrb[35].mxu1 }
 0x970   : > { %25854 = vmatmul.mubr.msk.f32.vlgmr.msra.gmra.mrb[80].mxu0 %vm17913_vm2, %v24390_v51  ;;  %25945 = vmatmul.mubr.msk.f32.gmra.mrb[110].mxu1 %vm17913_vm2, %v24434_v37  ;;  %v24450_v51 = vld [vmem:[%s34424_s6 + $0x2d0] sm:$0xff]  ;;  %v24494_v37 = vld [vmem:[%s34424_s6 + $0x3b8] sm:$0xff] }
 0x971   : > { %27114 = vmatpush3.bf16.msra.mxu0 %v27113_v30  ;;  %25856 = vmatprep.mubr.msk.f32.mxu0 %vm28078_vm1, %v28052_v0  ;;  %v27119_v30 = vpack.c.bf16 %v27955_v44, %v27954_v40  ;;  %v24451_v47 = vld [vmem:[%s34424_s6 + $0x2d8] sm:$0xff] }
 0x972   : > { %26000 = vmatprep.mubr.msk.f32.mxu1 %vm28078_vm1, %v28052_v0  ;;  %27118 = vmatprep.subr.bf16.mxu0 %v28077_v45  ;;  %v31485_v23 = vpop.f32.mrb[36].mxu1 }
 0x973   : > { %v25729_v52 = vpop.f32.mrb[37].mxu1 }
 0x974   : > { %25857 = vmatmul.mubr.msk.f32.gmra.mrb[82].mxu0 %vm17913_vm2, %v24391_v62  ;;  %26001 = vmatmul.mubr.msk.f32.vlgmr.msra.gmra.mrb[112].mxu1 %vm17913_vm2, %v24480_v57  ;;  %v24540_v62 = vld [vmem:[%s34424_s6 + $0x438] sm:$0xff]  ;;  %v27128_v57 = vpack.c.bf16 %v27970_v29, %v27969_v46  ;;  %v24541_v52 = vld [vmem:[%s34424_s6 + $0x440] sm:$0xff]  ;;  %v27963_v29 = vpop.permute.xlu0 %27962 }
 0x975   : > { %27123 = vmatpush3.bf16.msra.mxu1 %v27122_v3  ;;  %25859 = vmatprep.mubr.msk.f32.mxu0 %vm28078_vm1, %v28052_v0  ;;  %v24452_v3 = vld [vmem:[%s34424_s6 + $0x2e0] sm:$0xff] }
 0x976   : > { %26003 = vmatprep.mubr.msk.f32.mxu1 %vm28078_vm1, %v28052_v0  ;;  %27127 = vmatprep.subr.bf16.mxu1 %v28077_v45  ;;  %v31500_v16 = vpop.f32.mrb[38].mxu1 }
 0x977   : > { %v25732_v31 = vpop.f32.mrb[39].mxu1 }
 0x978   : > { %25860 = vmatmul.mubr.msk.f32.gmra.mrb[84].mxu0 %vm17913_vm2, %v24392_v50  ;;  %26004 = vmatmul.mubr.msk.f32.gmra.mrb[114].mxu1 %vm17913_vm2, %v24481_v33  ;;  %v24453_v50 = vld [vmem:[%s34424_s6 + $0x2e8] sm:$0xff]  ;;  %v24454_v31 = vld [vmem:[%s34424_s6 + $0x2f0] sm:$0xff] }
 0x979   : > { %25862 = vmatprep.mubr.msk.f32.mxu0 %vm28078_vm1, %v28052_v0  ;;  %26006 = vmatprep.mubr.msk.f32.mxu1 %vm28078_vm1, %v28052_v0  ;;  %v24542_v33 = vld [vmem:[%s34424_s6 + $0x448] sm:$0xff] }
 0x97a   : > { %v31514_v48 = vpop.f32.mrb[40].mxu1 }
 0x97b   : > { %v25735_v10 = vpop.f32.mrb[41].mxu1 }
 0x97c   : > { %25863 = vmatmul.mubr.msk.f32.gmra.mrb[86].mxu0 %vm17913_vm2, %v24393_v32  ;;  %26007 = vmatmul.mubr.msk.f32.gmra.mrb[116].mxu1 %vm17913_vm2, %v24482_v20  ;;  %v24543_v32 = vld [vmem:[%s34424_s6 + $0x450] sm:$0xff]  ;;  %v24455_v20 = vld [vmem:[%s34424_s6 + $0x2f8] sm:$0xff] }
 0x97d   : > { %25865 = vmatprep.mubr.msk.f32.mxu0 %vm28078_vm1, %v28052_v0  ;;  %26009 = vmatprep.mubr.msk.f32.mxu1 %vm28078_vm1, %v28052_v0  ;;  %v24544_v10 = vld [vmem:[%s34424_s6 + $0x458] sm:$0xff] }
 0x97e   : > { %v31528_v34 = vpop.f32.mrb[42].mxu1 }
 0x97f   : > { %v25738_v58 = vpop.f32.mrb[43].mxu1 }
 0x980   : > { %25866 = vmatmul.mubr.msk.f32.gmra.mrb[88].mxu0 %vm17913_vm2, %v24394_v2  ;;  %26010 = vmatmul.mubr.msk.f32.gmra.mrb[118].mxu1 %vm17913_vm2, %v24483_v61  ;;  %v24456_v2 = vld [vmem:[%s34424_s6 + $0x300] sm:$0xff]  ;;  %v24457_v58 = vld [vmem:[%s34424_s6 + $0x308] sm:$0xff] }
 0x981   : > { %25868 = vmatprep.mubr.msk.f32.mxu0 %vm28078_vm1, %v28052_v0  ;;  %26012 = vmatprep.mubr.msk.f32.mxu1 %vm28078_vm1, %v28052_v0  ;;  %v24545_v61 = vld [vmem:[%s34424_s6 + $0x460] sm:$0xff] }
 0x982   : > { %v31542_v55 = vpop.f32.mrb[44].mxu1 }
 0x983   : > { %v25741_v38 = vpop.f32.mrb[45].mxu1 }
 0x984   : > { %25869 = vmatmul.mubr.msk.f32.gmra.mrb[90].mxu0 %vm17913_vm2, %v24395_v21  ;;  %26013 = vmatmul.mubr.msk.f32.gmra.mrb[120].mxu1 %vm17913_vm2, %v24484_v4  ;;  %v24546_v21 = vld [vmem:[%s34424_s6 + $0x468] sm:$0xff]  ;;  %v24458_v4 = vld [vmem:[%s34424_s6 + $0x310] sm:$0xff] }
 0x985   : > { %25871 = vmatprep.mubr.msk.f32.mxu0 %vm28078_vm1, %v28052_v0  ;;  %26015 = vmatprep.mubr.msk.f32.mxu1 %vm28078_vm1, %v28052_v0  ;;  %v24547_v38 = vld [vmem:[%s34424_s6 + $0x470] sm:$0xff] }
 0x986   : > { %v31556_v35 = vpop.f32.mrb[46].mxu1 }
 0x987   : > { %v25744_v9 = vpop.f32.mrb[47].mxu1 }
 0x988   : > { %25872 = vmatmul.mubr.msk.f32.gmra.mrb[92].mxu0 %vm17913_vm2, %v24396_v14  ;;  %26016 = vmatmul.mubr.msk.f32.gmra.mrb[122].mxu1 %vm17913_vm2, %v24485_v41 }
 0x989   : > { %25874 = vmatprep.mubr.msk.f32.mxu0 %vm28078_vm1, %v28052_v0  ;;  %26018 = vmatprep.mubr.msk.f32.mxu1 %vm28078_vm1, %v28052_v0 }
 0x98a   : > { %v31570_v13 = vpop.f32.mrb[48].mxu1 }
 0x98b   : > { %v25747_v60 = vpop.f32.mrb[49].mxu1 }
 0x98c   : > { %25875 = vmatmul.mubr.msk.f32.gmra.mrb[94].mxu0 %vm17913_vm2, %v24397_v18  ;;  %26019 = vmatmul.mubr.msk.f32.gmra.mrb[124].mxu1 %vm17913_vm2, %v24486_v49  ;;  %v24459_v18 = vld [vmem:[%s34424_s6 + $0x318] sm:$0xff] }
 0x98d   : > { %25877 = vmatprep.mubr.msk.f32.mxu0 %vm28078_vm1, %v28052_v0  ;;  %26021 = vmatprep.mubr.msk.f32.mxu1 %vm28078_vm1, %v28052_v0 }
 0x98e   : > { %v31584_v26 = vpop.f32.mrb[50].mxu1 }
 0x98f   : > { %v25750_v5 = vpop.f32.mrb[51].mxu1 }
 0x990   : > { %25878 = vmatmul.mubr.msk.f32.gmra.mrb[96].mxu0 %vm17913_vm2, %v24398_v27  ;;  %26022 = vmatmul.mubr.msk.f32.gmra.mrb[126].mxu1 %vm17913_vm2, %v24487_v7 }
 0x991   : > { %25880 = vmatprep.mubr.msk.f32.mxu0 %vm28078_vm1, %v28052_v0  ;;  %26024 = vmatprep.mubr.msk.f32.mxu1 %vm28078_vm1, %v28052_v0 }
 0x994   : > { %25881 = vmatmul.mubr.msk.f32.gmra.mrb[98].mxu0 %vm17913_vm2, %v24399_v56  ;;  %26025 = vmatmul.mubr.msk.f32.gmra.mrb[128].mxu1 %vm17913_vm2, %v24488_v12  ;;  %v24460_v56 = vld [vmem:[%s34424_s6 + $0x320] sm:$0xff] }
 0x995   : > { %25883 = vmatprep.mubr.msk.f32.mxu0 %vm28078_vm1, %v28052_v0  ;;  %26027 = vmatprep.mubr.msk.f32.mxu1 %vm28078_vm1, %v28052_v0 }
 0x998   : > { %25884 = vmatmul.mubr.msk.f32.gmra.mrb[100].mxu0 %vm17913_vm2, %v24400_v8  ;;  %26028 = vmatmul.mubr.msk.f32.gmra.mrb[130].mxu1 %vm17913_vm2, %v24489_v19 }
 0x999   : > { %25886 = vmatprep.mubr.msk.f32.mxu0 %vm28078_vm1, %v28052_v0  ;;  %26030 = vmatprep.mubr.msk.f32.mxu1 %vm28078_vm1, %v28052_v0 }
 0x99c   : > { %25887 = vmatmul.mubr.msk.f32.gmra.mrb[102].mxu0 %vm17913_vm2, %v24401_v17  ;;  %26031 = vmatmul.mubr.msk.f32.gmra.mrb[132].mxu1 %vm17913_vm2, %v24490_v1 }
 0x99d   : > { %25889 = vmatprep.mubr.msk.f32.mxu0 %vm28078_vm1, %v28052_v0  ;;  %26033 = vmatprep.mubr.msk.f32.mxu1 %vm28078_vm1, %v28052_v0 }
 0x9a0   : > { %25890 = vmatmul.mubr.msk.f32.gmra.mrb[104].mxu0 %vm17913_vm2, %v24402_v24  ;;  %26034 = vmatmul.mubr.msk.f32.gmra.mrb[134].mxu1 %vm17913_vm2, %v24491_v39  ;;  %v24461_v24 = vld [vmem:[%s34424_s6 + $0x328] sm:$0xff] }
 0x9a1   : > { %25892 = vmatprep.mubr.msk.f32.mxu0 %vm28078_vm1, %v28052_v0  ;;  %26036 = vmatprep.mubr.msk.f32.mxu1 %vm28078_vm1, %v28052_v0 }
 0x9a4   : > { %25893 = vmatmul.mubr.msk.f32.gmra.mrb[106].mxu0 %vm17913_vm2, %v24403_v53  ;;  %26037 = vmatmul.mubr.msk.f32.gmra.mrb[136].mxu1 %vm17913_vm2, %v24492_v6 }
 0x9a5   : > { %25895 = vmatprep.mubr.msk.f32.mxu0 %vm28078_vm1, %v28052_v0  ;;  %26039 = vmatprep.mubr.msk.f32.mxu1 %vm28078_vm1, %v28052_v0 }
 0x9a8   : > { %25896 = vmatmul.mubr.msk.f32.gmra.mrb[108].mxu0 %vm17913_vm2, %v24404_v25  ;;  %26040 = vmatmul.mubr.msk.f32.gmra.mrb[138].mxu1 %vm17913_vm2, %v24493_v63  ;;  %v24462_v63 = vld [vmem:[%s34424_s6 + $0x330] sm:$0xff] }
 0x9a9   : > { %25951 = vmatprep.mubr.msk.f32.mxu0 %vm28078_vm1, %v28052_v0  ;;  %26042 = vmatprep.mubr.msk.f32.mxu1 %vm28078_vm1, %v28052_v0 }
 0x9ac   : > { %25952 = vmatmul.mubr.msk.f32.vlgmr.msra.gmra.mrb[110].mxu0 %vm17913_vm2, %v24450_v51  ;;  %26043 = vmatmul.mubr.msk.f32.gmra.mrb[140].mxu1 %vm17913_vm2, %v24494_v37 }
 0x9ad   : > { %27120 = vmatpush3.bf16.msra.mxu0 %v27119_v30  ;;  %25954 = vmatprep.mubr.msk.f32.mxu0 %vm28078_vm1, %v28052_v0  ;;  %v24463_v30 = vld [vmem:[%s34424_s6 + $0x338] sm:$0xff] }
 0x9ae   : > { %26098 = vmatprep.mubr.msk.f32.mxu1 %vm28078_vm1, %v28052_v0  ;;  %27124 = vmatprep.subr.bf16.mxu0 %v28077_v45 }
 0x9b0   : > { %25955 = vmatmul.mubr.msk.f32.gmra.mrb[112].mxu0 %vm17913_vm2, %v24451_v47  ;;  %26099 = vmatmul.mubr.msk.f32.vlgmr.msra.gmra.mrb[142].mxu1 %vm17913_vm2, %v24540_v62 }
 0x9b1   : > { %27129 = vmatpush3.bf16.msra.mxu1 %v27128_v57  ;;  %25957 = vmatprep.mubr.msk.f32.mxu0 %vm28078_vm1, %v28052_v0 }
 0x9b2   : > { %26101 = vmatprep.mubr.msk.f32.mxu1 %vm28078_vm1, %v28052_v0  ;;  %27133 = vmatprep.subr.bf16.mxu1 %v28077_v45 }
 0x9b4   : > { %25958 = vmatmul.mubr.msk.f32.gmra.mrb[114].mxu0 %vm17913_vm2, %v24452_v3  ;;  %26102 = vmatmul.mubr.msk.f32.gmra.mrb[144].mxu1 %vm17913_vm2, %v24541_v52  ;;  %v24464_v52 = vld [vmem:[%s34424_s6 + $0x340] sm:$0xff] }
 0x9b5   : > { %25960 = vmatprep.mubr.msk.f32.mxu0 %vm28078_vm1, %v28052_v0  ;;  %26104 = vmatprep.mubr.msk.f32.mxu1 %vm28078_vm1, %v28052_v0 }
 0x9b8   : > { %25961 = vmatmul.mubr.msk.f32.gmra.mrb[116].mxu0 %vm17913_vm2, %v24453_v50  ;;  %26105 = vmatmul.mubr.msk.f32.gmra.mrb[146].mxu1 %vm17913_vm2, %v24542_v33  ;;  %v27978_v50 = vpop.permute.xlu1 %27977  ;;  %v27965_v33 = vunpack.i.h.bf16 %v27963_v29 }
 0x9b9   : > { %25963 = vmatprep.mubr.msk.f32.mxu0 %vm28078_vm1, %v28052_v0  ;;  %26107 = vmatprep.mubr.msk.f32.mxu1 %vm28078_vm1, %v28052_v0 }
 0x9bc   : > { %25964 = vmatmul.mubr.msk.f32.gmra.mrb[118].mxu0 %vm17913_vm2, %v24454_v31  ;;  %26108 = vmatmul.mubr.msk.f32.gmra.mrb[148].mxu1 %vm17913_vm2, %v24543_v32  ;;  %v27964_v31 = vunpack.i.l.bf16 %v27963_v29  ;;  %v24514_v29 = vld [vmem:[%s34424_s6 + $0x3e0] sm:$0xff] }
 0x9bd   : > { %25966 = vmatprep.mubr.msk.f32.mxu0 %vm28078_vm1, %v28052_v0  ;;  %26110 = vmatprep.mubr.msk.f32.mxu1 %vm28078_vm1, %v28052_v0 }
 0x9c0   : > { %25967 = vmatmul.mubr.msk.f32.gmra.mrb[120].mxu0 %vm17913_vm2, %v24455_v20  ;;  %26111 = vmatmul.mubr.msk.f32.gmra.mrb[150].mxu1 %vm17913_vm2, %v24544_v10 }
 0x9c1   : > { %25969 = vmatprep.mubr.msk.f32.mxu0 %vm28078_vm1, %v28052_v0  ;;  %26113 = vmatprep.mubr.msk.f32.mxu1 %vm28078_vm1, %v28052_v0 }
 0x9c4   : > { %25970 = vmatmul.mubr.msk.f32.gmra.mrb[122].mxu0 %vm17913_vm2, %v24456_v2  ;;  %26114 = vmatmul.mubr.msk.f32.gmra.mrb[152].mxu1 %vm17913_vm2, %v24545_v61 }
 0x9c5   : > { %25972 = vmatprep.mubr.msk.f32.mxu0 %vm28078_vm1, %v28052_v0  ;;  %26116 = vmatprep.mubr.msk.f32.mxu1 %vm28078_vm1, %v28052_v0 }
 0x9c8   : > { %25973 = vmatmul.mubr.msk.f32.gmra.mrb[124].mxu0 %vm17913_vm2, %v24457_v58  ;;  %26117 = vmatmul.mubr.msk.f32.gmra.mrb[154].mxu1 %vm17913_vm2, %v24546_v21  ;;  %v24510_v58 = vld [vmem:[%s34424_s6 + $0x3c0] sm:$0xff]  ;;  %v27125_v21 = vpack.c.bf16 %v27965_v33, %v27964_v31 }
 0x9c9   : > { %25975 = vmatprep.mubr.msk.f32.mxu0 %vm28078_vm1, %v28052_v0  ;;  %26119 = vmatprep.mubr.msk.f32.mxu1 %vm28078_vm1, %v28052_v0 }
 0x9cb   : > { %v18025_v14 = vpop.f32.mrb[20].mxu0 }
 0x9cc   : > { %v31769_v41 = vadd.f32 %v31386_v28, %v18025_v14  ;;  %v25659_v9 = vpop.f32.mrb[21].mxu0  ;;  %25976 = vmatmul.mubr.msk.f32.gmra.mrb[126].mxu0 %vm17913_vm2, %v24458_v4  ;;  %26120 = vmatmul.mubr.msk.f32.gmra.mrb[156].mxu1 %vm17913_vm2, %v24547_v38  ;;  %v24548_v28 = vld [vmem:[%s34424_s6 + $0x478] sm:$0xff]  ;;  %v27980_v4 = vunpack.i.h.bf16 %v27978_v50  ;;  %v27979_v38 = vunpack.i.l.bf16 %v27978_v50  ;;  %v24515_v50 = vld [vmem:[%s34424_s6 + $0x3e8] sm:$0xff] }
 0x9cd   : > { %25978 = vmatprep.mubr.msk.f32.mxu0 %vm28078_vm1, %v28052_v0  ;;  %26122 = vmatprep.mubr.msk.f32.mxu1 %vm28078_vm1, %v28052_v0 }
 0x9cf   : > { %v18030_v49 = vpop.f32.mrb[22].mxu0  ;;  %v31783_v60 = vpop.f32.mrb[52].mxu1 }
 0x9d0   : > { %v31786_v27 = vadd.f32 %v31400_v22, %v18030_v49  ;;  %v25662_v7 = vpop.f32.mrb[23].mxu0  ;;  %25979 = vmatmul.mubr.msk.f32.gmra.mrb[128].mxu0 %vm17913_vm2, %v24459_v18  ;;  %26123 = vmatmul.mubr.msk.f32.gmra.mrb[158].mxu1 %vm17913_vm2, %v24548_v28  ;;  %v25806_v5 = vpop.f32.mrb[53].mxu1  ;;  %v24549_v22 = vld [vmem:[%s34424_s6 + $0x480] sm:$0xff] }
 0x9d1   : > { %25981 = vmatprep.mubr.msk.f32.mxu0 %vm28078_vm1, %v28052_v0  ;;  %26125 = vmatprep.mubr.msk.f32.mxu1 %vm28078_vm1, %v28052_v0  ;;  %v24511_v7 = vld [vmem:[%s34424_s6 + $0x3c8] sm:$0xff] }
 0x9d2   : > { %v24600_v5 = vld [vmem:[%s34424_s6 + $0x528] sm:$0xff] }
 0x9d3   : > { %v18035_v12 = vpop.f32.mrb[24].mxu0  ;;  %v31800_v8 = vpop.f32.mrb[54].mxu1 }
 0x9d4   : > { %v31803_v19 = vadd.f32 %v31414_v11, %v18035_v12  ;;  %v25665_v17 = vpop.f32.mrb[25].mxu0  ;;  %25982 = vmatmul.mubr.msk.f32.gmra.mrb[130].mxu0 %vm17913_vm2, %v24460_v56  ;;  %26126 = vmatmul.mubr.msk.f32.gmra.mrb[160].mxu1 %vm17913_vm2, %v24549_v22  ;;  %v25809_v1 = vpop.f32.mrb[55].mxu1  ;;  %v24550_v11 = vld [vmem:[%s34424_s6 + $0x488] sm:$0xff] }
 0x9d5   : > { %25984 = vmatprep.mubr.msk.f32.mxu0 %vm28078_vm1, %v28052_v0  ;;  %26128 = vmatprep.mubr.msk.f32.mxu1 %vm28078_vm1, %v28052_v0 }
 0x9d7   : > { %v18040_v39 = vpop.f32.mrb[26].mxu0  ;;  %v31817_v53 = vpop.f32.mrb[56].mxu1 }
 0x9d8   : > { %v31820_v6 = vadd.f32 %v31428_v15, %v18040_v39  ;;  %v25668_v59 = vpop.f32.mrb[27].mxu0  ;;  %25985 = vmatmul.mubr.msk.f32.gmra.mrb[132].mxu0 %vm17913_vm2, %v24461_v24  ;;  %26129 = vmatmul.mubr.msk.f32.gmra.mrb[162].mxu1 %vm17913_vm2, %v24550_v11  ;;  %v25812_v25 = vpop.f32.mrb[57].mxu1  ;;  %v24551_v15 = vld [vmem:[%s34424_s6 + $0x490] sm:$0xff] }
 0x9d9   : > { %25987 = vmatprep.mubr.msk.f32.mxu0 %vm28078_vm1, %v28052_v0  ;;  %26131 = vmatprep.mubr.msk.f32.mxu1 %vm28078_vm1, %v28052_v0  ;;  %v24512_v24 = vld [vmem:[%s34424_s6 + $0x3d0] sm:$0xff] }
 0x9da   : > { %v24601_v11 = vld [vmem:[%s34424_s6 + $0x530] sm:$0xff] }
 0x9db   : > { %v18045_v44 = vpop.f32.mrb[28].mxu0  ;;  %v31834_v40 = vpop.f32.mrb[58].mxu1 }
 0x9dc   : > { %v31837_v43 = vadd.f32 %v31442_v42, %v18045_v44  ;;  %v25671_v51 = vpop.f32.mrb[29].mxu0  ;;  %25988 = vmatmul.mubr.msk.f32.gmra.mrb[134].mxu0 %vm17913_vm2, %v24462_v63  ;;  %26132 = vmatmul.mubr.msk.f32.gmra.mrb[164].mxu1 %vm17913_vm2, %v24551_v15  ;;  %v25815_v37 = vpop.f32.mrb[59].mxu1  ;;  %v24552_v42 = vld [vmem:[%s34424_s6 + $0x498] sm:$0xff] }
 0x9dd   : > { %25990 = vmatprep.mubr.msk.f32.mxu0 %vm28078_vm1, %v28052_v0  ;;  %26134 = vmatprep.mubr.msk.f32.mxu1 %vm28078_vm1, %v28052_v0  ;;  %v24513_v15 = vld [vmem:[%s34424_s6 + $0x3d8] sm:$0xff] }
 0x9df   : > { %v18050_v46 = vpop.f32.mrb[30].mxu0  ;;  %v31851_v47 = vpop.f32.mrb[60].mxu1 }
 0x9e0   : > { %v31854_v62 = vadd.f32 %v31456_v54, %v18050_v46  ;;  %v25674_v57 = vpop.f32.mrb[31].mxu0  ;;  %25991 = vmatmul.mubr.msk.f32.gmra.mrb[136].mxu0 %vm17913_vm2, %v24463_v30  ;;  %26135 = vmatmul.mubr.msk.f32.gmra.mrb[166].mxu1 %vm17913_vm2, %v24552_v42  ;;  %v25818_v3 = vpop.f32.mrb[61].mxu1  ;;  %v24553_v54 = vld [vmem:[%s34424_s6 + $0x4a0] sm:$0xff] }
 0x9e1   : > { %25993 = vmatprep.mubr.msk.f32.mxu0 %vm28078_vm1, %v28052_v0  ;;  %26137 = vmatprep.mubr.msk.f32.mxu1 %vm28078_vm1, %v28052_v0 }
 0x9e3   : > { %v18055_v32 = vpop.f32.mrb[32].mxu0  ;;  %v31868_v20 = vpop.f32.mrb[62].mxu1 }
 0x9e4   : > { %v31871_v10 = vadd.f32 %v31470_v36, %v18055_v32  ;;  %v25677_v2 = vpop.f32.mrb[33].mxu0  ;;  %25994 = vmatmul.mubr.msk.f32.gmra.mrb[138].mxu0 %vm17913_vm2, %v24464_v52  ;;  %26138 = vmatmul.mubr.msk.f32.gmra.mrb[168].mxu1 %vm17913_vm2, %v24553_v54  ;;  %v25821_v61 = vpop.f32.mrb[63].mxu1  ;;  %v24554_v36 = vld [vmem:[%s34424_s6 + $0x4a8] sm:$0xff] }
 0x9e5   : > { %26049 = vmatprep.mubr.msk.f32.mxu0 %vm28078_vm1, %v28052_v0  ;;  %26140 = vmatprep.mubr.msk.f32.mxu1 %vm28078_vm1, %v28052_v0 }
 0x9e7   : > { %v18060_v14 = vpop.f32.mrb[34].mxu0  ;;  %v31885_v9 = vpop.f32.mrb[64].mxu1 }
 0x9e8   : > { %v31888_v18 = vadd.f32 %v31485_v23, %v18060_v14  ;;  %v25680_v28 = vpop.f32.mrb[35].mxu0  ;;  %26050 = vmatmul.mubr.msk.f32.vlgmr.msra.gmra.mrb[140].mxu0 %vm17913_vm2, %v24510_v58  ;;  %26141 = vmatmul.mubr.msk.f32.gmra.mrb[170].mxu1 %vm17913_vm2, %v24554_v36  ;;  %v25824_v49 = vpop.f32.mrb[65].mxu1  ;;  %v27134_v23 = vpack.c.bf16 %v27980_v4, %v27979_v38  ;;  %v24516_v58 = vld [vmem:[%s34424_s6 + $0x3f0] sm:$0xff] }
 0x9e9   : > { %27126 = vmatpush3.bf16.msra.mxu0 %v27125_v21  ;;  %26052 = vmatprep.mubr.msk.f32.mxu0 %vm28078_vm1, %v28052_v0  ;;  %v24517_v28 = vld [vmem:[%s34424_s6 + $0x3f8] sm:$0xff] }
 0x9ea   : > { %26196 = vmatprep.mubr.msk.f32.mxu1 %vm28078_vm1, %v28052_v0  ;;  %27130 = vmatprep.subr.bf16.mxu0 %v28077_v45 }
 0x9eb   : > { %v18065_v56 = vpop.f32.mrb[36].mxu0  ;;  %v31903_v22 = vpop.f32.mrb[66].mxu1 }
 0x9ec   : > { %v31906_v12 = vadd.f32 %v31500_v16, %v18065_v56  ;;  %v25683_v17 = vpop.f32.mrb[37].mxu0  ;;  %26053 = vmatmul.mubr.msk.f32.gmra.mrb[142].mxu0 %vm17913_vm2, %v24511_v7  ;;  %26197 = vmatmul.mubr.msk.f32.vlgmr.msra.gmra.mrb[172].mxu1 %vm17913_vm2, %v24600_v5  ;;  %v25827_v1 = vpop.f32.mrb[67].mxu1 }
 0x9ed   : > { %27135 = vmatpush3.bf16.msra.mxu1 %v27134_v23  ;;  %26055 = vmatprep.mubr.msk.f32.mxu0 %vm28078_vm1, %v28052_v0  ;;  %v24518_v17 = vld [vmem:[%s34424_s6 + $0x400] sm:$0xff] }
 0x9ee   : > { %26199 = vmatprep.mubr.msk.f32.mxu1 %vm28078_vm1, %v28052_v0  ;;  %27139 = vmatprep.subr.bf16.mxu1 %v28077_v45 }
 0x9ef   : > { %v18070_v16 = vpop.f32.mrb[38].mxu0  ;;  %v31921_v39 = vpop.f32.mrb[68].mxu1 }
 0x9f0   : > { %v31924_v59 = vadd.f32 %v31514_v48, %v18070_v16  ;;  %v25686_v25 = vpop.f32.mrb[39].mxu0  ;;  %26056 = vmatmul.mubr.msk.f32.gmra.mrb[144].mxu0 %vm17913_vm2, %v24512_v24  ;;  %26200 = vmatmul.mubr.msk.f32.gmra.mrb[174].mxu1 %vm17913_vm2, %v24601_v11  ;;  %v25830_v63 = vpop.f32.mrb[69].mxu1  ;;  %v24602_v48 = vld [vmem:[%s34424_s6 + $0x538] sm:$0xff] }
 0x9f1   : > { %26058 = vmatprep.mubr.msk.f32.mxu0 %vm28078_vm1, %v28052_v0  ;;  %26202 = vmatprep.mubr.msk.f32.mxu1 %vm28078_vm1, %v28052_v0  ;;  %v24519_v63 = vld [vmem:[%s34424_s6 + $0x408] sm:$0xff] }
 0x9f3   : > { %v18075_v44 = vpop.f32.mrb[40].mxu0  ;;  %v31938_v51 = vpop.f32.mrb[70].mxu1 }
 0x9f4   : > { %v31941_v37 = vadd.f32 %v31528_v34, %v18075_v44  ;;  %v25689_v30 = vpop.f32.mrb[41].mxu0  ;;  %26059 = vmatmul.mubr.msk.f32.gmra.mrb[146].mxu0 %vm17913_vm2, %v24513_v15  ;;  %26203 = vmatmul.mubr.msk.f32.gmra.mrb[176].mxu1 %vm17913_vm2, %v24602_v48  ;;  %v25833_v42 = vpop.f32.mrb[71].mxu1  ;;  %v24603_v34 = vld [vmem:[%s34424_s6 + $0x540] sm:$0xff] }
 0x9f5   : > { %26061 = vmatprep.mubr.msk.f32.mxu0 %vm28078_vm1, %v28052_v0  ;;  %26205 = vmatprep.mubr.msk.f32.mxu1 %vm28078_vm1, %v28052_v0 }
 0x9f7   : > { %v18080_v46 = vpop.f32.mrb[42].mxu0  ;;  %v31955_v57 = vpop.f32.mrb[72].mxu1 }
 0x9f8   : > { %v31958_v3 = vadd.f32 %v31542_v55, %v18080_v46  ;;  %v25692_v52 = vpop.f32.mrb[43].mxu0  ;;  %26062 = vmatmul.mubr.msk.f32.gmra.mrb[148].mxu0 %vm17913_vm2, %v24514_v29  ;;  %26206 = vmatmul.mubr.msk.f32.gmra.mrb[178].mxu1 %vm17913_vm2, %v24603_v34  ;;  %v25836_v54 = vpop.f32.mrb[73].mxu1  ;;  %v24604_v55 = vld [vmem:[%s34424_s6 + $0x548] sm:$0xff] }
 0x9f9   : > { %26064 = vmatprep.mubr.msk.f32.mxu0 %vm28078_vm1, %v28052_v0  ;;  %26208 = vmatprep.mubr.msk.f32.mxu1 %vm28078_vm1, %v28052_v0 }
 0x9fb   : > { %v18085_v33 = vpop.f32.mrb[44].mxu0  ;;  %v31972_v31 = vpop.f32.mrb[74].mxu1 }
 0x9fc   : > { %v31975_v32 = vadd.f32 %v31556_v35, %v18085_v33  ;;  %v25695_v2 = vpop.f32.mrb[45].mxu0  ;;  %26065 = vmatmul.mubr.msk.f32.gmra.mrb[150].mxu0 %vm17913_vm2, %v24515_v50  ;;  %26209 = vmatmul.mubr.msk.f32.gmra.mrb[180].mxu1 %vm17913_vm2, %v24604_v55  ;;  %v25839_v61 = vpop.f32.mrb[75].mxu1  ;;  %v24605_v35 = vld [vmem:[%s34424_s6 + $0x550] sm:$0xff] }
 0x9fd   : > { %26067 = vmatprep.mubr.msk.f32.mxu0 %vm28078_vm1, %v28052_v0  ;;  %26211 = vmatprep.mubr.msk.f32.mxu1 %vm28078_vm1, %v28052_v0 }
 0x9ff   : > { %v18090_v36 = vpop.f32.mrb[46].mxu0  ;;  %v31989_v21 = vpop.f32.mrb[76].mxu1 }
 0xa00   : > { %v31992_v4 = vadd.f32 %v31570_v13, %v18090_v36  ;;  %v25698_v38 = vpop.f32.mrb[47].mxu0  ;;  %26068 = vmatmul.mubr.msk.f32.gmra.mrb[152].mxu0 %vm17913_vm2, %v24516_v58  ;;  %26212 = vmatmul.mubr.msk.f32.gmra.mrb[182].mxu1 %vm17913_vm2, %v24605_v35  ;;  %v25842_v14 = vpop.f32.mrb[77].mxu1  ;;  %v24606_v13 = vld [vmem:[%s34424_s6 + $0x558] sm:$0xff] }
 0xa01   : > { %26070 = vmatprep.mubr.msk.f32.mxu0 %vm28078_vm1, %v28052_v0  ;;  %26214 = vmatprep.mubr.msk.f32.mxu1 %vm28078_vm1, %v28052_v0 }
 0xa03   : > { %v18095_v49 = vpop.f32.mrb[48].mxu0  ;;  %v32006_v7 = vpop.f32.mrb[78].mxu1 }
 0xa04   : > { %v32009_v5 = vadd.f32 %v31584_v26, %v18095_v49  ;;  %v25701_v23 = vpop.f32.mrb[49].mxu0  ;;  %26071 = vmatmul.mubr.msk.f32.gmra.mrb[154].mxu0 %vm17913_vm2, %v24517_v28  ;;  %26215 = vmatmul.mubr.msk.f32.gmra.mrb[184].mxu1 %vm17913_vm2, %v24606_v13  ;;  %v25845_v56 = vpop.f32.mrb[79].mxu1  ;;  %v24607_v26 = vld [vmem:[%s34424_s6 + $0x560] sm:$0xff] }
 0xa05   : > { %26073 = vmatprep.mubr.msk.f32.mxu0 %vm28078_vm1, %v28052_v0  ;;  %26217 = vmatprep.mubr.msk.f32.mxu1 %vm28078_vm1, %v28052_v0  ;;  %v27973_v56 = vpop.permute.xlu0 %27972 }
 0xa07   : > { %v18417_v1 = vpop.f32.mrb[50].mxu0  ;;  %v32023_v24 = vpop.f32.mrb[80].mxu1 }
 0xa08   : > { %v18491_v11 = vadd.f32 %v18417_v1, %v31769_v41  ;;  %v25757_v16 = vpop.f32.mrb[51].mxu0  ;;  %26074 = vmatmul.mubr.msk.f32.gmra.mrb[156].mxu0 %vm17913_vm2, %v24518_v17  ;;  %26218 = vmatmul.mubr.msk.f32.gmra.mrb[186].mxu1 %vm17913_vm2, %v24607_v26  ;;  %v25848_v25 = vpop.f32.mrb[81].mxu1  ;;  %v24608_v41 = vld [vmem:[%s34424_s6 + $0x568] sm:$0xff] }
 0xa09   : > { %26076 = vmatprep.mubr.msk.f32.mxu0 %vm28078_vm1, %v28052_v0  ;;  %26220 = vmatprep.mubr.msk.f32.mxu1 %vm28078_vm1, %v28052_v0 }
 0xa0a   : > { %v32039_v15 = vadd.f32 %v31783_v60, %v18491_v11  ;;  %v24520_v60 = vld [vmem:[%s34424_s6 + $0x410] sm:$0xff] }
 0xa0b   : > { %v18422_v48 = vpop.f32.mrb[52].mxu0  ;;  %v32041_v44 = vpop.f32.mrb[82].mxu1 }
 0xa0c   : > { %v18492_v30 = vadd.f32 %v18422_v48, %v31786_v27  ;;  %v25760_v42 = vpop.f32.mrb[53].mxu0  ;;  %26077 = vmatmul.mubr.msk.f32.gmra.mrb[158].mxu0 %vm17913_vm2, %v24519_v63  ;;  %26221 = vmatmul.mubr.msk.f32.gmra.mrb[188].mxu1 %vm17913_vm2, %v24608_v41  ;;  %v25904_v29 = vpop.f32.mrb[83].mxu1  ;;  %v24609_v27 = vld [vmem:[%s34424_s6 + $0x570] sm:$0xff]  ;;  %v27975_v48 = vunpack.i.h.bf16 %v27973_v56 }
 0xa0d   : > { %26079 = vmatprep.mubr.msk.f32.mxu0 %vm28078_vm1, %v28052_v0  ;;  %26223 = vmatprep.mubr.msk.f32.mxu1 %vm28078_vm1, %v28052_v0  ;;  %v27988_v63 = vpop.permute.xlu1 %27987 }
 0xa0e   : > { %v32057_v34 = vadd.f32 %v31800_v8, %v18492_v30  ;;  %v24521_v8 = vld [vmem:[%s34424_s6 + $0x418] sm:$0xff]  ;;  %v27974_v30 = vunpack.i.l.bf16 %v27973_v56 }
 0xa0f   : > { %v18427_v46 = vpop.f32.mrb[54].mxu0  ;;  %v32059_v52 = vpop.f32.mrb[84].mxu1 }
 0xa10   : > { %v18493_v54 = vadd.f32 %v18427_v46, %v31803_v19  ;;  %v25763_v50 = vpop.f32.mrb[55].mxu0  ;;  %26080 = vmatmul.mubr.msk.f32.gmra.mrb[160].mxu0 %vm17913_vm2, %v24520_v60  ;;  %26224 = vmatmul.mubr.msk.f32.gmra.mrb[190].mxu1 %vm17913_vm2, %v24609_v27  ;;  %v25907_v55 = vpop.f32.mrb[85].mxu1  ;;  %v24610_v19 = vld [vmem:[%s34424_s6 + $0x578] sm:$0xff] }
 0xa11   : > { %26082 = vmatprep.mubr.msk.f32.mxu0 %vm28078_vm1, %v28052_v0  ;;  %26226 = vmatprep.mubr.msk.f32.mxu1 %vm28078_vm1, %v28052_v0  ;;  %v27131_v50 = vpack.c.bf16 %v27975_v48, %v27974_v30  ;;  %v27990_v55 = vunpack.i.h.bf16 %v27988_v63 }
 0xa12   : > { %v32075_v33 = vadd.f32 %v31817_v53, %v18493_v54  ;;  %v24522_v53 = vld [vmem:[%s34424_s6 + $0x420] sm:$0xff] }
 0xa13   : > { %v18432_v2 = vpop.f32.mrb[56].mxu0  ;;  %v32077_v61 = vpop.f32.mrb[86].mxu1 }
 0xa14   : > { %v18494_v58 = vadd.f32 %v18432_v2, %v31820_v6  ;;  %v25766_v35 = vpop.f32.mrb[57].mxu0  ;;  %26083 = vmatmul.mubr.msk.f32.gmra.mrb[162].mxu0 %vm17913_vm2, %v24521_v8  ;;  %26227 = vmatmul.mubr.msk.f32.gmra.mrb[192].mxu1 %vm17913_vm2, %v24610_v19  ;;  %v25910_v36 = vpop.f32.mrb[87].mxu1  ;;  %v24611_v6 = vld [vmem:[%s34424_s6 + $0x580] sm:$0xff]  ;;  %v27989_v8 = vunpack.i.l.bf16 %v27988_v63 }
 0xa15   : > { %26085 = vmatprep.mubr.msk.f32.mxu0 %vm28078_vm1, %v28052_v0  ;;  %26229 = vmatprep.mubr.msk.f32.mxu1 %vm28078_vm1, %v28052_v0 }
 0xa16   : > { %v32093_v38 = vadd.f32 %v31834_v40, %v18494_v58  ;;  %v24523_v40 = vld [vmem:[%s34424_s6 + $0x428] sm:$0xff] }
 0xa17   : > { %v18437_v14 = vpop.f32.mrb[58].mxu0  ;;  %v32095_v28 = vpop.f32.mrb[88].mxu1 }
 0xa18   : > { %v18495_v13 = vadd.f32 %v18437_v14, %v31837_v43  ;;  %v25769_v49 = vpop.f32.mrb[59].mxu0  ;;  %26086 = vmatmul.mubr.msk.f32.gmra.mrb[164].mxu0 %vm17913_vm2, %v24522_v53  ;;  %26230 = vmatmul.mubr.msk.f32.gmra.mrb[194].mxu1 %vm17913_vm2, %v24611_v6  ;;  %v25913_v23 = vpop.f32.mrb[89].mxu1  ;;  %v24612_v43 = vld [vmem:[%s34424_s6 + $0x588] sm:$0xff]  ;;  %v24660_v53 = vld [vmem:[%s34424_s6 + $0x618] sm:$0xff]  ;;  %v27140_v6 = vpack.c.bf16 %v27990_v55, %v27989_v8 }
 0xa19   : > { %26088 = vmatprep.mubr.msk.f32.mxu0 %vm28078_vm1, %v28052_v0  ;;  %26232 = vmatprep.mubr.msk.f32.mxu1 %vm28078_vm1, %v28052_v0 }
 0xa1a   : > { %v32111_v17 = vadd.f32 %v31851_v47, %v18495_v13  ;;  %v24524_v47 = vld [vmem:[%s34424_s6 + $0x430] sm:$0xff] }
 0xa1b   : > { %v18442_v26 = vpop.f32.mrb[60].mxu0  ;;  %v32113_v1 = vpop.f32.mrb[90].mxu1 }
 0xa1c   : > { %v18496_v11 = vadd.f32 %v18442_v26, %v31854_v62  ;;  %v25772_v16 = vpop.f32.mrb[61].mxu0  ;;  %26089 = vmatmul.mubr.msk.f32.gmra.mrb[166].mxu0 %vm17913_vm2, %v24523_v40  ;;  %26233 = vmatmul.mubr.msk.f32.gmra.mrb[196].mxu1 %vm17913_vm2, %v24612_v43  ;;  %v25916_v25 = vpop.f32.mrb[91].mxu1  ;;  %v24613_v62 = vld [vmem:[%s34424_s6 + $0x590] sm:$0xff]  ;;  %v24661_v43 = vld [vmem:[%s34424_s6 + $0x620] sm:$0xff] }
 0xa1d   : > { %26091 = vmatprep.mubr.msk.f32.mxu0 %vm28078_vm1, %v28052_v0  ;;  %26235 = vmatprep.mubr.msk.f32.mxu1 %vm28078_vm1, %v28052_v0 }
 0xa1e   : > { %v32129_v41 = vadd.f32 %v31868_v20, %v18496_v11  ;;  %v24570_v20 = vld [vmem:[%s34424_s6 + $0x4b0] sm:$0xff] }
 0xa1f   : > { %v18447_v42 = vpop.f32.mrb[62].mxu0  ;;  %v32131_v29 = vpop.f32.mrb[92].mxu1 }
 0xa20   : > { %v18497_v60 = vadd.f32 %v18447_v42, %v31871_v10  ;;  %v25775_v27 = vpop.f32.mrb[63].mxu0  ;;  %26092 = vmatmul.mubr.msk.f32.gmra.mrb[168].mxu0 %vm17913_vm2, %v24524_v47  ;;  %26236 = vmatmul.mubr.msk.f32.gmra.mrb[198].mxu1 %vm17913_vm2, %v24613_v62  ;;  %v25919_v46 = vpop.f32.mrb[93].mxu1  ;;  %v24614_v10 = vld [vmem:[%s34424_s6 + $0x598] sm:$0xff] }
 0xa21   : > { %26147 = vmatprep.mubr.msk.f32.mxu0 %vm28078_vm1, %v28052_v0  ;;  %26238 = vmatprep.mubr.msk.f32.mxu1 %vm28078_vm1, %v28052_v0 }
 0xa22   : > { %v32147_v54 = vadd.f32 %v31885_v9, %v18497_v60  ;;  %v24571_v9 = vld [vmem:[%s34424_s6 + $0x4b8] sm:$0xff] }
 0xa23   : > { %v18452_v19 = vpop.f32.mrb[64].mxu0  ;;  %v32149_v2 = vpop.f32.mrb[94].mxu1 }
 0xa24   : > { %v18498_v58 = vadd.f32 %v18452_v19, %v31888_v18  ;;  %v25778_v35 = vpop.f32.mrb[65].mxu0  ;;  %26148 = vmatmul.mubr.msk.f32.vlgmr.msra.gmra.mrb[170].mxu0 %vm17913_vm2, %v24570_v20  ;;  %26239 = vmatmul.mubr.msk.f32.gmra.mrb[200].mxu1 %vm17913_vm2, %v24614_v10  ;;  %v25922_v36 = vpop.f32.mrb[95].mxu1 }
 0xa25   : > { %27132 = vmatpush3.bf16.msra.mxu0 %v27131_v50  ;;  %26150 = vmatprep.mubr.msk.f32.mxu0 %vm28078_vm1, %v28052_v0 }
 0xa26   : > { %v32163_v18 = vadd.f32 %v31903_v22, %v18498_v58  ;;  %26294 = vmatprep.mubr.msk.f32.mxu1 %vm28078_vm1, %v28052_v0  ;;  %27136 = vmatprep.subr.bf16.mxu0 %v28077_v45  ;;  %v24572_v22 = vld [vmem:[%s34424_s6 + $0x4c0] sm:$0xff] }
 0xa27   : > { %v18457_v14 = vpop.f32.mrb[66].mxu0  ;;  %v32168_v13 = vpop.f32.mrb[96].mxu1 }
 0xa28   : > { %v18499_v49 = vadd.f32 %v18457_v14, %v31906_v12  ;;  %v25781_v23 = vpop.f32.mrb[67].mxu0  ;;  %26151 = vmatmul.mubr.msk.f32.gmra.mrb[172].mxu0 %vm17913_vm2, %v24571_v9  ;;  %26295 = vmatmul.mubr.msk.f32.vlgmr.msra.gmra.mrb[202].mxu1 %vm17913_vm2, %v24660_v53  ;;  %v25925_v40 = vpop.f32.mrb[97].mxu1 }
 0xa29   : > { %27141 = vmatpush3.bf16.msra.mxu1 %v27140_v6  ;;  %26153 = vmatprep.mubr.msk.f32.mxu0 %vm28078_vm1, %v28052_v0 }
 0xa2a   : > { %v32182_v12 = vadd.f32 %v31921_v39, %v18499_v49  ;;  %26297 = vmatprep.mubr.msk.f32.mxu1 %vm28078_vm1, %v28052_v0  ;;  %27145 = vmatprep.subr.bf16.mxu1 %v28077_v45  ;;  %v24573_v39 = vld [vmem:[%s34424_s6 + $0x4c8] sm:$0xff] }
 0xa2b   : > { %v18462_v56 = vpop.f32.mrb[68].mxu0  ;;  %v32187_v26 = vpop.f32.mrb[98].mxu1 }
 0xa2c   : > { %v18500_v11 = vadd.f32 %v18462_v56, %v31924_v59  ;;  %v25784_v16 = vpop.f32.mrb[69].mxu0  ;;  %26154 = vmatmul.mubr.msk.f32.gmra.mrb[174].mxu0 %vm17913_vm2, %v24572_v22  ;;  %26298 = vmatmul.mubr.msk.f32.gmra.mrb[204].mxu1 %vm17913_vm2, %v24661_v43  ;;  %v25928_v25 = vpop.f32.mrb[99].mxu1  ;;  %v24662_v59 = vld [vmem:[%s34424_s6 + $0x628] sm:$0xff] }
 0xa2d   : > { %26156 = vmatprep.mubr.msk.f32.mxu0 %vm28078_vm1, %v28052_v0  ;;  %26300 = vmatprep.mubr.msk.f32.mxu1 %vm28078_vm1, %v28052_v0 }
 0xa2e   : > { %v32203_v47 = vadd.f32 %v31938_v51, %v18500_v11  ;;  %v24574_v51 = vld [vmem:[%s34424_s6 + $0x4d0] sm:$0xff] }
 0xa2f   : > { %v18467_v62 = vpop.f32.mrb[70].mxu0  ;;  %v32205_v63 = vpop.f32.mrb[100].mxu1 }
 0xa30   : > { %v18501_v48 = vadd.f32 %v18467_v62, %v31941_v37  ;;  %v25787_v30 = vpop.f32.mrb[71].mxu0  ;;  %26157 = vmatmul.mubr.msk.f32.gmra.mrb[176].mxu0 %vm17913_vm2, %v24573_v39  ;;  %26301 = vmatmul.mubr.msk.f32.gmra.mrb[206].mxu1 %vm17913_vm2, %v24662_v59  ;;  %v25931_v42 = vpop.f32.mrb[101].mxu1  ;;  %v24663_v37 = vld [vmem:[%s34424_s6 + $0x630] sm:$0xff] }
 0xa31   : > { %26159 = vmatprep.mubr.msk.f32.mxu0 %vm28078_vm1, %v28052_v0  ;;  %26303 = vmatprep.mubr.msk.f32.mxu1 %vm28078_vm1, %v28052_v0 }
 0xa32   : > { %v32221_v60 = vadd.f32 %v31955_v57, %v18501_v48  ;;  %v24575_v57 = vld [vmem:[%s34424_s6 + $0x4d8] sm:$0xff] }
 0xa33   : > { %v18472_v27 = vpop.f32.mrb[72].mxu0  ;;  %v32223_v46 = vpop.f32.mrb[102].mxu1 }
 0xa34   : > { %v18502_v20 = vadd.f32 %v18472_v27, %v31958_v3  ;;  %v25790_v10 = vpop.f32.mrb[73].mxu0  ;;  %26160 = vmatmul.mubr.msk.f32.gmra.mrb[178].mxu0 %vm17913_vm2, %v24574_v51  ;;  %26304 = vmatmul.mubr.msk.f32.gmra.mrb[208].mxu1 %vm17913_vm2, %v24663_v37  ;;  %v25934_v50 = vpop.f32.mrb[103].mxu1  ;;  %v24664_v3 = vld [vmem:[%s34424_s6 + $0x638] sm:$0xff] }
 0xa35   : > { %26162 = vmatprep.mubr.msk.f32.mxu0 %vm28078_vm1, %v28052_v0  ;;  %26306 = vmatprep.mubr.msk.f32.mxu1 %vm28078_vm1, %v28052_v0 }
 0xa36   : > { %v32239_v55 = vadd.f32 %v31972_v31, %v18502_v20  ;;  %v24576_v31 = vld [vmem:[%s34424_s6 + $0x4e0] sm:$0xff] }
 0xa37   : > { %v18477_v8 = vpop.f32.mrb[74].mxu0  ;;  %v32241_v19 = vpop.f32.mrb[104].mxu1 }
 0xa38   : > { %v18503_v58 = vadd.f32 %v18477_v8, %v31975_v32  ;;  %v25793_v35 = vpop.f32.mrb[75].mxu0  ;;  %26163 = vmatmul.mubr.msk.f32.gmra.mrb[180].mxu0 %vm17913_vm2, %v24575_v57  ;;  %26307 = vmatmul.mubr.msk.f32.gmra.mrb[210].mxu1 %vm17913_vm2, %v24664_v3  ;;  %v25937_v36 = vpop.f32.mrb[105].mxu1  ;;  %v24665_v32 = vld [vmem:[%s34424_s6 + $0x640] sm:$0xff] }
 0xa39   : > { %26165 = vmatprep.mubr.msk.f32.mxu0 %vm28078_vm1, %v28052_v0  ;;  %26309 = vmatprep.mubr.msk.f32.mxu1 %vm28078_vm1, %v28052_v0 }
 0xa3a   : > { %v32257_v9 = vadd.f32 %v31989_v21, %v18503_v58  ;;  %v24577_v21 = vld [vmem:[%s34424_s6 + $0x4e8] sm:$0xff] }
 0xa3b   : > { %v18482_v53 = vpop.f32.mrb[76].mxu0  ;;  %v32259_v6 = vpop.f32.mrb[106].mxu1 }
 0xa3c   : > { %v18504_v14 = vadd.f32 %v18482_v53, %v31992_v4  ;;  %v25796_v49 = vpop.f32.mrb[77].mxu0  ;;  %26166 = vmatmul.mubr.msk.f32.gmra.mrb[182].mxu0 %vm17913_vm2, %v24576_v31  ;;  %26310 = vmatmul.mubr.msk.f32.gmra.mrb[212].mxu1 %vm17913_vm2, %v24665_v32  ;;  %v25940_v23 = vpop.f32.mrb[107].mxu1  ;;  %v24666_v4 = vld [vmem:[%s34424_s6 + $0x648] sm:$0xff] }
 0xa3d   : > { %26168 = vmatprep.mubr.msk.f32.mxu0 %vm28078_vm1, %v28052_v0  ;;  %26312 = vmatprep.mubr.msk.f32.mxu1 %vm28078_vm1, %v28052_v0 }
 0xa3e   : > { %v32275_v40 = vadd.f32 %v32006_v7, %v18504_v14  ;;  %v24578_v7 = vld [vmem:[%s34424_s6 + $0x4f0] sm:$0xff] }
 0xa3f   : > { %v18487_v22 = vpop.f32.mrb[78].mxu0  ;;  %v32277_v43 = vpop.f32.mrb[108].mxu1 }
 0xa40   : > { %v18505_v56 = vadd.f32 %v18487_v22, %v32009_v5  ;;  %v25799_v11 = vpop.f32.mrb[79].mxu0  ;;  %26169 = vmatmul.mubr.msk.f32.gmra.mrb[184].mxu0 %vm17913_vm2, %v24577_v21  ;;  %26313 = vmatmul.mubr.msk.f32.gmra.mrb[214].mxu1 %vm17913_vm2, %v24666_v4  ;;  %v25943_v16 = vpop.f32.mrb[109].mxu1  ;;  %v24667_v5 = vld [vmem:[%s34424_s6 + $0x650] sm:$0xff] }
 0xa41   : > { %26171 = vmatprep.mubr.msk.f32.mxu0 %vm28078_vm1, %v28052_v0  ;;  %26315 = vmatprep.mubr.msk.f32.mxu1 %vm28078_vm1, %v28052_v0  ;;  %v27983_v16 = vpop.permute.xlu0 %27982 }
 0xa42   : > { %v32293_v25 = vadd.f32 %v32023_v24, %v18505_v56  ;;  %v24579_v24 = vld [vmem:[%s34424_s6 + $0x4f8] sm:$0xff] }
 0xa43   : > { %v18861_v39 = vpop.f32.mrb[80].mxu0  ;;  %v32295_v59 = vpop.f32.mrb[110].mxu1 }
 0xa44   : > { %v18935_v62 = vadd.f32 %v18861_v39, %v32039_v15  ;;  %v25855_v48 = vpop.f32.mrb[81].mxu0  ;;  %26172 = vmatmul.mubr.msk.f32.gmra.mrb[186].mxu0 %vm17913_vm2, %v24578_v7  ;;  %26316 = vmatmul.mubr.msk.f32.gmra.mrb[216].mxu1 %vm17913_vm2, %v24667_v5  ;;  %v25946_v30 = vpop.f32.mrb[111].mxu1  ;;  %v24668_v15 = vld [vmem:[%s34424_s6 + $0x658] sm:$0xff] }
 0xa45   : > { %26174 = vmatprep.mubr.msk.f32.mxu0 %vm28078_vm1, %v28052_v0  ;;  %26318 = vmatprep.mubr.msk.f32.mxu1 %vm28078_vm1, %v28052_v0 }
 0xa46   : > { %v32311_v42 = vadd.f32 %v32041_v44, %v18935_v62  ;;  %v24580_v44 = vld [vmem:[%s34424_s6 + $0x500] sm:$0xff] }
 0xa47   : > { %v18866_v51 = vpop.f32.mrb[82].mxu0  ;;  %v32313_v37 = vpop.f32.mrb[112].mxu1 }
 0xa48   : > { %v18936_v27 = vadd.f32 %v18866_v51, %v32057_v34  ;;  %v25858_v20 = vpop.f32.mrb[83].mxu0  ;;  %26175 = vmatmul.mubr.msk.f32.gmra.mrb[188].mxu0 %vm17913_vm2, %v24579_v24  ;;  %26319 = vmatmul.mubr.msk.f32.gmra.mrb[218].mxu1 %vm17913_vm2, %v24668_v15  ;;  %v26002_v10 = vpop.f32.mrb[113].mxu1  ;;  %v24669_v34 = vld [vmem:[%s34424_s6 + $0x660] sm:$0xff]  ;;  %v27985_v51 = vunpack.i.h.bf16 %v27983_v16 }
 0xa49   : > { %26177 = vmatprep.mubr.msk.f32.mxu0 %vm28078_vm1, %v28052_v0  ;;  %26321 = vmatprep.mubr.msk.f32.mxu1 %vm28078_vm1, %v28052_v0  ;;  %v27998_v24 = vpop.permute.xlu1 %27997 }
 0xa4a   : > { %v32329_v50 = vadd.f32 %v32059_v52, %v18936_v27  ;;  %v24581_v52 = vld [vmem:[%s34424_s6 + $0x508] sm:$0xff]  ;;  %v27984_v27 = vunpack.i.l.bf16 %v27983_v16 }
 0xa4b   : > { %v18871_v57 = vpop.f32.mrb[84].mxu0  ;;  %v32331_v3 = vpop.f32.mrb[114].mxu1 }
 0xa4c   : > { %v18937_v8 = vadd.f32 %v18871_v57, %v32075_v33  ;;  %v25861_v58 = vpop.f32.mrb[85].mxu0  ;;  %26178 = vmatmul.mubr.msk.f32.gmra.mrb[190].mxu0 %vm17913_vm2, %v24580_v44  ;;  %26322 = vmatmul.mubr.msk.f32.gmra.mrb[220].mxu1 %vm17913_vm2, %v24669_v34  ;;  %v26005_v35 = vpop.f32.mrb[115].mxu1  ;;  %v24670_v33 = vld [vmem:[%s34424_s6 + $0x668] sm:$0xff] }
 0xa4d   : > { %26180 = vmatprep.mubr.msk.f32.mxu0 %vm28078_vm1, %v28052_v0  ;;  %26324 = vmatprep.mubr.msk.f32.mxu1 %vm28078_vm1, %v28052_v0  ;;  %v27137_v58 = vpack.c.bf16 %v27985_v51, %v27984_v27  ;;  %v28000_v35 = vunpack.i.h.bf16 %v27998_v24 }
 0xa4e   : > { %v32347_v36 = vadd.f32 %v32077_v61, %v18937_v8  ;;  %v24582_v61 = vld [vmem:[%s34424_s6 + $0x510] sm:$0xff] }
 0xa4f   : > { %v18876_v31 = vpop.f32.mrb[86].mxu0  ;;  %v32349_v32 = vpop.f32.mrb[116].mxu1 }
 0xa50   : > { %v18938_v53 = vadd.f32 %v18876_v31, %v32093_v38  ;;  %v25864_v14 = vpop.f32.mrb[87].mxu0  ;;  %26181 = vmatmul.mubr.msk.f32.gmra.mrb[192].mxu0 %vm17913_vm2, %v24581_v52  ;;  %26325 = vmatmul.mubr.msk.f32.gmra.mrb[222].mxu1 %vm17913_vm2, %v24670_v33  ;;  %v26008_v49 = vpop.f32.mrb[117].mxu1  ;;  %v24671_v38 = vld [vmem:[%s34424_s6 + $0x670] sm:$0xff]  ;;  %v27999_v52 = vunpack.i.l.bf16 %v27998_v24 }
 0xa51   : > { %26183 = vmatprep.mubr.msk.f32.mxu0 %vm28078_vm1, %v28052_v0  ;;  %26327 = vmatprep.mubr.msk.f32.mxu1 %vm28078_vm1, %v28052_v0 }
 0xa52   : > { %v32365_v23 = vadd.f32 %v32095_v28, %v18938_v53  ;;  %v24583_v28 = vld [vmem:[%s34424_s6 + $0x518] sm:$0xff] }
 0xa53   : > { %v18881_v21 = vpop.f32.mrb[88].mxu0  ;;  %v32367_v4 = vpop.f32.mrb[118].mxu1 }
 0xa54   : > { %v18939_v22 = vadd.f32 %v18881_v21, %v32111_v17  ;;  %v25867_v56 = vpop.f32.mrb[89].mxu0  ;;  %26184 = vmatmul.mubr.msk.f32.gmra.mrb[194].mxu0 %vm17913_vm2, %v24582_v61  ;;  %26328 = vmatmul.mubr.msk.f32.gmra.mrb[224].mxu1 %vm17913_vm2, %v24671_v38  ;;  %v26011_v11 = vpop.f32.mrb[119].mxu1  ;;  %v24672_v17 = vld [vmem:[%s34424_s6 + $0x678] sm:$0xff]  ;;  %v24720_v61 = vld [vmem:[%s34424_s6 + $0x708] sm:$0xff]  ;;  %v27146_v38 = vpack.c.bf16 %v28000_v35, %v27999_v52 }
 0xa55   : > { %26186 = vmatprep.mubr.msk.f32.mxu0 %vm28078_vm1, %v28052_v0  ;;  %26330 = vmatprep.mubr.msk.f32.mxu1 %vm28078_vm1, %v28052_v0 }
 0xa56   : > { %v32383_v7 = vadd.f32 %v32113_v1, %v18939_v22  ;;  %v24584_v1 = vld [vmem:[%s34424_s6 + $0x520] sm:$0xff] }
 0xa57   : > { %v18886_v5 = vpop.f32.mrb[90].mxu0  ;;  %v32385_v39 = vpop.f32.mrb[120].mxu1 }
 0xa58   : > { %v18940_v62 = vadd.f32 %v18886_v5, %v32129_v41  ;;  %v25870_v48 = vpop.f32.mrb[91].mxu0  ;;  %26187 = vmatmul.mubr.msk.f32.gmra.mrb[196].mxu0 %vm17913_vm2, %v24583_v28  ;;  %26331 = vmatmul.mubr.msk.f32.gmra.mrb[226].mxu1 %vm17913_vm2, %v24672_v17  ;;  %v26014_v30 = vpop.f32.mrb[121].mxu1  ;;  %v24673_v41 = vld [vmem:[%s34424_s6 + $0x680] sm:$0xff]  ;;  %v24721_v17 = vld [vmem:[%s34424_s6 + $0x710] sm:$0xff] }
 0xa59   : > { %26189 = vmatprep.mubr.msk.f32.mxu0 %vm28078_vm1, %v28052_v0  ;;  %26333 = vmatprep.mubr.msk.f32.mxu1 %vm28078_vm1, %v28052_v0 }
 0xa5a   : > { %v32401_v15 = vadd.f32 %v32131_v29, %v18940_v62  ;;  %v24630_v29 = vld [vmem:[%s34424_s6 + $0x5a0] sm:$0xff] }
 0xa5b   : > { %v18891_v20 = vpop.f32.mrb[92].mxu0  ;;  %v32403_v10 = vpop.f32.mrb[122].mxu1 }
 0xa5c   : > { %v18941_v44 = vadd.f32 %v18891_v20, %v32147_v54  ;;  %v25873_v34 = vpop.f32.mrb[93].mxu0  ;;  %26190 = vmatmul.mubr.msk.f32.gmra.mrb[198].mxu0 %vm17913_vm2, %v24584_v1  ;;  %26334 = vmatmul.mubr.msk.f32.gmra.mrb[228].mxu1 %vm17913_vm2, %v24673_v41  ;;  %v26017_v57 = vpop.f32.mrb[123].mxu1  ;;  %v24674_v54 = vld [vmem:[%s34424_s6 + $0x688] sm:$0xff] }
 0xa5d   : > { %26245 = vmatprep.mubr.msk.f32.mxu0 %vm28078_vm1, %v28052_v0  ;;  %26336 = vmatprep.mubr.msk.f32.mxu1 %vm28078_vm1, %v28052_v0 }
 0xa5e   : > { %v32419_v8 = vadd.f32 %v32149_v2, %v18941_v44  ;;  %v24631_v2 = vld [vmem:[%s34424_s6 + $0x5a8] sm:$0xff] }
 0xa5f   : > { %v18896_v33 = vpop.f32.mrb[94].mxu0  ;;  %v32421_v31 = vpop.f32.mrb[124].mxu1 }
 0xa60   : > { %v18942_v53 = vadd.f32 %v18896_v33, %v32163_v18  ;;  %v25876_v14 = vpop.f32.mrb[95].mxu0  ;;  %26246 = vmatmul.mubr.msk.f32.vlgmr.msra.gmra.mrb[200].mxu0 %vm17913_vm2, %v24630_v29  ;;  %26337 = vmatmul.mubr.msk.f32.gmra.mrb[230].mxu1 %vm17913_vm2, %v24674_v54  ;;  %v26020_v49 = vpop.f32.mrb[125].mxu1 }
 0xa61   : > { %27138 = vmatpush3.bf16.msra.mxu0 %v27137_v58  ;;  %26248 = vmatprep.mubr.msk.f32.mxu0 %vm28078_vm1, %v28052_v0 }
 0xa62   : > { %v32435_v18 = vadd.f32 %v32168_v13, %v18942_v53  ;;  %26392 = vmatprep.mubr.msk.f32.mxu1 %vm28078_vm1, %v28052_v0  ;;  %27142 = vmatprep.subr.bf16.mxu0 %v28077_v45  ;;  %v24632_v13 = vld [vmem:[%s34424_s6 + $0x5b0] sm:$0xff] }
 0xa63   : > { %v18901_v21 = vpop.f32.mrb[96].mxu0  ;;  %v32440_v22 = vpop.f32.mrb[126].mxu1 }
 0xa64   : > { %v18943_v56 = vadd.f32 %v18901_v21, %v32182_v12  ;;  %v25879_v11 = vpop.f32.mrb[97].mxu0  ;;  %26249 = vmatmul.mubr.msk.f32.gmra.mrb[202].mxu0 %vm17913_vm2, %v24631_v2  ;;  %26393 = vmatmul.mubr.msk.f32.vlgmr.msra.gmra.mrb[232].mxu1 %vm17913_vm2, %v24720_v61  ;;  %v26023_v28 = vpop.f32.mrb[127].mxu1 }
 0xa65   : > { %27147 = vmatpush3.bf16.msra.mxu1 %v27146_v38  ;;  %26251 = vmatprep.mubr.msk.f32.mxu0 %vm28078_vm1, %v28052_v0 }
 0xa66   : > { %v32454_v12 = vadd.f32 %v32187_v26, %v18943_v56  ;;  %26395 = vmatprep.mubr.msk.f32.mxu1 %vm28078_vm1, %v28052_v0  ;;  %27151 = vmatprep.subr.bf16.mxu1 %v28077_v45  ;;  %v24633_v26 = vld [vmem:[%s34424_s6 + $0x5b8] sm:$0xff] }
 0xa67   : > { %v18906_v16 = vpop.f32.mrb[98].mxu0  ;;  %v32459_v5 = vpop.f32.mrb[128].mxu1 }
 0xa68   : > { %v18944_v62 = vadd.f32 %v18906_v16, %v32203_v47  ;;  %v25882_v48 = vpop.f32.mrb[99].mxu0  ;;  %26252 = vmatmul.mubr.msk.f32.gmra.mrb[204].mxu0 %vm17913_vm2, %v24632_v13  ;;  %26396 = vmatmul.mubr.msk.f32.gmra.mrb[234].mxu1 %vm17913_vm2, %v24721_v17  ;;  %v26026_v30 = vpop.f32.mrb[129].mxu1  ;;  %v24722_v47 = vld [vmem:[%s34424_s6 + $0x718] sm:$0xff] }
 0xa69   : > { %26254 = vmatprep.mubr.msk.f32.mxu0 %vm28078_vm1, %v28052_v0  ;;  %26398 = vmatprep.mubr.msk.f32.mxu1 %vm28078_vm1, %v28052_v0 }
 0xa6a   : > { %v32475_v1 = vadd.f32 %v32205_v63, %v18944_v62  ;;  %v24634_v63 = vld [vmem:[%s34424_s6 + $0x5c0] sm:$0xff] }
 0xa6b   : > { %v18911_v41 = vpop.f32.mrb[100].mxu0  ;;  %v32477_v24 = vpop.f32.mrb[130].mxu1 }
 0xa6c   : > { %v18945_v51 = vadd.f32 %v18911_v41, %v32221_v60  ;;  %v25885_v27 = vpop.f32.mrb[101].mxu0  ;;  %26255 = vmatmul.mubr.msk.f32.gmra.mrb[206].mxu0 %vm17913_vm2, %v24633_v26  ;;  %26399 = vmatmul.mubr.msk.f32.gmra.mrb[236].mxu1 %vm17913_vm2, %v24722_v47  ;;  %v26029_v20 = vpop.f32.mrb[131].mxu1  ;;  %v24723_v60 = vld [vmem:[%s34424_s6 + $0x720] sm:$0xff] }
 0xa6d   : > { %26257 = vmatprep.mubr.msk.f32.mxu0 %vm28078_vm1, %v28052_v0  ;;  %26401 = vmatprep.mubr.msk.f32.mxu1 %vm28078_vm1, %v28052_v0 }
 0xa6e   : > { %v32493_v44 = vadd.f32 %v32223_v46, %v18945_v51  ;;  %v24635_v46 = vld [vmem:[%s34424_s6 + $0x5c8] sm:$0xff] }
 0xa6f   : > { %v18916_v34 = vpop.f32.mrb[102].mxu0  ;;  %v32495_v57 = vpop.f32.mrb[132].mxu1 }
 0xa70   : > { %v18946_v29 = vadd.f32 %v18916_v34, %v32239_v55  ;;  %v25888_v54 = vpop.f32.mrb[103].mxu0  ;;  %26258 = vmatmul.mubr.msk.f32.gmra.mrb[208].mxu0 %vm17913_vm2, %v24634_v63  ;;  %26402 = vmatmul.mubr.msk.f32.gmra.mrb[238].mxu1 %vm17913_vm2, %v24723_v60  ;;  %v26032_v58 = vpop.f32.mrb[133].mxu1  ;;  %v24724_v55 = vld [vmem:[%s34424_s6 + $0x728] sm:$0xff] }
 0xa71   : > { %26260 = vmatprep.mubr.msk.f32.mxu0 %vm28078_vm1, %v28052_v0  ;;  %26404 = vmatprep.mubr.msk.f32.mxu1 %vm28078_vm1, %v28052_v0 }
 0xa72   : > { %v32511_v35 = vadd.f32 %v32241_v19, %v18946_v29  ;;  %v24636_v19 = vld [vmem:[%s34424_s6 + $0x5d0] sm:$0xff] }
 0xa73   : > { %v18921_v52 = vpop.f32.mrb[104].mxu0  ;;  %v32513_v33 = vpop.f32.mrb[134].mxu1 }
 0xa74   : > { %v18947_v53 = vadd.f32 %v18921_v52, %v32257_v9  ;;  %v25891_v14 = vpop.f32.mrb[105].mxu0  ;;  %26261 = vmatmul.mubr.msk.f32.gmra.mrb[210].mxu0 %vm17913_vm2, %v24635_v46  ;;  %26405 = vmatmul.mubr.msk.f32.gmra.mrb[240].mxu1 %vm17913_vm2, %v24724_v55  ;;  %v26035_v49 = vpop.f32.mrb[135].mxu1  ;;  %v24725_v9 = vld [vmem:[%s34424_s6 + $0x730] sm:$0xff] }
 0xa75   : > { %26263 = vmatprep.mubr.msk.f32.mxu0 %vm28078_vm1, %v28052_v0  ;;  %26407 = vmatprep.mubr.msk.f32.mxu1 %vm28078_vm1, %v28052_v0 }
 0xa76   : > { %v32529_v2 = vadd.f32 %v32259_v6, %v18947_v53  ;;  %v24637_v6 = vld [vmem:[%s34424_s6 + $0x5d8] sm:$0xff] }
 0xa77   : > { %v18926_v61 = vpop.f32.mrb[106].mxu0  ;;  %v32531_v38 = vpop.f32.mrb[136].mxu1 }
 0xa78   : > { %v18948_v21 = vadd.f32 %v18926_v61, %v32275_v40  ;;  %v25894_v56 = vpop.f32.mrb[107].mxu0  ;;  %26264 = vmatmul.mubr.msk.f32.gmra.mrb[212].mxu0 %vm17913_vm2, %v24636_v19  ;;  %26408 = vmatmul.mubr.msk.f32.gmra.mrb[242].mxu1 %vm17913_vm2, %v24725_v9  ;;  %v26038_v11 = vpop.f32.mrb[137].mxu1  ;;  %v24726_v40 = vld [vmem:[%s34424_s6 + $0x738] sm:$0xff] }
 0xa79   : > { %26266 = vmatprep.mubr.msk.f32.mxu0 %vm28078_vm1, %v28052_v0  ;;  %26410 = vmatprep.mubr.msk.f32.mxu1 %vm28078_vm1, %v28052_v0 }
 0xa7a   : > { %v32547_v28 = vadd.f32 %v32277_v43, %v18948_v21  ;;  %v24638_v43 = vld [vmem:[%s34424_s6 + $0x5e0] sm:$0xff] }
 0xa7b   : > { %v18931_v13 = vpop.f32.mrb[108].mxu0  ;;  %v32549_v17 = vpop.f32.mrb[138].mxu1 }
 0xa7c   : > { %v18949_v16 = vadd.f32 %v18931_v13, %v32293_v25  ;;  %v25897_v62 = vpop.f32.mrb[109].mxu0  ;;  %26267 = vmatmul.mubr.msk.f32.gmra.mrb[214].mxu0 %vm17913_vm2, %v24637_v6  ;;  %26411 = vmatmul.mubr.msk.f32.gmra.mrb[244].mxu1 %vm17913_vm2, %v24726_v40  ;;  %v26041_v48 = vpop.f32.mrb[139].mxu1  ;;  %v24727_v25 = vld [vmem:[%s34424_s6 + $0x740] sm:$0xff] }
 0xa7d   : > { %26269 = vmatprep.mubr.msk.f32.mxu0 %vm28078_vm1, %v28052_v0  ;;  %26413 = vmatprep.mubr.msk.f32.mxu1 %vm28078_vm1, %v28052_v0  ;;  %v27993_v48 = vpop.permute.xlu0 %27992 }
 0xa7e   : > { %v32565_v30 = vadd.f32 %v32295_v59, %v18949_v16  ;;  %v24639_v59 = vld [vmem:[%s34424_s6 + $0x5e8] sm:$0xff] }
 0xa7f   : > { %v19305_v26 = vpop.f32.mrb[110].mxu0  ;;  %v32567_v47 = vpop.f32.mrb[140].mxu1 }
 0xa80   : > { %v19379_v41 = vadd.f32 %v19305_v26, %v32311_v42  ;;  %v25953_v51 = vpop.f32.mrb[111].mxu0  ;;  %26270 = vmatmul.mubr.msk.f32.gmra.mrb[216].mxu0 %vm17913_vm2, %v24638_v43  ;;  %26414 = vmatmul.mubr.msk.f32.gmra.mrb[246].mxu1 %vm17913_vm2, %v24727_v25  ;;  %v26044_v27 = vpop.f32.mrb[141].mxu1  ;;  %v24728_v42 = vld [vmem:[%s34424_s6 + $0x748] sm:$0xff] }
 0xa81   : > { %26272 = vmatprep.mubr.msk.f32.mxu0 %vm28078_vm1, %v28052_v0  ;;  %26416 = vmatprep.mubr.msk.f32.mxu1 %vm28078_vm1, %v28052_v0 }
 0xa82   : > { %v32583_v20 = vadd.f32 %v32313_v37, %v19379_v41  ;;  %v24640_v37 = vld [vmem:[%s34424_s6 + $0x5f0] sm:$0xff] }
 0xa83   : > { %v19310_v63 = vpop.f32.mrb[112].mxu0  ;;  %v32585_v60 = vpop.f32.mrb[142].mxu1 }
 0xa84   : > { %v19380_v34 = vadd.f32 %v19310_v63, %v32329_v50  ;;  %v25956_v29 = vpop.f32.mrb[113].mxu0  ;;  %26273 = vmatmul.mubr.msk.f32.gmra.mrb[218].mxu0 %vm17913_vm2, %v24639_v59  ;;  %26417 = vmatmul.mubr.msk.f32.gmra.mrb[248].mxu1 %vm17913_vm2, %v24728_v42  ;;  %v26100_v54 = vpop.f32.mrb[143].mxu1  ;;  %v24729_v50 = vld [vmem:[%s34424_s6 + $0x750] sm:$0xff]  ;;  %v27995_v63 = vunpack.i.h.bf16 %v27993_v48 }
 0xa85   : > { %26275 = vmatprep.mubr.msk.f32.mxu0 %vm28078_vm1, %v28052_v0  ;;  %26419 = vmatprep.mubr.msk.f32.mxu1 %vm28078_vm1, %v28052_v0  ;;  %v28008_v59 = vpop.permute.xlu1 %28007 }
 0xa86   : > { %v32601_v58 = vadd.f32 %v32331_v3, %v19380_v34  ;;  %v24641_v3 = vld [vmem:[%s34424_s6 + $0x5f8] sm:$0xff]  ;;  %v27994_v34 = vunpack.i.l.bf16 %v27993_v48 }
 0xa87   : > { %v19315_v46 = vpop.f32.mrb[114].mxu0  ;;  %v32603_v55 = vpop.f32.mrb[144].mxu1 }
 0xa88   : > { %v19381_v52 = vadd.f32 %v19315_v46, %v32347_v36  ;;  %v25959_v53 = vpop.f32.mrb[115].mxu0  ;;  %26276 = vmatmul.mubr.msk.f32.gmra.mrb[220].mxu0 %vm17913_vm2, %v24640_v37  ;;  %26420 = vmatmul.mubr.msk.f32.gmra.mrb[250].mxu1 %vm17913_vm2, %v24729_v50  ;;  %v26103_v14 = vpop.f32.mrb[145].mxu1  ;;  %v24730_v36 = vld [vmem:[%s34424_s6 + $0x758] sm:$0xff] }
 0xa89   : > { %26278 = vmatprep.mubr.msk.f32.mxu0 %vm28078_vm1, %v28052_v0  ;;  %26422 = vmatprep.mubr.msk.f32.mxu1 %vm28078_vm1, %v28052_v0  ;;  %v27143_v53 = vpack.c.bf16 %v27995_v63, %v27994_v34  ;;  %v28010_v14 = vunpack.i.h.bf16 %v28008_v59 }
 0xa8a   : > { %v32619_v49 = vadd.f32 %v32349_v32, %v19381_v52  ;;  %v24642_v32 = vld [vmem:[%s34424_s6 + $0x600] sm:$0xff] }
 0xa8b   : > { %v19320_v19 = vpop.f32.mrb[116].mxu0  ;;  %v32621_v9 = vpop.f32.mrb[146].mxu1 }
 0xa8c   : > { %v19382_v61 = vadd.f32 %v19320_v19, %v32365_v23  ;;  %v25962_v21 = vpop.f32.mrb[117].mxu0  ;;  %26279 = vmatmul.mubr.msk.f32.gmra.mrb[222].mxu0 %vm17913_vm2, %v24641_v3  ;;  %26423 = vmatmul.mubr.msk.f32.gmra.mrb[252].mxu1 %vm17913_vm2, %v24730_v36  ;;  %v26106_v56 = vpop.f32.mrb[147].mxu1  ;;  %v24731_v23 = vld [vmem:[%s34424_s6 + $0x760] sm:$0xff]  ;;  %v28009_v3 = vunpack.i.l.bf16 %v28008_v59 }
 0xa8d   : > { %26281 = vmatprep.mubr.msk.f32.mxu0 %vm28078_vm1, %v28052_v0  ;;  %26425 = vmatprep.mubr.msk.f32.mxu1 %vm28078_vm1, %v28052_v0 }
 0xa8e   : > { %v32637_v11 = vadd.f32 %v32367_v4, %v19382_v61  ;;  %v24643_v4 = vld [vmem:[%s34424_s6 + $0x608] sm:$0xff] }
 0xa8f   : > { %v19325_v6 = vpop.f32.mrb[118].mxu0  ;;  %v32639_v40 = vpop.f32.mrb[148].mxu1 }
 0xa90   : > { %v19383_v13 = vadd.f32 %v19325_v6, %v32383_v7  ;;  %v25965_v16 = vpop.f32.mrb[119].mxu0  ;;  %26282 = vmatmul.mubr.msk.f32.gmra.mrb[224].mxu0 %vm17913_vm2, %v24642_v32  ;;  %26426 = vmatmul.mubr.msk.f32.gmra.mrb[254].mxu1 %vm17913_vm2, %v24731_v23  ;;  %v26109_v62 = vpop.f32.mrb[149].mxu1  ;;  %v24732_v7 = vld [vmem:[%s34424_s6 + $0x768] sm:$0xff]  ;;  %v24780_v32 = vld [vmem:[%s34424_s6 + $0x7f8] sm:$0xff]  ;;  %v27152_v23 = vpack.c.bf16 %v28010_v14, %v28009_v3 }
 0xa91   : > { %26284 = vmatprep.mubr.msk.f32.mxu0 %vm28078_vm1, %v28052_v0  ;;  %26428 = vmatprep.mubr.msk.f32.mxu1 %vm28078_vm1, %v28052_v0 }
 0xa92   : > { %v32655_v43 = vadd.f32 %v32385_v39, %v19383_v13  ;;  %v24644_v39 = vld [vmem:[%s34424_s6 + $0x610] sm:$0xff] }
 0xa93   : > { %v19330_v25 = vpop.f32.mrb[120].mxu0  ;;  %v32657_v26 = vpop.f32.mrb[150].mxu1 }
 0xa94   : > { %v19384_v41 = vadd.f32 %v19330_v25, %v32401_v15  ;;  %v25968_v51 = vpop.f32.mrb[121].mxu0  ;;  %26285 = vmatmul.mubr.msk.f32.gmra.mrb[226].mxu0 %vm17913_vm2, %v24643_v4  ;;  %26429 = vmatmul.mubr.msk.f32.gmra.mrb[0].mxu1 %vm17913_vm2, %v24732_v7  ;;  %v26112_v27 = vpop.f32.mrb[151].mxu1  ;;  %v24733_v15 = vld [vmem:[%s34424_s6 + $0x770] sm:$0xff]  ;;  %v24781_v7 = vld [vmem:[%s34424_s6 + $0x800] sm:$0xff] }
 0xa95   : > { %26287 = vmatprep.mubr.msk.f32.mxu0 %vm28078_vm1, %v28052_v0  ;;  %26431 = vmatprep.mubr.msk.f32.mxu1 %vm28078_vm1, %v28052_v0 }
 0xa96   : > { %v32673_v42 = vadd.f32 %v32403_v10, %v19384_v41  ;;  %v24690_v10 = vld [vmem:[%s34424_s6 + $0x690] sm:$0xff] }
 0xa97   : > { %v19335_v29 = vpop.f32.mrb[122].mxu0  ;;  %v32675_v54 = vpop.f32.mrb[152].mxu1 }
 0xa98   : > { %v19385_v37 = vadd.f32 %v19335_v29, %v32419_v8  ;;  %v25971_v50 = vpop.f32.mrb[123].mxu0  ;;  %26288 = vmatmul.mubr.msk.f32.gmra.mrb[228].mxu0 %vm17913_vm2, %v24644_v39  ;;  %26432 = vmatmul.mubr.msk.f32.gmra.mrb[2].mxu1 %vm17913_vm2, %v24733_v15  ;;  %v26115_v46 = vpop.f32.mrb[153].mxu1  ;;  %v24734_v8 = vld [vmem:[%s34424_s6 + $0x778] sm:$0xff] }
 0xa99   : > { %26343 = vmatprep.mubr.msk.f32.mxu0 %vm28078_vm1, %v28052_v0  ;;  %26434 = vmatprep.mubr.msk.f32.mxu1 %vm28078_vm1, %v28052_v0 }
 0xa9a   : > { %v32691_v52 = vadd.f32 %v32421_v31, %v19385_v37  ;;  %v24691_v31 = vld [vmem:[%s34424_s6 + $0x698] sm:$0xff] }
 0xa9b   : > { %v19340_v36 = vpop.f32.mrb[124].mxu0  ;;  %v32693_v19 = vpop.f32.mrb[154].mxu1 }
 0xa9c   : > { %v19386_v61 = vadd.f32 %v19340_v36, %v32435_v18  ;;  %v25974_v21 = vpop.f32.mrb[125].mxu0  ;;  %26344 = vmatmul.mubr.msk.f32.vlgmr.msra.gmra.mrb[230].mxu0 %vm17913_vm2, %v24690_v10  ;;  %26435 = vmatmul.mubr.msk.f32.gmra.mrb[4].mxu1 %vm17913_vm2, %v24734_v8  ;;  %v26118_v56 = vpop.f32.mrb[155].mxu1 }
 0xa9d   : > { %27144 = vmatpush3.bf16.msra.mxu0 %v27143_v53  ;;  %26346 = vmatprep.mubr.msk.f32.mxu0 %vm28078_vm1, %v28052_v0 }
 0xa9e   : > { %26490 = vmatprep.mubr.msk.f32.mxu1 %vm28078_vm1, %v28052_v0  ;;  %v32709_v18 = vadd.f32 %v32440_v22, %v19386_v61  ;;  %27148 = vmatprep.subr.bf16.mxu0 %v28077_v45  ;;  %v24692_v22 = vld [vmem:[%s34424_s6 + $0x6a0] sm:$0xff] }
 0xa9f   : > { %v19345_v6 = vpop.f32.mrb[126].mxu0  ;;  %v32712_v13 = vpop.f32.mrb[156].mxu1 }
 0xaa0   : > { %v19387_v16 = vadd.f32 %v19345_v6, %v32454_v12  ;;  %v25977_v62 = vpop.f32.mrb[127].mxu0  ;;  %26347 = vmatmul.mubr.msk.f32.gmra.mrb[232].mxu0 %vm17913_vm2, %v24691_v31  ;;  %26491 = vmatmul.mubr.msk.f32.vlgmr.msra.gmra.mrb[6].mxu1 %vm17913_vm2, %v24780_v32  ;;  %v26121_v4 = vpop.f32.mrb[157].mxu1 }
 0xaa1   : > { %27153 = vmatpush3.bf16.msra.mxu1 %v27152_v23  ;;  %26349 = vmatprep.mubr.msk.f32.mxu0 %vm28078_vm1, %v28052_v0 }
 0xaa2   : > { %26493 = vmatprep.mubr.msk.f32.mxu1 %vm28078_vm1, %v28052_v0  ;;  %v32728_v12 = vadd.f32 %v32459_v5, %v19387_v16  ;;  %27157 = vmatprep.subr.bf16.mxu1 %v28077_v45  ;;  %v24693_v5 = vld [vmem:[%s34424_s6 + $0x6a8] sm:$0xff] }
 0xaa3   : > { %v19350_v48 = vpop.f32.mrb[128].mxu0  ;;  %v32731_v25 = vpop.f32.mrb[158].mxu1 }
 0xaa4   : > { %v19388_v41 = vadd.f32 %v19350_v48, %v32475_v1  ;;  %v25980_v51 = vpop.f32.mrb[129].mxu0  ;;  %26350 = vmatmul.mubr.msk.f32.gmra.mrb[234].mxu0 %vm17913_vm2, %v24692_v22  ;;  %26494 = vmatmul.mubr.msk.f32.gmra.mrb[8].mxu1 %vm17913_vm2, %v24781_v7  ;;  %v26124_v27 = vpop.f32.mrb[159].mxu1  ;;  %v24782_v1 = vld [vmem:[%s34424_s6 + $0x808] sm:$0xff] }
 0xaa5   : > { %26352 = vmatprep.mubr.msk.f32.mxu0 %vm28078_vm1, %v28052_v0  ;;  %26496 = vmatprep.mubr.msk.f32.mxu1 %vm28078_vm1, %v28052_v0 }
 0xaa6   : > { %v32747_v39 = vadd.f32 %v32477_v24, %v19388_v41  ;;  %v24694_v24 = vld [vmem:[%s34424_s6 + $0x6b0] sm:$0xff] }
 0xaa7   : > { %v19355_v15 = vpop.f32.mrb[130].mxu0  ;;  %v32749_v59 = vpop.f32.mrb[160].mxu1 }
 0xaa8   : > { %v19389_v63 = vadd.f32 %v19355_v15, %v32493_v44  ;;  %v25983_v34 = vpop.f32.mrb[131].mxu0  ;;  %26353 = vmatmul.mubr.msk.f32.gmra.mrb[236].mxu0 %vm17913_vm2, %v24693_v5  ;;  %26497 = vmatmul.mubr.msk.f32.gmra.mrb[10].mxu1 %vm17913_vm2, %v24782_v1  ;;  %v26127_v29 = vpop.f32.mrb[161].mxu1  ;;  %v24783_v44 = vld [vmem:[%s34424_s6 + $0x810] sm:$0xff] }
 0xaa9   : > { %26355 = vmatprep.mubr.msk.f32.mxu0 %vm28078_vm1, %v28052_v0  ;;  %26499 = vmatprep.mubr.msk.f32.mxu1 %vm28078_vm1, %v28052_v0 }
 0xaaa   : > { %v32765_v37 = vadd.f32 %v32495_v57, %v19389_v63  ;;  %v24695_v57 = vld [vmem:[%s34424_s6 + $0x6b8] sm:$0xff] }
 0xaab   : > { %v19360_v50 = vpop.f32.mrb[132].mxu0  ;;  %v32767_v46 = vpop.f32.mrb[162].mxu1 }
 0xaac   : > { %v19390_v10 = vadd.f32 %v19360_v50, %v32511_v35  ;;  %v25986_v8 = vpop.f32.mrb[133].mxu0  ;;  %26356 = vmatmul.mubr.msk.f32.gmra.mrb[238].mxu0 %vm17913_vm2, %v24694_v24  ;;  %26500 = vmatmul.mubr.msk.f32.gmra.mrb[12].mxu1 %vm17913_vm2, %v24783_v44  ;;  %v26130_v53 = vpop.f32.mrb[163].mxu1  ;;  %v24784_v35 = vld [vmem:[%s34424_s6 + $0x818] sm:$0xff] }
 0xaad   : > { %26358 = vmatprep.mubr.msk.f32.mxu0 %vm28078_vm1, %v28052_v0  ;;  %26502 = vmatprep.mubr.msk.f32.mxu1 %vm28078_vm1, %v28052_v0 }
 0xaae   : > { %v32783_v14 = vadd.f32 %v32513_v33, %v19390_v10  ;;  %v24696_v33 = vld [vmem:[%s34424_s6 + $0x6c0] sm:$0xff] }
 0xaaf   : > { %v19365_v3 = vpop.f32.mrb[134].mxu0  ;;  %v32785_v36 = vpop.f32.mrb[164].mxu1 }
 0xab0   : > { %v19391_v61 = vadd.f32 %v19365_v3, %v32529_v2  ;;  %v25989_v21 = vpop.f32.mrb[135].mxu0  ;;  %26359 = vmatmul.mubr.msk.f32.gmra.mrb[240].mxu0 %vm17913_vm2, %v24695_v57  ;;  %26503 = vmatmul.mubr.msk.f32.gmra.mrb[14].mxu1 %vm17913_vm2, %v24784_v35  ;;  %v26133_v56 = vpop.f32.mrb[165].mxu1  ;;  %v24785_v2 = vld [vmem:[%s34424_s6 + $0x820] sm:$0xff] }
 0xab1   : > { %26361 = vmatprep.mubr.msk.f32.mxu0 %vm28078_vm1, %v28052_v0  ;;  %26505 = vmatprep.mubr.msk.f32.mxu1 %vm28078_vm1, %v28052_v0 }
 0xab2   : > { %v32801_v31 = vadd.f32 %v32531_v38, %v19391_v61  ;;  %v24697_v38 = vld [vmem:[%s34424_s6 + $0x6c8] sm:$0xff] }
 0xab3   : > { %v19370_v32 = vpop.f32.mrb[136].mxu0  ;;  %v32803_v23 = vpop.f32.mrb[166].mxu1 }
 0xab4   : > { %v19392_v6 = vadd.f32 %v19370_v32, %v32547_v28  ;;  %v25992_v16 = vpop.f32.mrb[137].mxu0  ;;  %26362 = vmatmul.mubr.msk.f32.gmra.mrb[242].mxu0 %vm17913_vm2, %v24696_v33  ;;  %26506 = vmatmul.mubr.msk.f32.gmra.mrb[16].mxu1 %vm17913_vm2, %v24785_v2  ;;  %v26136_v62 = vpop.f32.mrb[167].mxu1  ;;  %v24786_v28 = vld [vmem:[%s34424_s6 + $0x828] sm:$0xff] }
 0xab5   : > { %26364 = vmatprep.mubr.msk.f32.mxu0 %vm28078_vm1, %v28052_v0  ;;  %26508 = vmatprep.mubr.msk.f32.mxu1 %vm28078_vm1, %v28052_v0 }
 0xab6   : > { %v32819_v4 = vadd.f32 %v32549_v17, %v19392_v6  ;;  %v24698_v17 = vld [vmem:[%s34424_s6 + $0x6d0] sm:$0xff] }
 0xab7   : > { %v19375_v22 = vpop.f32.mrb[138].mxu0  ;;  %v32821_v7 = vpop.f32.mrb[168].mxu1 }
 0xab8   : > { %v19393_v48 = vadd.f32 %v19375_v22, %v32565_v30  ;;  %v25995_v41 = vpop.f32.mrb[139].mxu0  ;;  %26365 = vmatmul.mubr.msk.f32.gmra.mrb[244].mxu0 %vm17913_vm2, %v24697_v38  ;;  %26509 = vmatmul.mubr.msk.f32.gmra.mrb[18].mxu1 %vm17913_vm2, %v24786_v28  ;;  %v26139_v51 = vpop.f32.mrb[169].mxu1  ;;  %v24787_v30 = vld [vmem:[%s34424_s6 + $0x830] sm:$0xff] }
 0xab9   : > { %26367 = vmatprep.mubr.msk.f32.mxu0 %vm28078_vm1, %v28052_v0  ;;  %26511 = vmatprep.mubr.msk.f32.mxu1 %vm28078_vm1, %v28052_v0  ;;  %v24792_v51 = vld [vmem:[%s34424_s6 + $0x858] sm:$0xff] }
 0xaba   : > { %v32837_v27 = vadd.f32 %v32567_v47, %v19393_v48  ;;  %v24699_v47 = vld [vmem:[%s34424_s6 + $0x6d8] sm:$0xff] }
 0xabb   : > { %v19749_v5 = vpop.f32.mrb[140].mxu0  ;;  %v32839_v1 = vpop.f32.mrb[170].mxu1 }
 0xabc   : > { %v19823_v15 = vadd.f32 %v19749_v5, %v32583_v20  ;;  %v26051_v63 = vpop.f32.mrb[141].mxu0  ;;  %26368 = vmatmul.mubr.msk.f32.gmra.mrb[246].mxu0 %vm17913_vm2, %v24698_v17  ;;  %26512 = vmatmul.mubr.msk.f32.gmra.mrb[20].mxu1 %vm17913_vm2, %v24787_v30  ;;  %v26142_v34 = vpop.f32.mrb[171].mxu1  ;;  %v24788_v20 = vld [vmem:[%s34424_s6 + $0x838] sm:$0xff] }
 0xabd   : > { %26370 = vmatprep.mubr.msk.f32.mxu0 %vm28078_vm1, %v28052_v0  ;;  %26514 = vmatprep.mubr.msk.f32.mxu1 %vm28078_vm1, %v28052_v0  ;;  %v28003_v17 = vpop.permute.xlu0 %28002 }
 0xabe   : > { %v32855_v29 = vadd.f32 %v32585_v60, %v19823_v15  ;;  %v24700_v60 = vld [vmem:[%s34424_s6 + $0x6e0] sm:$0xff] }
 0xabf   : > { %v19754_v24 = vpop.f32.mrb[142].mxu0  ;;  %v32857_v44 = vpop.f32.mrb[172].mxu1 }
 0xac0   : > { %v19824_v50 = vadd.f32 %v19754_v24, %v32601_v58  ;;  %v26054_v10 = vpop.f32.mrb[143].mxu0  ;;  %26371 = vmatmul.mubr.msk.f32.gmra.mrb[248].mxu0 %vm17913_vm2, %v24699_v47  ;;  %26515 = vmatmul.mubr.msk.f32.gmra.mrb[22].mxu1 %vm17913_vm2, %v24788_v20  ;;  %v26198_v8 = vpop.f32.mrb[173].mxu1  ;;  %v24789_v58 = vld [vmem:[%s34424_s6 + $0x840] sm:$0xff] }
 0xac1   : > { %26373 = vmatprep.mubr.msk.f32.mxu0 %vm28078_vm1, %v28052_v0  ;;  %26517 = vmatprep.mubr.msk.f32.mxu1 %vm28078_vm1, %v28052_v0  ;;  %v24793_v47 = vld [vmem:[%s34424_s6 + $0x860] sm:$0xff]  ;;  %v28018_v20 = vpop.permute.xlu1 %28017 }
 0xac2   : > { %v32873_v53 = vadd.f32 %v32603_v55, %v19824_v50  ;;  %v24701_v55 = vld [vmem:[%s34424_s6 + $0x6e8] sm:$0xff]  ;;  %v28004_v50 = vunpack.i.l.bf16 %v28003_v17 }
 0xac3   : > { %v19759_v57 = vpop.f32.mrb[144].mxu0  ;;  %v32875_v35 = vpop.f32.mrb[174].mxu1 }
 0xac4   : > { %v19825_v3 = vadd.f32 %v19759_v57, %v32619_v49  ;;  %v26057_v61 = vpop.f32.mrb[145].mxu0  ;;  %26374 = vmatmul.mubr.msk.f32.gmra.mrb[250].mxu0 %vm17913_vm2, %v24700_v60  ;;  %26518 = vmatmul.mubr.msk.f32.gmra.mrb[24].mxu1 %vm17913_vm2, %v24789_v58  ;;  %v26201_v21 = vpop.f32.mrb[175].mxu1  ;;  %v24790_v49 = vld [vmem:[%s34424_s6 + $0x848] sm:$0xff] }
 0xac5   : > { %26376 = vmatprep.mubr.msk.f32.mxu0 %vm28078_vm1, %v28052_v0  ;;  %26520 = vmatprep.mubr.msk.f32.mxu1 %vm28078_vm1, %v28052_v0 }
 0xac6   : > { %v32891_v56 = vadd.f32 %v32621_v9, %v19825_v3  ;;  %v24702_v9 = vld [vmem:[%s34424_s6 + $0x6f0] sm:$0xff]  ;;  %v24794_v3 = vld [vmem:[%s34424_s6 + $0x868] sm:$0xff] }
 0xac7   : > { %v19764_v33 = vpop.f32.mrb[146].mxu0  ;;  %v32893_v2 = vpop.f32.mrb[176].mxu1 }
 0xac8   : > { %v19826_v32 = vadd.f32 %v19764_v33, %v32637_v11  ;;  %v26060_v6 = vpop.f32.mrb[147].mxu0  ;;  %26377 = vmatmul.mubr.msk.f32.gmra.mrb[252].mxu0 %vm17913_vm2, %v24701_v55  ;;  %26521 = vmatmul.mubr.msk.f32.gmra.mrb[26].mxu1 %vm17913_vm2, %v24790_v49  ;;  %v26204_v16 = vpop.f32.mrb[177].mxu1  ;;  %v24791_v11 = vld [vmem:[%s34424_s6 + $0x850] sm:$0xff]  ;;  %v28019_v55 = vunpack.i.l.bf16 %v28018_v20 }
 0xac9   : > { %26379 = vmatprep.mubr.msk.f32.mxu0 %vm28078_vm1, %v28052_v0  ;;  %26523 = vmatprep.mubr.msk.f32.mxu1 %vm28078_vm1, %v28052_v0 }
 0xaca   : > { %v32909_v62 = vadd.f32 %v32639_v40, %v19826_v32  ;;  %v24703_v40 = vld [vmem:[%s34424_s6 + $0x6f8] sm:$0xff] }
 0xacb   : > { %v19769_v38 = vpop.f32.mrb[148].mxu0  ;;  %v32911_v28 = vpop.f32.mrb[178].mxu1 }
 0xacc   : > { %v26063_v22 = vpop.f32.mrb[149].mxu0  ;;  %26380 = vmatmul.mubr.msk.f32.gmra.mrb[254].mxu0 %vm17913_vm2, %v24702_v9  ;;  %26524 = vmatmul.mubr.msk.f32.gmra.mrb[28].mxu1 %vm17913_vm2, %v24791_v11  ;;  %v19827_v48 = vadd.f32 %v19769_v38, %v32655_v43  ;;  %v26207_v41 = vpop.f32.mrb[179].mxu1  ;;  %v24840_v9 = vld [vmem:[%s34424_s6 + $0x8e8] sm:$0xff] }
 0xacd   : > { %26382 = vmatprep.mubr.msk.f32.mxu0 %vm28078_vm1, %v28052_v0  ;;  %26526 = vmatprep.mubr.msk.f32.mxu1 %vm28078_vm1, %v28052_v0 }
 0xace   : > { %v32927_v30 = vadd.f32 %v32657_v26, %v19827_v48  ;;  %v24704_v26 = vld [vmem:[%s34424_s6 + $0x700] sm:$0xff] }
 0xacf   : > { %v19774_v43 = vpop.f32.mrb[150].mxu0  ;;  %v32929_v5 = vpop.f32.mrb[180].mxu1 }
 0xad0   : > { %v26066_v15 = vpop.f32.mrb[151].mxu0  ;;  %26383 = vmatmul.mubr.msk.f32.gmra.mrb[2].mxu0 %vm17913_vm2, %v24703_v40  ;;  %26527 = vmatmul.mubr.msk.f32.gmra.mrb[30].mxu1 %vm17913_vm2, %v24792_v51  ;;  %v19828_v63 = vadd.f32 %v19774_v43, %v32673_v42  ;;  %v26210_v34 = vpop.f32.mrb[181].mxu1  ;;  %v28005_v42 = vunpack.i.h.bf16 %v28003_v17  ;;  %v24841_v51 = vld [vmem:[%s34424_s6 + $0x8f0] sm:$0xff] }
 0xad1   : > { %26385 = vmatprep.mubr.msk.f32.mxu0 %vm28078_vm1, %v28052_v0  ;;  %26529 = vmatprep.mubr.msk.f32.mxu1 %vm28078_vm1, %v28052_v0 }
 0xad2   : > { %v32945_v24 = vadd.f32 %v32675_v54, %v19828_v63  ;;  %v24750_v54 = vld [vmem:[%s34424_s6 + $0x780] sm:$0xff]  ;;  %v27149_v21 = vpack.c.bf16 %v28005_v42, %v28004_v50 }
 0xad3   : > { %v19779_v10 = vpop.f32.mrb[152].mxu0  ;;  %v32947_v8 = vpop.f32.mrb[182].mxu1 }
 0xad4   : > { %v26069_v60 = vpop.f32.mrb[153].mxu0  ;;  %26386 = vmatmul.mubr.msk.f32.gmra.mrb[0].mxu0 %vm17913_vm2, %v24704_v26  ;;  %26530 = vmatmul.mubr.msk.f32.gmra.mrb[32].mxu1 %vm17913_vm2, %v24793_v47  ;;  %v19829_v58 = vadd.f32 %v19779_v10, %v32691_v52  ;;  %v26213_v57 = vpop.f32.mrb[183].mxu1  ;;  %v28020_v52 = vunpack.i.h.bf16 %v28018_v20 }
 0xad5   : > { %26441 = vmatprep.mubr.msk.f32.mxu0 %vm28078_vm1, %v28052_v0  ;;  %26532 = vmatprep.mubr.msk.f32.mxu1 %vm28078_vm1, %v28052_v0 }
 0xad6   : > { %v32963_v61 = vadd.f32 %v32693_v19, %v19829_v58  ;;  %v24751_v19 = vld [vmem:[%s34424_s6 + $0x788] sm:$0xff]  ;;  %v27158_v11 = vpack.c.bf16 %v28020_v52, %v28019_v55 }
 0xad7   : > { %v19784_v49 = vpop.f32.mrb[154].mxu0  ;;  %v32965_v33 = vpop.f32.mrb[184].mxu1 }
 0xad8   : > { %v19830_v32 = vadd.f32 %v19784_v49, %v32709_v18  ;;  %v26072_v6 = vpop.f32.mrb[155].mxu0  ;;  %26442 = vmatmul.mubr.msk.f32.vlgmr.msra.gmra.mrb[4].mxu0 %vm17913_vm2, %v24750_v54  ;;  %26533 = vmatmul.mubr.msk.f32.gmra.mrb[34].mxu1 %vm17913_vm2, %v24794_v3  ;;  %v26216_v16 = vpop.f32.mrb[185].mxu1 }
 0xad9   : > { %27150 = vmatpush3.bf16.msra.mxu0 %v27149_v21  ;;  %26444 = vmatprep.mubr.msk.f32.mxu0 %vm28078_vm1, %v28052_v0 }
 0xada   : > { %v32979_v18 = vadd.f32 %v32712_v13, %v19830_v32  ;;  %26588 = vmatprep.mubr.msk.f32.mxu1 %vm28078_vm1, %v28052_v0  ;;  %27154 = vmatprep.subr.bf16.mxu0 %v28077_v45  ;;  %v24752_v13 = vld [vmem:[%s34424_s6 + $0x790] sm:$0xff] }
 0xadb   : > { %v19789_v38 = vpop.f32.mrb[156].mxu0  ;;  %v32984_v22 = vpop.f32.mrb[186].mxu1 }
 0xadc   : > { %v19831_v48 = vadd.f32 %v19789_v38, %v32728_v12  ;;  %v26075_v41 = vpop.f32.mrb[157].mxu0  ;;  %26445 = vmatmul.mubr.msk.f32.gmra.mrb[6].mxu0 %vm17913_vm2, %v24751_v19  ;;  %26589 = vmatmul.mubr.msk.f32.vlgmr.msra.gmra.mrb[36].mxu1 %vm17913_vm2, %v24840_v9  ;;  %v26219_v40 = vpop.f32.mrb[187].mxu1 }
 0xadd   : > { %27159 = vmatpush3.bf16.msra.mxu1 %v27158_v11  ;;  %26447 = vmatprep.mubr.msk.f32.mxu0 %vm28078_vm1, %v28052_v0 }
 0xade   : > { %v32998_v12 = vadd.f32 %v32731_v25, %v19831_v48  ;;  %26591 = vmatprep.mubr.msk.f32.mxu1 %vm28078_vm1, %v28052_v0  ;;  %27163 = vmatprep.subr.bf16.mxu1 %v28077_v45  ;;  %v24753_v25 = vld [vmem:[%s34424_s6 + $0x798] sm:$0xff] }
 0xadf   : > { %v19794_v17 = vpop.f32.mrb[158].mxu0  ;;  %v33003_v43 = vpop.f32.mrb[188].mxu1 }
 0xae0   : > { %v19832_v15 = vadd.f32 %v19794_v17, %v32747_v39  ;;  %v26078_v63 = vpop.f32.mrb[159].mxu0  ;;  %26448 = vmatmul.mubr.msk.f32.gmra.mrb[8].mxu0 %vm17913_vm2, %v24752_v13  ;;  %26592 = vmatmul.mubr.msk.f32.gmra.mrb[38].mxu1 %vm17913_vm2, %v24841_v51  ;;  %v26222_v34 = vpop.f32.mrb[189].mxu1  ;;  %v24842_v39 = vld [vmem:[%s34424_s6 + $0x8f8] sm:$0xff] }
 0xae1   : > { %26450 = vmatprep.mubr.msk.f32.mxu0 %vm28078_vm1, %v28052_v0  ;;  %26594 = vmatprep.mubr.msk.f32.mxu1 %vm28078_vm1, %v28052_v0 }
 0xae2   : > { %v33019_v26 = vadd.f32 %v32749_v59, %v19832_v15  ;;  %v24754_v59 = vld [vmem:[%s34424_s6 + $0x7a0] sm:$0xff] }
 0xae3   : > { %v19799_v47 = vpop.f32.mrb[160].mxu0  ;;  %v33021_v20 = vpop.f32.mrb[190].mxu1 }
 0xae4   : > { %v19833_v42 = vadd.f32 %v19799_v47, %v32765_v37  ;;  %v26081_v50 = vpop.f32.mrb[161].mxu0  ;;  %26451 = vmatmul.mubr.msk.f32.gmra.mrb[10].mxu0 %vm17913_vm2, %v24753_v25  ;;  %26595 = vmatmul.mubr.msk.f32.gmra.mrb[40].mxu1 %vm17913_vm2, %v24842_v39  ;;  %v26225_v10 = vpop.f32.mrb[191].mxu1  ;;  %v24843_v37 = vld [vmem:[%s34424_s6 + $0x900] sm:$0xff] }
 0xae5   : > { %26453 = vmatprep.mubr.msk.f32.mxu0 %vm28078_vm1, %v28052_v0  ;;  %26597 = vmatprep.mubr.msk.f32.mxu1 %vm28078_vm1, %v28052_v0 }
 0xae6   : > { %v33037_v60 = vadd.f32 %v32767_v46, %v19833_v42  ;;  %v24755_v46 = vld [vmem:[%s34424_s6 + $0x7a8] sm:$0xff] }
 0xae7   : > { %v19804_v58 = vpop.f32.mrb[162].mxu0  ;;  %v33039_v57 = vpop.f32.mrb[192].mxu1 }
 0xae8   : > { %v19834_v54 = vadd.f32 %v19804_v58, %v32783_v14  ;;  %v26084_v3 = vpop.f32.mrb[163].mxu0  ;;  %26454 = vmatmul.mubr.msk.f32.gmra.mrb[12].mxu0 %vm17913_vm2, %v24754_v59  ;;  %26598 = vmatmul.mubr.msk.f32.gmra.mrb[42].mxu1 %vm17913_vm2, %v24843_v37  ;;  %v26228_v21 = vpop.f32.mrb[193].mxu1  ;;  %v24844_v14 = vld [vmem:[%s34424_s6 + $0x908] sm:$0xff] }
 0xae9   : > { %26456 = vmatprep.mubr.msk.f32.mxu0 %vm28078_vm1, %v28052_v0  ;;  %26600 = vmatprep.mubr.msk.f32.mxu1 %vm28078_vm1, %v28052_v0 }
 0xaea   : > { %v33055_v52 = vadd.f32 %v32785_v36, %v19834_v54  ;;  %v24756_v36 = vld [vmem:[%s34424_s6 + $0x7b0] sm:$0xff] }
 0xaeb   : > { %v19809_v55 = vpop.f32.mrb[164].mxu0  ;;  %v33057_v49 = vpop.f32.mrb[194].mxu1 }
 0xaec   : > { %v19835_v32 = vadd.f32 %v19809_v55, %v32801_v31  ;;  %v26087_v6 = vpop.f32.mrb[165].mxu0  ;;  %26457 = vmatmul.mubr.msk.f32.gmra.mrb[14].mxu0 %vm17913_vm2, %v24755_v46  ;;  %26601 = vmatmul.mubr.msk.f32.gmra.mrb[44].mxu1 %vm17913_vm2, %v24844_v14  ;;  %v26231_v16 = vpop.f32.mrb[195].mxu1  ;;  %v24845_v31 = vld [vmem:[%s34424_s6 + $0x910] sm:$0xff] }
 0xaed   : > { %26459 = vmatprep.mubr.msk.f32.mxu0 %vm28078_vm1, %v28052_v0  ;;  %26603 = vmatprep.mubr.msk.f32.mxu1 %vm28078_vm1, %v28052_v0 }
 0xaee   : > { %v33073_v19 = vadd.f32 %v32803_v23, %v19835_v32  ;;  %v24757_v23 = vld [vmem:[%s34424_s6 + $0x7b8] sm:$0xff] }
 0xaef   : > { %v19814_v9 = vpop.f32.mrb[166].mxu0  ;;  %v33075_v11 = vpop.f32.mrb[196].mxu1 }
 0xaf0   : > { %v19836_v38 = vadd.f32 %v19814_v9, %v32819_v4  ;;  %v26090_v48 = vpop.f32.mrb[167].mxu0  ;;  %26460 = vmatmul.mubr.msk.f32.gmra.mrb[16].mxu0 %vm17913_vm2, %v24756_v36  ;;  %26604 = vmatmul.mubr.msk.f32.gmra.mrb[46].mxu1 %vm17913_vm2, %v24845_v31  ;;  %v26234_v41 = vpop.f32.mrb[197].mxu1  ;;  %v24846_v4 = vld [vmem:[%s34424_s6 + $0x918] sm:$0xff] }
 0xaf1   : > { %26462 = vmatprep.mubr.msk.f32.mxu0 %vm28078_vm1, %v28052_v0  ;;  %26606 = vmatprep.mubr.msk.f32.mxu1 %vm28078_vm1, %v28052_v0 }
 0xaf2   : > { %v33091_v40 = vadd.f32 %v32821_v7, %v19836_v38  ;;  %v24758_v7 = vld [vmem:[%s34424_s6 + $0x7c0] sm:$0xff] }
 0xaf3   : > { %v19819_v13 = vpop.f32.mrb[168].mxu0  ;;  %v33093_v51 = vpop.f32.mrb[198].mxu1 }
 0xaf4   : > { %v19837_v17 = vadd.f32 %v19819_v13, %v32837_v27  ;;  %v26093_v15 = vpop.f32.mrb[169].mxu0  ;;  %26463 = vmatmul.mubr.msk.f32.gmra.mrb[18].mxu0 %vm17913_vm2, %v24757_v23  ;;  %26607 = vmatmul.mubr.msk.f32.gmra.mrb[48].mxu1 %vm17913_vm2, %v24846_v4  ;;  %v26237_v63 = vpop.f32.mrb[199].mxu1  ;;  %v24847_v27 = vld [vmem:[%s34424_s6 + $0x920] sm:$0xff] }
 0xaf5   : > { %26465 = vmatprep.mubr.msk.f32.mxu0 %vm28078_vm1, %v28052_v0  ;;  %26609 = vmatprep.mubr.msk.f32.mxu1 %vm28078_vm1, %v28052_v0  ;;  %v28013_v63 = vpop.permute.xlu0 %28012 }
 0xaf6   : > { %v33109_v34 = vadd.f32 %v32839_v1, %v19837_v17  ;;  %v24759_v1 = vld [vmem:[%s34424_s6 + $0x7c8] sm:$0xff] }
 0xaf7   : > { %v20193_v25 = vpop.f32.mrb[170].mxu0  ;;  %v33111_v39 = vpop.f32.mrb[200].mxu1 }
 0xaf8   : > { %v20267_v47 = vadd.f32 %v20193_v25, %v32855_v29  ;;  %v26149_v42 = vpop.f32.mrb[171].mxu0  ;;  %26466 = vmatmul.mubr.msk.f32.gmra.mrb[20].mxu0 %vm17913_vm2, %v24758_v7  ;;  %26610 = vmatmul.mubr.msk.f32.gmra.mrb[50].mxu1 %vm17913_vm2, %v24847_v27  ;;  %v26240_v50 = vpop.f32.mrb[201].mxu1  ;;  %v24848_v29 = vld [vmem:[%s34424_s6 + $0x928] sm:$0xff] }
 0xaf9   : > { %26468 = vmatprep.mubr.msk.f32.mxu0 %vm28078_vm1, %v28052_v0  ;;  %26612 = vmatprep.mubr.msk.f32.mxu1 %vm28078_vm1, %v28052_v0 }
 0xafa   : > { %v33127_v10 = vadd.f32 %v32857_v44, %v20267_v47  ;;  %v24760_v44 = vld [vmem:[%s34424_s6 + $0x7d0] sm:$0xff] }
 0xafb   : > { %v20198_v59 = vpop.f32.mrb[172].mxu0  ;;  %v33129_v37 = vpop.f32.mrb[202].mxu1 }
 0xafc   : > { %v20268_v58 = vadd.f32 %v20198_v59, %v32873_v53  ;;  %v26152_v54 = vpop.f32.mrb[173].mxu0  ;;  %26469 = vmatmul.mubr.msk.f32.gmra.mrb[22].mxu0 %vm17913_vm2, %v24759_v1  ;;  %26613 = vmatmul.mubr.msk.f32.gmra.mrb[52].mxu1 %vm17913_vm2, %v24848_v29  ;;  %v26296_v3 = vpop.f32.mrb[203].mxu1  ;;  %v24849_v53 = vld [vmem:[%s34424_s6 + $0x930] sm:$0xff]  ;;  %v28015_v59 = vunpack.i.h.bf16 %v28013_v63 }
 0xafd   : > { %26471 = vmatprep.mubr.msk.f32.mxu0 %vm28078_vm1, %v28052_v0  ;;  %26615 = vmatprep.mubr.msk.f32.mxu1 %vm28078_vm1, %v28052_v0  ;;  %v28028_v1 = vpop.permute.xlu1 %28027 }
 0xafe   : > { %v33145_v21 = vadd.f32 %v32875_v35, %v20268_v58  ;;  %v24761_v35 = vld [vmem:[%s34424_s6 + $0x7d8] sm:$0xff]  ;;  %v28014_v58 = vunpack.i.l.bf16 %v28013_v63 }
 0xaff   : > { %v20203_v46 = vpop.f32.mrb[174].mxu0  ;;  %v33147_v14 = vpop.f32.mrb[204].mxu1 }
 0xb00   : > { %v20269_v55 = vadd.f32 %v20203_v46, %v32891_v56  ;;  %v26155_v32 = vpop.f32.mrb[175].mxu0  ;;  %26472 = vmatmul.mubr.msk.f32.gmra.mrb[24].mxu0 %vm17913_vm2, %v24760_v44  ;;  %26616 = vmatmul.mubr.msk.f32.gmra.mrb[54].mxu1 %vm17913_vm2, %v24849_v53  ;;  %v26299_v6 = vpop.f32.mrb[205].mxu1  ;;  %v24850_v56 = vld [vmem:[%s34424_s6 + $0x938] sm:$0xff] }
 0xb01   : > { %26474 = vmatprep.mubr.msk.f32.mxu0 %vm28078_vm1, %v28052_v0  ;;  %26618 = vmatprep.mubr.msk.f32.mxu1 %vm28078_vm1, %v28052_v0  ;;  %v27155_v32 = vpack.c.bf16 %v28015_v59, %v28014_v58  ;;  %v28030_v6 = vunpack.i.h.bf16 %v28028_v1 }
 0xb02   : > { %v33163_v16 = vadd.f32 %v32893_v2, %v20269_v55  ;;  %v24762_v2 = vld [vmem:[%s34424_s6 + $0x7e0] sm:$0xff] }
 0xb03   : > { %v20208_v36 = vpop.f32.mrb[176].mxu0  ;;  %v33165_v31 = vpop.f32.mrb[206].mxu1 }
 0xb04   : > { %v20270_v9 = vadd.f32 %v20208_v36, %v32909_v62  ;;  %v26158_v38 = vpop.f32.mrb[177].mxu0  ;;  %26475 = vmatmul.mubr.msk.f32.gmra.mrb[26].mxu0 %vm17913_vm2, %v24761_v35  ;;  %26619 = vmatmul.mubr.msk.f32.gmra.mrb[56].mxu1 %vm17913_vm2, %v24850_v56  ;;  %v26302_v48 = vpop.f32.mrb[207].mxu1  ;;  %v24851_v62 = vld [vmem:[%s34424_s6 + $0x940] sm:$0xff]  ;;  %v28029_v35 = vunpack.i.l.bf16 %v28028_v1 }
 0xb05   : > { %26477 = vmatprep.mubr.msk.f32.mxu0 %vm28078_vm1, %v28052_v0  ;;  %26621 = vmatprep.mubr.msk.f32.mxu1 %vm28078_vm1, %v28052_v0 }
 0xb06   : > { %v33181_v41 = vadd.f32 %v32911_v28, %v20270_v9  ;;  %v24763_v28 = vld [vmem:[%s34424_s6 + $0x7e8] sm:$0xff] }
 0xb07   : > { %v20213_v23 = vpop.f32.mrb[178].mxu0  ;;  %v33183_v4 = vpop.f32.mrb[208].mxu1 }
 0xb08   : > { %v20271_v13 = vadd.f32 %v20213_v23, %v32927_v30  ;;  %v26161_v17 = vpop.f32.mrb[179].mxu0  ;;  %26478 = vmatmul.mubr.msk.f32.gmra.mrb[28].mxu0 %vm17913_vm2, %v24762_v2  ;;  %26622 = vmatmul.mubr.msk.f32.gmra.mrb[58].mxu1 %vm17913_vm2, %v24851_v62  ;;  %v26305_v15 = vpop.f32.mrb[209].mxu1  ;;  %v24852_v30 = vld [vmem:[%s34424_s6 + $0x948] sm:$0xff]  ;;  %v24900_v2 = vld [vmem:[%s34424_s6 + $0x9d8] sm:$0xff]  ;;  %v27164_v62 = vpack.c.bf16 %v28030_v6, %v28029_v35 }
 0xb09   : > { %26480 = vmatprep.mubr.msk.f32.mxu0 %vm28078_vm1, %v28052_v0  ;;  %26624 = vmatprep.mubr.msk.f32.mxu1 %vm28078_vm1, %v28052_v0  ;;  %v24815_v6 = vld [vmem:[%s34424_s6 + $0x898] sm:$0xff] }
 0xb0a   : > { %v33199_v7 = vadd.f32 %v32929_v5, %v20271_v13  ;;  %v24764_v5 = vld [vmem:[%s34424_s6 + $0x7f0] sm:$0xff] }
 0xb0b   : > { %v20218_v27 = vpop.f32.mrb[180].mxu0  ;;  %v33201_v25 = vpop.f32.mrb[210].mxu1 }
 0xb0c   : > { %v20272_v47 = vadd.f32 %v20218_v27, %v32945_v24  ;;  %v26164_v42 = vpop.f32.mrb[181].mxu0  ;;  %26481 = vmatmul.mubr.msk.f32.gmra.mrb[30].mxu0 %vm17913_vm2, %v24763_v28  ;;  %26625 = vmatmul.mubr.msk.f32.gmra.mrb[60].mxu1 %vm17913_vm2, %v24852_v30  ;;  %v26308_v50 = vpop.f32.mrb[211].mxu1  ;;  %v24853_v24 = vld [vmem:[%s34424_s6 + $0x950] sm:$0xff]  ;;  %v24901_v30 = vld [vmem:[%s34424_s6 + $0x9e0] sm:$0xff] }
 0xb0d   : > { %26483 = vmatprep.mubr.msk.f32.mxu0 %vm28078_vm1, %v28052_v0  ;;  %26627 = vmatprep.mubr.msk.f32.mxu1 %vm28078_vm1, %v28052_v0 }
 0xb0e   : > { %v33217_v29 = vadd.f32 %v32947_v8, %v20272_v47  ;;  %v24810_v8 = vld [vmem:[%s34424_s6 + $0x870] sm:$0xff] }
 0xb0f   : > { %v20223_v54 = vpop.f32.mrb[182].mxu0  ;;  %v33219_v3 = vpop.f32.mrb[212].mxu1 }
 0xb10   : > { %v20273_v44 = vadd.f32 %v20223_v54, %v32963_v61  ;;  %v26167_v53 = vpop.f32.mrb[183].mxu0  ;;  %26484 = vmatmul.mubr.msk.f32.gmra.mrb[32].mxu0 %vm17913_vm2, %v24764_v5  ;;  %26628 = vmatmul.mubr.msk.f32.gmra.mrb[62].mxu1 %vm17913_vm2, %v24853_v24  ;;  %v26311_v46 = vpop.f32.mrb[213].mxu1  ;;  %v24854_v61 = vld [vmem:[%s34424_s6 + $0x958] sm:$0xff] }
 0xb11   : > { %26539 = vmatprep.mubr.msk.f32.mxu0 %vm28078_vm1, %v28052_v0  ;;  %26630 = vmatprep.mubr.msk.f32.mxu1 %vm28078_vm1, %v28052_v0 }
 0xb12   : > { %v33235_v55 = vadd.f32 %v32965_v33, %v20273_v44  ;;  %v24811_v33 = vld [vmem:[%s34424_s6 + $0x878] sm:$0xff]  ;;  %v24814_v44 = vld [vmem:[%s34424_s6 + $0x890] sm:$0xff] }
 0xb13   : > { %v20228_v56 = vpop.f32.mrb[184].mxu0  ;;  %v33237_v36 = vpop.f32.mrb[214].mxu1 }
 0xb14   : > { %v20274_v9 = vadd.f32 %v20228_v56, %v32979_v18  ;;  %v26170_v38 = vpop.f32.mrb[185].mxu0  ;;  %26540 = vmatmul.mubr.msk.f32.vlgmr.msra.gmra.mrb[34].mxu0 %vm17913_vm2, %v24810_v8  ;;  %26631 = vmatmul.mubr.msk.f32.gmra.mrb[64].mxu1 %vm17913_vm2, %v24854_v61  ;;  %v26314_v48 = vpop.f32.mrb[215].mxu1 }
 0xb15   : > { %27156 = vmatpush3.bf16.msra.mxu0 %v27155_v32  ;;  %26542 = vmatprep.mubr.msk.f32.mxu0 %vm28078_vm1, %v28052_v0 }
 0xb16   : > { %v33251_v18 = vadd.f32 %v32984_v22, %v20274_v9  ;;  %26686 = vmatprep.mubr.msk.f32.mxu1 %vm28078_vm1, %v28052_v0  ;;  %27160 = vmatprep.subr.bf16.mxu0 %v28077_v45  ;;  %v24812_v22 = vld [vmem:[%s34424_s6 + $0x880] sm:$0xff] }
 0xb17   : > { %v20233_v23 = vpop.f32.mrb[186].mxu0  ;;  %v33256_v13 = vpop.f32.mrb[216].mxu1 }
 0xb18   : > { %v20275_v17 = vadd.f32 %v20233_v23, %v32998_v12  ;;  %v26173_v15 = vpop.f32.mrb[187].mxu0  ;;  %26543 = vmatmul.mubr.msk.f32.gmra.mrb[36].mxu0 %vm17913_vm2, %v24811_v33  ;;  %26687 = vmatmul.mubr.msk.f32.vlgmr.msra.gmra.mrb[66].mxu1 %vm17913_vm2, %v24900_v2  ;;  %v26317_v28 = vpop.f32.mrb[217].mxu1  ;;  %v24816_v33 = vld [vmem:[%s34424_s6 + $0x8a0] sm:$0xff] }
 0xb19   : > { %27165 = vmatpush3.bf16.msra.mxu1 %v27164_v62  ;;  %26545 = vmatprep.mubr.msk.f32.mxu0 %vm28078_vm1, %v28052_v0  ;;  %v24817_v28 = vld [vmem:[%s34424_s6 + $0x8a8] sm:$0xff] }
 0xb1a   : > { %v33270_v12 = vadd.f32 %v33003_v43, %v20275_v17  ;;  %26689 = vmatprep.mubr.msk.f32.mxu1 %vm28078_vm1, %v28052_v0  ;;  %27169 = vmatprep.subr.bf16.mxu1 %v28077_v45  ;;  %v24813_v43 = vld [vmem:[%s34424_s6 + $0x888] sm:$0xff] }
 0xb1b   : > { %v20238_v63 = vpop.f32.mrb[188].mxu0  ;;  %v33275_v27 = vpop.f32.mrb[218].mxu1 }
 0xb1c   : > { %v20276_v47 = vadd.f32 %v20238_v63, %v33019_v26  ;;  %v26176_v42 = vpop.f32.mrb[189].mxu0  ;;  %26546 = vmatmul.mubr.msk.f32.gmra.mrb[38].mxu0 %vm17913_vm2, %v24812_v22  ;;  %26690 = vmatmul.mubr.msk.f32.gmra.mrb[68].mxu1 %vm17913_vm2, %v24901_v30  ;;  %v26320_v50 = vpop.f32.mrb[219].mxu1  ;;  %v24902_v26 = vld [vmem:[%s34424_s6 + $0x9e8] sm:$0xff] }
 0xb1d   : > { %26548 = vmatprep.mubr.msk.f32.mxu0 %vm28078_vm1, %v28052_v0  ;;  %26692 = vmatprep.mubr.msk.f32.mxu1 %vm28078_vm1, %v28052_v0  ;;  %v24818_v50 = vld [vmem:[%s34424_s6 + $0x8b0] sm:$0xff] }
 0xb1e   : > { %v33291_v5 = vadd.f32 %v33021_v20, %v20276_v47  ;;  %v24903_v20 = vld [vmem:[%s34424_s6 + $0x9f0] sm:$0xff] }
 0xb1f   : > { %v20243_v24 = vpop.f32.mrb[190].mxu0  ;;  %v33293_v1 = vpop.f32.mrb[220].mxu1 }
 0xb20   : > { %v20277_v59 = vadd.f32 %v20243_v24, %v33037_v60  ;;  %v26179_v58 = vpop.f32.mrb[191].mxu0  ;;  %26549 = vmatmul.mubr.msk.f32.gmra.mrb[40].mxu0 %vm17913_vm2, %v24813_v43  ;;  %26693 = vmatmul.mubr.msk.f32.gmra.mrb[70].mxu1 %vm17913_vm2, %v24902_v26  ;;  %v26323_v54 = vpop.f32.mrb[221].mxu1 }
 0xb21   : > { %26551 = vmatprep.mubr.msk.f32.mxu0 %vm28078_vm1, %v28052_v0  ;;  %26695 = vmatprep.mubr.msk.f32.mxu1 %vm28078_vm1, %v28052_v0  ;;  %v24819_v54 = vld [vmem:[%s34424_s6 + $0x8b8] sm:$0xff] }
 0xb22   : > { %v33309_v60 = vadd.f32 %v33039_v57, %v20277_v59  ;;  %v24904_v57 = vld [vmem:[%s34424_s6 + $0x9f8] sm:$0xff] }
 0xb23   : > { %v20248_v53 = vpop.f32.mrb[192].mxu0  ;;  %v33311_v46 = vpop.f32.mrb[222].mxu1 }
 0xb24   : > { %v20278_v8 = vadd.f32 %v20248_v53, %v33055_v52  ;;  %v26182_v61 = vpop.f32.mrb[193].mxu0  ;;  %26552 = vmatmul.mubr.msk.f32.gmra.mrb[42].mxu0 %vm17913_vm2, %v24814_v44  ;;  %26696 = vmatmul.mubr.msk.f32.gmra.mrb[72].mxu1 %vm17913_vm2, %v24903_v20  ;;  %v26326_v32 = vpop.f32.mrb[223].mxu1 }
 0xb25   : > { %26554 = vmatprep.mubr.msk.f32.mxu0 %vm28078_vm1, %v28052_v0  ;;  %26698 = vmatprep.mubr.msk.f32.mxu1 %vm28078_vm1, %v28052_v0  ;;  %v24820_v32 = vld [vmem:[%s34424_s6 + $0x8c0] sm:$0xff] }
 0xb26   : > { %v33327_v52 = vadd.f32 %v33057_v49, %v20278_v8  ;;  %v24905_v49 = vld [vmem:[%s34424_s6 + $0xa00] sm:$0xff] }
 0xb27   : > { %v20253_v35 = vpop.f32.mrb[194].mxu0  ;;  %v33329_v56 = vpop.f32.mrb[224].mxu1 }
 0xb28   : > { %v20279_v9 = vadd.f32 %v20253_v35, %v33073_v19  ;;  %v26185_v38 = vpop.f32.mrb[195].mxu0  ;;  %26555 = vmatmul.mubr.msk.f32.gmra.mrb[44].mxu0 %vm17913_vm2, %v24815_v6  ;;  %26699 = vmatmul.mubr.msk.f32.gmra.mrb[74].mxu1 %vm17913_vm2, %v24904_v57  ;;  %v26329_v48 = vpop.f32.mrb[225].mxu1 }
 0xb29   : > { %26557 = vmatprep.mubr.msk.f32.mxu0 %vm28078_vm1, %v28052_v0  ;;  %26701 = vmatprep.mubr.msk.f32.mxu1 %vm28078_vm1, %v28052_v0  ;;  %v24821_v48 = vld [vmem:[%s34424_s6 + $0x8c8] sm:$0xff] }
 0xb2a   : > { %v33345_v19 = vadd.f32 %v33075_v11, %v20279_v9  ;;  %v24906_v11 = vld [vmem:[%s34424_s6 + $0xa08] sm:$0xff] }
 0xb2b   : > { %v20258_v2 = vpop.f32.mrb[196].mxu0  ;;  %v33347_v62 = vpop.f32.mrb[226].mxu1 }
 0xb2c   : > { %v20280_v23 = vadd.f32 %v20258_v2, %v33091_v40  ;;  %v26188_v17 = vpop.f32.mrb[197].mxu0  ;;  %26558 = vmatmul.mubr.msk.f32.gmra.mrb[46].mxu0 %vm17913_vm2, %v24816_v33  ;;  %26702 = vmatmul.mubr.msk.f32.gmra.mrb[76].mxu1 %vm17913_vm2, %v24905_v49  ;;  %v26332_v15 = vpop.f32.mrb[227].mxu1 }
 0xb2d   : > { %26560 = vmatprep.mubr.msk.f32.mxu0 %vm28078_vm1, %v28052_v0  ;;  %26704 = vmatprep.mubr.msk.f32.mxu1 %vm28078_vm1, %v28052_v0  ;;  %v24822_v15 = vld [vmem:[%s34424_s6 + $0x8d0] sm:$0xff] }
 0xb2e   : > { %v33363_v40 = vadd.f32 %v33093_v51, %v20280_v23  ;;  %v24907_v51 = vld [vmem:[%s34424_s6 + $0xa10] sm:$0xff] }
 0xb2f   : > { %v20263_v22 = vpop.f32.mrb[198].mxu0  ;;  %v33365_v30 = vpop.f32.mrb[228].mxu1 }
 0xb30   : > { %v20281_v63 = vadd.f32 %v20263_v22, %v33109_v34  ;;  %v26191_v47 = vpop.f32.mrb[199].mxu0  ;;  %26561 = vmatmul.mubr.msk.f32.gmra.mrb[48].mxu0 %vm17913_vm2, %v24817_v28  ;;  %26705 = vmatmul.mubr.msk.f32.gmra.mrb[78].mxu1 %vm17913_vm2, %v24906_v11  ;;  %v26335_v42 = vpop.f32.mrb[229].mxu1 }
 0xb31   : > { %26563 = vmatprep.mubr.msk.f32.mxu0 %vm28078_vm1, %v28052_v0  ;;  %26707 = vmatprep.mubr.msk.f32.mxu1 %vm28078_vm1, %v28052_v0  ;;  %v24823_v42 = vld [vmem:[%s34424_s6 + $0x8d8] sm:$0xff] }
 0xb32   : > { %v33381_v34 = vadd.f32 %v33111_v39, %v20281_v63  ;;  %v24908_v39 = vld [vmem:[%s34424_s6 + $0xa18] sm:$0xff] }
 0xb33   : > { %v20637_v43 = vpop.f32.mrb[200].mxu0  ;;  %v33383_v26 = vpop.f32.mrb[230].mxu1 }
 0xb34   : > { %v20711_v24 = vadd.f32 %v20637_v43, %v33127_v10  ;;  %v26247_v59 = vpop.f32.mrb[201].mxu0  ;;  %26564 = vmatmul.mubr.msk.f32.gmra.mrb[50].mxu0 %vm17913_vm2, %v24818_v50  ;;  %26708 = vmatmul.mubr.msk.f32.gmra.mrb[80].mxu1 %vm17913_vm2, %v24907_v51  ;;  %v26338_v58 = vpop.f32.mrb[231].mxu1 }
 0xb35   : > { %26566 = vmatprep.mubr.msk.f32.mxu0 %vm28078_vm1, %v28052_v0  ;;  %26710 = vmatprep.mubr.msk.f32.mxu1 %vm28078_vm1, %v28052_v0 }
 0xb36   : > { %v33399_v10 = vadd.f32 %v33129_v37, %v20711_v24  ;;  %v24909_v37 = vld [vmem:[%s34424_s6 + $0xa20] sm:$0xff] }
 0xb37   : > { %v20642_v44 = vpop.f32.mrb[202].mxu0  ;;  %v33401_v20 = vpop.f32.mrb[232].mxu1 }
 0xb38   : > { %v20712_v53 = vadd.f32 %v20642_v44, %v33145_v21  ;;  %v26250_v8 = vpop.f32.mrb[203].mxu0  ;;  %26567 = vmatmul.mubr.msk.f32.gmra.mrb[52].mxu0 %vm17913_vm2, %v24819_v54  ;;  %26711 = vmatmul.mubr.msk.f32.gmra.mrb[82].mxu1 %vm17913_vm2, %v24908_v39  ;;  %v26394_v61 = vpop.f32.mrb[233].mxu1  ;;  %v24824_v54 = vld [vmem:[%s34424_s6 + $0x8e0] sm:$0xff] }
 0xb39   : > { %26569 = vmatprep.mubr.msk.f32.mxu0 %vm28078_vm1, %v28052_v0  ;;  %26713 = vmatprep.mubr.msk.f32.mxu1 %vm28078_vm1, %v28052_v0 }
 0xb3a   : > { %v33417_v21 = vadd.f32 %v33147_v14, %v20712_v53  ;;  %v24910_v14 = vld [vmem:[%s34424_s6 + $0xa28] sm:$0xff] }
 0xb3b   : > { %v20647_v6 = vpop.f32.mrb[204].mxu0  ;;  %v33419_v57 = vpop.f32.mrb[234].mxu1 }
 0xb3c   : > { %v20713_v35 = vadd.f32 %v20647_v6, %v33163_v16  ;;  %v26253_v9 = vpop.f32.mrb[205].mxu0  ;;  %26570 = vmatmul.mubr.msk.f32.gmra.mrb[54].mxu0 %vm17913_vm2, %v24820_v32  ;;  %26714 = vmatmul.mubr.msk.f32.gmra.mrb[84].mxu1 %vm17913_vm2, %v24909_v37  ;;  %v26397_v38 = vpop.f32.mrb[235].mxu1 }
 0xb3d   : > { %26572 = vmatprep.mubr.msk.f32.mxu0 %vm28078_vm1, %v28052_v0  ;;  %26716 = vmatprep.mubr.msk.f32.mxu1 %vm28078_vm1, %v28052_v0 }
 0xb3e   : > { %v33435_v16 = vadd.f32 %v33165_v31, %v20713_v35  ;;  %v24911_v31 = vld [vmem:[%s34424_s6 + $0xa30] sm:$0xff] }
 0xb3f   : > { %v20652_v33 = vpop.f32.mrb[206].mxu0  ;;  %v33437_v49 = vpop.f32.mrb[236].mxu1 }
 0xb40   : > { %v20714_v2 = vadd.f32 %v20652_v33, %v33181_v41  ;;  %v26256_v23 = vpop.f32.mrb[207].mxu0  ;;  %26573 = vmatmul.mubr.msk.f32.gmra.mrb[56].mxu0 %vm17913_vm2, %v24821_v48  ;;  %26717 = vmatmul.mubr.msk.f32.gmra.mrb[86].mxu1 %vm17913_vm2, %v24910_v14  ;;  %v26400_v17 = vpop.f32.mrb[237].mxu1 }
 0xb41   : > { %26575 = vmatprep.mubr.msk.f32.mxu0 %vm28078_vm1, %v28052_v0  ;;  %26719 = vmatprep.mubr.msk.f32.mxu1 %vm28078_vm1, %v28052_v0 }
 0xb42   : > { %v33453_v41 = vadd.f32 %v33183_v4, %v20714_v2  ;;  %v24912_v4 = vld [vmem:[%s34424_s6 + $0xa38] sm:$0xff]  ;;  %v24960_v2 = vld [vmem:[%s34424_s6 + $0xac8] sm:$0xff] }
 0xb43   : > { %v20657_v28 = vpop.f32.mrb[208].mxu0  ;;  %v33455_v11 = vpop.f32.mrb[238].mxu1 }
 0xb44   : > { %v20715_v22 = vadd.f32 %v20657_v28, %v33199_v7  ;;  %v26259_v63 = vpop.f32.mrb[209].mxu0  ;;  %26576 = vmatmul.mubr.msk.f32.gmra.mrb[58].mxu0 %vm17913_vm2, %v24822_v15  ;;  %26720 = vmatmul.mubr.msk.f32.gmra.mrb[88].mxu1 %vm17913_vm2, %v24911_v31  ;;  %v26403_v47 = vpop.f32.mrb[239].mxu1 }
 0xb45   : > { %26578 = vmatprep.mubr.msk.f32.mxu0 %vm28078_vm1, %v28052_v0  ;;  %26722 = vmatprep.mubr.msk.f32.mxu1 %vm28078_vm1, %v28052_v0  ;;  %v28023_v7 = vpop.permute.xlu0 %28022 }
 0xb46   : > { %v33471_v50 = vadd.f32 %v33201_v25, %v20715_v22  ;;  %v24913_v25 = vld [vmem:[%s34424_s6 + $0xa40] sm:$0xff]  ;;  %v28025_v39 = vunpack.i.h.bf16 %v28023_v7  ;;  %v28024_v44 = vunpack.i.l.bf16 %v28023_v7 }
 0xb47   : > { %v20662_v51 = vpop.f32.mrb[210].mxu0  ;;  %v33473_v43 = vpop.f32.mrb[240].mxu1 }
 0xb48   : > { %v20716_v24 = vadd.f32 %v20662_v51, %v33217_v29  ;;  %v26262_v59 = vpop.f32.mrb[211].mxu0  ;;  %26579 = vmatmul.mubr.msk.f32.gmra.mrb[60].mxu0 %vm17913_vm2, %v24823_v42  ;;  %26723 = vmatmul.mubr.msk.f32.gmra.mrb[90].mxu1 %vm17913_vm2, %v24912_v4  ;;  %v26406_v58 = vpop.f32.mrb[241].mxu1  ;;  %v27161_v35 = vpack.c.bf16 %v28025_v39, %v28024_v44  ;;  %v24873_v51 = vld [vmem:[%s34424_s6 + $0x978] sm:$0xff]  ;;  %v24874_v39 = vld [vmem:[%s34424_s6 + $0x980] sm:$0xff] }
 0xb49   : > { %26581 = vmatprep.mubr.msk.f32.mxu0 %vm28078_vm1, %v28052_v0  ;;  %26725 = vmatprep.mubr.msk.f32.mxu1 %vm28078_vm1, %v28052_v0 }
 0xb4a   : > { %v33489_v29 = vadd.f32 %v33219_v3, %v20716_v24  ;;  %v24870_v3 = vld [vmem:[%s34424_s6 + $0x960] sm:$0xff] }
 0xb4b   : > { %v20667_v53 = vpop.f32.mrb[212].mxu0  ;;  %v33491_v8 = vpop.f32.mrb[242].mxu1 }
 0xb4c   : > { %v20717_v61 = vadd.f32 %v20667_v53, %v33235_v55  ;;  %v26265_v32 = vpop.f32.mrb[213].mxu0  ;;  %26582 = vmatmul.mubr.msk.f32.gmra.mrb[62].mxu0 %vm17913_vm2, %v24824_v54  ;;  %26726 = vmatmul.mubr.msk.f32.gmra.mrb[92].mxu1 %vm17913_vm2, %v24913_v25  ;;  %v26409_v37 = vpop.f32.mrb[243].mxu1  ;;  %v24914_v55 = vld [vmem:[%s34424_s6 + $0xa48] sm:$0xff] }
 0xb4d   : > { %26637 = vmatprep.mubr.msk.f32.mxu0 %vm28078_vm1, %v28052_v0  ;;  %26728 = vmatprep.mubr.msk.f32.mxu1 %vm28078_vm1, %v28052_v0 }
 0xb4e   : > { %v33507_v6 = vadd.f32 %v33237_v36, %v20717_v61  ;;  %v24871_v36 = vld [vmem:[%s34424_s6 + $0x968] sm:$0xff] }
 0xb4f   : > { %v20672_v9 = vpop.f32.mrb[214].mxu0  ;;  %v33509_v38 = vpop.f32.mrb[244].mxu1 }
 0xb50   : > { %v20718_v48 = vadd.f32 %v20672_v9, %v33251_v18  ;;  %v26268_v14 = vpop.f32.mrb[215].mxu0  ;;  %26638 = vmatmul.mubr.msk.f32.vlgmr.msra.gmra.mrb[64].mxu0 %vm17913_vm2, %v24870_v3  ;;  %26729 = vmatmul.mubr.msk.f32.gmra.mrb[94].mxu1 %vm17913_vm2, %v24914_v55  ;;  %v26412_v33 = vpop.f32.mrb[245].mxu1  ;;  %v24875_v3 = vld [vmem:[%s34424_s6 + $0x988] sm:$0xff] }
 0xb51   : > { %27162 = vmatpush3.bf16.msra.mxu0 %v27161_v35  ;;  %26640 = vmatprep.mubr.msk.f32.mxu0 %vm28078_vm1, %v28052_v0  ;;  %v24876_v33 = vld [vmem:[%s34424_s6 + $0x990] sm:$0xff] }
 0xb52   : > { %v33523_v18 = vadd.f32 %v33256_v13, %v20718_v48  ;;  %27166 = vmatprep.subr.bf16.mxu0 %v28077_v45  ;;  %26784 = vmatprep.mubr.msk.f32.mxu1 %vm28078_vm1, %v28052_v0  ;;  %v24872_v13 = vld [vmem:[%s34424_s6 + $0x970] sm:$0xff] }
 0xb53   : > { %v20677_v23 = vpop.f32.mrb[216].mxu0  ;;  %v33528_v17 = vpop.f32.mrb[246].mxu1 }
 0xb54   : > { %v20719_v15 = vadd.f32 %v20677_v23, %v33270_v12  ;;  %v26271_v31 = vpop.f32.mrb[217].mxu0  ;;  %26641 = vmatmul.mubr.msk.f32.gmra.mrb[66].mxu0 %vm17913_vm2, %v24871_v36  ;;  %26785 = vmatmul.mubr.msk.f32.vlgmr.msra.gmra.mrb[96].mxu1 %vm17913_vm2, %v24960_v2  ;;  %v26415_v28 = vpop.f32.mrb[247].mxu1  ;;  %v24961_v12 = vld [vmem:[%s34424_s6 + $0xad0] sm:$0xff] }
 0xb55   : > { %26643 = vmatprep.mubr.msk.f32.mxu0 %vm28078_vm1, %v28052_v0  ;;  %26787 = vmatprep.mubr.msk.f32.mxu1 %vm28078_vm1, %v28052_v0  ;;  %v24877_v28 = vld [vmem:[%s34424_s6 + $0x998] sm:$0xff] }
 0xb56   : > { %v33544_v22 = vadd.f32 %v33275_v27, %v20719_v15  ;;  %v24962_v27 = vld [vmem:[%s34424_s6 + $0xad8] sm:$0xff] }
 0xb57   : > { %v20682_v63 = vpop.f32.mrb[218].mxu0  ;;  %v33546_v47 = vpop.f32.mrb[248].mxu1 }
 0xb58   : > { %v20720_v42 = vadd.f32 %v20682_v63, %v33291_v5  ;;  %v26274_v4 = vpop.f32.mrb[219].mxu0  ;;  %26644 = vmatmul.mubr.msk.f32.gmra.mrb[68].mxu0 %vm17913_vm2, %v24872_v13  ;;  %26788 = vmatmul.mubr.msk.f32.gmra.mrb[98].mxu1 %vm17913_vm2, %v24961_v12  ;;  %v26418_v7 = vpop.f32.mrb[249].mxu1 }
 0xb59   : > { %26646 = vmatprep.mubr.msk.f32.mxu0 %vm28078_vm1, %v28052_v0  ;;  %26790 = vmatprep.mubr.msk.f32.mxu1 %vm28078_vm1, %v28052_v0  ;;  %v24878_v7 = vld [vmem:[%s34424_s6 + $0x9a0] sm:$0xff] }
 0xb5a   : > { %v33562_v5 = vadd.f32 %v33293_v1, %v20720_v42  ;;  %v24963_v1 = vld [vmem:[%s34424_s6 + $0xae0] sm:$0xff] }
 0xb5b   : > { %v20687_v24 = vpop.f32.mrb[220].mxu0  ;;  %v33564_v59 = vpop.f32.mrb[250].mxu1 }
 0xb5c   : > { %v20721_v58 = vadd.f32 %v20687_v24, %v33309_v60  ;;  %v26277_v54 = vpop.f32.mrb[221].mxu0  ;;  %26647 = vmatmul.mubr.msk.f32.gmra.mrb[70].mxu0 %vm17913_vm2, %v24873_v51  ;;  %26791 = vmatmul.mubr.msk.f32.gmra.mrb[100].mxu1 %vm17913_vm2, %v24962_v27  ;;  %v26421_v25 = vpop.f32.mrb[251].mxu1 }
 0xb5d   : > { %26649 = vmatprep.mubr.msk.f32.mxu0 %vm28078_vm1, %v28052_v0  ;;  %26793 = vmatprep.mubr.msk.f32.mxu1 %vm28078_vm1, %v28052_v0  ;;  %v24879_v25 = vld [vmem:[%s34424_s6 + $0x9a8] sm:$0xff] }
 0xb5e   : > { %v33580_v60 = vadd.f32 %v33311_v46, %v20721_v58  ;;  %v24964_v46 = vld [vmem:[%s34424_s6 + $0xae8] sm:$0xff] }
 0xb5f   : > { %v20692_v44 = vpop.f32.mrb[222].mxu0  ;;  %v33582_v53 = vpop.f32.mrb[252].mxu1 }
 0xb60   : > { %v20722_v61 = vadd.f32 %v20692_v44, %v33327_v52  ;;  %v26280_v32 = vpop.f32.mrb[223].mxu0  ;;  %26650 = vmatmul.mubr.msk.f32.gmra.mrb[72].mxu0 %vm17913_vm2, %v24874_v39  ;;  %26794 = vmatmul.mubr.msk.f32.gmra.mrb[102].mxu1 %vm17913_vm2, %v24963_v1  ;;  %v26424_v37 = vpop.f32.mrb[253].mxu1 }
 0xb61   : > { %26652 = vmatprep.mubr.msk.f32.mxu0 %vm28078_vm1, %v28052_v0  ;;  %26796 = vmatprep.mubr.msk.f32.mxu1 %vm28078_vm1, %v28052_v0  ;;  %v24880_v37 = vld [vmem:[%s34424_s6 + $0x9b0] sm:$0xff] }
 0xb62   : > { %v33598_v52 = vadd.f32 %v33329_v56, %v20722_v61  ;;  %v24965_v56 = vld [vmem:[%s34424_s6 + $0xaf0] sm:$0xff] }
 0xb63   : > { %v20697_v55 = vpop.f32.mrb[224].mxu0  ;;  %v33600_v35 = vpop.f32.mrb[254].mxu1 }
 0xb64   : > { %v20723_v9 = vadd.f32 %v20697_v55, %v33345_v19  ;;  %v26283_v48 = vpop.f32.mrb[225].mxu0  ;;  %26653 = vmatmul.mubr.msk.f32.gmra.mrb[74].mxu0 %vm17913_vm2, %v24875_v3  ;;  %26797 = vmatmul.mubr.msk.f32.gmra.mrb[104].mxu1 %vm17913_vm2, %v24964_v46  ;;  %v26427_v14 = vpop.f32.mrb[255].mxu1 }
 0xb65   : > { %26655 = vmatprep.mubr.msk.f32.mxu0 %vm28078_vm1, %v28052_v0  ;;  %26799 = vmatprep.mubr.msk.f32.mxu1 %vm28078_vm1, %v28052_v0  ;;  %v24881_v14 = vld [vmem:[%s34424_s6 + $0x9b8] sm:$0xff] }
 0xb66   : > { %v33616_v19 = vadd.f32 %v33347_v62, %v20723_v9  ;;  %v24966_v62 = vld [vmem:[%s34424_s6 + $0xaf8] sm:$0xff] }
 0xb67   : > { %v20702_v36 = vpop.f32.mrb[226].mxu0  ;;  %v33618_v2 = vpop.f32.mrb[0].mxu1 }
 0xb68   : > { %v20724_v23 = vadd.f32 %v20702_v36, %v33363_v40  ;;  %v26286_v15 = vpop.f32.mrb[227].mxu0  ;;  %26656 = vmatmul.mubr.msk.f32.gmra.mrb[76].mxu0 %vm17913_vm2, %v24876_v33  ;;  %26800 = vmatmul.mubr.msk.f32.gmra.mrb[106].mxu1 %vm17913_vm2, %v24965_v56  ;;  %v26430_v31 = vpop.f32.mrb[1].mxu1 }
 0xb69   : > { %26658 = vmatprep.mubr.msk.f32.mxu0 %vm28078_vm1, %v28052_v0  ;;  %26802 = vmatprep.mubr.msk.f32.mxu1 %vm28078_vm1, %v28052_v0  ;;  %v24882_v31 = vld [vmem:[%s34424_s6 + $0x9c0] sm:$0xff] }
 0xb6a   : > { %v33634_v40 = vadd.f32 %v33365_v30, %v20724_v23  ;;  %v24967_v30 = vld [vmem:[%s34424_s6 + $0xb00] sm:$0xff] }
 0xb6b   : > { %v20707_v13 = vpop.f32.mrb[228].mxu0  ;;  %v33636_v12 = vpop.f32.mrb[2].mxu1 }
 0xb6c   : > { %v20725_v63 = vadd.f32 %v20707_v13, %v33381_v34  ;;  %v26289_v42 = vpop.f32.mrb[229].mxu0  ;;  %26659 = vmatmul.mubr.msk.f32.gmra.mrb[78].mxu0 %vm17913_vm2, %v24877_v28  ;;  %26803 = vmatmul.mubr.msk.f32.gmra.mrb[108].mxu1 %vm17913_vm2, %v24966_v62  ;;  %v26433_v4 = vpop.f32.mrb[3].mxu1 }
 0xb6d   : > { %26661 = vmatprep.mubr.msk.f32.mxu0 %vm28078_vm1, %v28052_v0  ;;  %26805 = vmatprep.mubr.msk.f32.mxu1 %vm28078_vm1, %v28052_v0  ;;  %v24883_v4 = vld [vmem:[%s34424_s6 + $0x9c8] sm:$0xff] }
 0xb6e   : > { %v33652_v34 = vadd.f32 %v33383_v26, %v20725_v63  ;;  %v24968_v26 = vld [vmem:[%s34424_s6 + $0xb08] sm:$0xff] }
 0xb6f   : > { %v21081_v51 = vpop.f32.mrb[230].mxu0  ;;  %v33654_v27 = vpop.f32.mrb[4].mxu1 }
 0xb70   : > { %v21155_v24 = vadd.f32 %v21081_v51, %v33399_v10  ;;  %v26345_v58 = vpop.f32.mrb[231].mxu0  ;;  %26662 = vmatmul.mubr.msk.f32.gmra.mrb[80].mxu0 %vm17913_vm2, %v24878_v7  ;;  %26806 = vmatmul.mubr.msk.f32.gmra.mrb[110].mxu1 %vm17913_vm2, %v24967_v30  ;;  %v26436_v54 = vpop.f32.mrb[5].mxu1 }
 0xb71   : > { %26664 = vmatprep.mubr.msk.f32.mxu0 %vm28078_vm1, %v28052_v0  ;;  %26808 = vmatprep.mubr.msk.f32.mxu1 %vm28078_vm1, %v28052_v0 }
 0xb72   : > { %v33670_v10 = vadd.f32 %v33401_v20, %v21155_v24  ;;  %v24969_v20 = vld [vmem:[%s34424_s6 + $0xb10] sm:$0xff] }
 0xb73   : > { %v21086_v39 = vpop.f32.mrb[232].mxu0  ;;  %v33672_v1 = vpop.f32.mrb[6].mxu1 }
 0xb74   : > { %v21156_v44 = vadd.f32 %v21086_v39, %v33417_v21  ;;  %v26348_v61 = vpop.f32.mrb[233].mxu0  ;;  %26665 = vmatmul.mubr.msk.f32.gmra.mrb[82].mxu0 %vm17913_vm2, %v24879_v25  ;;  %26809 = vmatmul.mubr.msk.f32.gmra.mrb[112].mxu1 %vm17913_vm2, %v24968_v26  ;;  %v26492_v32 = vpop.f32.mrb[7].mxu1  ;;  %v24884_v25 = vld [vmem:[%s34424_s6 + $0x9d0] sm:$0xff] }
 0xb75   : > { %26667 = vmatprep.mubr.msk.f32.mxu0 %vm28078_vm1, %v28052_v0  ;;  %26811 = vmatprep.mubr.msk.f32.mxu1 %vm28078_vm1, %v28052_v0 }
 0xb76   : > { %v33688_v21 = vadd.f32 %v33419_v57, %v21156_v44  ;;  %v24970_v57 = vld [vmem:[%s34424_s6 + $0xb18] sm:$0xff] }
 0xb77   : > { %v21091_v3 = vpop.f32.mrb[234].mxu0  ;;  %v33690_v46 = vpop.f32.mrb[8].mxu1 }
 0xb78   : > { %v21157_v55 = vadd.f32 %v21091_v3, %v33435_v16  ;;  %v26351_v9 = vpop.f32.mrb[235].mxu0  ;;  %26668 = vmatmul.mubr.msk.f32.gmra.mrb[84].mxu0 %vm17913_vm2, %v24880_v37  ;;  %26812 = vmatmul.mubr.msk.f32.gmra.mrb[114].mxu1 %vm17913_vm2, %v24969_v20  ;;  %v26495_v48 = vpop.f32.mrb[9].mxu1 }
 0xb79   : > { %26670 = vmatprep.mubr.msk.f32.mxu0 %vm28078_vm1, %v28052_v0  ;;  %26814 = vmatprep.mubr.msk.f32.mxu1 %vm28078_vm1, %v28052_v0 }
 0xb7a   : > { %v33706_v16 = vadd.f32 %v33437_v49, %v21157_v55  ;;  %v24971_v49 = vld [vmem:[%s34424_s6 + $0xb20] sm:$0xff] }
 0xb7b   : > { %v21096_v33 = vpop.f32.mrb[236].mxu0  ;;  %v33708_v56 = vpop.f32.mrb[10].mxu1 }
 0xb7c   : > { %v21158_v36 = vadd.f32 %v21096_v33, %v33453_v41  ;;  %v26354_v23 = vpop.f32.mrb[237].mxu0  ;;  %26671 = vmatmul.mubr.msk.f32.gmra.mrb[86].mxu0 %vm17913_vm2, %v24881_v14  ;;  %26815 = vmatmul.mubr.msk.f32.gmra.mrb[116].mxu1 %vm17913_vm2, %v24970_v57  ;;  %v26498_v15 = vpop.f32.mrb[11].mxu1 }
 0xb7d   : > { %26673 = vmatprep.mubr.msk.f32.mxu0 %vm28078_vm1, %v28052_v0  ;;  %26817 = vmatprep.mubr.msk.f32.mxu1 %vm28078_vm1, %v28052_v0 }
 0xb7e   : > { %v33724_v41 = vadd.f32 %v33455_v11, %v21158_v36  ;;  %v24972_v11 = vld [vmem:[%s34424_s6 + $0xb28] sm:$0xff] }
 0xb7f   : > { %v21101_v28 = vpop.f32.mrb[238].mxu0  ;;  %v33726_v62 = vpop.f32.mrb[12].mxu1 }
 0xb80   : > { %v21159_v13 = vadd.f32 %v21101_v28, %v33471_v50  ;;  %v26357_v63 = vpop.f32.mrb[239].mxu0  ;;  %26674 = vmatmul.mubr.msk.f32.gmra.mrb[88].mxu0 %vm17913_vm2, %v24882_v31  ;;  %26818 = vmatmul.mubr.msk.f32.gmra.mrb[118].mxu1 %vm17913_vm2, %v24971_v49  ;;  %v26501_v42 = vpop.f32.mrb[13].mxu1 }
 0xb81   : > { %26676 = vmatprep.mubr.msk.f32.mxu0 %vm28078_vm1, %v28052_v0  ;;  %26820 = vmatprep.mubr.msk.f32.mxu1 %vm28078_vm1, %v28052_v0  ;;  %v28033_v50 = vpop.permute.xlu0 %28032 }
 0xb82   : > { %v33742_v7 = vadd.f32 %v33473_v43, %v21159_v13  ;;  %v24973_v43 = vld [vmem:[%s34424_s6 + $0xb30] sm:$0xff]  ;;  %v28035_v26 = vunpack.i.h.bf16 %v28033_v50  ;;  %v28034_v39 = vunpack.i.l.bf16 %v28033_v50 }
 0xb83   : > { %v21106_v30 = vpop.f32.mrb[240].mxu0  ;;  %v33744_v51 = vpop.f32.mrb[14].mxu1 }
 0xb84   : > { %v21160_v24 = vadd.f32 %v21106_v30, %v33489_v29  ;;  %v26360_v58 = vpop.f32.mrb[241].mxu0  ;;  %26677 = vmatmul.mubr.msk.f32.gmra.mrb[90].mxu0 %vm17913_vm2, %v24883_v4  ;;  %26821 = vmatmul.mubr.msk.f32.gmra.mrb[120].mxu1 %vm17913_vm2, %v24972_v11  ;;  %v26504_v54 = vpop.f32.mrb[15].mxu1  ;;  %v27167_v55 = vpack.c.bf16 %v28035_v26, %v28034_v39  ;;  %v24933_v11 = vld [vmem:[%s34424_s6 + $0xa68] sm:$0xff] }
 0xb85   : > { %26679 = vmatprep.mubr.msk.f32.mxu0 %vm28078_vm1, %v28052_v0  ;;  %26823 = vmatprep.mubr.msk.f32.mxu1 %vm28078_vm1, %v28052_v0  ;;  %v24934_v54 = vld [vmem:[%s34424_s6 + $0xa70] sm:$0xff] }
 0xb86   : > { %v33760_v29 = vadd.f32 %v33491_v8, %v21160_v24  ;;  %v24930_v8 = vld [vmem:[%s34424_s6 + $0xa50] sm:$0xff] }
 0xb87   : > { %v21111_v44 = vpop.f32.mrb[242].mxu0  ;;  %v33762_v61 = vpop.f32.mrb[16].mxu1 }
 0xb88   : > { %v21161_v32 = vadd.f32 %v21111_v44, %v33507_v6  ;;  %v26363_v37 = vpop.f32.mrb[243].mxu0  ;;  %26680 = vmatmul.mubr.msk.f32.gmra.mrb[92].mxu0 %vm17913_vm2, %v24884_v25  ;;  %26824 = vmatmul.mubr.msk.f32.gmra.mrb[122].mxu1 %vm17913_vm2, %v24973_v43  ;;  %v26507_v20 = vpop.f32.mrb[17].mxu1  ;;  %v24974_v6 = vld [vmem:[%s34424_s6 + $0xb38] sm:$0xff] }
 0xb89   : > { %26735 = vmatprep.mubr.msk.f32.mxu0 %vm28078_vm1, %v28052_v0  ;;  %26826 = vmatprep.mubr.msk.f32.mxu1 %vm28078_vm1, %v28052_v0  ;;  %v24935_v44 = vld [vmem:[%s34424_s6 + $0xa78] sm:$0xff] }
 0xb8a   : > { %v33778_v3 = vadd.f32 %v33509_v38, %v21161_v32  ;;  %v24931_v38 = vld [vmem:[%s34424_s6 + $0xa58] sm:$0xff] }
 0xb8b   : > { %v21116_v9 = vpop.f32.mrb[244].mxu0  ;;  %v33780_v48 = vpop.f32.mrb[18].mxu1 }
 0xb8c   : > { %v21162_v14 = vadd.f32 %v21116_v9, %v33523_v18  ;;  %v26366_v57 = vpop.f32.mrb[245].mxu0  ;;  %26736 = vmatmul.mubr.msk.f32.vlgmr.msra.gmra.mrb[94].mxu0 %vm17913_vm2, %v24930_v8  ;;  %26827 = vmatmul.mubr.msk.f32.gmra.mrb[124].mxu1 %vm17913_vm2, %v24974_v6  ;;  %v26510_v33 = vpop.f32.mrb[19].mxu1  ;;  %v24936_v6 = vld [vmem:[%s34424_s6 + $0xa80] sm:$0xff] }
 0xb8d   : > { %27168 = vmatpush3.bf16.msra.mxu0 %v27167_v55  ;;  %26738 = vmatprep.mubr.msk.f32.mxu0 %vm28078_vm1, %v28052_v0  ;;  %v24937_v33 = vld [vmem:[%s34424_s6 + $0xa88] sm:$0xff] }
 0xb8e   : > { %v33791_v36 = vadd.f32 %v33528_v17, %v21162_v14  ;;  %26908 = vmatprep.mubr.msk.f32.mxu1 %vm28078_vm1, %v28052_v0  ;;  %v24932_v17 = vld [vmem:[%s34424_s6 + $0xa60] sm:$0xff] }
 0xb8f   : > { %v21121_v18 = vpop.f32.mrb[246].mxu0  ;;  %v33795_v23 = vpop.f32.mrb[20].mxu1 }
 0xb90   : > { %v21163_v15 = vadd.f32 %v21121_v18, %v33544_v22  ;;  %v26369_v31 = vpop.f32.mrb[247].mxu0  ;;  %26739 = vmatmul.mubr.msk.f32.gmra.mrb[96].mxu0 %vm17913_vm2, %v24931_v38  ;;  %v26513_v49 = vpop.f32.mrb[21].mxu1 }
 0xb91   : > { %26741 = vmatprep.mubr.msk.f32.mxu0 %vm28078_vm1, %v28052_v0  ;;  %v24938_v49 = vld [vmem:[%s34424_s6 + $0xa90] sm:$0xff] }
 0xb92   : > { %v33805_v28 = vadd.f32 %v33546_v47, %v21163_v15 }
 0xb93   : > { %v21126_v13 = vpop.f32.mrb[248].mxu0  ;;  %v33807_v63 = vpop.f32.mrb[22].mxu1 }
 0xb94   : > { %v21164_v42 = vadd.f32 %v21126_v13, %v33562_v5  ;;  %v26372_v22 = vpop.f32.mrb[249].mxu0  ;;  %26742 = vmatmul.mubr.msk.f32.gmra.mrb[98].mxu0 %vm17913_vm2, %v24932_v17  ;;  %v26516_v4 = vpop.f32.mrb[23].mxu1 }
 0xb95   : > { %26744 = vmatprep.mubr.msk.f32.mxu0 %vm28078_vm1, %v28052_v0  ;;  %v24939_v4 = vld [vmem:[%s34424_s6 + $0xa98] sm:$0xff] }
 0xb96   : > { %v33817_v50 = vadd.f32 %v33564_v59, %v21164_v42 }
 0xb97   : > { %v21131_v47 = vpop.f32.mrb[250].mxu0  ;;  %v33819_v30 = vpop.f32.mrb[24].mxu1 }
 0xb98   : > { %v21165_v24 = vadd.f32 %v21131_v47, %v33580_v60  ;;  %v26375_v5 = vpop.f32.mrb[251].mxu0  ;;  %26745 = vmatmul.mubr.msk.f32.gmra.mrb[100].mxu0 %vm17913_vm2, %v24933_v11  ;;  %v26519_v58 = vpop.f32.mrb[25].mxu1 }
 0xb99   : > { %26747 = vmatprep.mubr.msk.f32.mxu0 %vm28078_vm1, %v28052_v0  ;;  %v24940_v58 = vld [vmem:[%s34424_s6 + $0xaa0] sm:$0xff] }
 0xb9a   : > { %v33829_v25 = vadd.f32 %v33582_v53, %v21165_v24 }
 0xb9b   : > { %v21136_v59 = vpop.f32.mrb[252].mxu0  ;;  %v33831_v43 = vpop.f32.mrb[26].mxu1 }
 0xb9c   : > { %v21166_v26 = vadd.f32 %v21136_v59, %v33598_v52  ;;  %v26378_v60 = vpop.f32.mrb[253].mxu0  ;;  %26748 = vmatmul.mubr.msk.f32.gmra.mrb[102].mxu0 %vm17913_vm2, %v24934_v54  ;;  %v26522_v39 = vpop.f32.mrb[27].mxu1 }
 0xb9d   : > { %26750 = vmatprep.mubr.msk.f32.mxu0 %vm28078_vm1, %v28052_v0  ;;  %v24941_v39 = vld [vmem:[%s34424_s6 + $0xaa8] sm:$0xff] }
 0xb9e   : > { %v33841_v32 = vadd.f32 %v33600_v35, %v21166_v26 }
 0xb9f   : > { %v21141_v53 = vpop.f32.mrb[254].mxu0  ;;  %v33843_v37 = vpop.f32.mrb[28].mxu1 }
 0xba0   : > { %v21167_v20 = vadd.f32 %v21141_v53, %v33616_v19  ;;  %v26381_v52 = vpop.f32.mrb[255].mxu0  ;;  %26751 = vmatmul.mubr.msk.f32.gmra.mrb[104].mxu0 %vm17913_vm2, %v24935_v44  ;;  %v26525_v8 = vpop.f32.mrb[29].mxu1 }
 0xba1   : > { %26753 = vmatprep.mubr.msk.f32.mxu0 %vm28078_vm1, %v28052_v0  ;;  %v24942_v8 = vld [vmem:[%s34424_s6 + $0xab0] sm:$0xff] }
 0xba2   : > { %v33853_v55 = vadd.f32 %v33618_v2, %v21167_v20 }
 0xba3   : > { %v21146_v35 = vpop.f32.mrb[2].mxu0  ;;  %v33855_v9 = vpop.f32.mrb[30].mxu1 }
 0xba4   : > { %v21168_v14 = vadd.f32 %v21146_v35, %v33634_v40  ;;  %v26384_v19 = vpop.f32.mrb[3].mxu0  ;;  %26754 = vmatmul.mubr.msk.f32.gmra.mrb[106].mxu0 %vm17913_vm2, %v24936_v6  ;;  %v26528_v57 = vpop.f32.mrb[31].mxu1 }
 0xba5   : > { %26756 = vmatprep.mubr.msk.f32.mxu0 %vm28078_vm1, %v28052_v0  ;;  %v24943_v57 = vld [vmem:[%s34424_s6 + $0xab8] sm:$0xff] }
 0xba6   : > { %v33865_v38 = vadd.f32 %v33636_v12, %v21168_v14 }
 0xba7   : > { %v21151_v2 = vpop.f32.mrb[0].mxu0  ;;  %v33867_v18 = vpop.f32.mrb[32].mxu1 }
 0xba8   : > { %v21169_v15 = vadd.f32 %v21151_v2, %v33652_v34  ;;  %v26387_v40 = vpop.f32.mrb[1].mxu0  ;;  %26757 = vmatmul.mubr.msk.f32.gmra.mrb[108].mxu0 %vm17913_vm2, %v24937_v33  ;;  %v26531_v31 = vpop.f32.mrb[33].mxu1 }
 0xba9   : > { %26759 = vmatprep.mubr.msk.f32.mxu0 %vm28078_vm1, %v28052_v0  ;;  %v24944_v31 = vld [vmem:[%s34424_s6 + $0xac0] sm:$0xff] }
 0xbaa   : > { %v33877_v17 = vadd.f32 %v33654_v27, %v21169_v15 }
 0xbab   : > { %v21525_v12 = vpop.f32.mrb[4].mxu0  ;;  %v33879_v13 = vpop.f32.mrb[34].mxu1 }
 0xbac   : > { %v21599_v42 = vadd.f32 %v21525_v12, %v33670_v10  ;;  %v26443_v34 = vpop.f32.mrb[5].mxu0  ;;  %26760 = vmatmul.mubr.msk.f32.gmra.mrb[110].mxu0 %vm17913_vm2, %v24938_v49  ;;  %v26534_v22 = vpop.f32.mrb[35].mxu1 }
 0xbad   : > { %26762 = vmatprep.mubr.msk.f32.mxu0 %vm28078_vm1, %v28052_v0  ;;  %v24990_v22 = vld [vmem:[%s34424_s6 + $0xb40] sm:$0xff] }
 0xbae   : > { %v33889_v11 = vadd.f32 %v33672_v1, %v21599_v42 }
 0xbaf   : > { %v21530_v27 = vpop.f32.mrb[6].mxu0  ;;  %v33891_v47 = vpop.f32.mrb[36].mxu1 }
 0xbb0   : > { %v21600_v24 = vadd.f32 %v21530_v27, %v33688_v21  ;;  %v26446_v10 = vpop.f32.mrb[7].mxu0  ;;  %26763 = vmatmul.mubr.msk.f32.gmra.mrb[112].mxu0 %vm17913_vm2, %v24939_v4  ;;  %v26590_v5 = vpop.f32.mrb[37].mxu1 }
 0xbb1   : > { %26765 = vmatprep.mubr.msk.f32.mxu0 %vm28078_vm1, %v28052_v0  ;;  %v24991_v5 = vld [vmem:[%s34424_s6 + $0xb48] sm:$0xff] }
 0xbb2   : > { %v33901_v54 = vadd.f32 %v33690_v46, %v21600_v24 }
 0xbb3   : > { %v21535_v1 = vpop.f32.mrb[8].mxu0  ;;  %v33903_v59 = vpop.f32.mrb[38].mxu1 }
 0xbb4   : > { %v21601_v26 = vadd.f32 %v21535_v1, %v33706_v16  ;;  %v26449_v21 = vpop.f32.mrb[9].mxu0  ;;  %26766 = vmatmul.mubr.msk.f32.gmra.mrb[114].mxu0 %vm17913_vm2, %v24940_v58  ;;  %v26593_v60 = vpop.f32.mrb[39].mxu1 }
 0xbb5   : > { %26768 = vmatprep.mubr.msk.f32.mxu0 %vm28078_vm1, %v28052_v0  ;;  %v24992_v60 = vld [vmem:[%s34424_s6 + $0xb50] sm:$0xff] }
 0xbb6   : > { %v33913_v44 = vadd.f32 %v33708_v56, %v21601_v26 }
 0xbb7   : > { %v21540_v46 = vpop.f32.mrb[10].mxu0  ;;  %v33915_v53 = vpop.f32.mrb[40].mxu1 }
 0xbb8   : > { %v21602_v20 = vadd.f32 %v21540_v46, %v33724_v41  ;;  %v26452_v16 = vpop.f32.mrb[11].mxu0  ;;  %26769 = vmatmul.mubr.msk.f32.gmra.mrb[116].mxu0 %vm17913_vm2, %v24941_v39  ;;  %v26596_v52 = vpop.f32.mrb[41].mxu1 }
 0xbb9   : > { %26771 = vmatprep.mubr.msk.f32.mxu0 %vm28078_vm1, %v28052_v0  ;;  %v24993_v52 = vld [vmem:[%s34424_s6 + $0xb58] sm:$0xff] }
 0xbba   : > { %v33925_v6 = vadd.f32 %v33726_v62, %v21602_v20 }
 0xbbb   : > { %v21545_v56 = vpop.f32.mrb[12].mxu0  ;;  %v33927_v35 = vpop.f32.mrb[42].mxu1 }
 0xbbc   : > { %v21603_v14 = vadd.f32 %v21545_v56, %v33742_v7  ;;  %v26455_v41 = vpop.f32.mrb[13].mxu0  ;;  %26772 = vmatmul.mubr.msk.f32.gmra.mrb[118].mxu0 %vm17913_vm2, %v24942_v8  ;;  %v26599_v19 = vpop.f32.mrb[43].mxu1 }
 0xbbd   : > { %26774 = vmatprep.mubr.msk.f32.mxu0 %vm28078_vm1, %v28052_v0  ;;  %v24994_v19 = vld [vmem:[%s34424_s6 + $0xb60] sm:$0xff] }
 0xbbe   : > { %v33937_v33 = vadd.f32 %v33744_v51, %v21603_v14 }
 0xbbf   : > { %v21550_v62 = vpop.f32.mrb[14].mxu0  ;;  %v33939_v2 = vpop.f32.mrb[44].mxu1 }
 0xbc0   : > { %v21604_v15 = vadd.f32 %v21550_v62, %v33760_v29  ;;  %v26458_v7 = vpop.f32.mrb[15].mxu0  ;;  %26775 = vmatmul.mubr.msk.f32.gmra.mrb[120].mxu0 %vm17913_vm2, %v24943_v57  ;;  %v26602_v40 = vpop.f32.mrb[45].mxu1 }
 0xbc1   : > { %26777 = vmatprep.mubr.msk.f32.mxu0 %vm28078_vm1, %v28052_v0  ;;  %v24995_v40 = vld [vmem:[%s34424_s6 + $0xb68] sm:$0xff] }
 0xbc2   : > { %v33949_v49 = vadd.f32 %v33762_v61, %v21604_v15 }
 0xbc3   : > { %v21555_v51 = vpop.f32.mrb[16].mxu0  ;;  %v33951_v12 = vpop.f32.mrb[46].mxu1 }
 0xbc4   : > { %v21605_v42 = vadd.f32 %v21555_v51, %v33778_v3  ;;  %v26461_v29 = vpop.f32.mrb[17].mxu0  ;;  %26778 = vmatmul.mubr.msk.f32.gmra.mrb[122].mxu0 %vm17913_vm2, %v24944_v31  ;;  %v26605_v34 = vpop.f32.mrb[47].mxu1 }
 0xbc5   : > { %26833 = vmatprep.mubr.msk.f32.mxu0 %vm28078_vm1, %v28052_v0  ;;  %v24996_v34 = vld [vmem:[%s34424_s6 + $0xb70] sm:$0xff] }
 0xbc6   : > { %v33961_v4 = vadd.f32 %v33780_v48, %v21605_v42 }
 0xbc7   : > { %v21560_v61 = vpop.f32.mrb[18].mxu0  ;;  %v33963_v27 = vpop.f32.mrb[48].mxu1 }
 0xbc8   : > { %v21606_v24 = vadd.f32 %v21560_v61, %v33791_v36  ;;  %v26464_v3 = vpop.f32.mrb[19].mxu0  ;;  %26834 = vmatmul.mubr.msk.f32.vlgmr.msra.gmra.mrb[124].mxu0 %vm17913_vm2, %v24990_v22  ;;  %v26608_v10 = vpop.f32.mrb[49].mxu1 }
 0xbc9   : > { %26836 = vmatprep.mubr.msk.f32.mxu0 %vm28078_vm1, %v28052_v0  ;;  %v24997_v10 = vld [vmem:[%s34424_s6 + $0xb78] sm:$0xff] }
 0xbca   : > { %v33973_v58 = vadd.f32 %v33795_v23, %v21606_v24 }
 0xbcb   : > { %v21565_v48 = vpop.f32.mrb[20].mxu0  ;;  %v33975_v1 = vpop.f32.mrb[50].mxu1 }
 0xbcc   : > { %v21607_v26 = vadd.f32 %v21565_v48, %v33805_v28  ;;  %v26467_v36 = vpop.f32.mrb[21].mxu0  ;;  %26837 = vmatmul.mubr.msk.f32.gmra.mrb[126].mxu0 %vm17913_vm2, %v24991_v5  ;;  %v26611_v21 = vpop.f32.mrb[51].mxu1 }
 0xbcd   : > { %26839 = vmatprep.mubr.msk.f32.mxu0 %vm28078_vm1, %v28052_v0  ;;  %v24998_v21 = vld [vmem:[%s34424_s6 + $0xb80] sm:$0xff] }
 0xbce   : > { %v33985_v39 = vadd.f32 %v33807_v63, %v21607_v26 }
 0xbcf   : > { %v21570_v23 = vpop.f32.mrb[22].mxu0  ;;  %v33987_v46 = vpop.f32.mrb[52].mxu1 }
 0xbd0   : > { %v21608_v20 = vadd.f32 %v21570_v23, %v33817_v50  ;;  %v26470_v28 = vpop.f32.mrb[23].mxu0  ;;  %26840 = vmatmul.mubr.msk.f32.gmra.mrb[128].mxu0 %vm17913_vm2, %v24992_v60  ;;  %v26614_v16 = vpop.f32.mrb[53].mxu1 }
 0xbd1   : > { %26842 = vmatprep.mubr.msk.f32.mxu0 %vm28078_vm1, %v28052_v0  ;;  %v24999_v16 = vld [vmem:[%s34424_s6 + $0xb88] sm:$0xff] }
 0xbd2   : > { %v33997_v8 = vadd.f32 %v33819_v30, %v21608_v20 }
 0xbd3   : > { %v21575_v63 = vpop.f32.mrb[24].mxu0  ;;  %v33999_v56 = vpop.f32.mrb[54].mxu1 }
 0xbd4   : > { %v21609_v14 = vadd.f32 %v21575_v63, %v33829_v25  ;;  %v26473_v50 = vpop.f32.mrb[25].mxu0  ;;  %26843 = vmatmul.mubr.msk.f32.gmra.mrb[130].mxu0 %vm17913_vm2, %v24993_v52  ;;  %v26617_v41 = vpop.f32.mrb[55].mxu1 }
 0xbd5   : > { %26845 = vmatprep.mubr.msk.f32.mxu0 %vm28078_vm1, %v28052_v0  ;;  %v25000_v41 = vld [vmem:[%s34424_s6 + $0xb90] sm:$0xff] }
 0xbd6   : > { %v34009_v57 = vadd.f32 %v33831_v43, %v21609_v14 }
 0xbd7   : > { %v21580_v30 = vpop.f32.mrb[26].mxu0  ;;  %v34011_v62 = vpop.f32.mrb[56].mxu1 }
 0xbd8   : > { %v21610_v15 = vadd.f32 %v21580_v30, %v33841_v32  ;;  %v26476_v25 = vpop.f32.mrb[27].mxu0  ;;  %26846 = vmatmul.mubr.msk.f32.gmra.mrb[132].mxu0 %vm17913_vm2, %v24994_v19  ;;  %v26620_v7 = vpop.f32.mrb[57].mxu1 }
 0xbd9   : > { %26848 = vmatprep.mubr.msk.f32.mxu0 %vm28078_vm1, %v28052_v0  ;;  %v25001_v7 = vld [vmem:[%s34424_s6 + $0xb98] sm:$0xff] }
 0xbda   : > { %v34021_v31 = vadd.f32 %v33843_v37, %v21610_v15 }
 0xbdb   : > { %v21585_v43 = vpop.f32.mrb[28].mxu0  ;;  %v34023_v51 = vpop.f32.mrb[58].mxu1 }
 0xbdc   : > { %v21611_v42 = vadd.f32 %v21585_v43, %v33853_v55  ;;  %v26479_v32 = vpop.f32.mrb[29].mxu0  ;;  %26849 = vmatmul.mubr.msk.f32.gmra.mrb[134].mxu0 %vm17913_vm2, %v24995_v40  ;;  %v26623_v29 = vpop.f32.mrb[59].mxu1 }
 0xbdd   : > { %26851 = vmatprep.mubr.msk.f32.mxu0 %vm28078_vm1, %v28052_v0  ;;  %v25002_v29 = vld [vmem:[%s34424_s6 + $0xba0] sm:$0xff] }
 0xbde   : > { %v34033_v22 = vadd.f32 %v33855_v9, %v21611_v42 }
 0xbdf   : > { %v21590_v37 = vpop.f32.mrb[30].mxu0  ;;  %v34035_v61 = vpop.f32.mrb[60].mxu1 }
 0xbe0   : > { %v21612_v24 = vadd.f32 %v21590_v37, %v33865_v38  ;;  %v26482_v55 = vpop.f32.mrb[31].mxu0  ;;  %26852 = vmatmul.mubr.msk.f32.gmra.mrb[136].mxu0 %vm17913_vm2, %v24996_v34  ;;  %v26626_v3 = vpop.f32.mrb[61].mxu1 }
 0xbe1   : > { %26854 = vmatprep.mubr.msk.f32.mxu0 %vm28078_vm1, %v28052_v0  ;;  %v25003_v3 = vld [vmem:[%s34424_s6 + $0xba8] sm:$0xff] }
 0xbe2   : > { %v34045_v5 = vadd.f32 %v33867_v18, %v21612_v24 }
 0xbe3   : > { %v21595_v9 = vpop.f32.mrb[32].mxu0  ;;  %v34047_v48 = vpop.f32.mrb[62].mxu1 }
 0xbe4   : > { %v21613_v26 = vadd.f32 %v21595_v9, %v33877_v17  ;;  %v26485_v38 = vpop.f32.mrb[33].mxu0  ;;  %26855 = vmatmul.mubr.msk.f32.gmra.mrb[138].mxu0 %vm17913_vm2, %v24997_v10  ;;  %v26629_v36 = vpop.f32.mrb[63].mxu1 }
 0xbe5   : > { %26857 = vmatprep.mubr.msk.f32.mxu0 %vm28078_vm1, %v28052_v0  ;;  %v25004_v36 = vld [vmem:[%s34424_s6 + $0xbb0] sm:$0xff] }
 0xbe6   : > { %v34057_v60 = vadd.f32 %v33879_v13, %v21613_v26 }
 0xbe7   : > { %v21969_v18 = vpop.f32.mrb[34].mxu0  ;;  %v34059_v23 = vpop.f32.mrb[64].mxu1 }
 0xbe8   : > { %v22043_v20 = vadd.f32 %v21969_v18, %v33889_v11  ;;  %v26541_v17 = vpop.f32.mrb[35].mxu0  ;;  %26858 = vmatmul.mubr.msk.f32.gmra.mrb[140].mxu0 %vm17913_vm2, %v24998_v21  ;;  %v26632_v28 = vpop.f32.mrb[65].mxu1 }
 0xbe9   : > { %26860 = vmatprep.mubr.msk.f32.mxu0 %vm28078_vm1, %v28052_v0 }
 0xbea   : > { %v34069_v52 = vadd.f32 %v33891_v47, %v22043_v20 }
 0xbeb   : > { %v21974_v13 = vpop.f32.mrb[36].mxu0  ;;  %v34071_v63 = vpop.f32.mrb[66].mxu1 }
 0xbec   : > { %v22044_v14 = vadd.f32 %v21974_v13, %v33901_v54  ;;  %v26544_v11 = vpop.f32.mrb[37].mxu0  ;;  %26861 = vmatmul.mubr.msk.f32.gmra.mrb[142].mxu0 %vm17913_vm2, %v24999_v16  ;;  %v26688_v50 = vpop.f32.mrb[67].mxu1 }
 0xbed   : > { %26863 = vmatprep.mubr.msk.f32.mxu0 %vm28078_vm1, %v28052_v0 }
 0xbee   : > { %v34081_v19 = vadd.f32 %v33903_v59, %v22044_v14 }
 0xbef   : > { %v21979_v47 = vpop.f32.mrb[38].mxu0  ;;  %v34083_v30 = vpop.f32.mrb[68].mxu1 }
 0xbf0   : > { %v22045_v15 = vadd.f32 %v21979_v47, %v33913_v44  ;;  %v26547_v54 = vpop.f32.mrb[39].mxu0  ;;  %26864 = vmatmul.mubr.msk.f32.gmra.mrb[144].mxu0 %vm17913_vm2, %v25000_v41  ;;  %v26691_v25 = vpop.f32.mrb[69].mxu1 }
 0xbf1   : > { %26866 = vmatprep.mubr.msk.f32.mxu0 %vm28078_vm1, %v28052_v0 }
 0xbf2   : > { %v34093_v40 = vadd.f32 %v33915_v53, %v22045_v15 }
 0xbf3   : > { %v21984_v59 = vpop.f32.mrb[40].mxu0  ;;  %v34095_v43 = vpop.f32.mrb[70].mxu1 }
 0xbf4   : > { %v22046_v42 = vadd.f32 %v21984_v59, %v33925_v6  ;;  %v26550_v44 = vpop.f32.mrb[41].mxu0  ;;  %26867 = vmatmul.mubr.msk.f32.gmra.mrb[146].mxu0 %vm17913_vm2, %v25001_v7  ;;  %v26694_v32 = vpop.f32.mrb[71].mxu1 }
 0xbf5   : > { %26869 = vmatprep.mubr.msk.f32.mxu0 %vm28078_vm1, %v28052_v0 }
 0xbf6   : > { %v34105_v34 = vadd.f32 %v33927_v35, %v22046_v42 }
 0xbf7   : > { %v21989_v53 = vpop.f32.mrb[42].mxu0  ;;  %v34107_v37 = vpop.f32.mrb[72].mxu1 }
 0xbf8   : > { %v22047_v24 = vadd.f32 %v21989_v53, %v33937_v33  ;;  %v26553_v6 = vpop.f32.mrb[43].mxu0  ;;  %26870 = vmatmul.mubr.msk.f32.gmra.mrb[148].mxu0 %vm17913_vm2, %v25002_v29  ;;  %v26697_v55 = vpop.f32.mrb[73].mxu1 }
 0xbf9   : > { %26872 = vmatprep.mubr.msk.f32.mxu0 %vm28078_vm1, %v28052_v0 }
 0xbfa   : > { %v34117_v10 = vadd.f32 %v33939_v2, %v22047_v24 }
 0xbfb   : > { %v21994_v35 = vpop.f32.mrb[44].mxu0  ;;  %v34119_v9 = vpop.f32.mrb[74].mxu1 }
 0xbfc   : > { %v22048_v26 = vadd.f32 %v21994_v35, %v33949_v49  ;;  %v26556_v33 = vpop.f32.mrb[45].mxu0  ;;  %26873 = vmatmul.mubr.msk.f32.gmra.mrb[150].mxu0 %vm17913_vm2, %v25003_v3  ;;  %v26700_v38 = vpop.f32.mrb[75].mxu1 }
 0xbfd   : > { %26875 = vmatprep.mubr.msk.f32.mxu0 %vm28078_vm1, %v28052_v0 }
 0xbfe   : > { %v34129_v21 = vadd.f32 %v33951_v12, %v22048_v26 }
 0xbff   : > { %v21999_v2 = vpop.f32.mrb[46].mxu0  ;;  %v34131_v18 = vpop.f32.mrb[76].mxu1 }
 0xc00   : > { %v22049_v20 = vadd.f32 %v21999_v2, %v33961_v4  ;;  %v26559_v49 = vpop.f32.mrb[47].mxu0  ;;  %26876 = vmatmul.mubr.msk.f32.gmra.mrb[152].mxu0 %vm17913_vm2, %v25004_v36  ;;  %v26703_v17 = vpop.f32.mrb[77].mxu1 }
 0xc02   : > { %v34136_v28 = vadd.f32 %v33963_v27, %v22049_v20 }
 0xc03   : > { %v22004_v16 = vpop.f32.mrb[48].mxu0  ;;  %v34138_v13 = vpop.f32.mrb[78].mxu1 }
 0xc04   : > { %v22050_v14 = vadd.f32 %v22004_v16, %v33973_v58  ;;  %v26562_v11 = vpop.f32.mrb[49].mxu0  ;;  %v26706_v12 = vpop.f32.mrb[79].mxu1 }
 0xc06   : > { %v34142_v50 = vadd.f32 %v33975_v1, %v22050_v14 }
 0xc07   : > { %v22009_v41 = vpop.f32.mrb[50].mxu0  ;;  %v34144_v47 = vpop.f32.mrb[80].mxu1 }
 0xc08   : > { %v22051_v4 = vadd.f32 %v22009_v41, %v33985_v39  ;;  %v26565_v15 = vpop.f32.mrb[51].mxu0  ;;  %v26709_v54 = vpop.f32.mrb[81].mxu1 }
 0xc0a   : > { %v34148_v27 = vadd.f32 %v33987_v46, %v22051_v4 }
 0xc0b   : > { %v22014_v25 = vpop.f32.mrb[52].mxu0  ;;  %v34150_v7 = vpop.f32.mrb[82].mxu1 }
 0xc0c   : > { %v22052_v58 = vadd.f32 %v22014_v25, %v33997_v8  ;;  %v26568_v59 = vpop.f32.mrb[53].mxu0  ;;  %v26712_v42 = vpop.f32.mrb[83].mxu1 }
 0xc0e   : > { %v34154_v1 = vadd.f32 %v33999_v56, %v22052_v58 }
 0xc0f   : > { %v22019_v44 = vpop.f32.mrb[54].mxu0  ;;  %v34156_v32 = vpop.f32.mrb[84].mxu1 }
 0xc10   : > { %v22053_v39 = vadd.f32 %v22019_v44, %v34009_v57  ;;  %v26571_v29 = vpop.f32.mrb[55].mxu0  ;;  %v26715_v53 = vpop.f32.mrb[85].mxu1 }
 0xc12   : > { %v34160_v46 = vadd.f32 %v34011_v62, %v22053_v39 }
 0xc13   : > { %v22024_v24 = vpop.f32.mrb[56].mxu0  ;;  %v34162_v6 = vpop.f32.mrb[86].mxu1 }
 0xc14   : > { %v22054_v8 = vadd.f32 %v22024_v24, %v34021_v31  ;;  %v26574_v55 = vpop.f32.mrb[57].mxu0  ;;  %v26718_v3 = vpop.f32.mrb[87].mxu1 }
 0xc16   : > { %v34166_v56 = vadd.f32 %v34023_v51, %v22054_v8 }
 0xc17   : > { %v22029_v35 = vpop.f32.mrb[58].mxu0  ;;  %v34168_v26 = vpop.f32.mrb[88].mxu1 }
 0xc18   : > { %v22055_v57 = vadd.f32 %v22029_v35, %v34033_v22  ;;  %v26577_v33 = vpop.f32.mrb[59].mxu0  ;;  %v26721_v38 = vpop.f32.mrb[89].mxu1 }
 0xc1a   : > { %v34172_v62 = vadd.f32 %v34035_v61, %v22055_v57 }
 0xc1b   : > { %v22034_v36 = vpop.f32.mrb[60].mxu0  ;;  %v34174_v2 = vpop.f32.mrb[90].mxu1 }
 0xc1c   : > { %v22056_v31 = vadd.f32 %v22034_v36, %v34045_v5  ;;  %v26580_v20 = vpop.f32.mrb[61].mxu0  ;;  %v26724_v49 = vpop.f32.mrb[91].mxu1 }
 0xc1e   : > { %v34178_v51 = vadd.f32 %v34047_v48, %v22056_v31 }
 0xc1f   : > { %v22039_v17 = vpop.f32.mrb[62].mxu0  ;;  %v34180_v16 = vpop.f32.mrb[92].mxu1 }
 0xc20   : > { %v22057_v22 = vadd.f32 %v22039_v17, %v34057_v60  ;;  %v26583_v14 = vpop.f32.mrb[63].mxu0  ;;  %v26727_v11 = vpop.f32.mrb[93].mxu1 }
 0xc22   : > { %v34184_v61 = vadd.f32 %v34059_v23, %v22057_v22 }
 0xc23   : > { %v22413_v12 = vpop.f32.mrb[64].mxu0  ;;  %v34186_v41 = vpop.f32.mrb[94].mxu1 }
 0xc24   : > { %v22487_v5 = vadd.f32 %v22413_v12, %v34069_v52  ;;  %v26639_v4 = vpop.f32.mrb[65].mxu0  ;;  %v26730_v15 = vpop.f32.mrb[95].mxu1 }
 0xc26   : > { %v34190_v48 = vadd.f32 %v34071_v63, %v22487_v5 }
 0xc27   : > { %v22418_v54 = vpop.f32.mrb[66].mxu0  ;;  %v34192_v25 = vpop.f32.mrb[96].mxu1 }
 0xc28   : > { %v22488_v60 = vadd.f32 %v22418_v54, %v34081_v19  ;;  %v26642_v58 = vpop.f32.mrb[67].mxu0  ;;  %v26786_v59 = vpop.f32.mrb[97].mxu1 }
 0xc2a   : > { %v34196_v23 = vadd.f32 %v34083_v30, %v22488_v60 }
 0xc2b   : > { %v22423_v42 = vpop.f32.mrb[68].mxu0  ;;  %v34198_v44 = vpop.f32.mrb[98].mxu1 }
 0xc2c   : > { %v22489_v52 = vadd.f32 %v22423_v42, %v34093_v40  ;;  %v26645_v39 = vpop.f32.mrb[69].mxu0  ;;  %v26789_v29 = vpop.f32.mrb[99].mxu1 }
 0xc2e   : > { %v34202_v63 = vadd.f32 %v34095_v43, %v22489_v52 }
 0xc2f   : > { %v22428_v53 = vpop.f32.mrb[70].mxu0  ;;  %v34204_v24 = vpop.f32.mrb[100].mxu1 }
 0xc30   : > { %v22490_v19 = vadd.f32 %v22428_v53, %v34105_v34  ;;  %v26648_v8 = vpop.f32.mrb[71].mxu0  ;;  %v26792_v55 = vpop.f32.mrb[101].mxu1 }
 0xc32   : > { %v34208_v30 = vadd.f32 %v34107_v37, %v22490_v19 }
 0xc33   : > { %v22433_v3 = vpop.f32.mrb[72].mxu0  ;;  %v34210_v35 = vpop.f32.mrb[102].mxu1 }
 0xc34   : > { %v22491_v40 = vadd.f32 %v22433_v3, %v34117_v10  ;;  %v26651_v57 = vpop.f32.mrb[73].mxu0  ;;  %v26795_v33 = vpop.f32.mrb[103].mxu1 }
 0xc36   : > { %v34214_v43 = vadd.f32 %v34119_v9, %v22491_v40 }
 0xc37   : > { %v22438_v38 = vpop.f32.mrb[74].mxu0  ;;  %v34216_v36 = vpop.f32.mrb[104].mxu1 }
 0xc38   : > { %v22492_v34 = vadd.f32 %v22438_v38, %v34129_v21  ;;  %v26654_v31 = vpop.f32.mrb[75].mxu0  ;;  %v26798_v20 = vpop.f32.mrb[105].mxu1 }
 0xc3a   : > { %v34220_v37 = vadd.f32 %v34131_v18, %v22492_v34 }
 0xc3b   : > { %v22443_v49 = vpop.f32.mrb[76].mxu0  ;;  %v34222_v17 = vpop.f32.mrb[106].mxu1 }
 0xc3c   : > { %v22493_v10 = vadd.f32 %v22443_v49, %v34136_v28  ;;  %v26657_v22 = vpop.f32.mrb[77].mxu0  ;;  %v26801_v14 = vpop.f32.mrb[107].mxu1 }
 0xc3e   : > { %v34226_v9 = vadd.f32 %v34138_v13, %v22493_v10 }
 0xc3f   : > { %v22448_v11 = vpop.f32.mrb[78].mxu0  ;;  %v34228_v12 = vpop.f32.mrb[108].mxu1 }
 0xc40   : > { %v22494_v21 = vadd.f32 %v22448_v11, %v34142_v50  ;;  %v26660_v5 = vpop.f32.mrb[79].mxu0  ;;  %v26804_v4 = vpop.f32.mrb[109].mxu1 }
 0xc42   : > { %v34232_v18 = vadd.f32 %v34144_v47, %v22494_v21 }
 0xc43   : > { %v22453_v15 = vpop.f32.mrb[80].mxu0  ;;  %v34234_v54 = vpop.f32.mrb[110].mxu1 }
 0xc44   : > { %v22495_v28 = vadd.f32 %v22453_v15, %v34148_v27  ;;  %v26663_v60 = vpop.f32.mrb[81].mxu0  ;;  %v26807_v58 = vpop.f32.mrb[111].mxu1 }
 0xc46   : > { %v34238_v13 = vadd.f32 %v34150_v7, %v22495_v28 }
 0xc47   : > { %v22458_v59 = vpop.f32.mrb[82].mxu0  ;;  %v34240_v42 = vpop.f32.mrb[112].mxu1 }
 0xc48   : > { %v22496_v50 = vadd.f32 %v22458_v59, %v34154_v1  ;;  %v26666_v52 = vpop.f32.mrb[83].mxu0  ;;  %v26810_v39 = vpop.f32.mrb[113].mxu1 }
 0xc4a   : > { %v34244_v47 = vadd.f32 %v34156_v32, %v22496_v50 }
 0xc4b   : > { %v22463_v29 = vpop.f32.mrb[84].mxu0  ;;  %v34246_v53 = vpop.f32.mrb[114].mxu1 }
 0xc4c   : > { %v22497_v27 = vadd.f32 %v22463_v29, %v34160_v46  ;;  %v26669_v19 = vpop.f32.mrb[85].mxu0  ;;  %v26813_v8 = vpop.f32.mrb[115].mxu1 }
 0xc4e   : > { %v34250_v7 = vadd.f32 %v34162_v6, %v22497_v27 }
 0xc4f   : > { %v22468_v55 = vpop.f32.mrb[86].mxu0  ;;  %v34252_v3 = vpop.f32.mrb[116].mxu1 }
 0xc50   : > { %v22498_v1 = vadd.f32 %v22468_v55, %v34166_v56  ;;  %v26672_v40 = vpop.f32.mrb[87].mxu0  ;;  %v26816_v57 = vpop.f32.mrb[117].mxu1 }
 0xc52   : > { %v34256_v32 = vadd.f32 %v34168_v26, %v22498_v1 }
 0xc53   : > { %v22473_v33 = vpop.f32.mrb[88].mxu0  ;;  %v34258_v38 = vpop.f32.mrb[118].mxu1 }
 0xc54   : > { %v22499_v46 = vadd.f32 %v22473_v33, %v34172_v62  ;;  %v26675_v34 = vpop.f32.mrb[89].mxu0  ;;  %v26819_v31 = vpop.f32.mrb[119].mxu1 }
 0xc56   : > { %v34262_v6 = vadd.f32 %v34174_v2, %v22499_v46 }
 0xc57   : > { %v22478_v20 = vpop.f32.mrb[90].mxu0  ;;  %v34264_v49 = vpop.f32.mrb[120].mxu1 }
 0xc58   : > { %v22500_v56 = vadd.f32 %v22478_v20, %v34178_v51  ;;  %v26678_v10 = vpop.f32.mrb[91].mxu0  ;;  %v26822_v22 = vpop.f32.mrb[121].mxu1 }
 0xc5a   : > { %v22722_v26 = vadd.f32 %v34180_v16, %v22500_v56 }
 0xc5b   : > { %v22483_v14 = vpop.f32.mrb[92].mxu0  ;;  %v23144_v11 = vpop.f32.mrb[122].mxu1 }
 0xc5c   : > { %v22501_v21 = vadd.f32 %v22483_v14, %v34184_v61  ;;  %v26681_v5 = vpop.f32.mrb[93].mxu0  ;;  %v26825_v62 = vpop.f32.mrb[123].mxu1 }
 0xc5e   : > { %v22723_v4 = vadd.f32 %v34186_v41, %v22501_v21 }
 0xc5f   : > { %v22857_v15 = vpop.f32.mrb[94].mxu0  ;;  %v23149_v2 = vpop.f32.mrb[124].mxu1 }
 0xc60   : > { %v22931_v28 = vadd.f32 %v22857_v15, %v34190_v48  ;;  %v26737_v60 = vpop.f32.mrb[95].mxu0  ;;  %v26828_v58 = vpop.f32.mrb[125].mxu1 }
 0xc62   : > { %v23153_v51 = vadd.f32 %v34192_v25, %v22931_v28 }
 0xc63   : > { %v22862_v59 = vpop.f32.mrb[96].mxu0 }
 0xc64   : > { %v22932_v50 = vadd.f32 %v22862_v59, %v34196_v23  ;;  %v26740_v16 = vpop.f32.mrb[97].mxu0 }
 0xc66   : > { %v23154_v52 = vadd.f32 %v34198_v44, %v22932_v50 }
 0xc67   : > { %v22867_v39 = vpop.f32.mrb[98].mxu0 }
 0xc68   : > { %v22933_v61 = vadd.f32 %v22867_v39, %v34202_v63  ;;  %v26743_v29 = vpop.f32.mrb[99].mxu0 }
 0xc6a   : > { %v23155_v41 = vadd.f32 %v34204_v24, %v22933_v61  ;;  %v23408_v61 = vpop.permute.xlu1 %23407 }
 0xc6b   : > { %v22872_v27 = vpop.f32.mrb[100].mxu0 }
 0xc6c   : > { %v22934_v19 = vadd.f32 %v22872_v27, %v34208_v30  ;;  %v26746_v48 = vpop.f32.mrb[101].mxu0 }
 0xc6e   : > { %v34278_v8 = vadd.f32 %v34210_v35, %v22934_v19 }
 0xc6f   : > { %v22877_v25 = vpop.f32.mrb[102].mxu0 }
 0xc70   : > { %v22935_v55 = vadd.f32 %v22877_v25, %v34214_v43  ;;  %v26749_v23 = vpop.f32.mrb[103].mxu0 }
 0xc72   : > { %v34282_v1 = vadd.f32 %v34216_v36, %v22935_v55 }
 0xc73   : > { %v22882_v44 = vpop.f32.mrb[104].mxu0 }
 0xc74   : > { %v22936_v63 = vadd.f32 %v22882_v44, %v34220_v37  ;;  %v26752_v40 = vpop.f32.mrb[105].mxu0 }
 0xc76   : > { %v34286_v24 = vadd.f32 %v34222_v17, %v22936_v63 }
 0xc77   : > { %v22887_v57 = vpop.f32.mrb[106].mxu0 }
 0xc78   : > { %v22937_v30 = vadd.f32 %v22887_v57, %v34226_v9  ;;  %v26755_v33 = vpop.f32.mrb[107].mxu0 }
 0xc7a   : > { %v34290_v35 = vadd.f32 %v34228_v12, %v22937_v30 }
 0xc7b   : > { %v22892_v46 = vpop.f32.mrb[108].mxu0 }
 0xc7c   : > { %v22938_v43 = vadd.f32 %v22892_v46, %v34232_v18  ;;  %v26758_v34 = vpop.f32.mrb[109].mxu0 }
 0xc7e   : > { %v34294_v36 = vadd.f32 %v34234_v54, %v22938_v43 }
 0xc7f   : > { %v22897_v31 = vpop.f32.mrb[110].mxu0 }
 0xc80   : > { %v22939_v37 = vadd.f32 %v22897_v31, %v34238_v13  ;;  %v26761_v20 = vpop.f32.mrb[111].mxu0 }
 0xc82   : > { %v34298_v17 = vadd.f32 %v34240_v42, %v22939_v37 }
 0xc83   : > { %v22902_v56 = vpop.f32.mrb[112].mxu0 }
 0xc84   : > { %v22940_v9 = vadd.f32 %v22902_v56, %v34244_v47  ;;  %v26764_v10 = vpop.f32.mrb[113].mxu0 }
 0xc86   : > { %v34302_v12 = vadd.f32 %v34246_v53, %v22940_v9 }
 0xc87   : > { %v22907_v22 = vpop.f32.mrb[114].mxu0 }
 0xc88   : > { %v22941_v18 = vadd.f32 %v22907_v22, %v34250_v7  ;;  %v26767_v14 = vpop.f32.mrb[115].mxu0 }
 0xc8a   : > { %v34306_v54 = vadd.f32 %v34252_v3, %v22941_v18 }
 0xc8b   : > { %v22912_v21 = vpop.f32.mrb[116].mxu0 }
 0xc8c   : > { %v22942_v13 = vadd.f32 %v22912_v21, %v34256_v32  ;;  %v26770_v5 = vpop.f32.mrb[117].mxu0 }
 0xc8e   : > { %v34310_v42 = vadd.f32 %v34258_v38, %v22942_v13 }
 0xc8f   : > { %v22917_v62 = vpop.f32.mrb[118].mxu0 }
 0xc90   : > { %v22943_v47 = vadd.f32 %v22917_v62, %v34262_v6  ;;  %v26773_v15 = vpop.f32.mrb[119].mxu0 }
 0xc92   : > { %v34314_v53 = vadd.f32 %v34264_v49, %v22943_v47  ;;  %v23413_v49 = vpop.permute.xlu0 %23412 }
 0xc93   : > { %v22922_v28 = vpop.f32.mrb[120].mxu0 }
 0xc94   : > { %v22944_v7 = vadd.f32 %v22922_v28, %v22722_v26  ;;  %v26776_v60 = vpop.f32.mrb[121].mxu0 }
 0xc96   : > { %v34316_v58 = vadd.f32 %v23144_v11, %v22944_v7  ;;  %v23423_v57 = vpop.permute.xlu0 %23422 }
 0xc97   : > { %v22927_v3 = vpop.f32.mrb[122].mxu0 }
 0xc98   : > { %v22945_v59 = vadd.f32 %v22927_v3, %v22723_v4  ;;  %v26779_v50 = vpop.f32.mrb[123].mxu0  ;;  %v23418_v4 = vpop.permute.xlu1 %23417 }
 0xc9a   : > { %v34318_v32 = vadd.f32 %v23149_v2, %v22945_v59 }
 0xc9b   : > { %v23301_v16 = vpop.f32.mrb[124].mxu0 }
 0xc9c   : > { %v23375_v38 = vadd.f32 %v23301_v16, %v23153_v51  ;;  %v26835_v39 = vpop.f32.mrb[125].mxu0  ;;  %v23428_v31 = vpop.permute.xlu1 %23427 }
 0xc9e   : > { %v23480_v6 = vadd.f32 %v23408_v61, %v23375_v38 }
 0xc9f   : > { %v23306_v29 = vpop.f32.mrb[126].mxu0 }
 0xca0   : > { %v23376_v27 = vadd.f32 %v23306_v29, %v23154_v52  ;;  %v26838_v19 = vpop.f32.mrb[127].mxu0  ;;  %v23495_v26 = vmax.f32 %v23480_v6, 0.0  ;;  %v23438_v5 = vpop.permute.xlu1 %23437 }
 0xca2   : > { %v23481_v48 = vadd.f32 %v23413_v49, %v23376_v27 }
 0xca3   : > { %v23311_v25 = vpop.f32.mrb[128].mxu0 }
 0xca4   : > { %v23496_v55 = vmax.f32 %v23481_v48, 0.0  ;;  %v23377_v11 = vadd.f32 %v23311_v25, %v23155_v41  ;;  %v26841_v23 = vpop.f32.mrb[129].mxu0  ;;  %v23448_v38 = vpop.permute.xlu1 %23447 }
 0xca6   : > { %v27170_v44 = vpack.c.bf16 %v23496_v55, %v23495_v26  ;;  %v23482_v2 = vadd.f32 %v23418_v4, %v23377_v11 }
 0xca7   : > { %v23316_v63 = vpop.f32.mrb[130].mxu0 }
 0xca8   : > { %v23378_v40 = vadd.f32 %v23316_v63, %v34278_v8  ;;  %v26844_v51 = vpop.f32.mrb[131].mxu0  ;;  %27171 = vmatpush3.bf16.msra.mxu1 %v27170_v44  ;;  %v23497_v33 = vmax.f32 %v23482_v2, 0.0  ;;  %v23433_v8 = vpop.permute.xlu0 %23432 }
 0xca9   : > { %27172 = vmatprep.subr.bf16.mxu1 %v28077_v45  ;;  %v23458_v55 = vpop.permute.xlu1 %23457 }
 0xcaa   : > { %v23483_v52 = vadd.f32 %v23423_v57, %v23378_v40 }
 0xcab   : > { %v23321_v30 = vpop.f32.mrb[132].mxu0 }
 0xcac   : > { %v23498_v46 = vmax.f32 %v23483_v52, 0.0  ;;  %v23379_v43 = vadd.f32 %v23321_v30, %v34282_v1  ;;  %v26847_v34 = vpop.f32.mrb[133].mxu0 }
 0xcad   : > { %v23468_v30 = vpop.permute.xlu1 %23467 }
 0xcae   : > { %v27173_v41 = vpack.c.bf16 %v23498_v46, %v23497_v33  ;;  %v23484_v20 = vadd.f32 %v23428_v31, %v23379_v43 }
 0xcaf   : > { %v23326_v37 = vpop.f32.mrb[134].mxu0 }
 0xcb0   : > { %v23380_v56 = vadd.f32 %v23326_v37, %v34286_v24  ;;  %v26850_v9 = vpop.f32.mrb[135].mxu0  ;;  %27174 = vmatpush3.bf16.msra.mxu1 %v27173_v41  ;;  %v23499_v18 = vmax.f32 %v23484_v20, 0.0  ;;  %v23443_v24 = vpop.permute.xlu0 %23442 }
 0xcb1   : > { %27175 = vmatprep.subr.bf16.mxu1 %v28077_v45 }
 0xcb2   : > { %v23485_v10 = vadd.f32 %v23433_v8, %v23380_v56 }
 0xcb3   : > { %v23331_v22 = vpop.f32.mrb[136].mxu0 }
 0xcb4   : > { %v23500_v14 = vmax.f32 %v23485_v10, 0.0  ;;  %v23381_v21 = vadd.f32 %v23331_v22, %v34290_v35  ;;  %v26853_v13 = vpop.f32.mrb[137].mxu0 }
 0xcb5   : > { %v23516_v13 = vld [vmem:[%s34426_s8 + $0x30] sm:$0xff] }
 0xcb6   : > { %v27176_v1 = vpack.c.bf16 %v23500_v14, %v23499_v18  ;;  %v23486_v47 = vadd.f32 %v23438_v5, %v23381_v21  ;;  %v23513_v18 = vld [vmem:[%s34426_s8 + $0x18] sm:$0xff]  ;;  %v23514_v14 = vld [vmem:[%s34426_s8 + $0x20] sm:$0xff]  ;;  %v23515_v21 = vld [vmem:[%s34426_s8 + $0x28] sm:$0xff] }
 0xcb7   : > { %v23336_v62 = vpop.f32.mrb[138].mxu0  ;;  %v23518_v5 = vld [vmem:[%s34426_s8 + $0x40] sm:$0xff] }
 0xcb8   : > { %v23382_v15 = vadd.f32 %v23336_v62, %v34294_v36  ;;  %v26856_v28 = vpop.f32.mrb[139].mxu0  ;;  %27177 = vmatpush3.bf16.msra.mxu1 %v27176_v1  ;;  %v23501_v3 = vmax.f32 %v23486_v47, 0.0  ;;  %v23453_v36 = vpop.permute.xlu0 %23452  ;;  %v23517_v1 = vld [vmem:[%s34426_s8 + $0x38] sm:$0xff]  ;;  %v23519_v62 = vld [vmem:[%s34426_s8 + $0x48] sm:$0xff]  ;;  %v23520_v47 = vld [vmem:[%s34426_s8 + $0x50] sm:$0xff] }
 0xcb9   : > { %27178 = vmatprep.subr.bf16.mxu1 %v28077_v45 }
 0xcba   : > { %v23487_v7 = vadd.f32 %v23443_v24, %v23382_v15  ;;  %v23751_v15 = vld [vmem:[%s34428_s10] sm:$0xff] }
 0xcbb   : > { %v23341_v60 = vpop.f32.mrb[140].mxu0 }
 0xcbc   : > { %v23502_v59 = vmax.f32 %v23487_v7, 0.0  ;;  %v23383_v50 = vadd.f32 %v23341_v60, %v34298_v17  ;;  %v26859_v16 = vpop.f32.mrb[141].mxu0 }
 0xcbe   : > { %v27179_v35 = vpack.c.bf16 %v23502_v59, %v23501_v3  ;;  %v23488_v61 = vadd.f32 %v23448_v38, %v23383_v50 }
 0xcbf   : > { %v23346_v39 = vpop.f32.mrb[142].mxu0 }
 0xcc0   : > { %v23384_v29 = vadd.f32 %v23346_v39, %v34302_v12  ;;  %v26862_v6 = vpop.f32.mrb[143].mxu0  ;;  %27180 = vmatpush3.bf16.msra.mxu1 %v27179_v35  ;;  %v23503_v49 = vmax.f32 %v23488_v61, 0.0  ;;  %v23463_v12 = vpop.permute.xlu0 %23462 }
 0xcc1   : > { %27181 = vmatprep.subr.bf16.mxu1 %v28077_v45 }
 0xcc2   : > { %v23489_v27 = vadd.f32 %v23453_v36, %v23384_v29 }
 0xcc3   : > { %v23351_v19 = vpop.f32.mrb[144].mxu0 }
 0xcc4   : > { %v23504_v48 = vmax.f32 %v23489_v27, 0.0  ;;  %v23385_v25 = vadd.f32 %v23351_v19, %v34306_v54  ;;  %v26865_v26 = vpop.f32.mrb[145].mxu0 }
 0xcc6   : > { %v27182_v17 = vpack.c.bf16 %v23504_v48, %v23503_v49  ;;  %v23490_v23 = vadd.f32 %v23458_v55, %v23385_v25 }
 0xcc7   : > { %v23356_v11 = vpop.f32.mrb[146].mxu0 }
 0xcc8   : > { %v23386_v44 = vadd.f32 %v23356_v11, %v34310_v42  ;;  %v26868_v4 = vpop.f32.mrb[147].mxu0  ;;  %27183 = vmatpush3.bf16.msra.mxu1 %v27182_v17  ;;  %v23505_v40 = vmax.f32 %v23490_v23, 0.0  ;;  %v23473_v42 = vpop.permute.xlu0 %23472 }
 0xcc9   : > { %27184 = vmatprep.subr.bf16.mxu1 %v28077_v45 }
 0xcca   : > { %v23491_v63 = vadd.f32 %v23463_v12, %v23386_v44 }
 0xccb   : > { %v23361_v2 = vpop.f32.mrb[148].mxu0 }
 0xccc   : > { %v23506_v51 = vmax.f32 %v23491_v63, 0.0  ;;  %v23387_v57 = vadd.f32 %v23361_v2, %v34314_v53  ;;  %v26871_v52 = vpop.f32.mrb[149].mxu0  ;;  %v23478_v53 = vpop.permute.xlu1 %23477 }
 0xccd   : > { %v23535_v7 = vpop.permute.xlu0 %23534 }
 0xcce   : > { %v27185_v54 = vpack.c.bf16 %v23506_v51, %v23505_v40  ;;  %v23492_v46 = vadd.f32 %v23468_v30, %v23387_v57 }
 0xccf   : > { %v23366_v33 = vpop.f32.mrb[150].mxu0 }
 0xcd0   : > { %v23388_v43 = vadd.f32 %v23366_v33, %v34316_v58  ;;  %v26874_v34 = vpop.f32.mrb[151].mxu0  ;;  %27186 = vmatpush3.bf16.msra.mxu1 %v27185_v54  ;;  %v23507_v37 = vmax.f32 %v23492_v46, 0.0  ;;  %v23510_v58 = vld [vmem:[%s34426_s8] sm:$0xff]  ;;  %v23540_v3 = vpop.permute.xlu1 %23539 }
 0xcd1   : > { %27187 = vmatprep.subr.bf16.mxu1 %v28077_v45  ;;  %v23511_v45 = vld [vmem:[%s34426_s8 + $0x8] sm:$0xff]  ;;  %v23545_v29 = vpop.permute.xlu0 %23544 }
 0xcd2   : > { %v23493_v41 = vadd.f32 %v23473_v42, %v23388_v43 }
 0xcd3   : > { %v23371_v31 = vpop.f32.mrb[152].mxu0 }
 0xcd4   : > { %v23508_v20 = vmax.f32 %v23493_v41, 0.0  ;;  %v23389_v56 = vadd.f32 %v23371_v31, %v34318_v32  ;;  %v26877_v9 = vpop.f32.mrb[153].mxu0  ;;  %v23512_v32 = vld [vmem:[%s34426_s8 + $0x10] sm:$0xff]  ;;  %v23550_v36 = vpop.permute.xlu1 %23549 }
 0xcd5   : > { %v23555_v11 = vpop.permute.xlu0 %23554 }
 0xcd6   : > { %v27188_v8 = vpack.c.bf16 %v23508_v20, %v23507_v37  ;;  %v23494_v10 = vadd.f32 %v23478_v53, %v23389_v56 }
 0xcd8   : > { %27189 = vmatpush3.bf16.msra.mxu1 %v27188_v8  ;;  %v23509_v22 = vmax.f32 %v23494_v10, 0.0  ;;  %v23560_v44 = vpop.permute.xlu1 %23559 }
 0xcd9   : > { %26906 = vmatprep.subr.mxu1 %v28052_v0  ;;  %v23565_v54 = vpop.permute.xlu0 %23564 }
 0xcdc   : > { %26907 = vmatpush3.msra.mxu1 %v23509_v22  ;;  %v23570_v33 = vpop.permute.xlu1 %23569 }
 0xcdd   : > { %26909 = vmatmul.mubr.msk.f32.vlgmr.msra.gmra.mrb[126].mxu1 %vm10031_vm4, %v23510_v58  ;;  %v23575_v56 = vpop.permute.xlu0 %23574 }
 0xcde   : > { %26911 = vmatprep.mubr.msk.f32.mxu1 %vm28078_vm1, %v28052_v0 }
 0xce0   : > { %v23580_v53 = vpop.permute.xlu1 %23579 }
 0xce1   : > { %26912 = vmatmul.mubr.msk.f32.gmra.mrb[128].mxu1 %vm10031_vm4, %v23511_v45 }
 0xce2   : > { %26914 = vmatprep.mubr.msk.f32.mxu1 %vm28078_vm1, %v28052_v0 }
 0xce5   : > { %26915 = vmatmul.mubr.msk.f32.gmra.mrb[130].mxu1 %vm10031_vm4, %v23512_v32  ;;  %v23585_v32 = vpop.permute.xlu0 %23584 }
 0xce6   : > { %26917 = vmatprep.mubr.msk.f32.mxu1 %vm28078_vm1, %v28052_v0 }
 0xce9   : > { %26918 = vmatmul.mubr.msk.f32.gmra.mrb[132].mxu1 %vm10031_vm4, %v23513_v18 }
 0xcea   : > { %26920 = vmatprep.mubr.msk.f32.mxu1 %vm28078_vm1, %v28052_v0 }
 0xced   : > { %26921 = vmatmul.mubr.msk.f32.gmra.mrb[134].mxu1 %vm10031_vm4, %v23514_v14 }
 0xcee   : > { %26923 = vmatprep.mubr.msk.f32.mxu1 %vm28078_vm1, %v28052_v0 }
 0xcf1   : > { %26924 = vmatmul.mubr.msk.f32.gmra.mrb[136].mxu1 %vm10031_vm4, %v23515_v21 }
 0xcf2   : > { %26926 = vmatprep.mubr.msk.f32.mxu1 %vm28078_vm1, %v28052_v0 }
 0xcf5   : > { %26927 = vmatmul.mubr.msk.f32.gmra.mrb[138].mxu1 %vm10031_vm4, %v23516_v13 }
 0xcf6   : > { %26929 = vmatprep.mubr.msk.f32.mxu1 %vm28078_vm1, %v28052_v0 }
 0xcf9   : > { %26930 = vmatmul.mubr.msk.f32.gmra.mrb[140].mxu1 %vm10031_vm4, %v23517_v1 }
 0xcfa   : > { %26932 = vmatprep.mubr.msk.f32.mxu1 %vm28078_vm1, %v28052_v0 }
 0xcfd   : > { %26933 = vmatmul.mubr.msk.f32.gmra.mrb[142].mxu1 %vm10031_vm4, %v23518_v5  ;;  %v23752_v5 = vld [vmem:[%s34428_s10 + $0x8] sm:$0xff] }
 0xcfe   : > { %26935 = vmatprep.mubr.msk.f32.mxu1 %vm28078_vm1, %v28052_v0 }
 0xd01   : > { %26936 = vmatmul.mubr.msk.f32.gmra.mrb[144].mxu1 %vm10031_vm4, %v23519_v62  ;;  %v23763_v62 = vpop.permute.xlu0 %23762 }
 0xd02   : > { %26938 = vmatprep.mubr.msk.f32.mxu1 %vm28078_vm1, %v28052_v0 }
 0xd05   : > { %26939 = vmatmul.mubr.msk.f32.gmra.mrb[146].mxu1 %vm10031_vm4, %v23520_v47 }
 0xd06   : > { %26963 = vmatprep.mubr.msk.f32.mxu1 %vm23765_vm10, %v23751_v15  ;;  %v23758_v15 = vpop.permute.xlu1 %23757 }
 0xdb0   : > { %v23686_v28 = vpop.f32.mrb[126].mxu1 }
 0xdb1   : > { %v26910_v24 = vpop.f32.mrb[127].mxu1  ;;  %v23687_v60 = vadd.f32 %v23686_v28, %v23535_v7 }
 0xdb3   : > { %v23740_v16 = vmax.f32 %v23687_v60, 0.0 }
 0xdb4   : > { %v23691_v59 = vpop.f32.mrb[128].mxu1 }
 0xdb5   : > { %v23692_v0 = vadd.f32 %v23691_v59, %v23540_v3  ;;  %v26913_v50 = vpop.f32.mrb[129].mxu1 }
 0xdb7   : > { %v23741_v35 = vmax.f32 %v23692_v0, 0.0 }
 0xdb8   : > { %v23696_v38 = vpop.f32.mrb[130].mxu1 }
 0xdb9   : > { %v27190_v39 = vpack.c.bf16 %v23741_v35, %v23740_v16  ;;  %v26916_v61 = vpop.f32.mrb[131].mxu1  ;;  %v23697_v6 = vadd.f32 %v23696_v38, %v23545_v29 }
 0xdbb   : > { %27191 = vmatprep.subr.bf16.mxu1 %v27190_v39  ;;  %v23742_v48 = vmax.f32 %v23697_v6, 0.0 }
 0xdbc   : > { %v23701_v27 = vpop.f32.mrb[132].mxu1  ;;  %27193 = vmatpush3.bf16.msra.mxu1 %v27190_v39 }
 0xdbd   : > { %v23702_v19 = vadd.f32 %v23701_v27, %v23550_v36  ;;  %v26919_v49 = vpop.f32.mrb[133].mxu1 }
 0xdbf   : > { %v23743_v25 = vmax.f32 %v23702_v19, 0.0 }
 0xdc0   : > { %v23706_v26 = vpop.f32.mrb[134].mxu1 }
 0xdc1   : > { %v27194_v17 = vpack.c.bf16 %v23743_v25, %v23742_v48  ;;  %v26922_v55 = vpop.f32.mrb[135].mxu1  ;;  %v23707_v23 = vadd.f32 %v23706_v26, %v23555_v11 }
 0xdc3   : > { %27195 = vmatprep.subr.bf16.mxu1 %v27194_v17  ;;  %v23744_v2 = vmax.f32 %v23707_v23, 0.0 }
 0xdc4   : > { %v23711_v4 = vpop.f32.mrb[136].mxu1  ;;  %27197 = vmatpush3.bf16.msra.mxu1 %v27194_v17 }
 0xdc5   : > { %v23712_v12 = vadd.f32 %v23711_v4, %v23560_v44  ;;  %v26925_v63 = vpop.f32.mrb[137].mxu1 }
 0xdc7   : > { %v23745_v40 = vmax.f32 %v23712_v12, 0.0 }
 0xdc8   : > { %v23716_v51 = vpop.f32.mrb[138].mxu1 }
 0xdc9   : > { %v27198_v57 = vpack.c.bf16 %v23745_v40, %v23744_v2  ;;  %v26928_v52 = vpop.f32.mrb[139].mxu1  ;;  %v23717_v30 = vadd.f32 %v23716_v51, %v23565_v54 }
 0xdcb   : > { %27199 = vmatprep.subr.bf16.mxu1 %v27198_v57  ;;  %v23746_v42 = vmax.f32 %v23717_v30, 0.0 }
 0xdcc   : > { %v23721_v46 = vpop.f32.mrb[140].mxu1  ;;  %27201 = vmatpush3.bf16.msra.mxu1 %v27198_v57 }
 0xdcd   : > { %v23722_v43 = vadd.f32 %v23721_v46, %v23570_v33  ;;  %v26931_v34 = vpop.f32.mrb[141].mxu1 }
 0xdcf   : > { %v23747_v41 = vmax.f32 %v23722_v43, 0.0 }
 0xdd0   : > { %v23726_v31 = vpop.f32.mrb[142].mxu1 }
 0xdd1   : > { %v27202_v37 = vpack.c.bf16 %v23747_v41, %v23746_v42  ;;  %v26934_v20 = vpop.f32.mrb[143].mxu1  ;;  %v23727_v9 = vadd.f32 %v23726_v31, %v23575_v56 }
 0xdd3   : > { %27203 = vmatprep.subr.bf16.mxu1 %v27202_v37  ;;  %v23748_v58 = vmax.f32 %v23727_v9, 0.0 }
 0xdd4   : > { %v23731_v8 = vpop.f32.mrb[144].mxu1  ;;  %27205 = vmatpush3.bf16.msra.mxu1 %v27202_v37 }
 0xdd5   : > { %v23732_v10 = vadd.f32 %v23731_v8, %v23580_v53  ;;  %v26937_v22 = vpop.f32.mrb[145].mxu1 }
 0xdd7   : > { %v23749_v45 = vmax.f32 %v23732_v10, 0.0 }
 0xdd8   : > { %v23736_v18 = vpop.f32.mrb[146].mxu1 }
 0xdd9   : > { %v27206_v14 = vpack.c.bf16 %v23749_v45, %v23748_v58  ;;  %v23737_v21 = vadd.f32 %v23736_v18, %v23585_v32  ;;  %v26940_v13 = vpop.f32.mrb[147].mxu1 }
 0xddb   : > { %v23750_v1 = vmax.f32 %v23737_v21, 0.0  ;;  %27207 = vmatprep.subr.bf16.mxu1 %v27206_v14 }
 0xddc   : > { %27209 = vmatpush3.bf16.msra.mxu1 %v27206_v14 }
 0xddd   : > { %26961 = vmatprep.subr.mxu1 %v23750_v1 }
 0xde0   : > { %26962 = vmatpush3.msra.mxu1 %v23750_v1 }
 0xde1   : > { %26964 = vmatmul.mubr.msk.f32.vlgmr.msra.gmra.mrb[148].mxu1 %vm23765_vm10, %v23752_v5 }
 0xeb4   : > { %v26965_v47 = vpop.f32.mrb[148].mxu1 }
 0xeb5   : > { %v23844_v28 = vadd.f32 %v26965_v47, %v23763_v62  ;;  %v23838_v24 = vpop.f32.mrb[149].mxu1 }
 0xeb6   : > { %v23839_v7 = vadd.f32 %v23838_v24, %v23758_v15 }
 0xeb7   : > { %23848 = vst [vmem:[%s413_s30 + $0x8] sm:$0xff] %v23844_v28 }
 0xeb8   : > { %23847 = vst [vmem:[%s413_s30] sm:$0xff] %v23839_v7 }
 0xeb9 PF: > { %s22_s21 = sadd.s32 1, %s28050_s21  }
 0xeba   : > { %p19_p4 = scmp.ge.s32.totalorder %s22_s21, 4  }
 0xebc   :  { %21 = sbr.rel (!%p19_p4) target bundleno = 1 (0x1), region = 170 }

</bundles_post_ra>
